<compile_context>
chip_gen: v7x
topology: tpu7x:2x2x1
jax: 0.10.0
libtpu: 0.0.40
codegen_flags: <defaults>
</compile_context>

<pallas_src>
import functools

import jax
import jax.numpy as jnp
from jax.experimental import pallas as pl
from jax.experimental.pallas import tpu as pltpu

# ----------------------------- hparams (small, self-consistent) -------------
NUM_MELS = 16
OUTPUTS_PER_STEP = 2
PRENET_DIM = 32
EMBEDDING_DIM = 48
SPEAKER_EMB = 16
ENC_DIM = EMBEDDING_DIM + SPEAKER_EMB            # 64
DEC_UNITS = PRENET_DIM + ENC_DIM                 # 96  (LSTMCell input == decoder_lstm_units)
ATTN_DIM = 32
ATTN_FILTERS = 8
ATTN_KERNEL = 5                                  # odd -> "same" padding
ZONEOUT = 0.1
MR = NUM_MELS * OUTPUTS_PER_STEP                 # 32

UNITS_PAD = 128                                  # LSTM state padded to 128 lanes
GATE_W = 4 * UNITS_PAD                           # fused gate width (512 = 4x128)
DECODE_BLOCK = 8                                 # decode steps per grid iteration


# ----------------------------- preprocess kernel ----------------------------
# prenet (two linear+relu+dropout layers) fused with the one-time memory_layer
# (processed_memory = memory @ w_mem + attention_bias, folded once).
def _preprocess_kernel(x_ref, w1_ref, w2_ref, m1_ref, m2_ref,
                       mem_ref, w_mem_ref, abias_ref,
                       pre_ref, pm_ref):
    tp1, b, m = x_ref.shape
    x = x_ref[...].reshape(tp1 * b, m)
    h = jnp.maximum(jnp.dot(x, w1_ref[...], preferred_element_type=jnp.float32), 0.0)
    h = h * m1_ref[...].reshape(tp1 * b, -1)                     # dropout(0.5)
    h = jnp.maximum(jnp.dot(h, w2_ref[...], preferred_element_type=jnp.float32), 0.0)
    h = h * m2_ref[...].reshape(tp1 * b, -1)
    pre_ref[...] = h.reshape(tp1, b, -1)

    bm, t, e = mem_ref.shape
    pm = jnp.dot(mem_ref[...].reshape(bm * t, e), w_mem_ref[...],
                 preferred_element_type=jnp.float32)
    pm_ref[...] = pm + abias_ref[...]                            # fold attention_bias once


def preprocess(di, w1, w2, m1, m2, memory, w_mem, abias):
    tp1, b, _ = di.shape
    bm, t_in, _ = memory.shape
    return pl.pallas_call(
        _preprocess_kernel,
        out_shape=(jax.ShapeDtypeStruct((tp1, b, PRENET_DIM), jnp.float32),
                   jax.ShapeDtypeStruct((bm * t_in, ATTN_DIM), jnp.float32)),
    )(di, w1, w2, m1, m2, memory, w_mem, abias)


# ----------------------------- decode-block kernel ---------------------------
def _decode_kernel(B, T_IN, TB,
                   dec_in_ref, mem_ref, pm_ref,
                   w_aih_x_ref, w_aih_c_ref, w_ahh_ref, b_att_ref,
                   w_dih_x_ref, w_dih_c_ref, w_dhh_ref, b_dec_ref,
                   w_query_ref, loc_op_ref, v_op_ref,
                   w_proj_h_ref, w_proj_c_ref, b_proj_ref,
                   zo_att_ref, zo_dec_ref,
                   mel_ref, align_ref,
                   att_h, att_c, dec_h, dec_c, aw_s, awc_s, ctx_s):
    UP = UNITS_PAD
    g = pl.program_id(0)

    # initialize_decoder_states
    @pl.when(g == 0)
    def _init():
        att_h[...] = jnp.zeros_like(att_h)
        att_c[...] = jnp.zeros_like(att_c)
        dec_h[...] = jnp.zeros_like(dec_h)
        dec_c[...] = jnp.zeros_like(dec_c)
        aw_s[...] = jnp.zeros_like(aw_s)
        awc_s[...] = jnp.zeros_like(awc_s)
        ctx_s[...] = jnp.zeros_like(ctx_s)

    # hoist resident (constant-index) loads out of the per-step loop
    mem = mem_ref[...]                       # (B, T_in, E)
    pm = pm_ref[...]                         # (B, T_in*A)  (already includes attention_bias)
    w_aih_x = w_aih_x_ref[...]
    w_aih_c = w_aih_c_ref[...]
    w_ahh = w_ahh_ref[...]
    b_att = b_att_ref[...]
    w_dih_x = w_dih_x_ref[...]
    w_dih_c = w_dih_c_ref[...]
    w_dhh = w_dhh_ref[...]
    b_dec = b_dec_ref[...]
    w_query_t = w_query_ref[...]             # (UP, T_in*A)  query weight pre-tiled over T_in
    loc_op = loc_op_ref[...]                 # (2*T_in, T_in*A) folded location conv+dense
    v_op = v_op_ref[...]                     # (T_in*A, T_in)  folded v*avp reduce
    w_proj_h = w_proj_h_ref[...]
    w_proj_c = w_proj_c_ref[...]
    b_proj = b_proj_ref[...]

    # PyTorch LSTMCell with fused gate matmuls (gate order i|f|g|o, each a
    # 128-lane block; padded columns/rows are zero so the padding stays inert).
    def lstm_cell(x, ctx, h, c, w_x, w_c, w_h, b):
        gates = (jnp.dot(x, w_x, preferred_element_type=jnp.float32)
                 + jnp.dot(ctx, w_c, preferred_element_type=jnp.float32)
                 + jnp.dot(h, w_h, preferred_element_type=jnp.float32)
                 + b)
        i_g = jax.nn.sigmoid(gates[:, 0 * UP:1 * UP])
        f_g = jax.nn.sigmoid(gates[:, 1 * UP:2 * UP])
        g_g = jnp.tanh(gates[:, 2 * UP:3 * UP])
        o_g = jax.nn.sigmoid(gates[:, 3 * UP:4 * UP])
        c_new = f_g * c + i_g * g_g
        return o_g * jnp.tanh(c_new), c_new

    def step(i, carry):
        h_a, c_a, h_d, c_d, aw, awc, ctx = carry
        x = dec_in_ref[i]                                        # (B, P) prenet-ed frame

        # -------- attention RNN + dropout-on-hidden (source "zoneout") --------
        h_a, c_a = lstm_cell(x, ctx, h_a, c_a, w_aih_x, w_aih_c, w_ahh, b_att)
        h_a = h_a * zo_att_ref[i]

        # -------- location-sensitive attention (all-MXU formulation) ---------
        # pq_flat[b, t*A+a] = (query_layer h_a)[b, a]
        pq_flat = jnp.dot(h_a, w_query_t, preferred_element_type=jnp.float32)
        # proc_flat[b, t*A+a] = location_dense(location_conv([aw; awc]))[b, t, a]
        cat = jnp.concatenate([aw, awc], axis=1)                 # (B, 2*T_in)
        proc_flat = jnp.dot(cat, loc_op, preferred_element_type=jnp.float32)
        s_flat = jnp.tanh(pq_flat + proc_flat + pm)              # (B, T_in*A), lane-dense
        # energies[b, t] = sum_a v[a]*avp[a]*s[b, t, a]
        energies = jnp.dot(s_flat, v_op, preferred_element_type=jnp.float32)

        emax = jnp.max(energies, axis=1, keepdims=True)
        ee = jnp.exp(energies - emax)
        denom = jnp.sum(ee, axis=1, keepdims=True)
        w = ee * pl.reciprocal(denom, approx=True)               # softmax over T_in

        # attention_context = bmm(w, memory)
        ctx = jnp.einsum('bqt,bte->bqe', w[:, None, :], mem,
                         preferred_element_type=jnp.float32)[:, 0, :]
        awc = awc + w
        aw = w

        # -------- decoder RNN + dropout-on-hidden -----------------------------
        h_d, c_d = lstm_cell(x, ctx, h_d, c_d, w_dih_x, w_dih_c, w_dhh, b_dec)
        h_d = h_d * zo_dec_ref[i]

        # -------- linear projection of [decoder_hidden, attention_context] ---
        out = (jnp.dot(h_d, w_proj_h, preferred_element_type=jnp.float32)
               + jnp.dot(ctx, w_proj_c, preferred_element_type=jnp.float32)
               + b_proj)
        mel_ref[i] = out
        align_ref[i] = w
        return (h_a, c_a, h_d, c_d, aw, awc, ctx)

    carry = (att_h[...], att_c[...], dec_h[...], dec_c[...],
             aw_s[...], awc_s[...], ctx_s[...])
    carry = jax.lax.fori_loop(0, TB, step, carry, unroll=True)
    h_a, c_a, h_d, c_d, aw, awc, ctx = carry
    att_h[...] = h_a
    att_c[...] = c_a
    dec_h[...] = h_d
    dec_c[...] = c_d
    aw_s[...] = aw
    awc_s[...] = awc
    ctx_s[...] = ctx


def decoder_recurrence(dec_in, memory, pm_flat, p, zo_att, zo_dec, tb):
    t_pad, B, _ = dec_in.shape
    T_IN = memory.shape[1]
    grid = (t_pad // tb,)
    kernel = functools.partial(_decode_kernel, B, T_IN, tb)

    def full(arr):
        nd = arr.ndim
        # TODO(synk): at production sizes mark these constant blocks
        # pipeline_mode=pl.Buffered(1) (single buffer) / cast to bf16 to save VMEM.
        return pl.BlockSpec(arr.shape, lambda g, nd=nd: (0,) * nd)

    grid_spec = pltpu.PrefetchScalarGridSpec(
        num_scalar_prefetch=0,
        grid=grid,
        in_specs=[
            pl.BlockSpec((tb, B, PRENET_DIM), lambda g: (g, 0, 0)),   # prenet-ed inputs
            full(memory),
            full(pm_flat),
            full(p["w_aih_x"]), full(p["w_aih_c"]), full(p["w_ahh"]), full(p["b_att"]),
            full(p["w_dih_x"]), full(p["w_dih_c"]), full(p["w_dhh"]), full(p["b_dec"]),
            full(p["w_query_t"]), full(p["loc_op"]), full(p["v_op"]),
            full(p["w_proj_h"]), full(p["w_proj_c"]), full(p["b_proj"]),
            pl.BlockSpec((tb, B, UNITS_PAD), lambda g: (g, 0, 0)),    # dropout mask attn rnn
            pl.BlockSpec((tb, B, UNITS_PAD), lambda g: (g, 0, 0)),    # dropout mask dec rnn
        ],
        out_specs=[
            pl.BlockSpec((tb, B, MR), lambda g: (g, 0, 0)),
            pl.BlockSpec((tb, B, T_IN), lambda g: (g, 0, 0)),
        ],
        scratch_shapes=[
            pltpu.VMEM((B, UNITS_PAD), jnp.float32),   # attention_hidden
            pltpu.VMEM((B, UNITS_PAD), jnp.float32),   # attention_cell
            pltpu.VMEM((B, UNITS_PAD), jnp.float32),   # decoder_hidden
            pltpu.VMEM((B, UNITS_PAD), jnp.float32),   # decoder_cell
            pltpu.VMEM((B, T_IN), jnp.float32),        # attention_weights
            pltpu.VMEM((B, T_IN), jnp.float32),        # attention_weights_cum
            pltpu.VMEM((B, ENC_DIM), jnp.float32),     # attention_context
        ],
    )
    mel, align = pl.pallas_call(
        kernel,
        grid_spec=grid_spec,
        out_shape=(jax.ShapeDtypeStruct((t_pad, B, MR), jnp.float32),
                   jax.ShapeDtypeStruct((t_pad, B, T_IN), jnp.float32)),
        compiler_params=pltpu.CompilerParams(dimension_semantics=("arbitrary",)),
    )(dec_in, memory, pm_flat,
      p["w_aih_x"], p["w_aih_c"], p["w_ahh"], p["b_att"],
      p["w_dih_x"], p["w_dih_c"], p["w_dhh"], p["b_dec"],
      p["w_query_t"], p["loc_op"], p["v_op"],
      p["w_proj_h"], p["w_proj_c"], p["b_proj"],
      zo_att, zo_dec)
    return mel, align


# ----------------------------- host-side weight packing ---------------------
def _pack_gate_cols(w, rows_out):
    """(4, In, U) per-gate weights -> (rows_out, 4*UNITS_PAD), zero padded."""
    n_in = w.shape[1]
    out = jnp.zeros((rows_out, GATE_W), jnp.float32)
    for j in range(4):
        out = out.at[:n_in, j * UNITS_PAD:j * UNITS_PAD + DEC_UNITS].set(w[j])
    return out


def _pack_bias(b):
    out = jnp.zeros((1, GATE_W), jnp.float32)
    for j in range(4):
        out = out.at[0, j * UNITS_PAD:j * UNITS_PAD + DEC_UNITS].set(b[j])
    return out


def _prepare_decoder_params(params, t_in):
    A, K, U, UP = ATTN_DIM, ATTN_KERNEL, DEC_UNITS, UNITS_PAD

    ih_att = _pack_gate_cols(params["att_w_ih"], PRENET_DIM + ENC_DIM)
    ih_dec = _pack_gate_cols(params["dec_w_ih"], PRENET_DIM + ENC_DIM)

    # query weight padded to UP rows and pre-tiled over T_in (output layout t*A+a)
    w_query_pad = jnp.zeros((UP, A), jnp.float32).at[:U].set(params["w_query"])
    w_query_t = jnp.tile(w_query_pad, (1, t_in))

    # location conv (F,2,K) folded with location dense (F,A) -> m_loc (2,K,A),
    # then folded with the K zero-padded shifts into a single (2*T_in, T_in*A) operator.
    m_loc = jnp.einsum("fck,fa->cka", params["conv_w"], params["dense_w"])
    pad = (K - 1) // 2
    s_idx = jnp.arange(t_in)[:, None]
    t_idx = jnp.arange(t_in)[None, :]
    loc_op = jnp.zeros((2, t_in, t_in, A), jnp.float32)
    for k in range(K):
        ind = (s_idx == t_idx + (k - pad)).astype(jnp.float32)      # out[t] = in[t+k-pad]
        loc_op = loc_op + ind[None, :, :, None] * m_loc[:, k][:, None, None, :]
    loc_op = loc_op.reshape(2 * t_in, t_in * A)

    # fold v * attention_variable_projection and the A-reduce into one matmul operator
    v_eff = (params["v"] * params["avp"]).reshape(-1)               # (A,)
    v_op = (jnp.eye(t_in, dtype=jnp.float32)[:, None, :]
            * v_eff[None, :, None]).reshape(t_in * A, t_in)

    w_proj_h = jnp.zeros((UP, MR), jnp.float32).at[:U].set(params["w_proj"][:U])
    w_proj_c = params["w_proj"][U:]

    return dict(
        w_aih_x=ih_att[:PRENET_DIM], w_aih_c=ih_att[PRENET_DIM:],
        w_ahh=_pack_gate_cols(params["att_w_hh"], UP), b_att=_pack_bias(params["att_b"]),
        w_dih_x=ih_dec[:PRENET_DIM], w_dih_c=ih_dec[PRENET_DIM:],
        w_dhh=_pack_gate_cols(params["dec_w_hh"], UP), b_dec=_pack_bias(params["dec_b"]),
        w_query_t=w_query_t, loc_op=loc_op, v_op=v_op,
        w_proj_h=w_proj_h, w_proj_c=w_proj_c, b_proj=params["b_proj"],
    )


# ----------------------------- Decoder.forward (glue) -----------------------
def decoder_forward(params, memory, decoder_inputs, memory_lengths, rng):
    del memory_lengths  # TODO(synk): source Attention.forward never applies the mask.
    B, t_in, _ = memory.shape
    r = OUTPUTS_PER_STEP

    # get_go_frame + parse_decoder_inputs + cat
    di = decoder_inputs[:, r - 1::r, :]                   # (B, T_dec, num_mels)
    di = jnp.transpose(di, (1, 0, 2))                     # (T_dec, B, num_mels)
    go = jnp.zeros((1, B, NUM_MELS), decoder_inputs.dtype)
    di = jnp.concatenate([go, di], axis=0)                # (T_dec+1, B, num_mels)
    tp1 = di.shape[0]
    t_dec = tp1 - 1

    tb = DECODE_BLOCK
    t_pad = ((t_dec + tb - 1) // tb) * tb

    # deterministic dropout masks (scaled keep masks); zoneout masks are drawn at
    # the padded state width UNITS_PAD (padded columns multiply zeros -> inert).
    k1, k2, k3, k4 = jax.random.split(rng, 4)
    m1 = (jax.random.uniform(k1, (tp1, B, PRENET_DIM)) >= 0.5).astype(jnp.float32) / 0.5
    m2 = (jax.random.uniform(k2, (tp1, B, PRENET_DIM)) >= 0.5).astype(jnp.float32) / 0.5
    zo_att = ((jax.random.uniform(k3, (t_pad, B, UNITS_PAD)) >= ZONEOUT)
              .astype(jnp.float32) / (1.0 - ZONEOUT))
    zo_dec = ((jax.random.uniform(k4, (t_pad, B, UNITS_PAD)) >= ZONEOUT)
              .astype(jnp.float32) / (1.0 - ZONEOUT))

    # prenet + memory_layer (one fused Pallas call)
    pre, pm2d = preprocess(di, params["w_pre1"], params["w_pre2"], m1, m2,
                           memory, params["w_mem"], params["abias"])
    dec_in = pre[:t_dec]                                  # steps 0 .. T_dec-1
    if t_pad != t_dec:
        dec_in = jnp.concatenate(
            [dec_in, jnp.zeros((t_pad - t_dec, B, PRENET_DIM), jnp.float32)], axis=0)
    pm_flat = pm2d.reshape(B, t_in * ATTN_DIM)            # (B, T_in*A)

    packed = _prepare_decoder_params(params, t_in)
    mel, align = decoder_recurrence(dec_in, memory, pm_flat, packed, zo_att, zo_dec, tb)
    mel = mel[:t_dec]
    align = align[:t_dec]

    # parse_decoder_outputs
    mel = jnp.transpose(mel, (1, 0, 2)).reshape(B, -1, NUM_MELS)   # (B, T_dec*r, num_mels)
    align = jnp.transpose(align, (1, 0, 2))                        # (B, T_dec, T_in)
    return mel, align


# ----------------------------- deterministic params -------------------------
def init_params(key):
    ks = jax.random.split(key, 20)

    def w(k, shape, scale=0.1):
        return (scale * jax.random.normal(k, shape)).astype(jnp.float32)

    U, P, E, A, K, F = DEC_UNITS, PRENET_DIM, ENC_DIM, ATTN_DIM, ATTN_KERNEL, ATTN_FILTERS
    return dict(
        w_pre1=w(ks[0], (NUM_MELS, P)),
        w_pre2=w(ks[1], (P, P)),
        # LSTM weights per gate (i, f, g, o), transposed for x @ W; b = b_ih + b_hh
        att_w_ih=w(ks[2], (4, P + E, U)),
        att_w_hh=w(ks[3], (4, U, U)),
        att_b=w(ks[4], (4, U)) + w(ks[5], (4, U)),
        dec_w_ih=w(ks[6], (4, P + E, U)),
        dec_w_hh=w(ks[7], (4, U, U)),
        dec_b=w(ks[8], (4, U)) + w(ks[9], (4, U)),
        w_query=w(ks[12], (U, A)),
        w_mem=w(ks[13], (E, A)),
        conv_w=w(ks[10], (F, 2, K)),                       # location_conv weight
        dense_w=w(ks[11], (F, A)),                         # location_dense weight
        v=w(ks[14], (1, A)),
        avp=w(ks[15], (1, A)),                             # attention_variable_projection
        abias=jnp.zeros((1, A), jnp.float32),              # attention_bias
        w_proj=w(ks[16], (U + E, MR)),
        b_proj=w(ks[17], (1, MR)),
    )


if __name__ == "__main__":
    key = jax.random.PRNGKey(0)
    kp, km, kd, kr = jax.random.split(key, 4)

    # NOTE: B up to 8 is free throughput (sublane-dense); kept at 2 for the demo.
    B, T_IN, T_MEL = 2, 16, 16
    params = init_params(kp)
    memory = jax.random.normal(km, (B, T_IN, ENC_DIM), jnp.float32)
    decoder_inputs = jax.random.normal(kd, (B, T_MEL, NUM_MELS), jnp.float32)
    memory_lengths = jnp.full((B,), T_IN, jnp.int32)

    fwd = jax.jit(decoder_forward)
    mel_outputs, alignments = fwd(params, memory, decoder_inputs, memory_lengths, kr)
    jax.block_until_ready((mel_outputs, alignments))

    assert mel_outputs.shape == (B, T_MEL, NUM_MELS), mel_outputs.shape
    assert alignments.shape == (B, T_MEL // OUTPUTS_PER_STEP, T_IN), alignments.shape
    assert bool(jnp.all(jnp.isfinite(mel_outputs)))
    assert bool(jnp.allclose(jnp.sum(alignments, axis=-1), 1.0, atol=2e-3))
    print("KERNEL_OK")
</pallas_src>

<mosaic_0001>
module attributes {stable_mosaic.version = 11 : i64} {
  func.func @_preprocess_kernel(%arg0: memref<9x2x16xf32, #tpu.memory_space<vmem>>, %arg1: memref<16x32xf32, #tpu.memory_space<vmem>>, %arg2: memref<32x32xf32, #tpu.memory_space<vmem>>, %arg3: memref<9x2x32xf32, #tpu.memory_space<vmem>>, %arg4: memref<9x2x32xf32, #tpu.memory_space<vmem>>, %arg5: memref<2x16x64xf32, #tpu.memory_space<vmem>>, %arg6: memref<64x32xf32, #tpu.memory_space<vmem>>, %arg7: memref<1x32xf32, #tpu.memory_space<vmem>>, %arg8: memref<9x2x32xf32, #tpu.memory_space<vmem>>, %arg9: memref<32x32xf32, #tpu.memory_space<vmem>>) attributes {dimension_semantics = [], scalar_prefetch = 0 : i64, scratch_operands = 0 : i64, tpu.core_type = #tpu.core_type<tc>} {
    %c0 = arith.constant 0 : index
    %c0_0 = arith.constant 0 : index
    %c0_1 = arith.constant 0 : index
    %0 = vector.load %arg0[%c0, %c0_0, %c0_1] : memref<9x2x16xf32, #tpu.memory_space<vmem>>, vector<9x2x16xf32>
    %1 = vector.shape_cast %0 : vector<9x2x16xf32> to vector<18x16xf32>
    %c0_2 = arith.constant 0 : index
    %c0_3 = arith.constant 0 : index
    %2 = vector.load %arg1[%c0_2, %c0_3] : memref<16x32xf32, #tpu.memory_space<vmem>>, vector<16x32xf32>
    %cst = arith.constant dense<0.000000e+00> : vector<18x32xf32>
    %3 = tpu.matmul %1, %2, %cst {dimension_numbers = #tpu.dot_dimension_numbers<[1], [0], [0], [1], [0, 0, 1, 1], [], []>} : vector<18x16xf32>, vector<16x32xf32>, vector<18x32xf32> -> vector<18x32xf32>
    %cst_4 = arith.constant 0.000000e+00 : f32
    %4 = vector.broadcast %cst_4 : f32 to vector<18x32xf32>
    %5 = arith.maximumf %3, %4 : vector<18x32xf32>
    %c0_5 = arith.constant 0 : index
    %c0_6 = arith.constant 0 : index
    %c0_7 = arith.constant 0 : index
    %6 = vector.load %arg3[%c0_5, %c0_6, %c0_7] : memref<9x2x32xf32, #tpu.memory_space<vmem>>, vector<9x2x32xf32>
    %7 = vector.shape_cast %6 : vector<9x2x32xf32> to vector<18x32xf32>
    %8 = arith.mulf %5, %7 : vector<18x32xf32>
    %c0_8 = arith.constant 0 : index
    %c0_9 = arith.constant 0 : index
    %9 = vector.load %arg2[%c0_8, %c0_9] : memref<32x32xf32, #tpu.memory_space<vmem>>, vector<32x32xf32>
    %cst_10 = arith.constant dense<0.000000e+00> : vector<18x32xf32>
    %10 = tpu.matmul %8, %9, %cst_10 {dimension_numbers = #tpu.dot_dimension_numbers<[1], [0], [0], [1], [0, 0, 1, 1], [], []>} : vector<18x32xf32>, vector<32x32xf32>, vector<18x32xf32> -> vector<18x32xf32>
    %cst_11 = arith.constant 0.000000e+00 : f32
    %11 = vector.broadcast %cst_11 : f32 to vector<18x32xf32>
    %12 = arith.maximumf %10, %11 : vector<18x32xf32>
    %c0_12 = arith.constant 0 : index
    %c0_13 = arith.constant 0 : index
    %c0_14 = arith.constant 0 : index
    %13 = vector.load %arg4[%c0_12, %c0_13, %c0_14] : memref<9x2x32xf32, #tpu.memory_space<vmem>>, vector<9x2x32xf32>
    %14 = vector.shape_cast %13 : vector<9x2x32xf32> to vector<18x32xf32>
    %15 = arith.mulf %12, %14 : vector<18x32xf32>
    %16 = vector.shape_cast %15 : vector<18x32xf32> to vector<9x2x32xf32>
    %c0_15 = arith.constant 0 : index
    %c0_16 = arith.constant 0 : index
    %c0_17 = arith.constant 0 : index
    %17 = vector.load %arg8[%c0_15, %c0_16, %c0_17] : memref<9x2x32xf32, #tpu.memory_space<vmem>>, vector<9x2x32xf32>
    tpu.vector_store %arg8[%c0_15, %c0_16, %c0_17], %16 {strides = array<i32>} : memref<9x2x32xf32, #tpu.memory_space<vmem>>, vector<9x2x32xf32>,
    %c0_18 = arith.constant 0 : index
    %c0_19 = arith.constant 0 : index
    %c0_20 = arith.constant 0 : index
    %18 = vector.load %arg5[%c0_18, %c0_19, %c0_20] : memref<2x16x64xf32, #tpu.memory_space<vmem>>, vector<2x16x64xf32>
    %19 = vector.shape_cast %18 : vector<2x16x64xf32> to vector<32x64xf32>
    %c0_21 = arith.constant 0 : index
    %c0_22 = arith.constant 0 : index
    %20 = vector.load %arg6[%c0_21, %c0_22] : memref<64x32xf32, #tpu.memory_space<vmem>>, vector<64x32xf32>
    %cst_23 = arith.constant dense<0.000000e+00> : vector<32x32xf32>
    %21 = tpu.matmul %19, %20, %cst_23 {dimension_numbers = #tpu.dot_dimension_numbers<[1], [0], [0], [1], [0, 0, 1, 1], [], []>} : vector<32x64xf32>, vector<64x32xf32>, vector<32x32xf32> -> vector<32x32xf32>
    %c0_24 = arith.constant 0 : index
    %c0_25 = arith.constant 0 : index
    %22 = vector.load %arg7[%c0_24, %c0_25] : memref<1x32xf32, #tpu.memory_space<vmem>>, vector<1x32xf32>
    %23 = vector.broadcast %22 : vector<1x32xf32> to vector<32x32xf32>
    %24 = arith.addf %21, %23 : vector<32x32xf32>
    %c0_26 = arith.constant 0 : index
    %c0_27 = arith.constant 0 : index
    %25 = vector.load %arg9[%c0_26, %c0_27] : memref<32x32xf32, #tpu.memory_space<vmem>>, vector<32x32xf32>
    tpu.vector_store %arg9[%c0_26, %c0_27], %24 {strides = array<i32>} : memref<32x32xf32, #tpu.memory_space<vmem>>, vector<32x32xf32>,
    return
  }
}

module attributes {stable_mosaic.version = 11 : i64} {
  func.func @_decode_kernel(%arg0: i32, %arg1: memref<8x2x32xf32, #tpu.memory_space<vmem>>, %arg2: memref<2x16x64xf32, #tpu.memory_space<vmem>>, %arg3: memref<2x512xf32, #tpu.memory_space<vmem>>, %arg4: memref<32x512xf32, #tpu.memory_space<vmem>>, %arg5: memref<64x512xf32, #tpu.memory_space<vmem>>, %arg6: memref<128x512xf32, #tpu.memory_space<vmem>>, %arg7: memref<1x512xf32, #tpu.memory_space<vmem>>, %arg8: memref<32x512xf32, #tpu.memory_space<vmem>>, %arg9: memref<64x512xf32, #tpu.memory_space<vmem>>, %arg10: memref<128x512xf32, #tpu.memory_space<vmem>>, %arg11: memref<1x512xf32, #tpu.memory_space<vmem>>, %arg12: memref<128x512xf32, #tpu.memory_space<vmem>>, %arg13: memref<32x512xf32, #tpu.memory_space<vmem>>, %arg14: memref<512x16xf32, #tpu.memory_space<vmem>>, %arg15: memref<128x32xf32, #tpu.memory_space<vmem>>, %arg16: memref<64x32xf32, #tpu.memory_space<vmem>>, %arg17: memref<1x32xf32, #tpu.memory_space<vmem>>, %arg18: memref<8x2x128xf32, #tpu.memory_space<vmem>>, %arg19: memref<8x2x128xf32, #tpu.memory_space<vmem>>, %arg20: memref<8x2x32xf32, #tpu.memory_space<vmem>>, %arg21: memref<8x2x16xf32, #tpu.memory_space<vmem>>, %arg22: memref<2x128xf32, #tpu.memory_space<vmem>>, %arg23: memref<2x128xf32, #tpu.memory_space<vmem>>, %arg24: memref<2x128xf32, #tpu.memory_space<vmem>>, %arg25: memref<2x128xf32, #tpu.memory_space<vmem>>, %arg26: memref<2x16xf32, #tpu.memory_space<vmem>>, %arg27: memref<2x16xf32, #tpu.memory_space<vmem>>, %arg28: memref<2x64xf32, #tpu.memory_space<vmem>>) attributes {dimension_semantics = [#tpu.dimension_semantics<arbitrary>], iteration_bounds = array<i64: 1>, scalar_prefetch = 0 : i64, scratch_operands = 7 : i64, tpu.core_type = #tpu.core_type<tc>, window_params = [{transform_indices = @transform_0, window_bounds = array<i64: 8, 2, 32>}, {pipeline_mode = #tpu.pipeline_mode<synchronous>, transform_indices = @transform_1, window_bounds = array<i64: 2, 16, 64>}, {pipeline_mode = #tpu.pipeline_mode<synchronous>, transform_indices = @transform_2, window_bounds = array<i64: 2, 512>}, {pipeline_mode = #tpu.pipeline_mode<synchronous>, transform_indices = @transform_3, window_bounds = array<i64: 32, 512>}, {pipeline_mode = #tpu.pipeline_mode<synchronous>, transform_indices = @transform_4, window_bounds = array<i64: 64, 512>}, {pipeline_mode = #tpu.pipeline_mode<synchronous>, transform_indices = @transform_5, window_bounds = array<i64: 128, 512>}, {pipeline_mode = #tpu.pipeline_mode<synchronous>, transform_indices = @transform_6, window_bounds = array<i64: 1, 512>}, {pipeline_mode = #tpu.pipeline_mode<synchronous>, transform_indices = @transform_7, window_bounds = array<i64: 32, 512>}, {pipeline_mode = #tpu.pipeline_mode<synchronous>, transform_indices = @transform_8, window_bounds = array<i64: 64, 512>}, {pipeline_mode = #tpu.pipeline_mode<synchronous>, transform_indices = @transform_9, window_bounds = array<i64: 128, 512>}, {pipeline_mode = #tpu.pipeline_mode<synchronous>, transform_indices = @transform_10, window_bounds = array<i64: 1, 512>}, {pipeline_mode = #tpu.pipeline_mode<synchronous>, transform_indices = @transform_11, window_bounds = array<i64: 128, 512>}, {pipeline_mode = #tpu.pipeline_mode<synchronous>, transform_indices = @transform_12, window_bounds = array<i64: 32, 512>}, {pipeline_mode = #tpu.pipeline_mode<synchronous>, transform_indices = @transform_13, window_bounds = array<i64: 512, 16>}, {pipeline_mode = #tpu.pipeline_mode<synchronous>, transform_indices = @transform_14, window_bounds = array<i64: 128, 32>}, {pipeline_mode = #tpu.pipeline_mode<synchronous>, transform_indices = @transform_15, window_bounds = array<i64: 64, 32>}, {pipeline_mode = #tpu.pipeline_mode<synchronous>, transform_indices = @transform_16, window_bounds = array<i64: 1, 32>}, {transform_indices = @transform_17, window_bounds = array<i64: 8, 2, 128>}, {transform_indices = @transform_18, window_bounds = array<i64: 8, 2, 128>}, {transform_indices = @transform_19, window_bounds = array<i64: 8, 2, 32>}, {transform_indices = @transform_20, window_bounds = array<i64: 8, 2, 16>}]} {
    %c0_i32 = arith.constant 0 : i32
    %0 = arith.cmpi eq, %arg0, %c0_i32 : i32
    %1 = arith.extui %0 : i1 to i32
    %c0_i32_0 = arith.constant 0 : i32
    %2 = arith.cmpi ne, %1, %c0_i32_0 : i32
    scf.if %2 {
      %cst_301 = arith.constant 0.000000e+00 : f32
      %905 = vector.broadcast %cst_301 : f32 to vector<2x128xf32>
      %c0_302 = arith.constant 0 : index
      %c0_303 = arith.constant 0 : index
      %906 = vector.load %arg22[%c0_302, %c0_303] : memref<2x128xf32, #tpu.memory_space<vmem>>, vector<2x128xf32>
      tpu.vector_store %arg22[%c0_302, %c0_303], %905 {strides = array<i32>} : memref<2x128xf32, #tpu.memory_space<vmem>>, vector<2x128xf32>,
      %cst_304 = arith.constant 0.000000e+00 : f32
      %907 = vector.broadcast %cst_304 : f32 to vector<2x128xf32>
      %c0_305 = arith.constant 0 : index
      %c0_306 = arith.constant 0 : index
      %908 = vector.load %arg23[%c0_305, %c0_306] : memref<2x128xf32, #tpu.memory_space<vmem>>, vector<2x128xf32>
      tpu.vector_store %arg23[%c0_305, %c0_306], %907 {strides = array<i32>} : memref<2x128xf32, #tpu.memory_space<vmem>>, vector<2x128xf32>,
      %cst_307 = arith.constant 0.000000e+00 : f32
      %909 = vector.broadcast %cst_307 : f32 to vector<2x128xf32>
      %c0_308 = arith.constant 0 : index
      %c0_309 = arith.constant 0 : index
      %910 = vector.load %arg24[%c0_308, %c0_309] : memref<2x128xf32, #tpu.memory_space<vmem>>, vector<2x128xf32>
      tpu.vector_store %arg24[%c0_308, %c0_309], %909 {strides = array<i32>} : memref<2x128xf32, #tpu.memory_space<vmem>>, vector<2x128xf32>,
      %cst_310 = arith.constant 0.000000e+00 : f32
      %911 = vector.broadcast %cst_310 : f32 to vector<2x128xf32>
      %c0_311 = arith.constant 0 : index
      %c0_312 = arith.constant 0 : index
      %912 = vector.load %arg25[%c0_311, %c0_312] : memref<2x128xf32, #tpu.memory_space<vmem>>, vector<2x128xf32>
      tpu.vector_store %arg25[%c0_311, %c0_312], %911 {strides = array<i32>} : memref<2x128xf32, #tpu.memory_space<vmem>>, vector<2x128xf32>,
      %cst_313 = arith.constant 0.000000e+00 : f32
      %913 = vector.broadcast %cst_313 : f32 to vector<2x16xf32>
      %c0_314 = arith.constant 0 : index
      %c0_315 = arith.constant 0 : index
      %914 = vector.load %arg26[%c0_314, %c0_315] : memref<2x16xf32, #tpu.memory_space<vmem>>, vector<2x16xf32>
      tpu.vector_store %arg26[%c0_314, %c0_315], %913 {strides = array<i32>} : memref<2x16xf32, #tpu.memory_space<vmem>>, vector<2x16xf32>,
      %cst_316 = arith.constant 0.000000e+00 : f32
      %915 = vector.broadcast %cst_316 : f32 to vector<2x16xf32>
      %c0_317 = arith.constant 0 : index
      %c0_318 = arith.constant 0 : index
      %916 = vector.load %arg27[%c0_317, %c0_318] : memref<2x16xf32, #tpu.memory_space<vmem>>, vector<2x16xf32>
      tpu.vector_store %arg27[%c0_317, %c0_318], %915 {strides = array<i32>} : memref<2x16xf32, #tpu.memory_space<vmem>>, vector<2x16xf32>,
      %cst_319 = arith.constant 0.000000e+00 : f32
      %917 = vector.broadcast %cst_319 : f32 to vector<2x64xf32>
      %c0_320 = arith.constant 0 : index
      %c0_321 = arith.constant 0 : index
      %918 = vector.load %arg28[%c0_320, %c0_321] : memref<2x64xf32, #tpu.memory_space<vmem>>, vector<2x64xf32>
      tpu.vector_store %arg28[%c0_320, %c0_321], %917 {strides = array<i32>} : memref<2x64xf32, #tpu.memory_space<vmem>>, vector<2x64xf32>,
    } else {
    }
    %c0 = arith.constant 0 : index
    %c0_1 = arith.constant 0 : index
    %c0_2 = arith.constant 0 : index
    %3 = vector.load %arg2[%c0, %c0_1, %c0_2] : memref<2x16x64xf32, #tpu.memory_space<vmem>>, vector<2x16x64xf32>
    %c0_3 = arith.constant 0 : index
    %c0_4 = arith.constant 0 : index
    %4 = vector.load %arg3[%c0_3, %c0_4] : memref<2x512xf32, #tpu.memory_space<vmem>>, vector<2x512xf32>
    %c0_5 = arith.constant 0 : index
    %c0_6 = arith.constant 0 : index
    %5 = vector.load %arg4[%c0_5, %c0_6] : memref<32x512xf32, #tpu.memory_space<vmem>>, vector<32x512xf32>
    %c0_7 = arith.constant 0 : index
    %c0_8 = arith.constant 0 : index
    %6 = vector.load %arg5[%c0_7, %c0_8] : memref<64x512xf32, #tpu.memory_space<vmem>>, vector<64x512xf32>
    %c0_9 = arith.constant 0 : index
    %c0_10 = arith.constant 0 : index
    %7 = vector.load %arg6[%c0_9, %c0_10] : memref<128x512xf32, #tpu.memory_space<vmem>>, vector<128x512xf32>
    %c0_11 = arith.constant 0 : index
    %c0_12 = arith.constant 0 : index
    %8 = vector.load %arg7[%c0_11, %c0_12] : memref<1x512xf32, #tpu.memory_space<vmem>>, vector<1x512xf32>
    %c0_13 = arith.constant 0 : index
    %c0_14 = arith.constant 0 : index
    %9 = vector.load %arg8[%c0_13, %c0_14] : memref<32x512xf32, #tpu.memory_space<vmem>>, vector<32x512xf32>
    %c0_15 = arith.constant 0 : index
    %c0_16 = arith.constant 0 : index
    %10 = vector.load %arg9[%c0_15, %c0_16] : memref<64x512xf32, #tpu.memory_space<vmem>>, vector<64x512xf32>
    %c0_17 = arith.constant 0 : index
    %c0_18 = arith.constant 0 : index
    %11 = vector.load %arg10[%c0_17, %c0_18] : memref<128x512xf32, #tpu.memory_space<vmem>>, vector<128x512xf32>
    %c0_19 = arith.constant 0 : index
    %c0_20 = arith.constant 0 : index
    %12 = vector.load %arg11[%c0_19, %c0_20] : memref<1x512xf32, #tpu.memory_space<vmem>>, vector<1x512xf32>
    %c0_21 = arith.constant 0 : index
    %c0_22 = arith.constant 0 : index
    %13 = vector.load %arg12[%c0_21, %c0_22] : memref<128x512xf32, #tpu.memory_space<vmem>>, vector<128x512xf32>
    %c0_23 = arith.constant 0 : index
    %c0_24 = arith.constant 0 : index
    %14 = vector.load %arg13[%c0_23, %c0_24] : memref<32x512xf32, #tpu.memory_space<vmem>>, vector<32x512xf32>
    %c0_25 = arith.constant 0 : index
    %c0_26 = arith.constant 0 : index
    %15 = vector.load %arg14[%c0_25, %c0_26] : memref<512x16xf32, #tpu.memory_space<vmem>>, vector<512x16xf32>
    %c0_27 = arith.constant 0 : index
    %c0_28 = arith.constant 0 : index
    %16 = vector.load %arg15[%c0_27, %c0_28] : memref<128x32xf32, #tpu.memory_space<vmem>>, vector<128x32xf32>
    %c0_29 = arith.constant 0 : index
    %c0_30 = arith.constant 0 : index
    %17 = vector.load %arg16[%c0_29, %c0_30] : memref<64x32xf32, #tpu.memory_space<vmem>>, vector<64x32xf32>
    %c0_31 = arith.constant 0 : index
    %c0_32 = arith.constant 0 : index
    %18 = vector.load %arg17[%c0_31, %c0_32] : memref<1x32xf32, #tpu.memory_space<vmem>>, vector<1x32xf32>
    %c0_33 = arith.constant 0 : index
    %c0_34 = arith.constant 0 : index
    %19 = vector.load %arg22[%c0_33, %c0_34] : memref<2x128xf32, #tpu.memory_space<vmem>>, vector<2x128xf32>
    %c0_35 = arith.constant 0 : index
    %c0_36 = arith.constant 0 : index
    %20 = vector.load %arg23[%c0_35, %c0_36] : memref<2x128xf32, #tpu.memory_space<vmem>>, vector<2x128xf32>
    %c0_37 = arith.constant 0 : index
    %c0_38 = arith.constant 0 : index
    %21 = vector.load %arg24[%c0_37, %c0_38] : memref<2x128xf32, #tpu.memory_space<vmem>>, vector<2x128xf32>
    %c0_39 = arith.constant 0 : index
    %c0_40 = arith.constant 0 : index
    %22 = vector.load %arg25[%c0_39, %c0_40] : memref<2x128xf32, #tpu.memory_space<vmem>>, vector<2x128xf32>
    %c0_41 = arith.constant 0 : index
    %c0_42 = arith.constant 0 : index
    %23 = vector.load %arg26[%c0_41, %c0_42] : memref<2x16xf32, #tpu.memory_space<vmem>>, vector<2x16xf32>
    %c0_43 = arith.constant 0 : index
    %c0_44 = arith.constant 0 : index
    %24 = vector.load %arg27[%c0_43, %c0_44] : memref<2x16xf32, #tpu.memory_space<vmem>>, vector<2x16xf32>
    %c0_45 = arith.constant 0 : index
    %c0_46 = arith.constant 0 : index
    %25 = vector.load %arg28[%c0_45, %c0_46] : memref<2x64xf32, #tpu.memory_space<vmem>>, vector<2x64xf32>
    %c0_i32_47 = arith.constant 0 : i32
    %26 = arith.index_cast %c0_i32_47 : i32 to index
    %c0_48 = arith.constant 0 : index
    %c0_49 = arith.constant 0 : index
    %27 = vector.load %arg1[%26, %c0_48, %c0_49] : memref<8x2x32xf32, #tpu.memory_space<vmem>>, vector<1x2x32xf32>
    %28 = vector.shape_cast %27 : vector<1x2x32xf32> to vector<2x32xf32>
    %cst = arith.constant dense<0.000000e+00> : vector<2x512xf32>
    %29 = tpu.matmul %28, %5, %cst {dimension_numbers = #tpu.dot_dimension_numbers<[1], [0], [0], [1], [0, 0, 1, 1], [], []>} : vector<2x32xf32>, vector<32x512xf32>, vector<2x512xf32> -> vector<2x512xf32>
    %cst_50 = arith.constant dense<0.000000e+00> : vector<2x512xf32>
    %30 = tpu.matmul %25, %6, %cst_50 {dimension_numbers = #tpu.dot_dimension_numbers<[1], [0], [0], [1], [0, 0, 1, 1], [], []>} : vector<2x64xf32>, vector<64x512xf32>, vector<2x512xf32> -> vector<2x512xf32>
    %31 = arith.addf %29, %30 : vector<2x512xf32>
    %cst_51 = arith.constant dense<0.000000e+00> : vector<2x512xf32>
    %32 = tpu.matmul %19, %7, %cst_51 {dimension_numbers = #tpu.dot_dimension_numbers<[1], [0], [0], [1], [0, 0, 1, 1], [], []>} : vector<2x128xf32>, vector<128x512xf32>, vector<2x512xf32> -> vector<2x512xf32>
    %33 = arith.addf %31, %32 : vector<2x512xf32>
    %34 = vector.broadcast %8 : vector<1x512xf32> to vector<2x512xf32>
    %35 = arith.addf %33, %34 : vector<2x512xf32>
    %36 = vector.extract_strided_slice %35 {offsets = [0, 0], sizes = [2, 128], strides = [1, 1]} : vector<2x512xf32> to vector<2x128xf32>
    %37 = arith.negf %36 : vector<2x128xf32>
    %38 = math.exp %37 : vector<2x128xf32>
    %cst_52 = arith.constant 1.000000e+00 : f32
    %39 = vector.broadcast %cst_52 : f32 to vector<2x128xf32>
    %40 = arith.addf %39, %38 : vector<2x128xf32>
    %41 = arith.divf %39, %40 : vector<2x128xf32>
    %42 = vector.extract_strided_slice %35 {offsets = [0, 128], sizes = [2, 128], strides = [1, 1]} : vector<2x512xf32> to vector<2x128xf32>
    %43 = arith.negf %42 : vector<2x128xf32>
    %44 = math.exp %43 : vector<2x128xf32>
    %cst_53 = arith.constant 1.000000e+00 : f32
    %45 = vector.broadcast %cst_53 : f32 to vector<2x128xf32>
    %46 = arith.addf %45, %44 : vector<2x128xf32>
    %47 = arith.divf %45, %46 : vector<2x128xf32>
    %48 = vector.extract_strided_slice %35 {offsets = [0, 256], sizes = [2, 128], strides = [1, 1]} : vector<2x512xf32> to vector<2x128xf32>
    %49 = math.tanh %48 : vector<2x128xf32>
    %50 = vector.extract_strided_slice %35 {offsets = [0, 384], sizes = [2, 128], strides = [1, 1]} : vector<2x512xf32> to vector<2x128xf32>
    %51 = arith.negf %50 : vector<2x128xf32>
    %52 = math.exp %51 : vector<2x128xf32>
    %cst_54 = arith.constant 1.000000e+00 : f32
    %53 = vector.broadcast %cst_54 : f32 to vector<2x128xf32>
    %54 = arith.addf %53, %52 : vector<2x128xf32>
    %55 = arith.divf %53, %54 : vector<2x128xf32>
    %56 = arith.mulf %47, %20 : vector<2x128xf32>
    %57 = arith.mulf %41, %49 : vector<2x128xf32>
    %58 = arith.addf %56, %57 : vector<2x128xf32>
    %59 = math.tanh %58 : vector<2x128xf32>
    %60 = arith.mulf %55, %59 : vector<2x128xf32>
    %61 = arith.index_cast %c0_i32_47 : i32 to index
    %c0_55 = arith.constant 0 : index
    %c0_56 = arith.constant 0 : index
    %62 = vector.load %arg18[%61, %c0_55, %c0_56] : memref<8x2x128xf32, #tpu.memory_space<vmem>>, vector<1x2x128xf32>
    %63 = vector.shape_cast %62 : vector<1x2x128xf32> to vector<2x128xf32>
    %64 = arith.mulf %60, %63 : vector<2x128xf32>
    %cst_57 = arith.constant dense<0.000000e+00> : vector<2x512xf32>
    %65 = tpu.matmul %64, %13, %cst_57 {dimension_numbers = #tpu.dot_dimension_numbers<[1], [0], [0], [1], [0, 0, 1, 1], [], []>} : vector<2x128xf32>, vector<128x512xf32>, vector<2x512xf32> -> vector<2x512xf32>
    %66 = tpu.concatenate %23, %24 in 1 : vector<2x16xf32>, vector<2x16xf32> -> vector<2x32xf32>
    %cst_58 = arith.constant dense<0.000000e+00> : vector<2x512xf32>
    %67 = tpu.matmul %66, %14, %cst_58 {dimension_numbers = #tpu.dot_dimension_numbers<[1], [0], [0], [1], [0, 0, 1, 1], [], []>} : vector<2x32xf32>, vector<32x512xf32>, vector<2x512xf32> -> vector<2x512xf32>
    %68 = arith.addf %65, %67 : vector<2x512xf32>
    %69 = arith.addf %68, %4 : vector<2x512xf32>
    %70 = math.tanh %69 : vector<2x512xf32>
    %cst_59 = arith.constant dense<0.000000e+00> : vector<2x16xf32>
    %71 = tpu.matmul %70, %15, %cst_59 {dimension_numbers = #tpu.dot_dimension_numbers<[1], [0], [0], [1], [0, 0, 1, 1], [], []>} : vector<2x512xf32>, vector<512x16xf32>, vector<2x16xf32> -> vector<2x16xf32>
    %cst_60 = arith.constant dense<0xFF800000> : vector<2xf32>
    %72 = vector.multi_reduction <maximumf>, %71, %cst_60 [1] : vector<2x16xf32> to vector<2xf32>
    %73 = vector.shape_cast %72 : vector<2xf32> to vector<2x1xf32>
    %74 = vector.broadcast %73 : vector<2x1xf32> to vector<2x16xf32>
    %75 = arith.subf %71, %74 : vector<2x16xf32>
    %76 = math.exp %75 : vector<2x16xf32>
    %cst_61 = arith.constant dense<0.000000e+00> : vector<2xf32>
    %77 = vector.multi_reduction <add>, %76, %cst_61 [1] : vector<2x16xf32> to vector<2xf32>
    %78 = vector.shape_cast %77 : vector<2xf32> to vector<2x1xf32>
    %79 = tpu.reciprocal %78 {approx = true} : vector<2x1xf32> -> vector<2x1xf32>
    %80 = vector.broadcast %79 : vector<2x1xf32> to vector<2x16xf32>
    %81 = arith.mulf %76, %80 : vector<2x16xf32>
    %82 = vector.shape_cast %81 : vector<2x16xf32> to vector<2x1x16xf32>
    "tpu.trace_start"() <{level = 10 : i32, message = "bqt,bte->bqe"}> : () -> ()
    %cst_62 = arith.constant dense<0.000000e+00> : vector<2x1x64xf32>
    %83 = tpu.matmul %82, %3, %cst_62 {dimension_numbers = #tpu.dot_dimension_numbers<[2], [1], [1], [2], [0, 0, 0, 1, 1, 2], [0], [0]>} : vector<2x1x16xf32>, vector<2x16x64xf32>, vector<2x1x64xf32> -> vector<2x1x64xf32>
    "tpu.trace_stop"() : () -> ()
    %84 = vector.shape_cast %83 : vector<2x1x64xf32> to vector<2x64xf32>
    %85 = arith.addf %24, %81 : vector<2x16xf32>
    %cst_63 = arith.constant dense<0.000000e+00> : vector<2x512xf32>
    %86 = tpu.matmul %28, %9, %cst_63 {dimension_numbers = #tpu.dot_dimension_numbers<[1], [0], [0], [1], [0, 0, 1, 1], [], []>} : vector<2x32xf32>, vector<32x512xf32>, vector<2x512xf32> -> vector<2x512xf32>
    %cst_64 = arith.constant dense<0.000000e+00> : vector<2x512xf32>
    %87 = tpu.matmul %84, %10, %cst_64 {dimension_numbers = #tpu.dot_dimension_numbers<[1], [0], [0], [1], [0, 0, 1, 1], [], []>} : vector<2x64xf32>, vector<64x512xf32>, vector<2x512xf32> -> vector<2x512xf32>
    %88 = arith.addf %86, %87 : vector<2x512xf32>
    %cst_65 = arith.constant dense<0.000000e+00> : vector<2x512xf32>
    %89 = tpu.matmul %21, %11, %cst_65 {dimension_numbers = #tpu.dot_dimension_numbers<[1], [0], [0], [1], [0, 0, 1, 1], [], []>} : vector<2x128xf32>, vector<128x512xf32>, vector<2x512xf32> -> vector<2x512xf32>
    %90 = arith.addf %88, %89 : vector<2x512xf32>
    %91 = vector.broadcast %12 : vector<1x512xf32> to vector<2x512xf32>
    %92 = arith.addf %90, %91 : vector<2x512xf32>
    %93 = vector.extract_strided_slice %92 {offsets = [0, 0], sizes = [2, 128], strides = [1, 1]} : vector<2x512xf32> to vector<2x128xf32>
    %94 = arith.negf %93 : vector<2x128xf32>
    %95 = math.exp %94 : vector<2x128xf32>
    %cst_66 = arith.constant 1.000000e+00 : f32
    %96 = vector.broadcast %cst_66 : f32 to vector<2x128xf32>
    %97 = arith.addf %96, %95 : vector<2x128xf32>
    %98 = arith.divf %96, %97 : vector<2x128xf32>
    %99 = vector.extract_strided_slice %92 {offsets = [0, 128], sizes = [2, 128], strides = [1, 1]} : vector<2x512xf32> to vector<2x128xf32>
    %100 = arith.negf %99 : vector<2x128xf32>
    %101 = math.exp %100 : vector<2x128xf32>
    %cst_67 = arith.constant 1.000000e+00 : f32
    %102 = vector.broadcast %cst_67 : f32 to vector<2x128xf32>
    %103 = arith.addf %102, %101 : vector<2x128xf32>
    %104 = arith.divf %102, %103 : vector<2x128xf32>
    %105 = vector.extract_strided_slice %92 {offsets = [0, 256], sizes = [2, 128], strides = [1, 1]} : vector<2x512xf32> to vector<2x128xf32>
    %106 = math.tanh %105 : vector<2x128xf32>
    %107 = vector.extract_strided_slice %92 {offsets = [0, 384], sizes = [2, 128], strides = [1, 1]} : vector<2x512xf32> to vector<2x128xf32>
    %108 = arith.negf %107 : vector<2x128xf32>
    %109 = math.exp %108 : vector<2x128xf32>
    %cst_68 = arith.constant 1.000000e+00 : f32
    %110 = vector.broadcast %cst_68 : f32 to vector<2x128xf32>
    %111 = arith.addf %110, %109 : vector<2x128xf32>
    %112 = arith.divf %110, %111 : vector<2x128xf32>
    %113 = arith.mulf %104, %22 : vector<2x128xf32>
    %114 = arith.mulf %98, %106 : vector<2x128xf32>
    %115 = arith.addf %113, %114 : vector<2x128xf32>
    %116 = math.tanh %115 : vector<2x128xf32>
    %117 = arith.mulf %112, %116 : vector<2x128xf32>
    %118 = arith.index_cast %c0_i32_47 : i32 to index
    %c0_69 = arith.constant 0 : index
    %c0_70 = arith.constant 0 : index
    %119 = vector.load %arg19[%118, %c0_69, %c0_70] : memref<8x2x128xf32, #tpu.memory_space<vmem>>, vector<1x2x128xf32>
    %120 = vector.shape_cast %119 : vector<1x2x128xf32> to vector<2x128xf32>
    %121 = arith.mulf %117, %120 : vector<2x128xf32>
    %cst_71 = arith.constant dense<0.000000e+00> : vector<2x32xf32>
    %122 = tpu.matmul %121, %16, %cst_71 {dimension_numbers = #tpu.dot_dimension_numbers<[1], [0], [0], [1], [0, 0, 1, 1], [], []>} : vector<2x128xf32>, vector<128x32xf32>, vector<2x32xf32> -> vector<2x32xf32>
    %cst_72 = arith.constant dense<0.000000e+00> : vector<2x32xf32>
    %123 = tpu.matmul %84, %17, %cst_72 {dimension_numbers = #tpu.dot_dimension_numbers<[1], [0], [0], [1], [0, 0, 1, 1], [], []>} : vector<2x64xf32>, vector<64x32xf32>, vector<2x32xf32> -> vector<2x32xf32>
    %124 = arith.addf %122, %123 : vector<2x32xf32>
    %125 = vector.broadcast %18 : vector<1x32xf32> to vector<2x32xf32>
    %126 = arith.addf %124, %125 : vector<2x32xf32>
    %127 = arith.index_cast %c0_i32_47 : i32 to index
    %c0_73 = arith.constant 0 : index
    %c0_74 = arith.constant 0 : index
    %128 = vector.load %arg20[%127, %c0_73, %c0_74] : memref<8x2x32xf32, #tpu.memory_space<vmem>>, vector<1x2x32xf32>
    %129 = vector.shape_cast %128 : vector<1x2x32xf32> to vector<2x32xf32>
    %130 = vector.shape_cast %126 : vector<2x32xf32> to vector<1x2x32xf32>
    tpu.vector_store %arg20[%127, %c0_73, %c0_74], %130 {strides = array<i32>} : memref<8x2x32xf32, #tpu.memory_space<vmem>>, vector<1x2x32xf32>,
    %131 = arith.index_cast %c0_i32_47 : i32 to index
    %c0_75 = arith.constant 0 : index
    %c0_76 = arith.constant 0 : index
    %132 = vector.load %arg21[%131, %c0_75, %c0_76] : memref<8x2x16xf32, #tpu.memory_space<vmem>>, vector<1x2x16xf32>
    %133 = vector.shape_cast %132 : vector<1x2x16xf32> to vector<2x16xf32>
    %134 = vector.shape_cast %81 : vector<2x16xf32> to vector<1x2x16xf32>
    tpu.vector_store %arg21[%131, %c0_75, %c0_76], %134 {strides = array<i32>} : memref<8x2x16xf32, #tpu.memory_space<vmem>>, vector<1x2x16xf32>,
    %c1_i32 = arith.constant 1 : i32
    %135 = arith.index_cast %c1_i32 : i32 to index
    %c0_77 = arith.constant 0 : index
    %c0_78 = arith.constant 0 : index
    %136 = vector.load %arg1[%135, %c0_77, %c0_78] : memref<8x2x32xf32, #tpu.memory_space<vmem>>, vector<1x2x32xf32>
    %137 = vector.shape_cast %136 : vector<1x2x32xf32> to vector<2x32xf32>
    %cst_79 = arith.constant dense<0.000000e+00> : vector<2x512xf32>
    %138 = tpu.matmul %137, %5, %cst_79 {dimension_numbers = #tpu.dot_dimension_numbers<[1], [0], [0], [1], [0, 0, 1, 1], [], []>} : vector<2x32xf32>, vector<32x512xf32>, vector<2x512xf32> -> vector<2x512xf32>
    %cst_80 = arith.constant dense<0.000000e+00> : vector<2x512xf32>
    %139 = tpu.matmul %84, %6, %cst_80 {dimension_numbers = #tpu.dot_dimension_numbers<[1], [0], [0], [1], [0, 0, 1, 1], [], []>} : vector<2x64xf32>, vector<64x512xf32>, vector<2x512xf32> -> vector<2x512xf32>
    %140 = arith.addf %138, %139 : vector<2x512xf32>
    %cst_81 = arith.constant dense<0.000000e+00> : vector<2x512xf32>
    %141 = tpu.matmul %64, %7, %cst_81 {dimension_numbers = #tpu.dot_dimension_numbers<[1], [0], [0], [1], [0, 0, 1, 1], [], []>} : vector<2x128xf32>, vector<128x512xf32>, vector<2x512xf32> -> vector<2x512xf32>
    %142 = arith.addf %140, %141 : vector<2x512xf32>
    %143 = vector.broadcast %8 : vector<1x512xf32> to vector<2x512xf32>
    %144 = arith.addf %142, %143 : vector<2x512xf32>
    %145 = vector.extract_strided_slice %144 {offsets = [0, 0], sizes = [2, 128], strides = [1, 1]} : vector<2x512xf32> to vector<2x128xf32>
    %146 = arith.negf %145 : vector<2x128xf32>
    %147 = math.exp %146 : vector<2x128xf32>
    %cst_82 = arith.constant 1.000000e+00 : f32
    %148 = vector.broadcast %cst_82 : f32 to vector<2x128xf32>
    %149 = arith.addf %148, %147 : vector<2x128xf32>
    %150 = arith.divf %148, %149 : vector<2x128xf32>
    %151 = vector.extract_strided_slice %144 {offsets = [0, 128], sizes = [2, 128], strides = [1, 1]} : vector<2x512xf32> to vector<2x128xf32>
    %152 = arith.negf %151 : vector<2x128xf32>
    %153 = math.exp %152 : vector<2x128xf32>
    %cst_83 = arith.constant 1.000000e+00 : f32
    %154 = vector.broadcast %cst_83 : f32 to vector<2x128xf32>
    %155 = arith.addf %154, %153 : vector<2x128xf32>
    %156 = arith.divf %154, %155 : vector<2x128xf32>
    %157 = vector.extract_strided_slice %144 {offsets = [0, 256], sizes = [2, 128], strides = [1, 1]} : vector<2x512xf32> to vector<2x128xf32>
    %158 = math.tanh %157 : vector<2x128xf32>
    %159 = vector.extract_strided_slice %144 {offsets = [0, 384], sizes = [2, 128], strides = [1, 1]} : vector<2x512xf32> to vector<2x128xf32>
    %160 = arith.negf %159 : vector<2x128xf32>
    %161 = math.exp %160 : vector<2x128xf32>
    %cst_84 = arith.constant 1.000000e+00 : f32
    %162 = vector.broadcast %cst_84 : f32 to vector<2x128xf32>
    %163 = arith.addf %162, %161 : vector<2x128xf32>
    %164 = arith.divf %162, %163 : vector<2x128xf32>
    %165 = arith.mulf %156, %58 : vector<2x128xf32>
    %166 = arith.mulf %150, %158 : vector<2x128xf32>
    %167 = arith.addf %165, %166 : vector<2x128xf32>
    %168 = math.tanh %167 : vector<2x128xf32>
    %169 = arith.mulf %164, %168 : vector<2x128xf32>
    %170 = arith.index_cast %c1_i32 : i32 to index
    %c0_85 = arith.constant 0 : index
    %c0_86 = arith.constant 0 : index
    %171 = vector.load %arg18[%170, %c0_85, %c0_86] : memref<8x2x128xf32, #tpu.memory_space<vmem>>, vector<1x2x128xf32>
    %172 = vector.shape_cast %171 : vector<1x2x128xf32> to vector<2x128xf32>
    %173 = arith.mulf %169, %172 : vector<2x128xf32>
    %cst_87 = arith.constant dense<0.000000e+00> : vector<2x512xf32>
    %174 = tpu.matmul %173, %13, %cst_87 {dimension_numbers = #tpu.dot_dimension_numbers<[1], [0], [0], [1], [0, 0, 1, 1], [], []>} : vector<2x128xf32>, vector<128x512xf32>, vector<2x512xf32> -> vector<2x512xf32>
    %175 = tpu.concatenate %81, %85 in 1 : vector<2x16xf32>, vector<2x16xf32> -> vector<2x32xf32>
    %cst_88 = arith.constant dense<0.000000e+00> : vector<2x512xf32>
    %176 = tpu.matmul %175, %14, %cst_88 {dimension_numbers = #tpu.dot_dimension_numbers<[1], [0], [0], [1], [0, 0, 1, 1], [], []>} : vector<2x32xf32>, vector<32x512xf32>, vector<2x512xf32> -> vector<2x512xf32>
    %177 = arith.addf %174, %176 : vector<2x512xf32>
    %178 = arith.addf %177, %4 : vector<2x512xf32>
    %179 = math.tanh %178 : vector<2x512xf32>
    %cst_89 = arith.constant dense<0.000000e+00> : vector<2x16xf32>
    %180 = tpu.matmul %179, %15, %cst_89 {dimension_numbers = #tpu.dot_dimension_numbers<[1], [0], [0], [1], [0, 0, 1, 1], [], []>} : vector<2x512xf32>, vector<512x16xf32>, vector<2x16xf32> -> vector<2x16xf32>
    %cst_90 = arith.constant dense<0xFF800000> : vector<2xf32>
    %181 = vector.multi_reduction <maximumf>, %180, %cst_90 [1] : vector<2x16xf32> to vector<2xf32>
    %182 = vector.shape_cast %181 : vector<2xf32> to vector<2x1xf32>
    %183 = vector.broadcast %182 : vector<2x1xf32> to vector<2x16xf32>
    %184 = arith.subf %180, %183 : vector<2x16xf32>
    %185 = math.exp %184 : vector<2x16xf32>
    %cst_91 = arith.constant dense<0.000000e+00> : vector<2xf32>
    %186 = vector.multi_reduction <add>, %185, %cst_91 [1] : vector<2x16xf32> to vector<2xf32>
    %187 = vector.shape_cast %186 : vector<2xf32> to vector<2x1xf32>
    %188 = tpu.reciprocal %187 {approx = true} : vector<2x1xf32> -> vector<2x1xf32>
    %189 = vector.broadcast %188 : vector<2x1xf32> to vector<2x16xf32>
    %190 = arith.mulf %185, %189 : vector<2x16xf32>
    %191 = vector.shape_cast %190 : vector<2x16xf32> to vector<2x1x16xf32>
    "tpu.trace_start"() <{level = 10 : i32, message = "bqt,bte->bqe"}> : () -> ()
    %cst_92 = arith.constant dense<0.000000e+00> : vector<2x1x64xf32>
    %192 = tpu.matmul %191, %3, %cst_92 {dimension_numbers = #tpu.dot_dimension_numbers<[2], [1], [1], [2], [0, 0, 0, 1, 1, 2], [0], [0]>} : vector<2x1x16xf32>, vector<2x16x64xf32>, vector<2x1x64xf32> -> vector<2x1x64xf32>
    "tpu.trace_stop"() : () -> ()
    %193 = vector.shape_cast %192 : vector<2x1x64xf32> to vector<2x64xf32>
    %194 = arith.addf %85, %190 : vector<2x16xf32>
    %cst_93 = arith.constant dense<0.000000e+00> : vector<2x512xf32>
    %195 = tpu.matmul %137, %9, %cst_93 {dimension_numbers = #tpu.dot_dimension_numbers<[1], [0], [0], [1], [0, 0, 1, 1], [], []>} : vector<2x32xf32>, vector<32x512xf32>, vector<2x512xf32> -> vector<2x512xf32>
    %cst_94 = arith.constant dense<0.000000e+00> : vector<2x512xf32>
    %196 = tpu.matmul %193, %10, %cst_94 {dimension_numbers = #tpu.dot_dimension_numbers<[1], [0], [0], [1], [0, 0, 1, 1], [], []>} : vector<2x64xf32>, vector<64x512xf32>, vector<2x512xf32> -> vector<2x512xf32>
    %197 = arith.addf %195, %196 : vector<2x512xf32>
    %cst_95 = arith.constant dense<0.000000e+00> : vector<2x512xf32>
    %198 = tpu.matmul %121, %11, %cst_95 {dimension_numbers = #tpu.dot_dimension_numbers<[1], [0], [0], [1], [0, 0, 1, 1], [], []>} : vector<2x128xf32>, vector<128x512xf32>, vector<2x512xf32> -> vector<2x512xf32>
    %199 = arith.addf %197, %198 : vector<2x512xf32>
    %200 = vector.broadcast %12 : vector<1x512xf32> to vector<2x512xf32>
    %201 = arith.addf %199, %200 : vector<2x512xf32>
    %202 = vector.extract_strided_slice %201 {offsets = [0, 0], sizes = [2, 128], strides = [1, 1]} : vector<2x512xf32> to vector<2x128xf32>
    %203 = arith.negf %202 : vector<2x128xf32>
    %204 = math.exp %203 : vector<2x128xf32>
    %cst_96 = arith.constant 1.000000e+00 : f32
    %205 = vector.broadcast %cst_96 : f32 to vector<2x128xf32>
    %206 = arith.addf %205, %204 : vector<2x128xf32>
    %207 = arith.divf %205, %206 : vector<2x128xf32>
    %208 = vector.extract_strided_slice %201 {offsets = [0, 128], sizes = [2, 128], strides = [1, 1]} : vector<2x512xf32> to vector<2x128xf32>
    %209 = arith.negf %208 : vector<2x128xf32>
    %210 = math.exp %209 : vector<2x128xf32>
    %cst_97 = arith.constant 1.000000e+00 : f32
    %211 = vector.broadcast %cst_97 : f32 to vector<2x128xf32>
    %212 = arith.addf %211, %210 : vector<2x128xf32>
    %213 = arith.divf %211, %212 : vector<2x128xf32>
    %214 = vector.extract_strided_slice %201 {offsets = [0, 256], sizes = [2, 128], strides = [1, 1]} : vector<2x512xf32> to vector<2x128xf32>
    %215 = math.tanh %214 : vector<2x128xf32>
    %216 = vector.extract_strided_slice %201 {offsets = [0, 384], sizes = [2, 128], strides = [1, 1]} : vector<2x512xf32> to vector<2x128xf32>
    %217 = arith.negf %216 : vector<2x128xf32>
    %218 = math.exp %217 : vector<2x128xf32>
    %cst_98 = arith.constant 1.000000e+00 : f32
    %219 = vector.broadcast %cst_98 : f32 to vector<2x128xf32>
    %220 = arith.addf %219, %218 : vector<2x128xf32>
    %221 = arith.divf %219, %220 : vector<2x128xf32>
    %222 = arith.mulf %213, %115 : vector<2x128xf32>
    %223 = arith.mulf %207, %215 : vector<2x128xf32>
    %224 = arith.addf %222, %223 : vector<2x128xf32>
    %225 = math.tanh %224 : vector<2x128xf32>
    %226 = arith.mulf %221, %225 : vector<2x128xf32>
    %227 = arith.index_cast %c1_i32 : i32 to index
    %c0_99 = arith.constant 0 : index
    %c0_100 = arith.constant 0 : index
    %228 = vector.load %arg19[%227, %c0_99, %c0_100] : memref<8x2x128xf32, #tpu.memory_space<vmem>>, vector<1x2x128xf32>
    %229 = vector.shape_cast %228 : vector<1x2x128xf32> to vector<2x128xf32>
    %230 = arith.mulf %226, %229 : vector<2x128xf32>
    %cst_101 = arith.constant dense<0.000000e+00> : vector<2x32xf32>
    %231 = tpu.matmul %230, %16, %cst_101 {dimension_numbers = #tpu.dot_dimension_numbers<[1], [0], [0], [1], [0, 0, 1, 1], [], []>} : vector<2x128xf32>, vector<128x32xf32>, vector<2x32xf32> -> vector<2x32xf32>
    %cst_102 = arith.constant dense<0.000000e+00> : vector<2x32xf32>
    %232 = tpu.matmul %193, %17, %cst_102 {dimension_numbers = #tpu.dot_dimension_numbers<[1], [0], [0], [1], [0, 0, 1, 1], [], []>} : vector<2x64xf32>, vector<64x32xf32>, vector<2x32xf32> -> vector<2x32xf32>
    %233 = arith.addf %231, %232 : vector<2x32xf32>
    %234 = vector.broadcast %18 : vector<1x32xf32> to vector<2x32xf32>
    %235 = arith.addf %233, %234 : vector<2x32xf32>
    %236 = arith.index_cast %c1_i32 : i32 to index
    %c0_103 = arith.constant 0 : index
    %c0_104 = arith.constant 0 : index
    %237 = vector.load %arg20[%236, %c0_103, %c0_104] : memref<8x2x32xf32, #tpu.memory_space<vmem>>, vector<1x2x32xf32>
    %238 = vector.shape_cast %237 : vector<1x2x32xf32> to vector<2x32xf32>
    %239 = vector.shape_cast %235 : vector<2x32xf32> to vector<1x2x32xf32>
    tpu.vector_store %arg20[%236, %c0_103, %c0_104], %239 {strides = array<i32>} : memref<8x2x32xf32, #tpu.memory_space<vmem>>, vector<1x2x32xf32>,
    %240 = arith.index_cast %c1_i32 : i32 to index
    %c0_105 = arith.constant 0 : index
    %c0_106 = arith.constant 0 : index
    %241 = vector.load %arg21[%240, %c0_105, %c0_106] : memref<8x2x16xf32, #tpu.memory_space<vmem>>, vector<1x2x16xf32>
    %242 = vector.shape_cast %241 : vector<1x2x16xf32> to vector<2x16xf32>
    %243 = vector.shape_cast %190 : vector<2x16xf32> to vector<1x2x16xf32>
    tpu.vector_store %arg21[%240, %c0_105, %c0_106], %243 {strides = array<i32>} : memref<8x2x16xf32, #tpu.memory_space<vmem>>, vector<1x2x16xf32>,
    %c2_i32 = arith.constant 2 : i32
    %244 = arith.index_cast %c2_i32 : i32 to index
    %c0_107 = arith.constant 0 : index
    %c0_108 = arith.constant 0 : index
    %245 = vector.load %arg1[%244, %c0_107, %c0_108] : memref<8x2x32xf32, #tpu.memory_space<vmem>>, vector<1x2x32xf32>
    %246 = vector.shape_cast %245 : vector<1x2x32xf32> to vector<2x32xf32>
    %cst_109 = arith.constant dense<0.000000e+00> : vector<2x512xf32>
    %247 = tpu.matmul %246, %5, %cst_109 {dimension_numbers = #tpu.dot_dimension_numbers<[1], [0], [0], [1], [0, 0, 1, 1], [], []>} : vector<2x32xf32>, vector<32x512xf32>, vector<2x512xf32> -> vector<2x512xf32>
    %cst_110 = arith.constant dense<0.000000e+00> : vector<2x512xf32>
    %248 = tpu.matmul %193, %6, %cst_110 {dimension_numbers = #tpu.dot_dimension_numbers<[1], [0], [0], [1], [0, 0, 1, 1], [], []>} : vector<2x64xf32>, vector<64x512xf32>, vector<2x512xf32> -> vector<2x512xf32>
    %249 = arith.addf %247, %248 : vector<2x512xf32>
    %cst_111 = arith.constant dense<0.000000e+00> : vector<2x512xf32>
    %250 = tpu.matmul %173, %7, %cst_111 {dimension_numbers = #tpu.dot_dimension_numbers<[1], [0], [0], [1], [0, 0, 1, 1], [], []>} : vector<2x128xf32>, vector<128x512xf32>, vector<2x512xf32> -> vector<2x512xf32>
    %251 = arith.addf %249, %250 : vector<2x512xf32>
    %252 = vector.broadcast %8 : vector<1x512xf32> to vector<2x512xf32>
    %253 = arith.addf %251, %252 : vector<2x512xf32>
    %254 = vector.extract_strided_slice %253 {offsets = [0, 0], sizes = [2, 128], strides = [1, 1]} : vector<2x512xf32> to vector<2x128xf32>
    %255 = arith.negf %254 : vector<2x128xf32>
    %256 = math.exp %255 : vector<2x128xf32>
    %cst_112 = arith.constant 1.000000e+00 : f32
    %257 = vector.broadcast %cst_112 : f32 to vector<2x128xf32>
    %258 = arith.addf %257, %256 : vector<2x128xf32>
    %259 = arith.divf %257, %258 : vector<2x128xf32>
    %260 = vector.extract_strided_slice %253 {offsets = [0, 128], sizes = [2, 128], strides = [1, 1]} : vector<2x512xf32> to vector<2x128xf32>
    %261 = arith.negf %260 : vector<2x128xf32>
    %262 = math.exp %261 : vector<2x128xf32>
    %cst_113 = arith.constant 1.000000e+00 : f32
    %263 = vector.broadcast %cst_113 : f32 to vector<2x128xf32>
    %264 = arith.addf %263, %262 : vector<2x128xf32>
    %265 = arith.divf %263, %264 : vector<2x128xf32>
    %266 = vector.extract_strided_slice %253 {offsets = [0, 256], sizes = [2, 128], strides = [1, 1]} : vector<2x512xf32> to vector<2x128xf32>
    %267 = math.tanh %266 : vector<2x128xf32>
    %268 = vector.extract_strided_slice %253 {offsets = [0, 384], sizes = [2, 128], strides = [1, 1]} : vector<2x512xf32> to vector<2x128xf32>
    %269 = arith.negf %268 : vector<2x128xf32>
    %270 = math.exp %269 : vector<2x128xf32>
    %cst_114 = arith.constant 1.000000e+00 : f32
    %271 = vector.broadcast %cst_114 : f32 to vector<2x128xf32>
    %272 = arith.addf %271, %270 : vector<2x128xf32>
    %273 = arith.divf %271, %272 : vector<2x128xf32>
    %274 = arith.mulf %265, %167 : vector<2x128xf32>
    %275 = arith.mulf %259, %267 : vector<2x128xf32>
    %276 = arith.addf %274, %275 : vector<2x128xf32>
    %277 = math.tanh %276 : vector<2x128xf32>
    %278 = arith.mulf %273, %277 : vector<2x128xf32>
    %279 = arith.index_cast %c2_i32 : i32 to index
    %c0_115 = arith.constant 0 : index
    %c0_116 = arith.constant 0 : index
    %280 = vector.load %arg18[%279, %c0_115, %c0_116] : memref<8x2x128xf32, #tpu.memory_space<vmem>>, vector<1x2x128xf32>
    %281 = vector.shape_cast %280 : vector<1x2x128xf32> to vector<2x128xf32>
    %282 = arith.mulf %278, %281 : vector<2x128xf32>
    %cst_117 = arith.constant dense<0.000000e+00> : vector<2x512xf32>
    %283 = tpu.matmul %282, %13, %cst_117 {dimension_numbers = #tpu.dot_dimension_numbers<[1], [0], [0], [1], [0, 0, 1, 1], [], []>} : vector<2x128xf32>, vector<128x512xf32>, vector<2x512xf32> -> vector<2x512xf32>
    %284 = tpu.concatenate %190, %194 in 1 : vector<2x16xf32>, vector<2x16xf32> -> vector<2x32xf32>
    %cst_118 = arith.constant dense<0.000000e+00> : vector<2x512xf32>
    %285 = tpu.matmul %284, %14, %cst_118 {dimension_numbers = #tpu.dot_dimension_numbers<[1], [0], [0], [1], [0, 0, 1, 1], [], []>} : vector<2x32xf32>, vector<32x512xf32>, vector<2x512xf32> -> vector<2x512xf32>
    %286 = arith.addf %283, %285 : vector<2x512xf32>
    %287 = arith.addf %286, %4 : vector<2x512xf32>
    %288 = math.tanh %287 : vector<2x512xf32>
    %cst_119 = arith.constant dense<0.000000e+00> : vector<2x16xf32>
    %289 = tpu.matmul %288, %15, %cst_119 {dimension_numbers = #tpu.dot_dimension_numbers<[1], [0], [0], [1], [0, 0, 1, 1], [], []>} : vector<2x512xf32>, vector<512x16xf32>, vector<2x16xf32> -> vector<2x16xf32>
    %cst_120 = arith.constant dense<0xFF800000> : vector<2xf32>
    %290 = vector.multi_reduction <maximumf>, %289, %cst_120 [1] : vector<2x16xf32> to vector<2xf32>
    %291 = vector.shape_cast %290 : vector<2xf32> to vector<2x1xf32>
    %292 = vector.broadcast %291 : vector<2x1xf32> to vector<2x16xf32>
    %293 = arith.subf %289, %292 : vector<2x16xf32>
    %294 = math.exp %293 : vector<2x16xf32>
    %cst_121 = arith.constant dense<0.000000e+00> : vector<2xf32>
    %295 = vector.multi_reduction <add>, %294, %cst_121 [1] : vector<2x16xf32> to vector<2xf32>
    %296 = vector.shape_cast %295 : vector<2xf32> to vector<2x1xf32>
    %297 = tpu.reciprocal %296 {approx = true} : vector<2x1xf32> -> vector<2x1xf32>
    %298 = vector.broadcast %297 : vector<2x1xf32> to vector<2x16xf32>
    %299 = arith.mulf %294, %298 : vector<2x16xf32>
    %300 = vector.shape_cast %299 : vector<2x16xf32> to vector<2x1x16xf32>
    "tpu.trace_start"() <{level = 10 : i32, message = "bqt,bte->bqe"}> : () -> ()
    %cst_122 = arith.constant dense<0.000000e+00> : vector<2x1x64xf32>
    %301 = tpu.matmul %300, %3, %cst_122 {dimension_numbers = #tpu.dot_dimension_numbers<[2], [1], [1], [2], [0, 0, 0, 1, 1, 2], [0], [0]>} : vector<2x1x16xf32>, vector<2x16x64xf32>, vector<2x1x64xf32> -> vector<2x1x64xf32>
    "tpu.trace_stop"() : () -> ()
    %302 = vector.shape_cast %301 : vector<2x1x64xf32> to vector<2x64xf32>
    %303 = arith.addf %194, %299 : vector<2x16xf32>
    %cst_123 = arith.constant dense<0.000000e+00> : vector<2x512xf32>
    %304 = tpu.matmul %246, %9, %cst_123 {dimension_numbers = #tpu.dot_dimension_numbers<[1], [0], [0], [1], [0, 0, 1, 1], [], []>} : vector<2x32xf32>, vector<32x512xf32>, vector<2x512xf32> -> vector<2x512xf32>
    %cst_124 = arith.constant dense<0.000000e+00> : vector<2x512xf32>
    %305 = tpu.matmul %302, %10, %cst_124 {dimension_numbers = #tpu.dot_dimension_numbers<[1], [0], [0], [1], [0, 0, 1, 1], [], []>} : vector<2x64xf32>, vector<64x512xf32>, vector<2x512xf32> -> vector<2x512xf32>
    %306 = arith.addf %304, %305 : vector<2x512xf32>
    %cst_125 = arith.constant dense<0.000000e+00> : vector<2x512xf32>
    %307 = tpu.matmul %230, %11, %cst_125 {dimension_numbers = #tpu.dot_dimension_numbers<[1], [0], [0], [1], [0, 0, 1, 1], [], []>} : vector<2x128xf32>, vector<128x512xf32>, vector<2x512xf32> -> vector<2x512xf32>
    %308 = arith.addf %306, %307 : vector<2x512xf32>
    %309 = vector.broadcast %12 : vector<1x512xf32> to vector<2x512xf32>
    %310 = arith.addf %308, %309 : vector<2x512xf32>
    %311 = vector.extract_strided_slice %310 {offsets = [0, 0], sizes = [2, 128], strides = [1, 1]} : vector<2x512xf32> to vector<2x128xf32>
    %312 = arith.negf %311 : vector<2x128xf32>
    %313 = math.exp %312 : vector<2x128xf32>
    %cst_126 = arith.constant 1.000000e+00 : f32
    %314 = vector.broadcast %cst_126 : f32 to vector<2x128xf32>
    %315 = arith.addf %314, %313 : vector<2x128xf32>
    %316 = arith.divf %314, %315 : vector<2x128xf32>
    %317 = vector.extract_strided_slice %310 {offsets = [0, 128], sizes = [2, 128], strides = [1, 1]} : vector<2x512xf32> to vector<2x128xf32>
    %318 = arith.negf %317 : vector<2x128xf32>
    %319 = math.exp %318 : vector<2x128xf32>
    %cst_127 = arith.constant 1.000000e+00 : f32
    %320 = vector.broadcast %cst_127 : f32 to vector<2x128xf32>
    %321 = arith.addf %320, %319 : vector<2x128xf32>
    %322 = arith.divf %320, %321 : vector<2x128xf32>
    %323 = vector.extract_strided_slice %310 {offsets = [0, 256], sizes = [2, 128], strides = [1, 1]} : vector<2x512xf32> to vector<2x128xf32>
    %324 = math.tanh %323 : vector<2x128xf32>
    %325 = vector.extract_strided_slice %310 {offsets = [0, 384], sizes = [2, 128], strides = [1, 1]} : vector<2x512xf32> to vector<2x128xf32>
    %326 = arith.negf %325 : vector<2x128xf32>
    %327 = math.exp %326 : vector<2x128xf32>
    %cst_128 = arith.constant 1.000000e+00 : f32
    %328 = vector.broadcast %cst_128 : f32 to vector<2x128xf32>
    %329 = arith.addf %328, %327 : vector<2x128xf32>
    %330 = arith.divf %328, %329 : vector<2x128xf32>
    %331 = arith.mulf %322, %224 : vector<2x128xf32>
    %332 = arith.mulf %316, %324 : vector<2x128xf32>
    %333 = arith.addf %331, %332 : vector<2x128xf32>
    %334 = math.tanh %333 : vector<2x128xf32>
    %335 = arith.mulf %330, %334 : vector<2x128xf32>
    %336 = arith.index_cast %c2_i32 : i32 to index
    %c0_129 = arith.constant 0 : index
    %c0_130 = arith.constant 0 : index
    %337 = vector.load %arg19[%336, %c0_129, %c0_130] : memref<8x2x128xf32, #tpu.memory_space<vmem>>, vector<1x2x128xf32>
    %338 = vector.shape_cast %337 : vector<1x2x128xf32> to vector<2x128xf32>
    %339 = arith.mulf %335, %338 : vector<2x128xf32>
    %cst_131 = arith.constant dense<0.000000e+00> : vector<2x32xf32>
    %340 = tpu.matmul %339, %16, %cst_131 {dimension_numbers = #tpu.dot_dimension_numbers<[1], [0], [0], [1], [0, 0, 1, 1], [], []>} : vector<2x128xf32>, vector<128x32xf32>, vector<2x32xf32> -> vector<2x32xf32>
    %cst_132 = arith.constant dense<0.000000e+00> : vector<2x32xf32>
    %341 = tpu.matmul %302, %17, %cst_132 {dimension_numbers = #tpu.dot_dimension_numbers<[1], [0], [0], [1], [0, 0, 1, 1], [], []>} : vector<2x64xf32>, vector<64x32xf32>, vector<2x32xf32> -> vector<2x32xf32>
    %342 = arith.addf %340, %341 : vector<2x32xf32>
    %343 = vector.broadcast %18 : vector<1x32xf32> to vector<2x32xf32>
    %344 = arith.addf %342, %343 : vector<2x32xf32>
    %345 = arith.index_cast %c2_i32 : i32 to index
    %c0_133 = arith.constant 0 : index
    %c0_134 = arith.constant 0 : index
    %346 = vector.load %arg20[%345, %c0_133, %c0_134] : memref<8x2x32xf32, #tpu.memory_space<vmem>>, vector<1x2x32xf32>
    %347 = vector.shape_cast %346 : vector<1x2x32xf32> to vector<2x32xf32>
    %348 = vector.shape_cast %344 : vector<2x32xf32> to vector<1x2x32xf32>
    tpu.vector_store %arg20[%345, %c0_133, %c0_134], %348 {strides = array<i32>} : memref<8x2x32xf32, #tpu.memory_space<vmem>>, vector<1x2x32xf32>,
    %349 = arith.index_cast %c2_i32 : i32 to index
    %c0_135 = arith.constant 0 : index
    %c0_136 = arith.constant 0 : index
    %350 = vector.load %arg21[%349, %c0_135, %c0_136] : memref<8x2x16xf32, #tpu.memory_space<vmem>>, vector<1x2x16xf32>
    %351 = vector.shape_cast %350 : vector<1x2x16xf32> to vector<2x16xf32>
    %352 = vector.shape_cast %299 : vector<2x16xf32> to vector<1x2x16xf32>
    tpu.vector_store %arg21[%349, %c0_135, %c0_136], %352 {strides = array<i32>} : memref<8x2x16xf32, #tpu.memory_space<vmem>>, vector<1x2x16xf32>,
    %c3_i32 = arith.constant 3 : i32
    %353 = arith.index_cast %c3_i32 : i32 to index
    %c0_137 = arith.constant 0 : index
    %c0_138 = arith.constant 0 : index
    %354 = vector.load %arg1[%353, %c0_137, %c0_138] : memref<8x2x32xf32, #tpu.memory_space<vmem>>, vector<1x2x32xf32>
    %355 = vector.shape_cast %354 : vector<1x2x32xf32> to vector<2x32xf32>
    %cst_139 = arith.constant dense<0.000000e+00> : vector<2x512xf32>
    %356 = tpu.matmul %355, %5, %cst_139 {dimension_numbers = #tpu.dot_dimension_numbers<[1], [0], [0], [1], [0, 0, 1, 1], [], []>} : vector<2x32xf32>, vector<32x512xf32>, vector<2x512xf32> -> vector<2x512xf32>
    %cst_140 = arith.constant dense<0.000000e+00> : vector<2x512xf32>
    %357 = tpu.matmul %302, %6, %cst_140 {dimension_numbers = #tpu.dot_dimension_numbers<[1], [0], [0], [1], [0, 0, 1, 1], [], []>} : vector<2x64xf32>, vector<64x512xf32>, vector<2x512xf32> -> vector<2x512xf32>
    %358 = arith.addf %356, %357 : vector<2x512xf32>
    %cst_141 = arith.constant dense<0.000000e+00> : vector<2x512xf32>
    %359 = tpu.matmul %282, %7, %cst_141 {dimension_numbers = #tpu.dot_dimension_numbers<[1], [0], [0], [1], [0, 0, 1, 1], [], []>} : vector<2x128xf32>, vector<128x512xf32>, vector<2x512xf32> -> vector<2x512xf32>
    %360 = arith.addf %358, %359 : vector<2x512xf32>
    %361 = vector.broadcast %8 : vector<1x512xf32> to vector<2x512xf32>
    %362 = arith.addf %360, %361 : vector<2x512xf32>
    %363 = vector.extract_strided_slice %362 {offsets = [0, 0], sizes = [2, 128], strides = [1, 1]} : vector<2x512xf32> to vector<2x128xf32>
    %364 = arith.negf %363 : vector<2x128xf32>
    %365 = math.exp %364 : vector<2x128xf32>
    %cst_142 = arith.constant 1.000000e+00 : f32
    %366 = vector.broadcast %cst_142 : f32 to vector<2x128xf32>
    %367 = arith.addf %366, %365 : vector<2x128xf32>
    %368 = arith.divf %366, %367 : vector<2x128xf32>
    %369 = vector.extract_strided_slice %362 {offsets = [0, 128], sizes = [2, 128], strides = [1, 1]} : vector<2x512xf32> to vector<2x128xf32>
    %370 = arith.negf %369 : vector<2x128xf32>
    %371 = math.exp %370 : vector<2x128xf32>
    %cst_143 = arith.constant 1.000000e+00 : f32
    %372 = vector.broadcast %cst_143 : f32 to vector<2x128xf32>
    %373 = arith.addf %372, %371 : vector<2x128xf32>
    %374 = arith.divf %372, %373 : vector<2x128xf32>
    %375 = vector.extract_strided_slice %362 {offsets = [0, 256], sizes = [2, 128], strides = [1, 1]} : vector<2x512xf32> to vector<2x128xf32>
    %376 = math.tanh %375 : vector<2x128xf32>
    %377 = vector.extract_strided_slice %362 {offsets = [0, 384], sizes = [2, 128], strides = [1, 1]} : vector<2x512xf32> to vector<2x128xf32>
    %378 = arith.negf %377 : vector<2x128xf32>
    %379 = math.exp %378 : vector<2x128xf32>
    %cst_144 = arith.constant 1.000000e+00 : f32
    %380 = vector.broadcast %cst_144 : f32 to vector<2x128xf32>
    %381 = arith.addf %380, %379 : vector<2x128xf32>
    %382 = arith.divf %380, %381 : vector<2x128xf32>
    %383 = arith.mulf %374, %276 : vector<2x128xf32>
    %384 = arith.mulf %368, %376 : vector<2x128xf32>
    %385 = arith.addf %383, %384 : vector<2x128xf32>
    %386 = math.tanh %385 : vector<2x128xf32>
    %387 = arith.mulf %382, %386 : vector<2x128xf32>
    %388 = arith.index_cast %c3_i32 : i32 to index
    %c0_145 = arith.constant 0 : index
    %c0_146 = arith.constant 0 : index
    %389 = vector.load %arg18[%388, %c0_145, %c0_146] : memref<8x2x128xf32, #tpu.memory_space<vmem>>, vector<1x2x128xf32>
    %390 = vector.shape_cast %389 : vector<1x2x128xf32> to vector<2x128xf32>
    %391 = arith.mulf %387, %390 : vector<2x128xf32>
    %cst_147 = arith.constant dense<0.000000e+00> : vector<2x512xf32>
    %392 = tpu.matmul %391, %13, %cst_147 {dimension_numbers = #tpu.dot_dimension_numbers<[1], [0], [0], [1], [0, 0, 1, 1], [], []>} : vector<2x128xf32>, vector<128x512xf32>, vector<2x512xf32> -> vector<2x512xf32>
    %393 = tpu.concatenate %299, %303 in 1 : vector<2x16xf32>, vector<2x16xf32> -> vector<2x32xf32>
    %cst_148 = arith.constant dense<0.000000e+00> : vector<2x512xf32>
    %394 = tpu.matmul %393, %14, %cst_148 {dimension_numbers = #tpu.dot_dimension_numbers<[1], [0], [0], [1], [0, 0, 1, 1], [], []>} : vector<2x32xf32>, vector<32x512xf32>, vector<2x512xf32> -> vector<2x512xf32>
    %395 = arith.addf %392, %394 : vector<2x512xf32>
    %396 = arith.addf %395, %4 : vector<2x512xf32>
    %397 = math.tanh %396 : vector<2x512xf32>
    %cst_149 = arith.constant dense<0.000000e+00> : vector<2x16xf32>
    %398 = tpu.matmul %397, %15, %cst_149 {dimension_numbers = #tpu.dot_dimension_numbers<[1], [0], [0], [1], [0, 0, 1, 1], [], []>} : vector<2x512xf32>, vector<512x16xf32>, vector<2x16xf32> -> vector<2x16xf32>
    %cst_150 = arith.constant dense<0xFF800000> : vector<2xf32>
    %399 = vector.multi_reduction <maximumf>, %398, %cst_150 [1] : vector<2x16xf32> to vector<2xf32>
    %400 = vector.shape_cast %399 : vector<2xf32> to vector<2x1xf32>
    %401 = vector.broadcast %400 : vector<2x1xf32> to vector<2x16xf32>
    %402 = arith.subf %398, %401 : vector<2x16xf32>
    %403 = math.exp %402 : vector<2x16xf32>
    %cst_151 = arith.constant dense<0.000000e+00> : vector<2xf32>
    %404 = vector.multi_reduction <add>, %403, %cst_151 [1] : vector<2x16xf32> to vector<2xf32>
    %405 = vector.shape_cast %404 : vector<2xf32> to vector<2x1xf32>
    %406 = tpu.reciprocal %405 {approx = true} : vector<2x1xf32> -> vector<2x1xf32>
    %407 = vector.broadcast %406 : vector<2x1xf32> to vector<2x16xf32>
    %408 = arith.mulf %403, %407 : vector<2x16xf32>
    %409 = vector.shape_cast %408 : vector<2x16xf32> to vector<2x1x16xf32>
    "tpu.trace_start"() <{level = 10 : i32, message = "bqt,bte->bqe"}> : () -> ()
    %cst_152 = arith.constant dense<0.000000e+00> : vector<2x1x64xf32>
    %410 = tpu.matmul %409, %3, %cst_152 {dimension_numbers = #tpu.dot_dimension_numbers<[2], [1], [1], [2], [0, 0, 0, 1, 1, 2], [0], [0]>} : vector<2x1x16xf32>, vector<2x16x64xf32>, vector<2x1x64xf32> -> vector<2x1x64xf32>
    "tpu.trace_stop"() : () -> ()
    %411 = vector.shape_cast %410 : vector<2x1x64xf32> to vector<2x64xf32>
    %412 = arith.addf %303, %408 : vector<2x16xf32>
    %cst_153 = arith.constant dense<0.000000e+00> : vector<2x512xf32>
    %413 = tpu.matmul %355, %9, %cst_153 {dimension_numbers = #tpu.dot_dimension_numbers<[1], [0], [0], [1], [0, 0, 1, 1], [], []>} : vector<2x32xf32>, vector<32x512xf32>, vector<2x512xf32> -> vector<2x512xf32>
    %cst_154 = arith.constant dense<0.000000e+00> : vector<2x512xf32>
    %414 = tpu.matmul %411, %10, %cst_154 {dimension_numbers = #tpu.dot_dimension_numbers<[1], [0], [0], [1], [0, 0, 1, 1], [], []>} : vector<2x64xf32>, vector<64x512xf32>, vector<2x512xf32> -> vector<2x512xf32>
    %415 = arith.addf %413, %414 : vector<2x512xf32>
    %cst_155 = arith.constant dense<0.000000e+00> : vector<2x512xf32>
    %416 = tpu.matmul %339, %11, %cst_155 {dimension_numbers = #tpu.dot_dimension_numbers<[1], [0], [0], [1], [0, 0, 1, 1], [], []>} : vector<2x128xf32>, vector<128x512xf32>, vector<2x512xf32> -> vector<2x512xf32>
    %417 = arith.addf %415, %416 : vector<2x512xf32>
    %418 = vector.broadcast %12 : vector<1x512xf32> to vector<2x512xf32>
    %419 = arith.addf %417, %418 : vector<2x512xf32>
    %420 = vector.extract_strided_slice %419 {offsets = [0, 0], sizes = [2, 128], strides = [1, 1]} : vector<2x512xf32> to vector<2x128xf32>
    %421 = arith.negf %420 : vector<2x128xf32>
    %422 = math.exp %421 : vector<2x128xf32>
    %cst_156 = arith.constant 1.000000e+00 : f32
    %423 = vector.broadcast %cst_156 : f32 to vector<2x128xf32>
    %424 = arith.addf %423, %422 : vector<2x128xf32>
    %425 = arith.divf %423, %424 : vector<2x128xf32>
    %426 = vector.extract_strided_slice %419 {offsets = [0, 128], sizes = [2, 128], strides = [1, 1]} : vector<2x512xf32> to vector<2x128xf32>
    %427 = arith.negf %426 : vector<2x128xf32>
    %428 = math.exp %427 : vector<2x128xf32>
    %cst_157 = arith.constant 1.000000e+00 : f32
    %429 = vector.broadcast %cst_157 : f32 to vector<2x128xf32>
    %430 = arith.addf %429, %428 : vector<2x128xf32>
    %431 = arith.divf %429, %430 : vector<2x128xf32>
    %432 = vector.extract_strided_slice %419 {offsets = [0, 256], sizes = [2, 128], strides = [1, 1]} : vector<2x512xf32> to vector<2x128xf32>
    %433 = math.tanh %432 : vector<2x128xf32>
    %434 = vector.extract_strided_slice %419 {offsets = [0, 384], sizes = [2, 128], strides = [1, 1]} : vector<2x512xf32> to vector<2x128xf32>
    %435 = arith.negf %434 : vector<2x128xf32>
    %436 = math.exp %435 : vector<2x128xf32>
    %cst_158 = arith.constant 1.000000e+00 : f32
    %437 = vector.broadcast %cst_158 : f32 to vector<2x128xf32>
    %438 = arith.addf %437, %436 : vector<2x128xf32>
    %439 = arith.divf %437, %438 : vector<2x128xf32>
    %440 = arith.mulf %431, %333 : vector<2x128xf32>
    %441 = arith.mulf %425, %433 : vector<2x128xf32>
    %442 = arith.addf %440, %441 : vector<2x128xf32>
    %443 = math.tanh %442 : vector<2x128xf32>
    %444 = arith.mulf %439, %443 : vector<2x128xf32>
    %445 = arith.index_cast %c3_i32 : i32 to index
    %c0_159 = arith.constant 0 : index
    %c0_160 = arith.constant 0 : index
    %446 = vector.load %arg19[%445, %c0_159, %c0_160] : memref<8x2x128xf32, #tpu.memory_space<vmem>>, vector<1x2x128xf32>
    %447 = vector.shape_cast %446 : vector<1x2x128xf32> to vector<2x128xf32>
    %448 = arith.mulf %444, %447 : vector<2x128xf32>
    %cst_161 = arith.constant dense<0.000000e+00> : vector<2x32xf32>
    %449 = tpu.matmul %448, %16, %cst_161 {dimension_numbers = #tpu.dot_dimension_numbers<[1], [0], [0], [1], [0, 0, 1, 1], [], []>} : vector<2x128xf32>, vector<128x32xf32>, vector<2x32xf32> -> vector<2x32xf32>
    %cst_162 = arith.constant dense<0.000000e+00> : vector<2x32xf32>
    %450 = tpu.matmul %411, %17, %cst_162 {dimension_numbers = #tpu.dot_dimension_numbers<[1], [0], [0], [1], [0, 0, 1, 1], [], []>} : vector<2x64xf32>, vector<64x32xf32>, vector<2x32xf32> -> vector<2x32xf32>
    %451 = arith.addf %449, %450 : vector<2x32xf32>
    %452 = vector.broadcast %18 : vector<1x32xf32> to vector<2x32xf32>
    %453 = arith.addf %451, %452 : vector<2x32xf32>
    %454 = arith.index_cast %c3_i32 : i32 to index
    %c0_163 = arith.constant 0 : index
    %c0_164 = arith.constant 0 : index
    %455 = vector.load %arg20[%454, %c0_163, %c0_164] : memref<8x2x32xf32, #tpu.memory_space<vmem>>, vector<1x2x32xf32>
    %456 = vector.shape_cast %455 : vector<1x2x32xf32> to vector<2x32xf32>
    %457 = vector.shape_cast %453 : vector<2x32xf32> to vector<1x2x32xf32>
    tpu.vector_store %arg20[%454, %c0_163, %c0_164], %457 {strides = array<i32>} : memref<8x2x32xf32, #tpu.memory_space<vmem>>, vector<1x2x32xf32>,
    %458 = arith.index_cast %c3_i32 : i32 to index
    %c0_165 = arith.constant 0 : index
    %c0_166 = arith.constant 0 : index
    %459 = vector.load %arg21[%458, %c0_165, %c0_166] : memref<8x2x16xf32, #tpu.memory_space<vmem>>, vector<1x2x16xf32>
    %460 = vector.shape_cast %459 : vector<1x2x16xf32> to vector<2x16xf32>
    %461 = vector.shape_cast %408 : vector<2x16xf32> to vector<1x2x16xf32>
    tpu.vector_store %arg21[%458, %c0_165, %c0_166], %461 {strides = array<i32>} : memref<8x2x16xf32, #tpu.memory_space<vmem>>, vector<1x2x16xf32>,
    %c4_i32 = arith.constant 4 : i32
    %462 = arith.index_cast %c4_i32 : i32 to index
    %c0_167 = arith.constant 0 : index
    %c0_168 = arith.constant 0 : index
    %463 = vector.load %arg1[%462, %c0_167, %c0_168] : memref<8x2x32xf32, #tpu.memory_space<vmem>>, vector<1x2x32xf32>
    %464 = vector.shape_cast %463 : vector<1x2x32xf32> to vector<2x32xf32>
    %cst_169 = arith.constant dense<0.000000e+00> : vector<2x512xf32>
    %465 = tpu.matmul %464, %5, %cst_169 {dimension_numbers = #tpu.dot_dimension_numbers<[1], [0], [0], [1], [0, 0, 1, 1], [], []>} : vector<2x32xf32>, vector<32x512xf32>, vector<2x512xf32> -> vector<2x512xf32>
    %cst_170 = arith.constant dense<0.000000e+00> : vector<2x512xf32>
    %466 = tpu.matmul %411, %6, %cst_170 {dimension_numbers = #tpu.dot_dimension_numbers<[1], [0], [0], [1], [0, 0, 1, 1], [], []>} : vector<2x64xf32>, vector<64x512xf32>, vector<2x512xf32> -> vector<2x512xf32>
    %467 = arith.addf %465, %466 : vector<2x512xf32>
    %cst_171 = arith.constant dense<0.000000e+00> : vector<2x512xf32>
    %468 = tpu.matmul %391, %7, %cst_171 {dimension_numbers = #tpu.dot_dimension_numbers<[1], [0], [0], [1], [0, 0, 1, 1], [], []>} : vector<2x128xf32>, vector<128x512xf32>, vector<2x512xf32> -> vector<2x512xf32>
    %469 = arith.addf %467, %468 : vector<2x512xf32>
    %470 = vector.broadcast %8 : vector<1x512xf32> to vector<2x512xf32>
    %471 = arith.addf %469, %470 : vector<2x512xf32>
    %472 = vector.extract_strided_slice %471 {offsets = [0, 0], sizes = [2, 128], strides = [1, 1]} : vector<2x512xf32> to vector<2x128xf32>
    %473 = arith.negf %472 : vector<2x128xf32>
    %474 = math.exp %473 : vector<2x128xf32>
    %cst_172 = arith.constant 1.000000e+00 : f32
    %475 = vector.broadcast %cst_172 : f32 to vector<2x128xf32>
    %476 = arith.addf %475, %474 : vector<2x128xf32>
    %477 = arith.divf %475, %476 : vector<2x128xf32>
    %478 = vector.extract_strided_slice %471 {offsets = [0, 128], sizes = [2, 128], strides = [1, 1]} : vector<2x512xf32> to vector<2x128xf32>
    %479 = arith.negf %478 : vector<2x128xf32>
    %480 = math.exp %479 : vector<2x128xf32>
    %cst_173 = arith.constant 1.000000e+00 : f32
    %481 = vector.broadcast %cst_173 : f32 to vector<2x128xf32>
    %482 = arith.addf %481, %480 : vector<2x128xf32>
    %483 = arith.divf %481, %482 : vector<2x128xf32>
    %484 = vector.extract_strided_slice %471 {offsets = [0, 256], sizes = [2, 128], strides = [1, 1]} : vector<2x512xf32> to vector<2x128xf32>
    %485 = math.tanh %484 : vector<2x128xf32>
    %486 = vector.extract_strided_slice %471 {offsets = [0, 384], sizes = [2, 128], strides = [1, 1]} : vector<2x512xf32> to vector<2x128xf32>
    %487 = arith.negf %486 : vector<2x128xf32>
    %488 = math.exp %487 : vector<2x128xf32>
    %cst_174 = arith.constant 1.000000e+00 : f32
    %489 = vector.broadcast %cst_174 : f32 to vector<2x128xf32>
    %490 = arith.addf %489, %488 : vector<2x128xf32>
    %491 = arith.divf %489, %490 : vector<2x128xf32>
    %492 = arith.mulf %483, %385 : vector<2x128xf32>
    %493 = arith.mulf %477, %485 : vector<2x128xf32>
    %494 = arith.addf %492, %493 : vector<2x128xf32>
    %495 = math.tanh %494 : vector<2x128xf32>
    %496 = arith.mulf %491, %495 : vector<2x128xf32>
    %497 = arith.index_cast %c4_i32 : i32 to index
    %c0_175 = arith.constant 0 : index
    %c0_176 = arith.constant 0 : index
    %498 = vector.load %arg18[%497, %c0_175, %c0_176] : memref<8x2x128xf32, #tpu.memory_space<vmem>>, vector<1x2x128xf32>
    %499 = vector.shape_cast %498 : vector<1x2x128xf32> to vector<2x128xf32>
    %500 = arith.mulf %496, %499 : vector<2x128xf32>
    %cst_177 = arith.constant dense<0.000000e+00> : vector<2x512xf32>
    %501 = tpu.matmul %500, %13, %cst_177 {dimension_numbers = #tpu.dot_dimension_numbers<[1], [0], [0], [1], [0, 0, 1, 1], [], []>} : vector<2x128xf32>, vector<128x512xf32>, vector<2x512xf32> -> vector<2x512xf32>
    %502 = tpu.concatenate %408, %412 in 1 : vector<2x16xf32>, vector<2x16xf32> -> vector<2x32xf32>
    %cst_178 = arith.constant dense<0.000000e+00> : vector<2x512xf32>
    %503 = tpu.matmul %502, %14, %cst_178 {dimension_numbers = #tpu.dot_dimension_numbers<[1], [0], [0], [1], [0, 0, 1, 1], [], []>} : vector<2x32xf32>, vector<32x512xf32>, vector<2x512xf32> -> vector<2x512xf32>
    %504 = arith.addf %501, %503 : vector<2x512xf32>
    %505 = arith.addf %504, %4 : vector<2x512xf32>
    %506 = math.tanh %505 : vector<2x512xf32>
    %cst_179 = arith.constant dense<0.000000e+00> : vector<2x16xf32>
    %507 = tpu.matmul %506, %15, %cst_179 {dimension_numbers = #tpu.dot_dimension_numbers<[1], [0], [0], [1], [0, 0, 1, 1], [], []>} : vector<2x512xf32>, vector<512x16xf32>, vector<2x16xf32> -> vector<2x16xf32>
    %cst_180 = arith.constant dense<0xFF800000> : vector<2xf32>
    %508 = vector.multi_reduction <maximumf>, %507, %cst_180 [1] : vector<2x16xf32> to vector<2xf32>
    %509 = vector.shape_cast %508 : vector<2xf32> to vector<2x1xf32>
    %510 = vector.broadcast %509 : vector<2x1xf32> to vector<2x16xf32>
    %511 = arith.subf %507, %510 : vector<2x16xf32>
    %512 = math.exp %511 : vector<2x16xf32>
    %cst_181 = arith.constant dense<0.000000e+00> : vector<2xf32>
    %513 = vector.multi_reduction <add>, %512, %cst_181 [1] : vector<2x16xf32> to vector<2xf32>
    %514 = vector.shape_cast %513 : vector<2xf32> to vector<2x1xf32>
    %515 = tpu.reciprocal %514 {approx = true} : vector<2x1xf32> -> vector<2x1xf32>
    %516 = vector.broadcast %515 : vector<2x1xf32> to vector<2x16xf32>
    %517 = arith.mulf %512, %516 : vector<2x16xf32>
    %518 = vector.shape_cast %517 : vector<2x16xf32> to vector<2x1x16xf32>
    "tpu.trace_start"() <{level = 10 : i32, message = "bqt,bte->bqe"}> : () -> ()
    %cst_182 = arith.constant dense<0.000000e+00> : vector<2x1x64xf32>
    %519 = tpu.matmul %518, %3, %cst_182 {dimension_numbers = #tpu.dot_dimension_numbers<[2], [1], [1], [2], [0, 0, 0, 1, 1, 2], [0], [0]>} : vector<2x1x16xf32>, vector<2x16x64xf32>, vector<2x1x64xf32> -> vector<2x1x64xf32>
    "tpu.trace_stop"() : () -> ()
    %520 = vector.shape_cast %519 : vector<2x1x64xf32> to vector<2x64xf32>
    %521 = arith.addf %412, %517 : vector<2x16xf32>
    %cst_183 = arith.constant dense<0.000000e+00> : vector<2x512xf32>
    %522 = tpu.matmul %464, %9, %cst_183 {dimension_numbers = #tpu.dot_dimension_numbers<[1], [0], [0], [1], [0, 0, 1, 1], [], []>} : vector<2x32xf32>, vector<32x512xf32>, vector<2x512xf32> -> vector<2x512xf32>
    %cst_184 = arith.constant dense<0.000000e+00> : vector<2x512xf32>
    %523 = tpu.matmul %520, %10, %cst_184 {dimension_numbers = #tpu.dot_dimension_numbers<[1], [0], [0], [1], [0, 0, 1, 1], [], []>} : vector<2x64xf32>, vector<64x512xf32>, vector<2x512xf32> -> vector<2x512xf32>
    %524 = arith.addf %522, %523 : vector<2x512xf32>
    %cst_185 = arith.constant dense<0.000000e+00> : vector<2x512xf32>
    %525 = tpu.matmul %448, %11, %cst_185 {dimension_numbers = #tpu.dot_dimension_numbers<[1], [0], [0], [1], [0, 0, 1, 1], [], []>} : vector<2x128xf32>, vector<128x512xf32>, vector<2x512xf32> -> vector<2x512xf32>
    %526 = arith.addf %524, %525 : vector<2x512xf32>
    %527 = vector.broadcast %12 : vector<1x512xf32> to vector<2x512xf32>
    %528 = arith.addf %526, %527 : vector<2x512xf32>
    %529 = vector.extract_strided_slice %528 {offsets = [0, 0], sizes = [2, 128], strides = [1, 1]} : vector<2x512xf32> to vector<2x128xf32>
    %530 = arith.negf %529 : vector<2x128xf32>
    %531 = math.exp %530 : vector<2x128xf32>
    %cst_186 = arith.constant 1.000000e+00 : f32
    %532 = vector.broadcast %cst_186 : f32 to vector<2x128xf32>
    %533 = arith.addf %532, %531 : vector<2x128xf32>
    %534 = arith.divf %532, %533 : vector<2x128xf32>
    %535 = vector.extract_strided_slice %528 {offsets = [0, 128], sizes = [2, 128], strides = [1, 1]} : vector<2x512xf32> to vector<2x128xf32>
    %536 = arith.negf %535 : vector<2x128xf32>
    %537 = math.exp %536 : vector<2x128xf32>
    %cst_187 = arith.constant 1.000000e+00 : f32
    %538 = vector.broadcast %cst_187 : f32 to vector<2x128xf32>
    %539 = arith.addf %538, %537 : vector<2x128xf32>
    %540 = arith.divf %538, %539 : vector<2x128xf32>
    %541 = vector.extract_strided_slice %528 {offsets = [0, 256], sizes = [2, 128], strides = [1, 1]} : vector<2x512xf32> to vector<2x128xf32>
    %542 = math.tanh %541 : vector<2x128xf32>
    %543 = vector.extract_strided_slice %528 {offsets = [0, 384], sizes = [2, 128], strides = [1, 1]} : vector<2x512xf32> to vector<2x128xf32>
    %544 = arith.negf %543 : vector<2x128xf32>
    %545 = math.exp %544 : vector<2x128xf32>
    %cst_188 = arith.constant 1.000000e+00 : f32
    %546 = vector.broadcast %cst_188 : f32 to vector<2x128xf32>
    %547 = arith.addf %546, %545 : vector<2x128xf32>
    %548 = arith.divf %546, %547 : vector<2x128xf32>
    %549 = arith.mulf %540, %442 : vector<2x128xf32>
    %550 = arith.mulf %534, %542 : vector<2x128xf32>
    %551 = arith.addf %549, %550 : vector<2x128xf32>
    %552 = math.tanh %551 : vector<2x128xf32>
    %553 = arith.mulf %548, %552 : vector<2x128xf32>
    %554 = arith.index_cast %c4_i32 : i32 to index
    %c0_189 = arith.constant 0 : index
    %c0_190 = arith.constant 0 : index
    %555 = vector.load %arg19[%554, %c0_189, %c0_190] : memref<8x2x128xf32, #tpu.memory_space<vmem>>, vector<1x2x128xf32>
    %556 = vector.shape_cast %555 : vector<1x2x128xf32> to vector<2x128xf32>
    %557 = arith.mulf %553, %556 : vector<2x128xf32>
    %cst_191 = arith.constant dense<0.000000e+00> : vector<2x32xf32>
    %558 = tpu.matmul %557, %16, %cst_191 {dimension_numbers = #tpu.dot_dimension_numbers<[1], [0], [0], [1], [0, 0, 1, 1], [], []>} : vector<2x128xf32>, vector<128x32xf32>, vector<2x32xf32> -> vector<2x32xf32>
    %cst_192 = arith.constant dense<0.000000e+00> : vector<2x32xf32>
    %559 = tpu.matmul %520, %17, %cst_192 {dimension_numbers = #tpu.dot_dimension_numbers<[1], [0], [0], [1], [0, 0, 1, 1], [], []>} : vector<2x64xf32>, vector<64x32xf32>, vector<2x32xf32> -> vector<2x32xf32>
    %560 = arith.addf %558, %559 : vector<2x32xf32>
    %561 = vector.broadcast %18 : vector<1x32xf32> to vector<2x32xf32>
    %562 = arith.addf %560, %561 : vector<2x32xf32>
    %563 = arith.index_cast %c4_i32 : i32 to index
    %c0_193 = arith.constant 0 : index
    %c0_194 = arith.constant 0 : index
    %564 = vector.load %arg20[%563, %c0_193, %c0_194] : memref<8x2x32xf32, #tpu.memory_space<vmem>>, vector<1x2x32xf32>
    %565 = vector.shape_cast %564 : vector<1x2x32xf32> to vector<2x32xf32>
    %566 = vector.shape_cast %562 : vector<2x32xf32> to vector<1x2x32xf32>
    tpu.vector_store %arg20[%563, %c0_193, %c0_194], %566 {strides = array<i32>} : memref<8x2x32xf32, #tpu.memory_space<vmem>>, vector<1x2x32xf32>,
    %567 = arith.index_cast %c4_i32 : i32 to index
    %c0_195 = arith.constant 0 : index
    %c0_196 = arith.constant 0 : index
    %568 = vector.load %arg21[%567, %c0_195, %c0_196] : memref<8x2x16xf32, #tpu.memory_space<vmem>>, vector<1x2x16xf32>
    %569 = vector.shape_cast %568 : vector<1x2x16xf32> to vector<2x16xf32>
    %570 = vector.shape_cast %517 : vector<2x16xf32> to vector<1x2x16xf32>
    tpu.vector_store %arg21[%567, %c0_195, %c0_196], %570 {strides = array<i32>} : memref<8x2x16xf32, #tpu.memory_space<vmem>>, vector<1x2x16xf32>,
    %c5_i32 = arith.constant 5 : i32
    %571 = arith.index_cast %c5_i32 : i32 to index
    %c0_197 = arith.constant 0 : index
    %c0_198 = arith.constant 0 : index
    %572 = vector.load %arg1[%571, %c0_197, %c0_198] : memref<8x2x32xf32, #tpu.memory_space<vmem>>, vector<1x2x32xf32>
    %573 = vector.shape_cast %572 : vector<1x2x32xf32> to vector<2x32xf32>
    %cst_199 = arith.constant dense<0.000000e+00> : vector<2x512xf32>
    %574 = tpu.matmul %573, %5, %cst_199 {dimension_numbers = #tpu.dot_dimension_numbers<[1], [0], [0], [1], [0, 0, 1, 1], [], []>} : vector<2x32xf32>, vector<32x512xf32>, vector<2x512xf32> -> vector<2x512xf32>
    %cst_200 = arith.constant dense<0.000000e+00> : vector<2x512xf32>
    %575 = tpu.matmul %520, %6, %cst_200 {dimension_numbers = #tpu.dot_dimension_numbers<[1], [0], [0], [1], [0, 0, 1, 1], [], []>} : vector<2x64xf32>, vector<64x512xf32>, vector<2x512xf32> -> vector<2x512xf32>
    %576 = arith.addf %574, %575 : vector<2x512xf32>
    %cst_201 = arith.constant dense<0.000000e+00> : vector<2x512xf32>
    %577 = tpu.matmul %500, %7, %cst_201 {dimension_numbers = #tpu.dot_dimension_numbers<[1], [0], [0], [1], [0, 0, 1, 1], [], []>} : vector<2x128xf32>, vector<128x512xf32>, vector<2x512xf32> -> vector<2x512xf32>
    %578 = arith.addf %576, %577 : vector<2x512xf32>
    %579 = vector.broadcast %8 : vector<1x512xf32> to vector<2x512xf32>
    %580 = arith.addf %578, %579 : vector<2x512xf32>
    %581 = vector.extract_strided_slice %580 {offsets = [0, 0], sizes = [2, 128], strides = [1, 1]} : vector<2x512xf32> to vector<2x128xf32>
    %582 = arith.negf %581 : vector<2x128xf32>
    %583 = math.exp %582 : vector<2x128xf32>
    %cst_202 = arith.constant 1.000000e+00 : f32
    %584 = vector.broadcast %cst_202 : f32 to vector<2x128xf32>
    %585 = arith.addf %584, %583 : vector<2x128xf32>
    %586 = arith.divf %584, %585 : vector<2x128xf32>
    %587 = vector.extract_strided_slice %580 {offsets = [0, 128], sizes = [2, 128], strides = [1, 1]} : vector<2x512xf32> to vector<2x128xf32>
    %588 = arith.negf %587 : vector<2x128xf32>
    %589 = math.exp %588 : vector<2x128xf32>
    %cst_203 = arith.constant 1.000000e+00 : f32
    %590 = vector.broadcast %cst_203 : f32 to vector<2x128xf32>
    %591 = arith.addf %590, %589 : vector<2x128xf32>
    %592 = arith.divf %590, %591 : vector<2x128xf32>
    %593 = vector.extract_strided_slice %580 {offsets = [0, 256], sizes = [2, 128], strides = [1, 1]} : vector<2x512xf32> to vector<2x128xf32>
    %594 = math.tanh %593 : vector<2x128xf32>
    %595 = vector.extract_strided_slice %580 {offsets = [0, 384], sizes = [2, 128], strides = [1, 1]} : vector<2x512xf32> to vector<2x128xf32>
    %596 = arith.negf %595 : vector<2x128xf32>
    %597 = math.exp %596 : vector<2x128xf32>
    %cst_204 = arith.constant 1.000000e+00 : f32
    %598 = vector.broadcast %cst_204 : f32 to vector<2x128xf32>
    %599 = arith.addf %598, %597 : vector<2x128xf32>
    %600 = arith.divf %598, %599 : vector<2x128xf32>
    %601 = arith.mulf %592, %494 : vector<2x128xf32>
    %602 = arith.mulf %586, %594 : vector<2x128xf32>
    %603 = arith.addf %601, %602 : vector<2x128xf32>
    %604 = math.tanh %603 : vector<2x128xf32>
    %605 = arith.mulf %600, %604 : vector<2x128xf32>
    %606 = arith.index_cast %c5_i32 : i32 to index
    %c0_205 = arith.constant 0 : index
    %c0_206 = arith.constant 0 : index
    %607 = vector.load %arg18[%606, %c0_205, %c0_206] : memref<8x2x128xf32, #tpu.memory_space<vmem>>, vector<1x2x128xf32>
    %608 = vector.shape_cast %607 : vector<1x2x128xf32> to vector<2x128xf32>
    %609 = arith.mulf %605, %608 : vector<2x128xf32>
    %cst_207 = arith.constant dense<0.000000e+00> : vector<2x512xf32>
    %610 = tpu.matmul %609, %13, %cst_207 {dimension_numbers = #tpu.dot_dimension_numbers<[1], [0], [0], [1], [0, 0, 1, 1], [], []>} : vector<2x128xf32>, vector<128x512xf32>, vector<2x512xf32> -> vector<2x512xf32>
    %611 = tpu.concatenate %517, %521 in 1 : vector<2x16xf32>, vector<2x16xf32> -> vector<2x32xf32>
    %cst_208 = arith.constant dense<0.000000e+00> : vector<2x512xf32>
    %612 = tpu.matmul %611, %14, %cst_208 {dimension_numbers = #tpu.dot_dimension_numbers<[1], [0], [0], [1], [0, 0, 1, 1], [], []>} : vector<2x32xf32>, vector<32x512xf32>, vector<2x512xf32> -> vector<2x512xf32>
    %613 = arith.addf %610, %612 : vector<2x512xf32>
    %614 = arith.addf %613, %4 : vector<2x512xf32>
    %615 = math.tanh %614 : vector<2x512xf32>
    %cst_209 = arith.constant dense<0.000000e+00> : vector<2x16xf32>
    %616 = tpu.matmul %615, %15, %cst_209 {dimension_numbers = #tpu.dot_dimension_numbers<[1], [0], [0], [1], [0, 0, 1, 1], [], []>} : vector<2x512xf32>, vector<512x16xf32>, vector<2x16xf32> -> vector<2x16xf32>
    %cst_210 = arith.constant dense<0xFF800000> : vector<2xf32>
    %617 = vector.multi_reduction <maximumf>, %616, %cst_210 [1] : vector<2x16xf32> to vector<2xf32>
    %618 = vector.shape_cast %617 : vector<2xf32> to vector<2x1xf32>
    %619 = vector.broadcast %618 : vector<2x1xf32> to vector<2x16xf32>
    %620 = arith.subf %616, %619 : vector<2x16xf32>
    %621 = math.exp %620 : vector<2x16xf32>
    %cst_211 = arith.constant dense<0.000000e+00> : vector<2xf32>
    %622 = vector.multi_reduction <add>, %621, %cst_211 [1] : vector<2x16xf32> to vector<2xf32>
    %623 = vector.shape_cast %622 : vector<2xf32> to vector<2x1xf32>
    %624 = tpu.reciprocal %623 {approx = true} : vector<2x1xf32> -> vector<2x1xf32>
    %625 = vector.broadcast %624 : vector<2x1xf32> to vector<2x16xf32>
    %626 = arith.mulf %621, %625 : vector<2x16xf32>
    %627 = vector.shape_cast %626 : vector<2x16xf32> to vector<2x1x16xf32>
    "tpu.trace_start"() <{level = 10 : i32, message = "bqt,bte->bqe"}> : () -> ()
    %cst_212 = arith.constant dense<0.000000e+00> : vector<2x1x64xf32>
    %628 = tpu.matmul %627, %3, %cst_212 {dimension_numbers = #tpu.dot_dimension_numbers<[2], [1], [1], [2], [0, 0, 0, 1, 1, 2], [0], [0]>} : vector<2x1x16xf32>, vector<2x16x64xf32>, vector<2x1x64xf32> -> vector<2x1x64xf32>
    "tpu.trace_stop"() : () -> ()
    %629 = vector.shape_cast %628 : vector<2x1x64xf32> to vector<2x64xf32>
    %630 = arith.addf %521, %626 : vector<2x16xf32>
    %cst_213 = arith.constant dense<0.000000e+00> : vector<2x512xf32>
    %631 = tpu.matmul %573, %9, %cst_213 {dimension_numbers = #tpu.dot_dimension_numbers<[1], [0], [0], [1], [0, 0, 1, 1], [], []>} : vector<2x32xf32>, vector<32x512xf32>, vector<2x512xf32> -> vector<2x512xf32>
    %cst_214 = arith.constant dense<0.000000e+00> : vector<2x512xf32>
    %632 = tpu.matmul %629, %10, %cst_214 {dimension_numbers = #tpu.dot_dimension_numbers<[1], [0], [0], [1], [0, 0, 1, 1], [], []>} : vector<2x64xf32>, vector<64x512xf32>, vector<2x512xf32> -> vector<2x512xf32>
    %633 = arith.addf %631, %632 : vector<2x512xf32>
    %cst_215 = arith.constant dense<0.000000e+00> : vector<2x512xf32>
    %634 = tpu.matmul %557, %11, %cst_215 {dimension_numbers = #tpu.dot_dimension_numbers<[1], [0], [0], [1], [0, 0, 1, 1], [], []>} : vector<2x128xf32>, vector<128x512xf32>, vector<2x512xf32> -> vector<2x512xf32>
    %635 = arith.addf %633, %634 : vector<2x512xf32>
    %636 = vector.broadcast %12 : vector<1x512xf32> to vector<2x512xf32>
    %637 = arith.addf %635, %636 : vector<2x512xf32>
    %638 = vector.extract_strided_slice %637 {offsets = [0, 0], sizes = [2, 128], strides = [1, 1]} : vector<2x512xf32> to vector<2x128xf32>
    %639 = arith.negf %638 : vector<2x128xf32>
    %640 = math.exp %639 : vector<2x128xf32>
    %cst_216 = arith.constant 1.000000e+00 : f32
    %641 = vector.broadcast %cst_216 : f32 to vector<2x128xf32>
    %642 = arith.addf %641, %640 : vector<2x128xf32>
    %643 = arith.divf %641, %642 : vector<2x128xf32>
    %644 = vector.extract_strided_slice %637 {offsets = [0, 128], sizes = [2, 128], strides = [1, 1]} : vector<2x512xf32> to vector<2x128xf32>
    %645 = arith.negf %644 : vector<2x128xf32>
    %646 = math.exp %645 : vector<2x128xf32>
    %cst_217 = arith.constant 1.000000e+00 : f32
    %647 = vector.broadcast %cst_217 : f32 to vector<2x128xf32>
    %648 = arith.addf %647, %646 : vector<2x128xf32>
    %649 = arith.divf %647, %648 : vector<2x128xf32>
    %650 = vector.extract_strided_slice %637 {offsets = [0, 256], sizes = [2, 128], strides = [1, 1]} : vector<2x512xf32> to vector<2x128xf32>
    %651 = math.tanh %650 : vector<2x128xf32>
    %652 = vector.extract_strided_slice %637 {offsets = [0, 384], sizes = [2, 128], strides = [1, 1]} : vector<2x512xf32> to vector<2x128xf32>
    %653 = arith.negf %652 : vector<2x128xf32>
    %654 = math.exp %653 : vector<2x128xf32>
    %cst_218 = arith.constant 1.000000e+00 : f32
    %655 = vector.broadcast %cst_218 : f32 to vector<2x128xf32>
    %656 = arith.addf %655, %654 : vector<2x128xf32>
    %657 = arith.divf %655, %656 : vector<2x128xf32>
    %658 = arith.mulf %649, %551 : vector<2x128xf32>
    %659 = arith.mulf %643, %651 : vector<2x128xf32>
    %660 = arith.addf %658, %659 : vector<2x128xf32>
    %661 = math.tanh %660 : vector<2x128xf32>
    %662 = arith.mulf %657, %661 : vector<2x128xf32>
    %663 = arith.index_cast %c5_i32 : i32 to index
    %c0_219 = arith.constant 0 : index
    %c0_220 = arith.constant 0 : index
    %664 = vector.load %arg19[%663, %c0_219, %c0_220] : memref<8x2x128xf32, #tpu.memory_space<vmem>>, vector<1x2x128xf32>
    %665 = vector.shape_cast %664 : vector<1x2x128xf32> to vector<2x128xf32>
    %666 = arith.mulf %662, %665 : vector<2x128xf32>
    %cst_221 = arith.constant dense<0.000000e+00> : vector<2x32xf32>
    %667 = tpu.matmul %666, %16, %cst_221 {dimension_numbers = #tpu.dot_dimension_numbers<[1], [0], [0], [1], [0, 0, 1, 1], [], []>} : vector<2x128xf32>, vector<128x32xf32>, vector<2x32xf32> -> vector<2x32xf32>
    %cst_222 = arith.constant dense<0.000000e+00> : vector<2x32xf32>
    %668 = tpu.matmul %629, %17, %cst_222 {dimension_numbers = #tpu.dot_dimension_numbers<[1], [0], [0], [1], [0, 0, 1, 1], [], []>} : vector<2x64xf32>, vector<64x32xf32>, vector<2x32xf32> -> vector<2x32xf32>
    %669 = arith.addf %667, %668 : vector<2x32xf32>
    %670 = vector.broadcast %18 : vector<1x32xf32> to vector<2x32xf32>
    %671 = arith.addf %669, %670 : vector<2x32xf32>
    %672 = arith.index_cast %c5_i32 : i32 to index
    %c0_223 = arith.constant 0 : index
    %c0_224 = arith.constant 0 : index
    %673 = vector.load %arg20[%672, %c0_223, %c0_224] : memref<8x2x32xf32, #tpu.memory_space<vmem>>, vector<1x2x32xf32>
    %674 = vector.shape_cast %673 : vector<1x2x32xf32> to vector<2x32xf32>
    %675 = vector.shape_cast %671 : vector<2x32xf32> to vector<1x2x32xf32>
    tpu.vector_store %arg20[%672, %c0_223, %c0_224], %675 {strides = array<i32>} : memref<8x2x32xf32, #tpu.memory_space<vmem>>, vector<1x2x32xf32>,
    %676 = arith.index_cast %c5_i32 : i32 to index
    %c0_225 = arith.constant 0 : index
    %c0_226 = arith.constant 0 : index
    %677 = vector.load %arg21[%676, %c0_225, %c0_226] : memref<8x2x16xf32, #tpu.memory_space<vmem>>, vector<1x2x16xf32>
    %678 = vector.shape_cast %677 : vector<1x2x16xf32> to vector<2x16xf32>
    %679 = vector.shape_cast %626 : vector<2x16xf32> to vector<1x2x16xf32>
    tpu.vector_store %arg21[%676, %c0_225, %c0_226], %679 {strides = array<i32>} : memref<8x2x16xf32, #tpu.memory_space<vmem>>, vector<1x2x16xf32>,
    %c6_i32 = arith.constant 6 : i32
    %680 = arith.index_cast %c6_i32 : i32 to index
    %c0_227 = arith.constant 0 : index
    %c0_228 = arith.constant 0 : index
    %681 = vector.load %arg1[%680, %c0_227, %c0_228] : memref<8x2x32xf32, #tpu.memory_space<vmem>>, vector<1x2x32xf32>
    %682 = vector.shape_cast %681 : vector<1x2x32xf32> to vector<2x32xf32>
    %cst_229 = arith.constant dense<0.000000e+00> : vector<2x512xf32>
    %683 = tpu.matmul %682, %5, %cst_229 {dimension_numbers = #tpu.dot_dimension_numbers<[1], [0], [0], [1], [0, 0, 1, 1], [], []>} : vector<2x32xf32>, vector<32x512xf32>, vector<2x512xf32> -> vector<2x512xf32>
    %cst_230 = arith.constant dense<0.000000e+00> : vector<2x512xf32>
    %684 = tpu.matmul %629, %6, %cst_230 {dimension_numbers = #tpu.dot_dimension_numbers<[1], [0], [0], [1], [0, 0, 1, 1], [], []>} : vector<2x64xf32>, vector<64x512xf32>, vector<2x512xf32> -> vector<2x512xf32>
    %685 = arith.addf %683, %684 : vector<2x512xf32>
    %cst_231 = arith.constant dense<0.000000e+00> : vector<2x512xf32>
    %686 = tpu.matmul %609, %7, %cst_231 {dimension_numbers = #tpu.dot_dimension_numbers<[1], [0], [0], [1], [0, 0, 1, 1], [], []>} : vector<2x128xf32>, vector<128x512xf32>, vector<2x512xf32> -> vector<2x512xf32>
    %687 = arith.addf %685, %686 : vector<2x512xf32>
    %688 = vector.broadcast %8 : vector<1x512xf32> to vector<2x512xf32>
    %689 = arith.addf %687, %688 : vector<2x512xf32>
    %690 = vector.extract_strided_slice %689 {offsets = [0, 0], sizes = [2, 128], strides = [1, 1]} : vector<2x512xf32> to vector<2x128xf32>
    %691 = arith.negf %690 : vector<2x128xf32>
    %692 = math.exp %691 : vector<2x128xf32>
    %cst_232 = arith.constant 1.000000e+00 : f32
    %693 = vector.broadcast %cst_232 : f32 to vector<2x128xf32>
    %694 = arith.addf %693, %692 : vector<2x128xf32>
    %695 = arith.divf %693, %694 : vector<2x128xf32>
    %696 = vector.extract_strided_slice %689 {offsets = [0, 128], sizes = [2, 128], strides = [1, 1]} : vector<2x512xf32> to vector<2x128xf32>
    %697 = arith.negf %696 : vector<2x128xf32>
    %698 = math.exp %697 : vector<2x128xf32>
    %cst_233 = arith.constant 1.000000e+00 : f32
    %699 = vector.broadcast %cst_233 : f32 to vector<2x128xf32>
    %700 = arith.addf %699, %698 : vector<2x128xf32>
    %701 = arith.divf %699, %700 : vector<2x128xf32>
    %702 = vector.extract_strided_slice %689 {offsets = [0, 256], sizes = [2, 128], strides = [1, 1]} : vector<2x512xf32> to vector<2x128xf32>
    %703 = math.tanh %702 : vector<2x128xf32>
    %704 = vector.extract_strided_slice %689 {offsets = [0, 384], sizes = [2, 128], strides = [1, 1]} : vector<2x512xf32> to vector<2x128xf32>
    %705 = arith.negf %704 : vector<2x128xf32>
    %706 = math.exp %705 : vector<2x128xf32>
    %cst_234 = arith.constant 1.000000e+00 : f32
    %707 = vector.broadcast %cst_234 : f32 to vector<2x128xf32>
    %708 = arith.addf %707, %706 : vector<2x128xf32>
    %709 = arith.divf %707, %708 : vector<2x128xf32>
    %710 = arith.mulf %701, %603 : vector<2x128xf32>
    %711 = arith.mulf %695, %703 : vector<2x128xf32>
    %712 = arith.addf %710, %711 : vector<2x128xf32>
    %713 = math.tanh %712 : vector<2x128xf32>
    %714 = arith.mulf %709, %713 : vector<2x128xf32>
    %715 = arith.index_cast %c6_i32 : i32 to index
    %c0_235 = arith.constant 0 : index
    %c0_236 = arith.constant 0 : index
    %716 = vector.load %arg18[%715, %c0_235, %c0_236] : memref<8x2x128xf32, #tpu.memory_space<vmem>>, vector<1x2x128xf32>
    %717 = vector.shape_cast %716 : vector<1x2x128xf32> to vector<2x128xf32>
    %718 = arith.mulf %714, %717 : vector<2x128xf32>
    %cst_237 = arith.constant dense<0.000000e+00> : vector<2x512xf32>
    %719 = tpu.matmul %718, %13, %cst_237 {dimension_numbers = #tpu.dot_dimension_numbers<[1], [0], [0], [1], [0, 0, 1, 1], [], []>} : vector<2x128xf32>, vector<128x512xf32>, vector<2x512xf32> -> vector<2x512xf32>
    %720 = tpu.concatenate %626, %630 in 1 : vector<2x16xf32>, vector<2x16xf32> -> vector<2x32xf32>
    %cst_238 = arith.constant dense<0.000000e+00> : vector<2x512xf32>
    %721 = tpu.matmul %720, %14, %cst_238 {dimension_numbers = #tpu.dot_dimension_numbers<[1], [0], [0], [1], [0, 0, 1, 1], [], []>} : vector<2x32xf32>, vector<32x512xf32>, vector<2x512xf32> -> vector<2x512xf32>
    %722 = arith.addf %719, %721 : vector<2x512xf32>
    %723 = arith.addf %722, %4 : vector<2x512xf32>
    %724 = math.tanh %723 : vector<2x512xf32>
    %cst_239 = arith.constant dense<0.000000e+00> : vector<2x16xf32>
    %725 = tpu.matmul %724, %15, %cst_239 {dimension_numbers = #tpu.dot_dimension_numbers<[1], [0], [0], [1], [0, 0, 1, 1], [], []>} : vector<2x512xf32>, vector<512x16xf32>, vector<2x16xf32> -> vector<2x16xf32>
    %cst_240 = arith.constant dense<0xFF800000> : vector<2xf32>
    %726 = vector.multi_reduction <maximumf>, %725, %cst_240 [1] : vector<2x16xf32> to vector<2xf32>
    %727 = vector.shape_cast %726 : vector<2xf32> to vector<2x1xf32>
    %728 = vector.broadcast %727 : vector<2x1xf32> to vector<2x16xf32>
    %729 = arith.subf %725, %728 : vector<2x16xf32>
    %730 = math.exp %729 : vector<2x16xf32>
    %cst_241 = arith.constant dense<0.000000e+00> : vector<2xf32>
    %731 = vector.multi_reduction <add>, %730, %cst_241 [1] : vector<2x16xf32> to vector<2xf32>
    %732 = vector.shape_cast %731 : vector<2xf32> to vector<2x1xf32>
    %733 = tpu.reciprocal %732 {approx = true} : vector<2x1xf32> -> vector<2x1xf32>
    %734 = vector.broadcast %733 : vector<2x1xf32> to vector<2x16xf32>
    %735 = arith.mulf %730, %734 : vector<2x16xf32>
    %736 = vector.shape_cast %735 : vector<2x16xf32> to vector<2x1x16xf32>
    "tpu.trace_start"() <{level = 10 : i32, message = "bqt,bte->bqe"}> : () -> ()
    %cst_242 = arith.constant dense<0.000000e+00> : vector<2x1x64xf32>
    %737 = tpu.matmul %736, %3, %cst_242 {dimension_numbers = #tpu.dot_dimension_numbers<[2], [1], [1], [2], [0, 0, 0, 1, 1, 2], [0], [0]>} : vector<2x1x16xf32>, vector<2x16x64xf32>, vector<2x1x64xf32> -> vector<2x1x64xf32>
    "tpu.trace_stop"() : () -> ()
    %738 = vector.shape_cast %737 : vector<2x1x64xf32> to vector<2x64xf32>
    %739 = arith.addf %630, %735 : vector<2x16xf32>
    %cst_243 = arith.constant dense<0.000000e+00> : vector<2x512xf32>
    %740 = tpu.matmul %682, %9, %cst_243 {dimension_numbers = #tpu.dot_dimension_numbers<[1], [0], [0], [1], [0, 0, 1, 1], [], []>} : vector<2x32xf32>, vector<32x512xf32>, vector<2x512xf32> -> vector<2x512xf32>
    %cst_244 = arith.constant dense<0.000000e+00> : vector<2x512xf32>
    %741 = tpu.matmul %738, %10, %cst_244 {dimension_numbers = #tpu.dot_dimension_numbers<[1], [0], [0], [1], [0, 0, 1, 1], [], []>} : vector<2x64xf32>, vector<64x512xf32>, vector<2x512xf32> -> vector<2x512xf32>
    %742 = arith.addf %740, %741 : vector<2x512xf32>
    %cst_245 = arith.constant dense<0.000000e+00> : vector<2x512xf32>
    %743 = tpu.matmul %666, %11, %cst_245 {dimension_numbers = #tpu.dot_dimension_numbers<[1], [0], [0], [1], [0, 0, 1, 1], [], []>} : vector<2x128xf32>, vector<128x512xf32>, vector<2x512xf32> -> vector<2x512xf32>
    %744 = arith.addf %742, %743 : vector<2x512xf32>
    %745 = vector.broadcast %12 : vector<1x512xf32> to vector<2x512xf32>
    %746 = arith.addf %744, %745 : vector<2x512xf32>
    %747 = vector.extract_strided_slice %746 {offsets = [0, 0], sizes = [2, 128], strides = [1, 1]} : vector<2x512xf32> to vector<2x128xf32>
    %748 = arith.negf %747 : vector<2x128xf32>
    %749 = math.exp %748 : vector<2x128xf32>
    %cst_246 = arith.constant 1.000000e+00 : f32
    %750 = vector.broadcast %cst_246 : f32 to vector<2x128xf32>
    %751 = arith.addf %750, %749 : vector<2x128xf32>
    %752 = arith.divf %750, %751 : vector<2x128xf32>
    %753 = vector.extract_strided_slice %746 {offsets = [0, 128], sizes = [2, 128], strides = [1, 1]} : vector<2x512xf32> to vector<2x128xf32>
    %754 = arith.negf %753 : vector<2x128xf32>
    %755 = math.exp %754 : vector<2x128xf32>
    %cst_247 = arith.constant 1.000000e+00 : f32
    %756 = vector.broadcast %cst_247 : f32 to vector<2x128xf32>
    %757 = arith.addf %756, %755 : vector<2x128xf32>
    %758 = arith.divf %756, %757 : vector<2x128xf32>
    %759 = vector.extract_strided_slice %746 {offsets = [0, 256], sizes = [2, 128], strides = [1, 1]} : vector<2x512xf32> to vector<2x128xf32>
    %760 = math.tanh %759 : vector<2x128xf32>
    %761 = vector.extract_strided_slice %746 {offsets = [0, 384], sizes = [2, 128], strides = [1, 1]} : vector<2x512xf32> to vector<2x128xf32>
    %762 = arith.negf %761 : vector<2x128xf32>
    %763 = math.exp %762 : vector<2x128xf32>
    %cst_248 = arith.constant 1.000000e+00 : f32
    %764 = vector.broadcast %cst_248 : f32 to vector<2x128xf32>
    %765 = arith.addf %764, %763 : vector<2x128xf32>
    %766 = arith.divf %764, %765 : vector<2x128xf32>
    %767 = arith.mulf %758, %660 : vector<2x128xf32>
    %768 = arith.mulf %752, %760 : vector<2x128xf32>
    %769 = arith.addf %767, %768 : vector<2x128xf32>
    %770 = math.tanh %769 : vector<2x128xf32>
    %771 = arith.mulf %766, %770 : vector<2x128xf32>
    %772 = arith.index_cast %c6_i32 : i32 to index
    %c0_249 = arith.constant 0 : index
    %c0_250 = arith.constant 0 : index
    %773 = vector.load %arg19[%772, %c0_249, %c0_250] : memref<8x2x128xf32, #tpu.memory_space<vmem>>, vector<1x2x128xf32>
    %774 = vector.shape_cast %773 : vector<1x2x128xf32> to vector<2x128xf32>
    %775 = arith.mulf %771, %774 : vector<2x128xf32>
    %cst_251 = arith.constant dense<0.000000e+00> : vector<2x32xf32>
    %776 = tpu.matmul %775, %16, %cst_251 {dimension_numbers = #tpu.dot_dimension_numbers<[1], [0], [0], [1], [0, 0, 1, 1], [], []>} : vector<2x128xf32>, vector<128x32xf32>, vector<2x32xf32> -> vector<2x32xf32>
    %cst_252 = arith.constant dense<0.000000e+00> : vector<2x32xf32>
    %777 = tpu.matmul %738, %17, %cst_252 {dimension_numbers = #tpu.dot_dimension_numbers<[1], [0], [0], [1], [0, 0, 1, 1], [], []>} : vector<2x64xf32>, vector<64x32xf32>, vector<2x32xf32> -> vector<2x32xf32>
    %778 = arith.addf %776, %777 : vector<2x32xf32>
    %779 = vector.broadcast %18 : vector<1x32xf32> to vector<2x32xf32>
    %780 = arith.addf %778, %779 : vector<2x32xf32>
    %781 = arith.index_cast %c6_i32 : i32 to index
    %c0_253 = arith.constant 0 : index
    %c0_254 = arith.constant 0 : index
    %782 = vector.load %arg20[%781, %c0_253, %c0_254] : memref<8x2x32xf32, #tpu.memory_space<vmem>>, vector<1x2x32xf32>
    %783 = vector.shape_cast %782 : vector<1x2x32xf32> to vector<2x32xf32>
    %784 = vector.shape_cast %780 : vector<2x32xf32> to vector<1x2x32xf32>
    tpu.vector_store %arg20[%781, %c0_253, %c0_254], %784 {strides = array<i32>} : memref<8x2x32xf32, #tpu.memory_space<vmem>>, vector<1x2x32xf32>,
    %785 = arith.index_cast %c6_i32 : i32 to index
    %c0_255 = arith.constant 0 : index
    %c0_256 = arith.constant 0 : index
    %786 = vector.load %arg21[%785, %c0_255, %c0_256] : memref<8x2x16xf32, #tpu.memory_space<vmem>>, vector<1x2x16xf32>
    %787 = vector.shape_cast %786 : vector<1x2x16xf32> to vector<2x16xf32>
    %788 = vector.shape_cast %735 : vector<2x16xf32> to vector<1x2x16xf32>
    tpu.vector_store %arg21[%785, %c0_255, %c0_256], %788 {strides = array<i32>} : memref<8x2x16xf32, #tpu.memory_space<vmem>>, vector<1x2x16xf32>,
    %c7_i32 = arith.constant 7 : i32
    %789 = arith.index_cast %c7_i32 : i32 to index
    %c0_257 = arith.constant 0 : index
    %c0_258 = arith.constant 0 : index
    %790 = vector.load %arg1[%789, %c0_257, %c0_258] : memref<8x2x32xf32, #tpu.memory_space<vmem>>, vector<1x2x32xf32>
    %791 = vector.shape_cast %790 : vector<1x2x32xf32> to vector<2x32xf32>
    %cst_259 = arith.constant dense<0.000000e+00> : vector<2x512xf32>
    %792 = tpu.matmul %791, %5, %cst_259 {dimension_numbers = #tpu.dot_dimension_numbers<[1], [0], [0], [1], [0, 0, 1, 1], [], []>} : vector<2x32xf32>, vector<32x512xf32>, vector<2x512xf32> -> vector<2x512xf32>
    %cst_260 = arith.constant dense<0.000000e+00> : vector<2x512xf32>
    %793 = tpu.matmul %738, %6, %cst_260 {dimension_numbers = #tpu.dot_dimension_numbers<[1], [0], [0], [1], [0, 0, 1, 1], [], []>} : vector<2x64xf32>, vector<64x512xf32>, vector<2x512xf32> -> vector<2x512xf32>
    %794 = arith.addf %792, %793 : vector<2x512xf32>
    %cst_261 = arith.constant dense<0.000000e+00> : vector<2x512xf32>
    %795 = tpu.matmul %718, %7, %cst_261 {dimension_numbers = #tpu.dot_dimension_numbers<[1], [0], [0], [1], [0, 0, 1, 1], [], []>} : vector<2x128xf32>, vector<128x512xf32>, vector<2x512xf32> -> vector<2x512xf32>
    %796 = arith.addf %794, %795 : vector<2x512xf32>
    %797 = vector.broadcast %8 : vector<1x512xf32> to vector<2x512xf32>
    %798 = arith.addf %796, %797 : vector<2x512xf32>
    %799 = vector.extract_strided_slice %798 {offsets = [0, 0], sizes = [2, 128], strides = [1, 1]} : vector<2x512xf32> to vector<2x128xf32>
    %800 = arith.negf %799 : vector<2x128xf32>
    %801 = math.exp %800 : vector<2x128xf32>
    %cst_262 = arith.constant 1.000000e+00 : f32
    %802 = vector.broadcast %cst_262 : f32 to vector<2x128xf32>
    %803 = arith.addf %802, %801 : vector<2x128xf32>
    %804 = arith.divf %802, %803 : vector<2x128xf32>
    %805 = vector.extract_strided_slice %798 {offsets = [0, 128], sizes = [2, 128], strides = [1, 1]} : vector<2x512xf32> to vector<2x128xf32>
    %806 = arith.negf %805 : vector<2x128xf32>
    %807 = math.exp %806 : vector<2x128xf32>
    %cst_263 = arith.constant 1.000000e+00 : f32
    %808 = vector.broadcast %cst_263 : f32 to vector<2x128xf32>
    %809 = arith.addf %808, %807 : vector<2x128xf32>
    %810 = arith.divf %808, %809 : vector<2x128xf32>
    %811 = vector.extract_strided_slice %798 {offsets = [0, 256], sizes = [2, 128], strides = [1, 1]} : vector<2x512xf32> to vector<2x128xf32>
    %812 = math.tanh %811 : vector<2x128xf32>
    %813 = vector.extract_strided_slice %798 {offsets = [0, 384], sizes = [2, 128], strides = [1, 1]} : vector<2x512xf32> to vector<2x128xf32>
    %814 = arith.negf %813 : vector<2x128xf32>
    %815 = math.exp %814 : vector<2x128xf32>
    %cst_264 = arith.constant 1.000000e+00 : f32
    %816 = vector.broadcast %cst_264 : f32 to vector<2x128xf32>
    %817 = arith.addf %816, %815 : vector<2x128xf32>
    %818 = arith.divf %816, %817 : vector<2x128xf32>
    %819 = arith.mulf %810, %712 : vector<2x128xf32>
    %820 = arith.mulf %804, %812 : vector<2x128xf32>
    %821 = arith.addf %819, %820 : vector<2x128xf32>
    %822 = math.tanh %821 : vector<2x128xf32>
    %823 = arith.mulf %818, %822 : vector<2x128xf32>
    %824 = arith.index_cast %c7_i32 : i32 to index
    %c0_265 = arith.constant 0 : index
    %c0_266 = arith.constant 0 : index
    %825 = vector.load %arg18[%824, %c0_265, %c0_266] : memref<8x2x128xf32, #tpu.memory_space<vmem>>, vector<1x2x128xf32>
    %826 = vector.shape_cast %825 : vector<1x2x128xf32> to vector<2x128xf32>
    %827 = arith.mulf %823, %826 : vector<2x128xf32>
    %cst_267 = arith.constant dense<0.000000e+00> : vector<2x512xf32>
    %828 = tpu.matmul %827, %13, %cst_267 {dimension_numbers = #tpu.dot_dimension_numbers<[1], [0], [0], [1], [0, 0, 1, 1], [], []>} : vector<2x128xf32>, vector<128x512xf32>, vector<2x512xf32> -> vector<2x512xf32>
    %829 = tpu.concatenate %735, %739 in 1 : vector<2x16xf32>, vector<2x16xf32> -> vector<2x32xf32>
    %cst_268 = arith.constant dense<0.000000e+00> : vector<2x512xf32>
    %830 = tpu.matmul %829, %14, %cst_268 {dimension_numbers = #tpu.dot_dimension_numbers<[1], [0], [0], [1], [0, 0, 1, 1], [], []>} : vector<2x32xf32>, vector<32x512xf32>, vector<2x512xf32> -> vector<2x512xf32>
    %831 = arith.addf %828, %830 : vector<2x512xf32>
    %832 = arith.addf %831, %4 : vector<2x512xf32>
    %833 = math.tanh %832 : vector<2x512xf32>
    %cst_269 = arith.constant dense<0.000000e+00> : vector<2x16xf32>
    %834 = tpu.matmul %833, %15, %cst_269 {dimension_numbers = #tpu.dot_dimension_numbers<[1], [0], [0], [1], [0, 0, 1, 1], [], []>} : vector<2x512xf32>, vector<512x16xf32>, vector<2x16xf32> -> vector<2x16xf32>
    %cst_270 = arith.constant dense<0xFF800000> : vector<2xf32>
    %835 = vector.multi_reduction <maximumf>, %834, %cst_270 [1] : vector<2x16xf32> to vector<2xf32>
    %836 = vector.shape_cast %835 : vector<2xf32> to vector<2x1xf32>
    %837 = vector.broadcast %836 : vector<2x1xf32> to vector<2x16xf32>
    %838 = arith.subf %834, %837 : vector<2x16xf32>
    %839 = math.exp %838 : vector<2x16xf32>
    %cst_271 = arith.constant dense<0.000000e+00> : vector<2xf32>
    %840 = vector.multi_reduction <add>, %839, %cst_271 [1] : vector<2x16xf32> to vector<2xf32>
    %841 = vector.shape_cast %840 : vector<2xf32> to vector<2x1xf32>
    %842 = tpu.reciprocal %841 {approx = true} : vector<2x1xf32> -> vector<2x1xf32>
    %843 = vector.broadcast %842 : vector<2x1xf32> to vector<2x16xf32>
    %844 = arith.mulf %839, %843 : vector<2x16xf32>
    %845 = vector.shape_cast %844 : vector<2x16xf32> to vector<2x1x16xf32>
    "tpu.trace_start"() <{level = 10 : i32, message = "bqt,bte->bqe"}> : () -> ()
    %cst_272 = arith.constant dense<0.000000e+00> : vector<2x1x64xf32>
    %846 = tpu.matmul %845, %3, %cst_272 {dimension_numbers = #tpu.dot_dimension_numbers<[2], [1], [1], [2], [0, 0, 0, 1, 1, 2], [0], [0]>} : vector<2x1x16xf32>, vector<2x16x64xf32>, vector<2x1x64xf32> -> vector<2x1x64xf32>
    "tpu.trace_stop"() : () -> ()
    %847 = vector.shape_cast %846 : vector<2x1x64xf32> to vector<2x64xf32>
    %848 = arith.addf %739, %844 : vector<2x16xf32>
    %cst_273 = arith.constant dense<0.000000e+00> : vector<2x512xf32>
    %849 = tpu.matmul %791, %9, %cst_273 {dimension_numbers = #tpu.dot_dimension_numbers<[1], [0], [0], [1], [0, 0, 1, 1], [], []>} : vector<2x32xf32>, vector<32x512xf32>, vector<2x512xf32> -> vector<2x512xf32>
    %cst_274 = arith.constant dense<0.000000e+00> : vector<2x512xf32>
    %850 = tpu.matmul %847, %10, %cst_274 {dimension_numbers = #tpu.dot_dimension_numbers<[1], [0], [0], [1], [0, 0, 1, 1], [], []>} : vector<2x64xf32>, vector<64x512xf32>, vector<2x512xf32> -> vector<2x512xf32>
    %851 = arith.addf %849, %850 : vector<2x512xf32>
    %cst_275 = arith.constant dense<0.000000e+00> : vector<2x512xf32>
    %852 = tpu.matmul %775, %11, %cst_275 {dimension_numbers = #tpu.dot_dimension_numbers<[1], [0], [0], [1], [0, 0, 1, 1], [], []>} : vector<2x128xf32>, vector<128x512xf32>, vector<2x512xf32> -> vector<2x512xf32>
    %853 = arith.addf %851, %852 : vector<2x512xf32>
    %854 = vector.broadcast %12 : vector<1x512xf32> to vector<2x512xf32>
    %855 = arith.addf %853, %854 : vector<2x512xf32>
    %856 = vector.extract_strided_slice %855 {offsets = [0, 0], sizes = [2, 128], strides = [1, 1]} : vector<2x512xf32> to vector<2x128xf32>
    %857 = arith.negf %856 : vector<2x128xf32>
    %858 = math.exp %857 : vector<2x128xf32>
    %cst_276 = arith.constant 1.000000e+00 : f32
    %859 = vector.broadcast %cst_276 : f32 to vector<2x128xf32>
    %860 = arith.addf %859, %858 : vector<2x128xf32>
    %861 = arith.divf %859, %860 : vector<2x128xf32>
    %862 = vector.extract_strided_slice %855 {offsets = [0, 128], sizes = [2, 128], strides = [1, 1]} : vector<2x512xf32> to vector<2x128xf32>
    %863 = arith.negf %862 : vector<2x128xf32>
    %864 = math.exp %863 : vector<2x128xf32>
    %cst_277 = arith.constant 1.000000e+00 : f32
    %865 = vector.broadcast %cst_277 : f32 to vector<2x128xf32>
    %866 = arith.addf %865, %864 : vector<2x128xf32>
    %867 = arith.divf %865, %866 : vector<2x128xf32>
    %868 = vector.extract_strided_slice %855 {offsets = [0, 256], sizes = [2, 128], strides = [1, 1]} : vector<2x512xf32> to vector<2x128xf32>
    %869 = math.tanh %868 : vector<2x128xf32>
    %870 = vector.extract_strided_slice %855 {offsets = [0, 384], sizes = [2, 128], strides = [1, 1]} : vector<2x512xf32> to vector<2x128xf32>
    %871 = arith.negf %870 : vector<2x128xf32>
    %872 = math.exp %871 : vector<2x128xf32>
    %cst_278 = arith.constant 1.000000e+00 : f32
    %873 = vector.broadcast %cst_278 : f32 to vector<2x128xf32>
    %874 = arith.addf %873, %872 : vector<2x128xf32>
    %875 = arith.divf %873, %874 : vector<2x128xf32>
    %876 = arith.mulf %867, %769 : vector<2x128xf32>
    %877 = arith.mulf %861, %869 : vector<2x128xf32>
    %878 = arith.addf %876, %877 : vector<2x128xf32>
    %879 = math.tanh %878 : vector<2x128xf32>
    %880 = arith.mulf %875, %879 : vector<2x128xf32>
    %881 = arith.index_cast %c7_i32 : i32 to index
    %c0_279 = arith.constant 0 : index
    %c0_280 = arith.constant 0 : index
    %882 = vector.load %arg19[%881, %c0_279, %c0_280] : memref<8x2x128xf32, #tpu.memory_space<vmem>>, vector<1x2x128xf32>
    %883 = vector.shape_cast %882 : vector<1x2x128xf32> to vector<2x128xf32>
    %884 = arith.mulf %880, %883 : vector<2x128xf32>
    %cst_281 = arith.constant dense<0.000000e+00> : vector<2x32xf32>
    %885 = tpu.matmul %884, %16, %cst_281 {dimension_numbers = #tpu.dot_dimension_numbers<[1], [0], [0], [1], [0, 0, 1, 1], [], []>} : vector<2x128xf32>, vector<128x32xf32>, vector<2x32xf32> -> vector<2x32xf32>
    %cst_282 = arith.constant dense<0.000000e+00> : vector<2x32xf32>
    %886 = tpu.matmul %847, %17, %cst_282 {dimension_numbers = #tpu.dot_dimension_numbers<[1], [0], [0], [1], [0, 0, 1, 1], [], []>} : vector<2x64xf32>, vector<64x32xf32>, vector<2x32xf32> -> vector<2x32xf32>
    %887 = arith.addf %885, %886 : vector<2x32xf32>
    %888 = vector.broadcast %18 : vector<1x32xf32> to vector<2x32xf32>
    %889 = arith.addf %887, %888 : vector<2x32xf32>
    %890 = arith.index_cast %c7_i32 : i32 to index
    %c0_283 = arith.constant 0 : index
    %c0_284 = arith.constant 0 : index
    %891 = vector.load %arg20[%890, %c0_283, %c0_284] : memref<8x2x32xf32, #tpu.memory_space<vmem>>, vector<1x2x32xf32>
    %892 = vector.shape_cast %891 : vector<1x2x32xf32> to vector<2x32xf32>
    %893 = vector.shape_cast %889 : vector<2x32xf32> to vector<1x2x32xf32>
    tpu.vector_store %arg20[%890, %c0_283, %c0_284], %893 {strides = array<i32>} : memref<8x2x32xf32, #tpu.memory_space<vmem>>, vector<1x2x32xf32>,
    %894 = arith.index_cast %c7_i32 : i32 to index
    %c0_285 = arith.constant 0 : index
    %c0_286 = arith.constant 0 : index
    %895 = vector.load %arg21[%894, %c0_285, %c0_286] : memref<8x2x16xf32, #tpu.memory_space<vmem>>, vector<1x2x16xf32>
    %896 = vector.shape_cast %895 : vector<1x2x16xf32> to vector<2x16xf32>
    %897 = vector.shape_cast %844 : vector<2x16xf32> to vector<1x2x16xf32>
    tpu.vector_store %arg21[%894, %c0_285, %c0_286], %897 {strides = array<i32>} : memref<8x2x16xf32, #tpu.memory_space<vmem>>, vector<1x2x16xf32>,
    %c8_i32 = arith.constant 8 : i32
    %c0_287 = arith.constant 0 : index
    %c0_288 = arith.constant 0 : index
    %898 = vector.load %arg22[%c0_287, %c0_288] : memref<2x128xf32, #tpu.memory_space<vmem>>, vector<2x128xf32>
    tpu.vector_store %arg22[%c0_287, %c0_288], %827 {strides = array<i32>} : memref<2x128xf32, #tpu.memory_space<vmem>>, vector<2x128xf32>,
    %c0_289 = arith.constant 0 : index
    %c0_290 = arith.constant 0 : index
    %899 = vector.load %arg23[%c0_289, %c0_290] : memref<2x128xf32, #tpu.memory_space<vmem>>, vector<2x128xf32>
    tpu.vector_store %arg23[%c0_289, %c0_290], %821 {strides = array<i32>} : memref<2x128xf32, #tpu.memory_space<vmem>>, vector<2x128xf32>,
    %c0_291 = arith.constant 0 : index
    %c0_292 = arith.constant 0 : index
    %900 = vector.load %arg24[%c0_291, %c0_292] : memref<2x128xf32, #tpu.memory_space<vmem>>, vector<2x128xf32>
    tpu.vector_store %arg24[%c0_291, %c0_292], %884 {strides = array<i32>} : memref<2x128xf32, #tpu.memory_space<vmem>>, vector<2x128xf32>,
    %c0_293 = arith.constant 0 : index
    %c0_294 = arith.constant 0 : index
    %901 = vector.load %arg25[%c0_293, %c0_294] : memref<2x128xf32, #tpu.memory_space<vmem>>, vector<2x128xf32>
    tpu.vector_store %arg25[%c0_293, %c0_294], %878 {strides = array<i32>} : memref<2x128xf32, #tpu.memory_space<vmem>>, vector<2x128xf32>,
    %c0_295 = arith.constant 0 : index
    %c0_296 = arith.constant 0 : index
    %902 = vector.load %arg26[%c0_295, %c0_296] : memref<2x16xf32, #tpu.memory_space<vmem>>, vector<2x16xf32>
    tpu.vector_store %arg26[%c0_295, %c0_296], %844 {strides = array<i32>} : memref<2x16xf32, #tpu.memory_space<vmem>>, vector<2x16xf32>,
    %c0_297 = arith.constant 0 : index
    %c0_298 = arith.constant 0 : index
    %903 = vector.load %arg27[%c0_297, %c0_298] : memref<2x16xf32, #tpu.memory_space<vmem>>, vector<2x16xf32>
    tpu.vector_store %arg27[%c0_297, %c0_298], %848 {strides = array<i32>} : memref<2x16xf32, #tpu.memory_space<vmem>>, vector<2x16xf32>,
    %c0_299 = arith.constant 0 : index
    %c0_300 = arith.constant 0 : index
    %904 = vector.load %arg28[%c0_299, %c0_300] : memref<2x64xf32, #tpu.memory_space<vmem>>, vector<2x64xf32>
    tpu.vector_store %arg28[%c0_299, %c0_300], %847 {strides = array<i32>} : memref<2x64xf32, #tpu.memory_space<vmem>>, vector<2x64xf32>,
    return
  }
  func.func @transform_0(%arg0: i32) -> (i32, i32, i32) {
    %c0_i32 = arith.constant 0 : i32
    %c0_i32_0 = arith.constant 0 : i32
    %c0_i32_1 = arith.constant 0 : i32
    return %arg0, %c0_i32, %c0_i32_0 : i32, i32, i32
  }
  func.func @transform_1(%arg0: i32) -> (i32, i32, i32) {
    %c0_i32 = arith.constant 0 : i32
    %c0_i32_0 = arith.constant 0 : i32
    %c0_i32_1 = arith.constant 0 : i32
    %c0_i32_2 = arith.constant 0 : i32
    return %c0_i32, %c0_i32_0, %c0_i32_1 : i32, i32, i32
  }
  func.func @transform_2(%arg0: i32) -> (i32, i32) {
    %c0_i32 = arith.constant 0 : i32
    %c0_i32_0 = arith.constant 0 : i32
    %c0_i32_1 = arith.constant 0 : i32
    return %c0_i32, %c0_i32_0 : i32, i32
  }
  func.func @transform_3(%arg0: i32) -> (i32, i32) {
    %c0_i32 = arith.constant 0 : i32
    %c0_i32_0 = arith.constant 0 : i32
    %c0_i32_1 = arith.constant 0 : i32
    return %c0_i32, %c0_i32_0 : i32, i32
  }
  func.func @transform_4(%arg0: i32) -> (i32, i32) {
    %c0_i32 = arith.constant 0 : i32
    %c0_i32_0 = arith.constant 0 : i32
    %c0_i32_1 = arith.constant 0 : i32
    return %c0_i32, %c0_i32_0 : i32, i32
  }
  func.func @transform_5(%arg0: i32) -> (i32, i32) {
    %c0_i32 = arith.constant 0 : i32
    %c0_i32_0 = arith.constant 0 : i32
    %c0_i32_1 = arith.constant 0 : i32
    return %c0_i32, %c0_i32_0 : i32, i32
  }
  func.func @transform_6(%arg0: i32) -> (i32, i32) {
    %c0_i32 = arith.constant 0 : i32
    %c0_i32_0 = arith.constant 0 : i32
    %c0_i32_1 = arith.constant 0 : i32
    return %c0_i32, %c0_i32_0 : i32, i32
  }
  func.func @transform_7(%arg0: i32) -> (i32, i32) {
    %c0_i32 = arith.constant 0 : i32
    %c0_i32_0 = arith.constant 0 : i32
    %c0_i32_1 = arith.constant 0 : i32
    return %c0_i32, %c0_i32_0 : i32, i32
  }
  func.func @transform_8(%arg0: i32) -> (i32, i32) {
    %c0_i32 = arith.constant 0 : i32
    %c0_i32_0 = arith.constant 0 : i32
    %c0_i32_1 = arith.constant 0 : i32
    return %c0_i32, %c0_i32_0 : i32, i32
  }
  func.func @transform_9(%arg0: i32) -> (i32, i32) {
    %c0_i32 = arith.constant 0 : i32
    %c0_i32_0 = arith.constant 0 : i32
    %c0_i32_1 = arith.constant 0 : i32
    return %c0_i32, %c0_i32_0 : i32, i32
  }
  func.func @transform_10(%arg0: i32) -> (i32, i32) {
    %c0_i32 = arith.constant 0 : i32
    %c0_i32_0 = arith.constant 0 : i32
    %c0_i32_1 = arith.constant 0 : i32
    return %c0_i32, %c0_i32_0 : i32, i32
  }
  func.func @transform_11(%arg0: i32) -> (i32, i32) {
    %c0_i32 = arith.constant 0 : i32
    %c0_i32_0 = arith.constant 0 : i32
    %c0_i32_1 = arith.constant 0 : i32
    return %c0_i32, %c0_i32_0 : i32, i32
  }
  func.func @transform_12(%arg0: i32) -> (i32, i32) {
    %c0_i32 = arith.constant 0 : i32
    %c0_i32_0 = arith.constant 0 : i32
    %c0_i32_1 = arith.constant 0 : i32
    return %c0_i32, %c0_i32_0 : i32, i32
  }
  func.func @transform_13(%arg0: i32) -> (i32, i32) {
    %c0_i32 = arith.constant 0 : i32
    %c0_i32_0 = arith.constant 0 : i32
    %c0_i32_1 = arith.constant 0 : i32
    return %c0_i32, %c0_i32_0 : i32, i32
  }
  func.func @transform_14(%arg0: i32) -> (i32, i32) {
    %c0_i32 = arith.constant 0 : i32
    %c0_i32_0 = arith.constant 0 : i32
    %c0_i32_1 = arith.constant 0 : i32
    return %c0_i32, %c0_i32_0 : i32, i32
  }
  func.func @transform_15(%arg0: i32) -> (i32, i32) {
    %c0_i32 = arith.constant 0 : i32
    %c0_i32_0 = arith.constant 0 : i32
    %c0_i32_1 = arith.constant 0 : i32
    return %c0_i32, %c0_i32_0 : i32, i32
  }
  func.func @transform_16(%arg0: i32) -> (i32, i32) {
    %c0_i32 = arith.constant 0 : i32
    %c0_i32_0 = arith.constant 0 : i32
    %c0_i32_1 = arith.constant 0 : i32
    return %c0_i32, %c0_i32_0 : i32, i32
  }
  func.func @transform_17(%arg0: i32) -> (i32, i32, i32) {
    %c0_i32 = arith.constant 0 : i32
    %c0_i32_0 = arith.constant 0 : i32
    %c0_i32_1 = arith.constant 0 : i32
    return %arg0, %c0_i32, %c0_i32_0 : i32, i32, i32
  }
  func.func @transform_18(%arg0: i32) -> (i32, i32, i32) {
    %c0_i32 = arith.constant 0 : i32
    %c0_i32_0 = arith.constant 0 : i32
    %c0_i32_1 = arith.constant 0 : i32
    return %arg0, %c0_i32, %c0_i32_0 : i32, i32, i32
  }
  func.func @transform_19(%arg0: i32) -> (i32, i32, i32) {
    %c0_i32 = arith.constant 0 : i32
    %c0_i32_0 = arith.constant 0 : i32
    %c0_i32_1 = arith.constant 0 : i32
    return %arg0, %c0_i32, %c0_i32_0 : i32, i32, i32
  }
  func.func @transform_20(%arg0: i32) -> (i32, i32, i32) {
    %c0_i32 = arith.constant 0 : i32
    %c0_i32_0 = arith.constant 0 : i32
    %c0_i32_1 = arith.constant 0 : i32
    return %arg0, %c0_i32, %c0_i32_0 : i32, i32, i32
  }
}

</mosaic_0001>

<bundles_post_ra>
// kernel: decoder_forward.4
= control target key start
LH: loop header
LB: loop body
LE: loop exit
PB: predicated region body
PF: predicated region fallthrough
CT: control target
= control target key end

     0   :  { %15 = vsyncpa [#allocation3], 0  ;;  %s1094_s0 = inlined_call_operand.vmem [shape: f32[9,2,16], index: 0, kind: input, shape index: {}]   ;;  %s1095_s1 = inlined_call_operand.vmem [shape: f32[16,32], index: 1, kind: input, shape index: {}]   ;;  %s1096_s2 = inlined_call_operand.hbm [shape: f32[32,32], index: 2, kind: input, shape index: {}]   ;;  %s1097_s3 = inlined_call_operand.vmem [shape: f32[9,2,32], index: 3, kind: input, shape index: {}]   ;;  %s1098_s4 = inlined_call_operand.vmem [shape: f32[9,2,32], index: 4, kind: input, shape index: {}]   ;;  %s1099_s5 = inlined_call_operand.vmem [shape: f32[2,16,64], index: 5, kind: input, shape index: {}]   ;;  %s1100_s6 = inlined_call_operand.vmem [shape: f32[64,32], index: 6, kind: input, shape index: {}]   ;;  %s1101_s7 = inlined_call_operand.hbm [shape: f32[1,32], index: 7, kind: input, shape index: {}]   ;;  %s1102_s8 = inlined_call_operand.vmem [shape: f32[9,2,32], index: 8, kind: output, shape index: {0}]   ;;  %s1103_s9 = inlined_call_operand.vmem [shape: f32[32,32], index: 9, kind: output, shape index: {1}]  }
   0x1   :  { %16 = vsyncpa [#allocation5], 0  ;;  %s800_s30 = smov [#allocation2]   ;;  %s752_s13 = scalar_lea.hbm %s1096_s2, 512 }
   0x2   :  { %s26_s10 = sshll.u32 %s800_s30, 4  ;;  %p753_p0 = scmp.ne.s32.totalorder %s1096_s2, %s752_s13  ;;  %s27_s10 = int_to_ptr.vmem [resolvable:$true] %s26_s10 }
   0x3   :  { %p756_p1 = scmp.lt.u32.totalorder %s752_s13, %s1096_s2 }
   0x5   :  { %p758_p2 = pnand %p756_p1, %p753_p0 }
   0x7   :  { %761 = shalt.err (!%p758_p2)
}
   0x8   :  { %s762_s18 = scalar_lea.vmem %s27_s10, 512  ;;  %p767_p4 = scmp.lt.s32.totalorder %s27_s10, %s27_s10 }
   0x9   :  { %p763_p3 = scmp.ne.s32.totalorder %s27_s10, %s762_s18  ;;  %p768_p5 = scmp.lt.s32.totalorder %s762_s18, %s762_s18 }
   0xb   :  { %p769_p6 = por %p768_p5, %p767_p4 }
   0xd   :  { %p770_p7 = pnand %p769_p6, %p763_p3 }
   0xf   :  { %773 = shalt.err (!%p770_p7)
}
  0x10   :  { %s801_s19 = smov 128   ;;  %s802_s20 = smov 8  }
  0x11   :  { %32 = dma.hbm_to_vmem [thread:$0]  %s1096_s2, 512, %s27_s10, [#allocation3], %s801_s19, %s801_s19, %s802_s20  }
  0x12   :  { %s803_s23 = smov [#allocation4]   ;;  %s774_s27 = scalar_lea.hbm %s1101_s7, 16 }
  0x13   :  { %s47_s24 = sshll.u32 %s803_s23, 4  ;;  %p775_p8 = scmp.ne.s32.totalorder %s1101_s7, %s774_s27  ;;  %s48_s24 = int_to_ptr.vmem [resolvable:$true] %s47_s24 }
  0x14   :  { %p778_p9 = scmp.lt.u32.totalorder %s774_s27, %s1101_s7 }
  0x16   :  { %p780_p10 = pnand %p778_p9, %p775_p8 }
  0x18   :  { %783 = shalt.err (!%p780_p10)
}
  0x19   :  { %s784_s12 = scalar_lea.vmem %s48_s24, 16  ;;  %s788_s2 = scalar_lea.vmem %s48_s24, 32 }
  0x1a   :  { %p785_p11 = scmp.ne.s32.totalorder %s48_s24, %s784_s12  ;;  %p789_p12 = scmp.lt.s32.totalorder %s48_s24, %s48_s24 }
  0x1b   :  { %p790_p13 = scmp.lt.s32.totalorder %s788_s2, %s784_s12 }
  0x1d   :  { %p791_p0 = por %p790_p13, %p789_p12 }
  0x1f   :  { %p792_p1 = pnand %p791_p0, %p785_p11 }
  0x21   :  { %795 = shalt.err (!%p792_p1)
}
  0x22   :  { %50 = dma.hbm_to_vmem [thread:$0]  %s1101_s7, 16, %s48_s24, [#allocation5]  }
  0x23   :  { %796 = dma.done.wait [#allocation3], 512  }
  0x24   :  { %797 = vsyncadd [#allocation3], 4294966784 }
  0x25   :  { %798 = dma.done.wait [#allocation5], 16  }
  0x26   :  { %799 = vsyncadd [#allocation5], 4294967280  ;;  %v82_v0 = vlaneseq  ;;  %v804_v1 = vmov 0.0|0.0   ;;  %vm805_vm0 = vmmov 0   ;;  %v806_v2 = vmov 0.0   ;;  %v66_v7 = vld [vmem:[%s1095_s1] sm:$0xff] }
  0x27   :  { %719 = vmatprep.subr.bf16.mxu0 %v804_v1  ;;  %671 = vmatprep.mubr.msk.f32.mxu0 %vm805_vm0, %v806_v2  ;;  %v807_v3 = vmov 1983009808   ;;  %v67_v8 = vld [vmem:[%s1095_s1 + $0x8] sm:$0xff]  ;;  %v57_v9 = vld [vmem:[%s1094_s0] sm:$0x3]  ;;  %vm118_vm1 = vcmask 130048  }
  0x28   :  { %v80_v4 = vunpack.c.l.s4 %v807_v3  ;;  %722 = vmatprep.subr.bf16.mxu1 %v804_v1  ;;  %688 = vmatprep.mubr.msk.f32.mxu1 %vm805_vm0, %v806_v2  ;;  %v83_v5 = vshrl.u32 %v82_v0, 7  ;;  %v720_v11 = vpack.c.bf16 %v67_v8, %v66_v7  ;;  %v58_v12 = vld [vmem:[%s1094_s0 + $0x2] sm:$0x3]  ;;  %v59_v13 = vld [vmem:[%s1094_s0 + $0x4] sm:$0x3]  ;;  %v503_v26 = vld [vmem:[%s1100_s6 + $0x8] sm:$0xff] }
  0x29   :  { %v60_v14 = vld [vmem:[%s1094_s0 + $0x6] sm:$0x3]  ;;  %v77_v15 = vcombine.low %v57_v9, %v58_v12  ;;  %v61_v17 = vld [vmem:[%s1094_s0 + $0x8] sm:$0x3]  ;;  %v62_v18 = vld [vmem:[%s1094_s0 + $0xa] sm:$0x3] }
  0x2a   :  { %v81_v6 = vunpack.c.0.s8 %v80_v4  ;;  %v78_v16 = vcombine.low %v59_v13, %v60_v14  ;;  %v63_v19 = vld [vmem:[%s1094_s0 + $0xc] sm:$0x3]  ;;  %721 = vmatpush3.bf16.msra.mxu0 %v720_v11  ;;  %v64_v20 = vld [vmem:[%s1094_s0 + $0xe] sm:$0x3]  ;;  %v94_v21 = vcombine.low %v61_v17, %v62_v18  ;;  %v502_v25 = vld [vmem:[%s1100_s6] sm:$0xff]  ;;  %vm517_vm2 = vcmask 523264  }
  0x2b   :  { %v95_v24 = vcombine.low %v63_v19, %v64_v20  ;;  %v273_v27 = vld [vmem:[#allocation2] sm:$0xff]  ;;  %v728_v29 = vpack.c.bf16 %v503_v26, %v502_v25  ;;  %v274_v30 = vld [vmem:[#allocation2 + $0x8] sm:$0xff]  ;;  %v504_v31 = vld [vmem:[%s1100_s6 + $0x10] sm:$0xff]  ;;  %vm277_vm3 = vcmask 261120   ;;  %vm488_vm4 = vcmask 254976  }
  0x2c   :  { %v895_v10 = vsub.s32 %v81_v6, %v83_v5  ;;  %v505_v32 = vld [vmem:[%s1100_s6 + $0x18] sm:$0xff]  ;;  %v723_v35 = vpack.c.bf16 %v274_v30, %v273_v27  ;;  %v629_v38 = vld.sshfl [vmem:[%s1094_s0 + $0x10] sm:$0x3 pattern:$0x76325410]  ;;  %v506_v42 = vld [vmem:[%s1100_s6 + $0x20] sm:$0xff] }
  0x2d   :  { %v732_v36 = vpack.c.bf16 %v505_v32, %v504_v31  ;;  %729 = vmatprep.subr.bf16.mxu0 %v728_v29  ;;  %v275_v39 = vld [vmem:[#allocation2 + $0x10] sm:$0xff]  ;;  %v276_v40 = vld [vmem:[#allocation2 + $0x18] sm:$0xff]  ;;  %v507_v43 = vld [vmem:[%s1100_s6 + $0x28] sm:$0xff] }
  0x2e   :  { %v85_v22 = vrot.slane %v77_v15, %v895_v10  ;;  %v92_v23 = vrot.slane %v78_v16, %v895_v10  ;;  %v102_v28 = vrot.slane %v94_v21, %v895_v10  ;;  %v109_v34 = vrot.slane %v95_v24, %v895_v10  ;;  %724 = vmatpush3.bf16.msra.mxu1 %v723_v35  ;;  %v508_v45 = vld [vmem:[%s1100_s6 + $0x30] sm:$0xff]  ;;  %v509_v46 = vld [vmem:[%s1100_s6 + $0x38] sm:$0xff]  ;;  %v498_v48 = vld [vmem:[%s1099_s5] sm:$0xff] }
  0x2f   :  { %725 = vmatprep.subr.bf16.mxu1 %v804_v1  ;;  %v726_v41 = vpack.c.bf16 %v276_v40, %v275_v39  ;;  %v736_v44 = vpack.c.bf16 %v507_v43, %v506_v42  ;;  %v740_v47 = vpack.c.bf16 %v509_v46, %v508_v45  ;;  %v499_v49 = vld [vmem:[%s1099_s5 + $0x8] sm:$0xff]  ;;  %v500_v50 = vld [vmem:[%s1099_s5 + $0x10] sm:$0xff]  ;;  %v501_v51 = vld [vmem:[%s1099_s5 + $0x18] sm:$0xff] }
  0x30   :  { %v93_v33 = vcombine.low %v85_v22, %v92_v23  ;;  %v110_v37 = vcombine.low %v102_v28, %v109_v34  ;;  %v208_v52 = vld [vmem:[%s1097_s3] sm:$0x3]  ;;  %v209_v53 = vld [vmem:[%s1097_s3 + $0x2] sm:$0x3]  ;;  %v210_v54 = vld [vmem:[%s1097_s3 + $0x4] sm:$0x3] }
  0x31   :  { %v211_v55 = vld [vmem:[%s1097_s3 + $0x6] sm:$0x3]  ;;  %v226_v56 = vcombine.low %v208_v52, %v209_v53  ;;  %v212_v58 = vld [vmem:[%s1097_s3 + $0x8] sm:$0x3]  ;;  %v213_v59 = vld [vmem:[%s1097_s3 + $0xa] sm:$0x3] }
  0x32   :  { %672 = vmatmul.mubr.msk.f32.vlgmr.msra.gmra.mrb[0].mxu0 %vm118_vm1, %v93_v33  ;;  %727 = vmatpush3.bf16.msra.mxu1 %v726_v41  ;;  %v227_v57 = vcombine.low %v210_v54, %v211_v55  ;;  %v214_v60 = vld [vmem:[%s1097_s3 + $0xc] sm:$0x3]  ;;  %v215_v61 = vld [vmem:[%s1097_s3 + $0xe] sm:$0x3]  ;;  %v243_v0 = vcombine.low %v212_v58, %v213_v59  ;;  %v638_v22 = vld [vmem:[#allocation4] ss:$0 sm:$0xff] }
  0x33   :  { %674 = vmatprep.mubr.msk.f32.mxu0 %vm805_vm0, %v806_v2  ;;  %731 = vmatpush3.bf16.msra.mxu0 %v728_v29  ;;  %v234_v62 = vrot.slane %v226_v56, %v895_v10  ;;  %v244_v1 = vcombine.low %v214_v60, %v215_v61  ;;  %v633_v17 = vld.sshfl [vmem:[%s1097_s3 + $0x10] sm:$0x3 pattern:$0x76325410]  ;;  %v370_v29 = vld [vmem:[%s1098_s4] sm:$0x3] }
  0x34   :  { %733 = vmatprep.subr.bf16.mxu0 %v732_v36  ;;  %v241_v63 = vrot.slane %v227_v57, %v895_v10  ;;  %v251_v4 = vrot.slane %v243_v0, %v895_v10  ;;  %v371_v30 = vld [vmem:[%s1098_s4 + $0x2] sm:$0x3]  ;;  %v372_v31 = vld [vmem:[%s1098_s4 + $0x4] sm:$0x3]  ;;  %v373_v32 = vld [vmem:[%s1098_s4 + $0x6] sm:$0x3] }
  0x35   :  { %v258_v5 = vrot.slane %v244_v1, %v895_v10  ;;  %v388_v33 = vcombine.low %v370_v29, %v371_v30  ;;  %v389_v34 = vcombine.low %v372_v31, %v373_v32  ;;  %v374_v35 = vld [vmem:[%s1098_s4 + $0x8] sm:$0x3]  ;;  %v637_v60 = vld.sshfl [vmem:[%s1098_s4 + $0x10] sm:$0x3 pattern:$0x76325410] }
  0x36   :  { %675 = vmatmul.mubr.msk.f32.gmra.mrb[2].mxu0 %vm118_vm1, %v110_v37  ;;  %v242_v3 = vcombine.low %v234_v62, %v241_v63  ;;  %v376_v37 = vld [vmem:[%s1098_s4 + $0xc] sm:$0x3] }
  0x37   :  { %677 = vmatprep.mubr.msk.f32.mxu0 %vm805_vm0, %v806_v2  ;;  %735 = vmatpush3.bf16.msra.mxu0 %v732_v36  ;;  %v259_v11 = vcombine.low %v251_v4, %v258_v5  ;;  %v375_v36 = vld [vmem:[%s1098_s4 + $0xa] sm:$0x3]  ;;  %v396_v39 = vrot.slane %v388_v33, %v895_v10  ;;  %v403_v40 = vrot.slane %v389_v34, %v895_v10 }
  0x38   :  { %737 = vmatprep.subr.bf16.mxu0 %v736_v44  ;;  %v405_v41 = vcombine.low %v374_v35, %v375_v36 }
  0x39   :  { %v404_v43 = vcombine.low %v396_v39, %v403_v40 }
  0x3a   :  { %678 = vmatmul.mubr.msk.f32.gmra.mrb[4].mxu0 %vm118_vm1, %v629_v38  ;;  %v377_v38 = vld [vmem:[%s1098_s4 + $0xe] sm:$0x3] }
  0x3b   :  { %739 = vmatpush3.bf16.msra.mxu0 %v736_v44  ;;  %713 = vmatprep.mubr.msk.f32.mxu0 %vm517_vm2, %v498_v48  ;;  %v406_v42 = vcombine.low %v376_v37, %v377_v38  ;;  %v413_v44 = vrot.slane %v405_v41, %v895_v10 }
  0x3c   :  { %741 = vmatprep.subr.bf16.mxu0 %v740_v47 }
  0x3d   :  { %v420_v45 = vrot.slane %v406_v42, %v895_v10 }
  0x3f   :  { %743 = vmatpush3.bf16.msra.mxu0 %v740_v47 }
  0x42   :  { %714 = vmatmul.mubr.msk.f32.vlgmr.msra.gmra.mrb[6].mxu0 %vm517_vm2, %v499_v49 }
  0x43   :  { %716 = vmatprep.mubr.msk.f32.mxu0 %vm517_vm2, %v500_v50  ;;  %v421_v50 = vcombine.low %v413_v44, %v420_v45 }
  0x46   :  { %717 = vmatmul.mubr.msk.f32.gmra.mrb[8].mxu0 %vm517_vm2, %v501_v51 }
 0x105   :  { %v191_v6 = vpop.f32.mrb[0].mxu0 }
 0x106   :  { %v205_v7 = vmax.f32 %v191_v6, 0.0  ;;  %v673_v8 = vpop.f32.mrb[1].mxu0 }
 0x108   :  { %v270_v9 = vmul.f32 %v242_v3, %v205_v7 }
 0x109   :  { %v196_v12 = vpop.f32.mrb[2].mxu0 }
 0x10a   :  { %v206_v13 = vmax.f32 %v196_v12, 0.0  ;;  %v676_v14 = vpop.f32.mrb[3].mxu0  ;;  %689 = vmatmul.mubr.msk.f32.vlgmr.msra.gmra.mrb[0].mxu1 %vm277_vm3, %v270_v9 }
 0x10b   :  { %691 = vmatprep.mubr.msk.f32.mxu1 %vm805_vm0, %v806_v2 }
 0x10c   :  { %v271_v15 = vmul.f32 %v259_v11, %v206_v13 }
 0x10d   :  { %v201_v16 = vpop.f32.mrb[4].mxu0 }
 0x10e   :  { %v207_v18 = vmax.f32 %v201_v16, 0.0  ;;  %v679_v19 = vpop.f32.mrb[5].mxu0  ;;  %692 = vmatmul.mubr.msk.f32.gmra.mrb[2].mxu1 %vm277_vm3, %v271_v15 }
 0x10f   :  { %694 = vmatprep.mubr.msk.f32.mxu1 %vm805_vm0, %v806_v2 }
 0x110   :  { %v272_v20 = vmul.f32 %v633_v17, %v207_v18 }
 0x112   :  { %695 = vmatmul.mubr.msk.f32.gmra.mrb[4].mxu1 %vm277_vm3, %v272_v20 }
 0x115   :  { %v715_v21 = vpop.f32.mrb[6].mxu0 }
 0x116   :  { %v596_v23 = vpop.f32.mrb[7].mxu0  ;;  %v602_v24 = vadd.f32 %v715_v21, %v638_v22 }
 0x117   :  { %v597_v25 = vadd.f32 %v638_v22, %v596_v23 }
 0x118   :  { %616 = vst.msk [vmem:[%s1103_s9 + $0x8] sm:$0xff] %vm277_vm3, %v602_v24 }
 0x119   :  { %615 = vst.msk [vmem:[%s1103_s9] sm:$0xff] %vm277_vm3, %v597_v25  ;;  %v718_v26 = vpop.f32.mrb[8].mxu0 }
 0x11a   :  { %v606_v2 = vpop.f32.mrb[9].mxu0  ;;  %v612_v27 = vadd.f32 %v718_v26, %v638_v22 }
 0x11b   :  { %v607_v28 = vadd.f32 %v638_v22, %v606_v2 }
 0x11c   :  { %618 = vst.msk [vmem:[%s1103_s9 + $0x18] sm:$0xff] %vm277_vm3, %v612_v27 }
 0x11d   :  { %617 = vst.msk [vmem:[%s1103_s9 + $0x10] sm:$0xff] %vm277_vm3, %v607_v28 }
 0x1dd   :  { %v353_v46 = vpop.f32.mrb[0].mxu1 }
 0x1de   :  { %v367_v47 = vmax.f32 %v353_v46, 0.0  ;;  %v690_v48 = vpop.f32.mrb[1].mxu1 }
 0x1e0   :  { %v432_v49 = vmul.f32 %v404_v43, %v367_v47 }
 0x1e1   :  { %v358_v51 = vpop.f32.mrb[2].mxu1 }
 0x1e2   :  { %v438_v52 = vcombine.high %v432_v49, %v432_v49  ;;  %v445_v53 = vrot.slane %v432_v49, %v895_v10  ;;  %v368_v54 = vmax.f32 %v358_v51, 0.0  ;;  %v693_v55 = vpop.f32.mrb[3].mxu1 }
 0x1e4   :  { %v452_v56 = vrot.slane %v438_v52, %v895_v10  ;;  %v453_v57 = vcombine.high %v445_v53, %v445_v53  ;;  %489 = vst.msk [vmem:[%s1102_s8] sm:$0x3] %vm488_vm4, %v445_v53  ;;  %v433_v58 = vmul.f32 %v421_v50, %v368_v54 }
 0x1e5   :  { %v363_v59 = vpop.f32.mrb[4].mxu1 }
 0x1e6   :  { %v454_v61 = vcombine.high %v452_v56, %v452_v56  ;;  %490 = vst.msk [vmem:[%s1102_s8 + $0x2] sm:$0x3] %vm488_vm4, %v453_v57  ;;  %491 = vst.msk [vmem:[%s1102_s8 + $0x4] sm:$0x3] %vm488_vm4, %v452_v56  ;;  %v455_v62 = vcombine.high %v433_v58, %v433_v58  ;;  %v462_v63 = vrot.slane %v433_v58, %v895_v10  ;;  %v369_v0 = vmax.f32 %v363_v59, 0.0  ;;  %v696_v1 = vpop.f32.mrb[5].mxu1 }
 0x1e8   :  { %492 = vst.msk [vmem:[%s1102_s8 + $0x6] sm:$0x3] %vm488_vm4, %v454_v61  ;;  %v469_v3 = vrot.slane %v455_v62, %v895_v10  ;;  %v470_v4 = vcombine.high %v462_v63, %v462_v63  ;;  %493 = vst.msk [vmem:[%s1102_s8 + $0x8] sm:$0x3] %vm488_vm4, %v462_v63  ;;  %v434_v5 = vmul.f32 %v637_v60, %v369_v0 }
 0x1ea   :  { %v471_v6 = vcombine.high %v469_v3, %v469_v3  ;;  %494 = vst.msk [vmem:[%s1102_s8 + $0xa] sm:$0x3] %vm488_vm4, %v470_v4  ;;  %495 = vst.msk [vmem:[%s1102_s8 + $0xc] sm:$0x3] %vm488_vm4, %v469_v3  ;;  %v478_v7 = vrot.slane %v434_v5, %v895_v10 }
 0x1ec   :  { %496 = vst.msk [vmem:[%s1102_s8 + $0xe] sm:$0x3] %vm488_vm4, %v471_v6  ;;  %497 = vst.msk [vmem:[%s1102_s8 + $0x10] sm:$0x3] %vm488_vm4, %v478_v7 }
 0x1ed   :  { %627 = vsyncpa [#allocation3], 1 }
 0x1ee   :  { %628 = vsyncpa [#allocation5], 1 }

// kernel: decoder_forward.5
= control target key start
LH: loop header
LB: loop body
LE: loop exit
PB: predicated region body
PF: predicated region fallthrough
CT: control target
= control target key end

     0   :  { %vm75_vm0 = vcmask 517120   ;;  %v23948_v3 = vmov 0.0   ;;  %vm72_vm1 = vcmask 123904   ;;  %vm631_vm2 = vcmask 261120   ;;  %s23922_s4 = inlined_call_operand.vmem [shape: f32[64,512], index: 4, kind: input, shape index: {}]   ;;  %s23923_s3 = inlined_call_operand.vmem [shape: f32[32,512], index: 3, kind: input, shape index: {}]   ;;  %s23924_s5 = inlined_call_operand.vmem [shape: f32[128,512], index: 5, kind: input, shape index: {}]   ;;  %s23925_s0 = inlined_call_operand.vmem [shape: f32[8,2,32], index: 0, kind: input, shape index: {}]   ;;  %s23926_s12 = inlined_call_operand.vmem [shape: f32[32,512], index: 12, kind: input, shape index: {}]   ;;  %s23927_s11 = inlined_call_operand.vmem [shape: f32[128,512], index: 11, kind: input, shape index: {}]   ;;  %s23928_s13 = inlined_call_operand.vmem [shape: f32[512,16], index: 13, kind: input, shape index: {}]   ;;  %s23929_s6 = inlined_call_operand.vmem [shape: f32[1,512], index: 6, kind: input, shape index: {}]   ;;  %s23930_s17 = inlined_call_operand.vmem [shape: f32[8,2,128], index: 17, kind: input, shape index: {}]   ;;  %s23931_s2 = inlined_call_operand.vmem [shape: f32[2,512], index: 2, kind: input, shape index: {}]   ;;  %s23932_s1 = inlined_call_operand.vmem [shape: f32[2,16,64], index: 1, kind: input, shape index: {}]   ;;  %s23933_s8 = inlined_call_operand.vmem [shape: f32[64,512], index: 8, kind: input, shape index: {}]   ;;  %s23934_s20 = inlined_call_operand.vmem [shape: f32[8,2,16], index: 20, kind: output, shape index: {1}]   ;;  %s23935_s7 = inlined_call_operand.vmem [shape: f32[32,512], index: 7, kind: input, shape index: {}]   ;;  %s23936_s9 = inlined_call_operand.vmem [shape: f32[128,512], index: 9, kind: input, shape index: {}]   ;;  %s23937_s15 = inlined_call_operand.vmem [shape: f32[64,32], index: 15, kind: input, shape index: {}]   ;;  %s23938_s14 = inlined_call_operand.vmem [shape: f32[128,32], index: 14, kind: input, shape index: {}]   ;;  %s23939_s10 = inlined_call_operand.vmem [shape: f32[1,512], index: 10, kind: input, shape index: {}]   ;;  %s23940_s18 = inlined_call_operand.vmem [shape: f32[8,2,128], index: 18, kind: input, shape index: {}]   ;;  %s23941_s16 = inlined_call_operand.vmem [shape: f32[1,32], index: 16, kind: input, shape index: {}]   ;;  %s23942_s19 = inlined_call_operand.vmem [shape: f32[8,2,32], index: 19, kind: output, shape index: {0}]  }
   0x1   :  { %24405 = sst [smem:[#allocation224_spill]] %s23922_s4  ;;  %699 = vmatprep.mubr.f32.mxu0 %v23948_v3  ;;  %68 = vst [vmem:[#allocation2] sm:$0x3] %v23948_v3  ;;  %69 = vst [vmem:[#allocation3] sm:$0x3] %v23948_v3  ;;  %553 = vmatprep.mubr.f32.mxu1 %v23948_v3  ;;  %vm485_vm3 = vcmask 523264  }
   0x2   :  { %24406 = sst [smem:[#allocation225_spill]] %s23923_s3  ;;  %s24410_s23 = sld [smem:[#allocation224_spill]]  ;;  %70 = vst [vmem:[#allocation4] sm:$0x3] %v23948_v3  ;;  %71 = vst [vmem:[#allocation5] sm:$0x3] %v23948_v3 }
   0x3   :  { %24407 = sst [smem:[#allocation226_spill]] %s23924_s5  ;;  %s24411_s26 = sld [smem:[#allocation225_spill]]  ;;  %76 = vst.msk [vmem:[#allocation8] sm:$0x3] %vm75_vm0, %v23948_v3  ;;  %vm978_vm4 = vcmask 130048   ;;  %vm19507_vm5 = vmmov 0  }
   0x4   :  { %24408 = sst [smem:[#allocation227_spill]] %s23925_s0  ;;  %74 = vst.msk [vmem:[#allocation7] sm:$0x3] %vm72_vm1, %v23948_v3  ;;  %73 = vst.msk [vmem:[#allocation6] sm:$0x3] %vm72_vm1, %v23948_v3  ;;  %s24421_s21 = sld [smem:[#allocation226_spill]] }
   0x5   :  { %24409 = sst [smem:[#allocation228_spill]] %s23926_s12  ;;  %s24423_s12 = sld [smem:[#allocation227_spill]]  ;;  %vm1620_vm6 = vcmask 1041409   ;;  %vm2252_vm7 = vcmask 254976  }
   0x6   :  { %s19504_s4 = smov 16   ;;  %s24470_s0 = sld [smem:[#allocation228_spill]] }
   0x8   :  { %v99_v0 = vld [vmem:[%s24410_s23 + $0x8] sm:$0xff]  ;;  %v98_v6 = vld [vmem:[%s24410_s23] sm:$0xff]  ;;  %v101_v48 = vld [vmem:[%s24410_s23 + $0x18] sm:$0xff] }
   0x9   :  { %v103_v1 = vld [vmem:[%s24410_s23 + $0x28] sm:$0xff]  ;;  %v102_v7 = vld [vmem:[%s24410_s23 + $0x20] sm:$0xff]  ;;  %v105_v49 = vld [vmem:[%s24410_s23 + $0x38] sm:$0xff] }
   0xa   :  { %v83_v2 = vld [vmem:[%s24411_s26 + $0x8] sm:$0xff]  ;;  %v19631_v4 = vpack.c.bf16 %v103_v1, %v99_v0  ;;  %v19648_v9 = vpack.c.bf16 %v102_v7, %v98_v6  ;;  %v82_v10 = vld [vmem:[%s24411_s26] sm:$0xff]  ;;  %v19786_v54 = vpack.c.bf16 %v105_v49, %v101_v48  ;;  %v100_v55 = vld [vmem:[%s24410_s23 + $0x10] sm:$0xff] }
   0xb   :  { %v87_v5 = vld [vmem:[%s24411_s26 + $0x28] sm:$0xff]  ;;  %v86_v11 = vld [vmem:[%s24411_s26 + $0x20] sm:$0xff]  ;;  %v104_v56 = vld [vmem:[%s24410_s23 + $0x30] sm:$0xff] }
   0xc   :  { %24412 = vst [vmem:[#allocation9_spill] sm:$0xff] %v19631_v4  ;;  %v19646_v8 = vpack.c.bf16 %v87_v5, %v83_v2  ;;  %24414 = vst [vmem:[#allocation11_spill] sm:$0xff] %v19648_v9  ;;  %v107_v12 = vld [vmem:[%s24410_s23 + $0x48] sm:$0xff]  ;;  %15700 = vmatprep.subr.bf16.mxu1 %v19631_v4  ;;  %v19660_v13 = vpack.c.bf16 %v86_v11, %v82_v10  ;;  %v106_v19 = vld [vmem:[%s24410_s23 + $0x40] sm:$0xff]  ;;  %v19819_v1 = vpack.c.bf16 %v104_v56, %v100_v55 }
   0xd   :  { %v111_v14 = vld [vmem:[%s24410_s23 + $0x68] sm:$0xff]  ;;  %15702 = vmatpush1.bf16.msra.mxu1 %v19648_v9  ;;  %v110_v20 = vld [vmem:[%s24410_s23 + $0x60] sm:$0xff]  ;;  %24430 = vst [vmem:[#allocation25_spill] sm:$0xff] %v19786_v54  ;;  %v109_v60 = vld [vmem:[%s24410_s23 + $0x58] sm:$0xff] }
   0xe   :  { %24413 = vst [vmem:[#allocation10_spill] sm:$0xff] %v19646_v8  ;;  %24415 = vst [vmem:[#allocation12_spill] sm:$0xff] %v19660_v13  ;;  %v91_v15 = vld [vmem:[%s24411_s26 + $0x48] sm:$0xff]  ;;  %15732 = vmatprep.subr.bf16.mxu0 %v19646_v8  ;;  %v19673_v17 = vpack.c.bf16 %v111_v14, %v107_v12  ;;  %v90_v21 = vld [vmem:[%s24411_s26 + $0x40] sm:$0xff]  ;;  %v19687_v22 = vpack.c.bf16 %v110_v20, %v106_v19 }
   0xf   :  { %v95_v16 = vld [vmem:[%s24411_s26 + $0x68] sm:$0xff]  ;;  %15734 = vmatpush1.bf16.msra.mxu0 %v19660_v13  ;;  %v94_v23 = vld [vmem:[%s24411_s26 + $0x60] sm:$0xff]  ;;  %v113_v61 = vld [vmem:[%s24410_s23 + $0x78] sm:$0xff]  ;;  %24432 = vst [vmem:[#allocation27_spill] sm:$0xff] %v19819_v1 }
  0x10   :  { %24416 = vst [vmem:[#allocation13_spill] sm:$0xff] %v19673_v17  ;;  %v19675_v18 = vpack.c.bf16 %v95_v16, %v91_v15  ;;  %24418 = vst [vmem:[#allocation15_spill] sm:$0xff] %v19687_v22  ;;  %v115_v24 = vld [vmem:[%s24410_s23 + $0x88] sm:$0xff]  ;;  %15704 = vmatprep.subr.bf16.mxu1 %v19673_v17  ;;  %v19700_v26 = vpack.c.bf16 %v94_v23, %v90_v21  ;;  %v114_v30 = vld [vmem:[%s24410_s23 + $0x80] sm:$0xff]  ;;  %v19825_v5 = vpack.c.bf16 %v113_v61, %v109_v60 }
  0x11   :  { %v119_v25 = vld [vmem:[%s24410_s23 + $0xa8] sm:$0xff]  ;;  %v118_v32 = vld [vmem:[%s24410_s23 + $0xa0] sm:$0xff]  ;;  %15706 = vmatpush1.bf16.msra.mxu1 %v19687_v22  ;;  %v108_v6 = vld [vmem:[%s24410_s23 + $0x50] sm:$0xff] }
  0x12   :  { %24417 = vst [vmem:[#allocation14_spill] sm:$0xff] %v19675_v18  ;;  %15736 = vmatprep.subr.bf16.mxu0 %v19675_v18  ;;  %24419 = vst [vmem:[#allocation16_spill] sm:$0xff] %v19700_v26  ;;  %v19702_v27 = vpack.c.bf16 %v119_v25, %v115_v24  ;;  %v131_v28 = vld [vmem:[%s24421_s21 + $0x8] sm:$0xff]  ;;  %v19721_v33 = vld [vmem:[%s24423_s12] sm:$0x3]  ;;  %v19727_v35 = vpack.c.bf16 %v118_v32, %v114_v30 }
  0x13   :  { %v135_v29 = vld [vmem:[%s24421_s21 + $0x28] sm:$0xff]  ;;  %v130_v34 = vld [vmem:[%s24421_s21] sm:$0xff]  ;;  %15738 = vmatpush1.bf16.msra.mxu0 %v19700_v26  ;;  %24434 = vst [vmem:[#allocation29_spill] sm:$0xff] %v19825_v5  ;;  %v112_v7 = vld [vmem:[%s24410_s23 + $0x70] sm:$0xff] }
  0x14   :  { %24420 = vst [vmem:[#allocation17_spill] sm:$0xff] %v19702_v27  ;;  %v19713_v31 = vpack.c.bf16 %v135_v29, %v131_v28  ;;  %24424 = vst [vmem:[#allocation19_spill] sm:$0xff] %v19727_v35  ;;  %v134_v36 = vld [vmem:[%s24421_s21 + $0x20] sm:$0xff]  ;;  %v123_v37 = vld [vmem:[%s24410_s23 + $0xc8] sm:$0xff]  ;;  %15708 = vmatprep.subr.bf16.mxu1 %v19702_v27  ;;  %v19857_v20 = vpack.c.bf16 %v112_v7, %v108_v6 }
  0x15   :  { %v127_v38 = vld [vmem:[%s24410_s23 + $0xe8] sm:$0xff]  ;;  %v19740_v39 = vpack.c.bf16 %v134_v36, %v130_v34  ;;  %v122_v43 = vld [vmem:[%s24410_s23 + $0xc0] sm:$0xff]  ;;  %15710 = vmatpush1.bf16.msra.mxu1 %v19727_v35  ;;  %v117_v14 = vld [vmem:[%s24410_s23 + $0x98] sm:$0xff] }
  0x16   :  { %24422 = vst [vmem:[#allocation18_spill] sm:$0xff] %v19713_v31  ;;  %v19742_v40 = vpack.c.bf16 %v127_v38, %v123_v37  ;;  %v139_v41 = vld [vmem:[%s24421_s21 + $0x48] sm:$0xff]  ;;  %15748 = vmatprep.subr.bf16.mxu0 %v19713_v31  ;;  %v126_v45 = vld [vmem:[%s24410_s23 + $0xe0] sm:$0xff]  ;;  %14153 = vmatmul.mubr.msk.f32.vlgmr.msra.gmra.mrb[0].mxu0 %vm631_vm2, %v19721_v33  ;;  %v121_v15 = vld [vmem:[%s24410_s23 + $0xb8] sm:$0xff] }
  0x17   :  { %24425 = vst [vmem:[#allocation20_spill] sm:$0xff] %v19740_v39  ;;  %v143_v42 = vld [vmem:[%s24421_s21 + $0x68] sm:$0xff]  ;;  %v138_v46 = vld [vmem:[%s24421_s21 + $0x40] sm:$0xff]  ;;  %v19774_v50 = vpack.c.bf16 %v126_v45, %v122_v43  ;;  %15750 = vmatpush1.bf16.msra.mxu0 %v19740_v39  ;;  %841 = vmatprep.mubr.f32.mxu0 %v23948_v3  ;;  %24436 = vst [vmem:[#allocation31_spill] sm:$0xff] %v19857_v20  ;;  %v19864_v23 = vpack.c.bf16 %v121_v15, %v117_v14 }
  0x18   :  { %24426 = vst [vmem:[#allocation21_spill] sm:$0xff] %v19742_v40  ;;  %v19754_v44 = vpack.c.bf16 %v143_v42, %v139_v41  ;;  %v142_v47 = vld [vmem:[%s24421_s21 + $0x60] sm:$0xff]  ;;  %v147_v51 = vld [vmem:[%s24421_s21 + $0x88] sm:$0xff]  ;;  %15712 = vmatprep.subr.bf16.mxu1 %v19742_v40  ;;  %v116_v24 = vld [vmem:[%s24410_s23 + $0x90] sm:$0xff] }
  0x19   :  { %24428 = vst [vmem:[#allocation23_spill] sm:$0xff] %v19774_v50  ;;  %v151_v52 = vld [vmem:[%s24421_s21 + $0xa8] sm:$0xff]  ;;  %v19784_v53 = vpack.c.bf16 %v142_v47, %v138_v46  ;;  %v146_v57 = vld [vmem:[%s24421_s21 + $0x80] sm:$0xff]  ;;  %15714 = vmatpush1.bf16.msra.mxu1 %v19774_v50  ;;  %24438 = vst [vmem:[#allocation33_spill] sm:$0xff] %v19864_v23 }
  0x1a   :  { %24427 = vst [vmem:[#allocation22_spill] sm:$0xff] %v19754_v44  ;;  %15752 = vmatprep.subr.bf16.mxu0 %v19754_v44  ;;  %v19798_v58 = vpack.c.bf16 %v151_v52, %v147_v51  ;;  %v150_v59 = vld [vmem:[%s24421_s21 + $0xa0] sm:$0xff]  ;;  %v155_v62 = vld [vmem:[%s24421_s21 + $0xc8] sm:$0xff]  ;;  %15716 = vmatprep.subr.bf16.mxu1 %v19786_v54  ;;  %v120_v25 = vld [vmem:[%s24410_s23 + $0xb0] sm:$0xff] }
  0x1b   :  { %24429 = vst [vmem:[#allocation24_spill] sm:$0xff] %v19784_v53  ;;  %v159_v63 = vld [vmem:[%s24421_s21 + $0xe8] sm:$0xff]  ;;  %15754 = vmatpush1.bf16.msra.mxu0 %v19784_v53  ;;  %v19823_v2 = vpack.c.bf16 %v150_v59, %v146_v57  ;;  %v154_v10 = vld [vmem:[%s24421_s21 + $0xc0] sm:$0xff]  ;;  %v125_v32 = vld [vmem:[%s24410_s23 + $0xd8] sm:$0xff]  ;;  %v19894_v38 = vpack.c.bf16 %v120_v25, %v116_v24 }
  0x1c   :  { %24431 = vst [vmem:[#allocation26_spill] sm:$0xff] %v19798_v58  ;;  %v19817_v0 = vld [vmem:[#allocation8] sm:$0x3]  ;;  %15756 = vmatprep.subr.bf16.mxu0 %v19798_v58  ;;  %v19837_v11 = vpack.c.bf16 %v159_v63, %v155_v62  ;;  %v158_v12 = vld [vmem:[%s24421_s21 + $0xe0] sm:$0xff]  ;;  %v129_v34 = vld [vmem:[%s24410_s23 + $0xf8] sm:$0xff] }
  0x1d   :  { %24433 = vst [vmem:[#allocation28_spill] sm:$0xff] %v19823_v2  ;;  %14151 = vmatmul.mubr.msk.f32.vlgmr.msra.gmra.mrb[0].mxu1 %vm485_vm3, %v19817_v0  ;;  %v163_v16 = vld [vmem:[%s24421_s21 + $0x108] sm:$0xff]  ;;  %v19862_v21 = vpack.c.bf16 %v158_v12, %v154_v10  ;;  %v162_v28 = vld [vmem:[%s24421_s21 + $0x100] sm:$0xff]  ;;  %24440 = vst [vmem:[#allocation35_spill] sm:$0xff] %v19894_v38  ;;  %v19900_v42 = vpack.c.bf16 %v129_v34, %v125_v32 }
  0x1e   :  { %24435 = vst [vmem:[#allocation30_spill] sm:$0xff] %v19837_v11  ;;  %v167_v19 = vld [vmem:[%s24421_s21 + $0x128] sm:$0xff]  ;;  %15718 = vmatpush1.bf16.msra.mxu1 %v19819_v1  ;;  %624 = vmatprep.mubr.f32.mxu1 %v23948_v3  ;;  %v166_v30 = vld [vmem:[%s24421_s21 + $0x120] sm:$0xff]  ;;  %v124_v43 = vld [vmem:[%s24410_s23 + $0xd0] sm:$0xff] }
  0x1f   :  { %15758 = vmatpush1.bf16.msra.mxu0 %v19823_v2  ;;  %15720 = vmatprep.subr.bf16.mxu1 %v19825_v5  ;;  %24437 = vst [vmem:[#allocation32_spill] sm:$0xff] %v19862_v21  ;;  %v19876_v29 = vpack.c.bf16 %v167_v19, %v163_v16  ;;  %v171_v36 = vld [vmem:[%s24421_s21 + $0x148] sm:$0xff]  ;;  %v19898_v41 = vpack.c.bf16 %v166_v30, %v162_v28  ;;  %24442 = vst [vmem:[#allocation37_spill] sm:$0xff] %v19900_v42  ;;  %v128_v45 = vld [vmem:[%s24410_s23 + $0xf0] sm:$0xff] }
  0x20   :  { %15760 = vmatprep.subr.bf16.mxu0 %v19837_v11  ;;  %v175_v37 = vld [vmem:[%s24421_s21 + $0x168] sm:$0xff]  ;;  %v170_v46 = vld [vmem:[%s24421_s21 + $0x140] sm:$0xff]  ;;  %v85_v49 = vld [vmem:[%s24411_s26 + $0x18] sm:$0xff]  ;;  %v19930_v56 = vpack.c.bf16 %v128_v45, %v124_v43 }
  0x21   :  { %24439 = vst [vmem:[#allocation34_spill] sm:$0xff] %v19876_v29  ;;  %24441 = vst [vmem:[#allocation36_spill] sm:$0xff] %v19898_v41  ;;  %v19912_v47 = vpack.c.bf16 %v175_v37, %v171_v36  ;;  %v174_v48 = vld [vmem:[%s24421_s21 + $0x160] sm:$0xff]  ;;  %v89_v51 = vld [vmem:[%s24411_s26 + $0x38] sm:$0xff] }
  0x22   :  { %15722 = vmatpush1.bf16.msra.mxu1 %v19857_v20  ;;  %v179_v52 = vld [vmem:[%s24421_s21 + $0x188] sm:$0xff]  ;;  %24444 = vst [vmem:[#allocation39_spill] sm:$0xff] %v19930_v56  ;;  %v19934_v57 = vpack.c.bf16 %v174_v48, %v170_v46  ;;  %v19936_v59 = vpack.c.bf16 %v89_v51, %v85_v49  ;;  %v84_v60 = vld [vmem:[%s24411_s26 + $0x10] sm:$0xff]  ;;  %v178_v62 = vld [vmem:[%s24421_s21 + $0x180] sm:$0xff] }
  0x23   :  { %15762 = vmatpush1.bf16.msra.mxu0 %v19862_v21  ;;  %15724 = vmatprep.subr.bf16.mxu1 %v19864_v23  ;;  %24443 = vst [vmem:[#allocation38_spill] sm:$0xff] %v19912_v47  ;;  %v183_v55 = vld [vmem:[%s24421_s21 + $0x1a8] sm:$0xff]  ;;  %v88_v61 = vld [vmem:[%s24411_s26 + $0x30] sm:$0xff]  ;;  %v182_v6 = vld [vmem:[%s24421_s21 + $0x1a0] sm:$0xff] }
  0x24   :  { %15764 = vmatprep.subr.bf16.mxu0 %v19876_v29  ;;  %24445 = vst [vmem:[#allocation40_spill] sm:$0xff] %v19934_v57  ;;  %24446 = vst [vmem:[#allocation41_spill] sm:$0xff] %v19936_v59  ;;  %v19948_v63 = vpack.c.bf16 %v183_v55, %v179_v52  ;;  %v93_v7 = vld [vmem:[%s24411_s26 + $0x58] sm:$0xff]  ;;  %v187_v12 = vld [vmem:[%s24421_s21 + $0x1c8] sm:$0xff]  ;;  %v19966_v15 = vpack.c.bf16 %v88_v61, %v84_v60  ;;  %v19970_v16 = vpack.c.bf16 %v182_v6, %v178_v62 }
  0x25   :  { %v97_v10 = vld [vmem:[%s24411_s26 + $0x78] sm:$0xff]  ;;  %v191_v14 = vld [vmem:[%s24421_s21 + $0x1e8] sm:$0xff]  ;;  %v92_v24 = vld [vmem:[%s24411_s26 + $0x50] sm:$0xff] }
  0x26   :  { %15726 = vmatpush1.bf16.msra.mxu1 %v19894_v38  ;;  %24447 = vst [vmem:[#allocation42_spill] sm:$0xff] %v19948_v63  ;;  %24448 = vst [vmem:[#allocation43_spill] sm:$0xff] %v19966_v15  ;;  %v19972_v19 = vpack.c.bf16 %v97_v10, %v93_v7  ;;  %v96_v25 = vld [vmem:[%s24411_s26 + $0x70] sm:$0xff]  ;;  %v186_v28 = vld [vmem:[%s24421_s21 + $0x1c0] sm:$0xff]  ;;  %v19984_v30 = vpack.c.bf16 %v191_v14, %v187_v12 }
  0x27   :  { %15766 = vmatpush1.bf16.msra.mxu0 %v19898_v41  ;;  %15728 = vmatprep.subr.bf16.mxu1 %v19900_v42  ;;  %24449 = vst [vmem:[#allocation44_spill] sm:$0xff] %v19970_v16  ;;  %v190_v32 = vld [vmem:[%s24421_s21 + $0x1e0] sm:$0xff]  ;;  %v133_v34 = vld [vmem:[%s24421_s21 + $0x18] sm:$0xff]  ;;  %v19998_v37 = vpack.c.bf16 %v96_v25, %v92_v24  ;;  %v132_v46 = vld [vmem:[%s24421_s21 + $0x10] sm:$0xff] }
  0x28   :  { %15768 = vmatprep.subr.bf16.mxu0 %v19912_v47  ;;  %24450 = vst [vmem:[#allocation45_spill] sm:$0xff] %v19972_v19  ;;  %24451 = vst [vmem:[#allocation46_spill] sm:$0xff] %v19984_v30  ;;  %v137_v36 = vld [vmem:[%s24421_s21 + $0x38] sm:$0xff]  ;;  %v20003_v43 = vpack.c.bf16 %v190_v32, %v186_v28  ;;  %v482_v51 = vld [vmem:[#allocation7] sm:$0x3] }
  0x29   :  { %24452 = vst [vmem:[#allocation47_spill] sm:$0xff] %v19998_v37  ;;  %v20005_v45 = vpack.c.bf16 %v137_v36, %v133_v34  ;;  %v141_v48 = vld [vmem:[%s24421_s21 + $0x58] sm:$0xff]  ;;  %975 = vrot.lane.b32.xlu0 %v482_v51, %s19504_s4  ;;  %v477_v55 = vld [vmem:[#allocation2] sm:$0x3]  ;;  %v140_v61 = vld [vmem:[%s24421_s21 + $0x50] sm:$0xff] }
  0x2a   :  { %15730 = vmatpush1.bf16.msra.mxu1 %v19930_v56  ;;  %24453 = vst [vmem:[#allocation48_spill] sm:$0xff] %v20003_v43  ;;  %v145_v49 = vld [vmem:[%s24421_s21 + $0x78] sm:$0xff]  ;;  %v144_v62 = vld [vmem:[%s24421_s21 + $0x70] sm:$0xff] }
  0x2b   :  { %15770 = vmatpush1.bf16.msra.mxu0 %v19934_v57  ;;  %15740 = vmatprep.subr.bf16.mxu1 %v19936_v59  ;;  %24454 = vst [vmem:[#allocation49_spill] sm:$0xff] %v20005_v45  ;;  %v20026_v60 = vpack.c.bf16 %v145_v49, %v141_v48  ;;  %v149_v6 = vld [vmem:[%s24421_s21 + $0x98] sm:$0xff]  ;;  %v20043_v10 = vpack.c.bf16 %v144_v62, %v140_v61  ;;  %v148_v14 = vld [vmem:[%s24421_s21 + $0x90] sm:$0xff] }
  0x2c   :  { %15772 = vmatprep.subr.bf16.mxu0 %v19948_v63  ;;  %v153_v7 = vld [vmem:[%s24421_s21 + $0xb8] sm:$0xff]  ;;  %v152_v24 = vld [vmem:[%s24421_s21 + $0xb0] sm:$0xff] }
  0x2d   :  { %14152 = vmatmul.mubr.msk.f32.vlgmr.msra.gmra.mrb[2].mxu1 %vm485_vm3, %v19817_v0  ;;  %v136_v0 = vld [vmem:[%s24421_s21 + $0x30] sm:$0xff]  ;;  %24456 = vst [vmem:[#allocation51_spill] sm:$0xff] %v20026_v60  ;;  %24457 = vst [vmem:[#allocation52_spill] sm:$0xff] %v20043_v10  ;;  %v20046_v12 = vpack.c.bf16 %v153_v7, %v149_v6  ;;  %v161_v25 = vld [vmem:[%s24421_s21 + $0xf8] sm:$0xff]  ;;  %v20063_v28 = vpack.c.bf16 %v152_v24, %v148_v14 }
  0x2e   :  { %15742 = vmatpush1.bf16.msra.mxu1 %v19966_v15  ;;  %770 = vmatprep.mubr.f32.mxu1 %v23948_v3  ;;  %v20022_v52 = vpack.c.bf16 %v136_v0, %v132_v46  ;;  %v156_v34 = vld [vmem:[%s24421_s21 + $0xd0] sm:$0xff]  ;;  %v165_v46 = vld [vmem:[%s24421_s21 + $0x118] sm:$0xff] }
  0x2f   :  { %15774 = vmatpush1.bf16.msra.mxu0 %v19970_v16  ;;  %15744 = vmatprep.subr.bf16.mxu1 %v19972_v19  ;;  %24458 = vst [vmem:[#allocation53_spill] sm:$0xff] %v20046_v12  ;;  %24459 = vst [vmem:[#allocation54_spill] sm:$0xff] %v20063_v28  ;;  %v160_v36 = vld [vmem:[%s24421_s21 + $0xf0] sm:$0xff]  ;;  %v169_v0 = vld [vmem:[%s24421_s21 + $0x138] sm:$0xff] }
  0x30   :  { %15776 = vmatprep.subr.bf16.mxu0 %v19984_v30  ;;  %24455 = vst [vmem:[#allocation50_spill] sm:$0xff] %v20022_v52  ;;  %v20081_v48 = vpack.c.bf16 %v160_v36, %v156_v34  ;;  %v20084_v49 = vpack.c.bf16 %v169_v0, %v165_v46  ;;  %v164_v51 = vld [vmem:[%s24421_s21 + $0x110] sm:$0xff]  ;;  %v173_v62 = vld [vmem:[%s24421_s21 + $0x158] sm:$0xff] }
  0x31   :  { %v168_v61 = vld [vmem:[%s24421_s21 + $0x130] sm:$0xff]  ;;  %v177_v6 = vld [vmem:[%s24421_s21 + $0x178] sm:$0xff] }
  0x32   :  { %15746 = vmatpush1.bf16.msra.mxu1 %v19998_v37  ;;  %24461 = vst [vmem:[#allocation56_spill] sm:$0xff] %v20081_v48  ;;  %24462 = vst [vmem:[#allocation57_spill] sm:$0xff] %v20084_v49  ;;  %v20099_v7 = vpack.c.bf16 %v168_v61, %v164_v51  ;;  %v20102_v14 = vpack.c.bf16 %v177_v6, %v173_v62  ;;  %v172_v24 = vld [vmem:[%s24421_s21 + $0x150] sm:$0xff]  ;;  %v185_v34 = vld [vmem:[%s24421_s21 + $0x1b8] sm:$0xff] }
  0x33   :  { %15778 = vmatpush1.bf16.msra.mxu0 %v20003_v43  ;;  %15780 = vmatprep.subr.bf16.mxu1 %v20005_v45  ;;  %v180_v0 = vld [vmem:[%s24421_s21 + $0x190] sm:$0xff]  ;;  %v189_v61 = vld [vmem:[%s24421_s21 + $0x1d8] sm:$0xff] }
  0x34   :  { %24463 = vst [vmem:[#allocation58_spill] sm:$0xff] %v20099_v7  ;;  %24464 = vst [vmem:[#allocation59_spill] sm:$0xff] %v20102_v14  ;;  %v184_v51 = vld [vmem:[%s24421_s21 + $0x1b0] sm:$0xff]  ;;  %v193_v62 = vld [vmem:[%s24421_s21 + $0x1f8] sm:$0xff] }
  0x35   :  { %14154 = vmatmul.mubr.msk.f32.vlgmr.msra.gmra.mrb[2].mxu1 %vm631_vm2, %v19721_v33  ;;  %v157_v33 = vld [vmem:[%s24421_s21 + $0xd8] sm:$0xff]  ;;  %v20135_v6 = vpack.c.bf16 %v184_v51, %v180_v0  ;;  %v373_v0 = vld [vmem:[%s24470_s0 + $0x8] sm:$0xff] }
  0x36   :  { %842 = vmatmul.mubr.f32.vlgmr.msra.gmra.mrb[0].mxu0 %v477_v55  ;;  %15782 = vmatpush1.bf16.msra.mxu1 %v20022_v52  ;;  %v20066_v32 = vpack.c.bf16 %v161_v25, %v157_v33  ;;  %v176_v33 = vld [vmem:[%s24421_s21 + $0x170] sm:$0xff]  ;;  %v181_v25 = vld [vmem:[%s24421_s21 + $0x198] sm:$0xff]  ;;  %v377_v51 = vld [vmem:[%s24470_s0 + $0x28] sm:$0xff] }
  0x37   :  { %15784 = vmatprep.subr.bf16.mxu1 %v20026_v60  ;;  %912 = vmatprep.mubr.f32.mxu1 %v23948_v3  ;;  %v20117_v36 = vpack.c.bf16 %v176_v33, %v172_v24  ;;  %v20120_v46 = vpack.c.bf16 %v185_v34, %v181_v25  ;;  %24467 = vst [vmem:[#allocation62_spill] sm:$0xff] %v20135_v6  ;;  %v188_v33 = vld [vmem:[%s24421_s21 + $0x1d0] sm:$0xff] }
  0x38   :  { %1047 = vmatprep.mubr.f32.mxu0 %v23948_v3  ;;  %24460 = vst [vmem:[#allocation55_spill] sm:$0xff] %v20066_v32  ;;  %v20138_v24 = vpack.c.bf16 %v193_v62, %v189_v61  ;;  %v192_v25 = vld [vmem:[%s24421_s21 + $0x1f0] sm:$0xff]  ;;  %v375_v61 = vld [vmem:[%s24470_s0 + $0x18] sm:$0xff]  ;;  %v20161_v62 = vpack.c.bf16 %v377_v51, %v373_v0 }
  0x39   :  { %24465 = vst [vmem:[#allocation60_spill] sm:$0xff] %v20117_v36  ;;  %24466 = vst [vmem:[#allocation61_spill] sm:$0xff] %v20120_v46  ;;  %v20147_v34 = vpack.c.bf16 %v192_v25, %v188_v33  ;;  %v372_v33 = vld [vmem:[%s24470_s0] sm:$0xff]  ;;  %v374_v0 = vld [vmem:[%s24470_s0 + $0x10] sm:$0xff] }
  0x3a   :  { %15786 = vmatpush1.bf16.msra.mxu1 %v20043_v10  ;;  %24468 = vst [vmem:[#allocation63_spill] sm:$0xff] %v20138_v24  ;;  %24471 = vst [vmem:[#allocation65_spill] sm:$0xff] %v20161_v62  ;;  %v376_v25 = vld [vmem:[%s24470_s0 + $0x20] sm:$0xff]  ;;  %v378_v51 = vld [vmem:[%s24470_s0 + $0x30] sm:$0xff]  ;;  %15812 = vmatprep.subr.bf16.mxu0 %v20161_v62 }
  0x3b   :  { %15788 = vmatprep.subr.bf16.mxu1 %v20046_v12  ;;  %24469 = vst [vmem:[#allocation64_spill] sm:$0xff] %v20147_v34  ;;  %v384_v62 = vld [vmem:[%s24470_s0 + $0x60] sm:$0xff] }
  0x3e   :  { %15790 = vmatpush1.bf16.msra.mxu1 %v20063_v28 }
  0x3f   :  { %15792 = vmatprep.subr.bf16.mxu1 %v20066_v32 }
  0x42   :  { %15794 = vmatpush1.bf16.msra.mxu1 %v20081_v48 }
  0x43   :  { %15796 = vmatprep.subr.bf16.mxu1 %v20084_v49 }
  0x46   :  { %15798 = vmatpush1.bf16.msra.mxu1 %v20099_v7 }
  0x47   :  { %15800 = vmatprep.subr.bf16.mxu1 %v20102_v14  ;;  %v371_v14 = vld [vmem:[%s23927_s11 + $0x1f8] sm:$0xff] }
  0x4a   :  { %15802 = vmatpush1.bf16.msra.mxu1 %v20117_v36 }
  0x4b   :  { %15804 = vmatprep.subr.bf16.mxu1 %v20120_v46  ;;  %v382_v46 = vld [vmem:[%s24470_s0 + $0x50] sm:$0xff] }
  0x4e   :  { %15806 = vmatpush1.bf16.msra.mxu1 %v20135_v6  ;;  %v20186_v6 = vpack.c.bf16 %v378_v51, %v374_v0  ;;  %v380_v51 = vld [vmem:[%s24470_s0 + $0x40] sm:$0xff] }
  0x4f   :  { %15808 = vmatprep.subr.bf16.mxu1 %v20138_v24  ;;  %v381_v24 = vld [vmem:[%s24470_s0 + $0x48] sm:$0xff] }
  0x50   :  { %24474 = vst [vmem:[#allocation68_spill] sm:$0xff] %v20186_v6 }
  0x52   :  { %15810 = vmatpush1.bf16.msra.mxu1 %v20147_v34  ;;  %v20174_v34 = vpack.c.bf16 %v376_v25, %v372_v33  ;;  %v387_v33 = vld [vmem:[%s24470_s0 + $0x78] sm:$0xff] }
  0x54   :  { %24473 = vst [vmem:[#allocation67_spill] sm:$0xff] %v20174_v34  ;;  %15814 = vmatpush1.bf16.msra.mxu0 %v20174_v34 }
  0x55   :  { %913 = vmatmul.mubr.f32.vlgmr.msra.gmra.mrb[2].mxu1 %v477_v55  ;;  %v379_v55 = vld [vmem:[%s24470_s0 + $0x38] sm:$0xff] }
  0x56   :  { %1118 = vmatprep.mubr.f32.mxu1 %v23948_v3  ;;  %v20172_v3 = vpack.c.bf16 %v379_v55, %v375_v61  ;;  %v385_v61 = vld [vmem:[%s24470_s0 + $0x68] sm:$0xff]  ;;  %v383_v55 = vld [vmem:[%s24470_s0 + $0x58] sm:$0xff] }
  0x57   :  { %v20199_v25 = vpack.c.bf16 %v385_v61, %v381_v24  ;;  %v20201_v0 = vpack.c.bf16 %v387_v33, %v383_v55  ;;  %v386_v24 = vld [vmem:[%s24470_s0 + $0x70] sm:$0xff]  ;;  %v309_v55 = vld [vmem:[%s23927_s11 + $0x8] sm:$0xff]  ;;  %v311_v33 = vld [vmem:[%s23927_s11 + $0x18] sm:$0xff] }
  0x58   :  { %24472 = vst [vmem:[#allocation66_spill] sm:$0xff] %v20172_v3  ;;  %15820 = vmatprep.subr.bf16.mxu1 %v20172_v3  ;;  %v20213_v3 = vpack.c.bf16 %v384_v62, %v380_v51  ;;  %v20220_v61 = vpack.c.bf16 %v386_v24, %v382_v46  ;;  %v313_v62 = vld [vmem:[%s23927_s11 + $0x28] sm:$0xff]  ;;  %v315_v46 = vld [vmem:[%s23927_s11 + $0x38] sm:$0xff]  ;;  %v308_v24 = vld [vmem:[%s23927_s11] sm:$0xff] }
  0x59   :  { %24475 = vst [vmem:[#allocation69_spill] sm:$0xff] %v20199_v25  ;;  %24476 = vst [vmem:[#allocation70_spill] sm:$0xff] %v20201_v0  ;;  %15822 = vmatpush1.bf16.msra.mxu1 %v20186_v6  ;;  %15816 = vmatprep.subr.bf16.mxu0 %v20199_v25  ;;  %v20233_v51 = vpack.c.bf16 %v313_v62, %v309_v55  ;;  %v481_v6 = vld [vmem:[#allocation6] sm:$0x3]  ;;  %v310_v55 = vld [vmem:[%s23927_s11 + $0x10] sm:$0xff] }
  0x5a   :  { %24477 = vst [vmem:[#allocation71_spill] sm:$0xff] %v20213_v3  ;;  %15824 = vmatprep.subr.bf16.mxu1 %v20201_v0  ;;  %24478 = vst [vmem:[#allocation72_spill] sm:$0xff] %v20220_v61  ;;  %15818 = vmatpush1.bf16.msra.mxu0 %v20213_v3  ;;  %v20244_v3 = vpack.c.bf16 %v315_v46, %v311_v33  ;;  %v314_v62 = vld [vmem:[%s23927_s11 + $0x30] sm:$0xff]  ;;  %v321_v33 = vld [vmem:[%s23927_s11 + $0x68] sm:$0xff] }
  0x5b   :  { %24479 = vst [vmem:[#allocation73_spill] sm:$0xff] %v20233_v51  ;;  %15828 = vmatprep.subr.bf16.mxu0 %v20233_v51  ;;  %v20256_v36 = vpack.c.bf16 %v314_v62, %v310_v55  ;;  %v323_v46 = vld [vmem:[%s23927_s11 + $0x78] sm:$0xff]  ;;  %v320_v55 = vld [vmem:[%s23927_s11 + $0x60] sm:$0xff] }
  0x5c   :  { %24480 = vst [vmem:[#allocation74_spill] sm:$0xff] %v20244_v3 }
  0x5d   :  { %15826 = vmatpush1.bf16.msra.mxu1 %v20220_v61  ;;  %v312_v61 = vld [vmem:[%s23927_s11 + $0x20] sm:$0xff]  ;;  %24482 = vst [vmem:[#allocation76_spill] sm:$0xff] %v20256_v36 }
  0x5e   :  { %v20246_v25 = vpack.c.bf16 %v312_v61, %v308_v24  ;;  %15860 = vmatprep.subr.bf16.mxu1 %v20244_v3  ;;  %v317_v61 = vld [vmem:[%s23927_s11 + $0x48] sm:$0xff]  ;;  %v316_v24 = vld [vmem:[%s23927_s11 + $0x40] sm:$0xff]  ;;  %v24486_v3 = vmov 0.0  }
  0x60   :  { %24481 = vst [vmem:[#allocation75_spill] sm:$0xff] %v20246_v25 }
  0x9b   :  { %v976_v0 = vpop.permute.xlu0 %975 }
  0x9c   :  { %v979_v34 = vsel %vm978_vm4, %v481_v6, %v976_v0  ;;  %v319_v6 = vld [vmem:[%s23927_s11 + $0x58] sm:$0xff]  ;;  %v20271_v0 = vpack.c.bf16 %v321_v33, %v317_v61  ;;  %v318_v61 = vld [vmem:[%s23927_s11 + $0x50] sm:$0xff] }
  0x9d   :  { %14158 = vmatmul.mubr.msk.f32.vlgmr.msra.gmra.mrb[2].mxu0 %vm631_vm2, %v979_v34  ;;  %14159 = vmatmul.mubr.msk.f32.vlgmr.msra.gmra.mrb[4].mxu1 %vm631_vm2, %v979_v34  ;;  %v20283_v62 = vpack.c.bf16 %v323_v46, %v319_v6  ;;  %v20285_v34 = vpack.c.bf16 %v320_v55, %v316_v24  ;;  %v322_v33 = vld [vmem:[%s23927_s11 + $0x70] sm:$0xff]  ;;  %v325_v6 = vld [vmem:[%s23927_s11 + $0x88] sm:$0xff]  ;;  %v327_v24 = vld [vmem:[%s23927_s11 + $0x98] sm:$0xff] }
  0x9e   :  { %15830 = vmatpush1.bf16.msra.mxu0 %v20246_v25  ;;  %24483 = vst [vmem:[#allocation77_spill] sm:$0xff] %v20271_v0  ;;  %15862 = vmatpush1.bf16.msra.mxu1 %v20256_v36  ;;  %v20295_v25 = vpack.c.bf16 %v322_v33, %v318_v61  ;;  %v329_v46 = vld [vmem:[%s23927_s11 + $0xa8] sm:$0xff]  ;;  %v331_v61 = vld [vmem:[%s23927_s11 + $0xb8] sm:$0xff]  ;;  %v324_v33 = vld [vmem:[%s23927_s11 + $0x80] sm:$0xff] }
  0x9f   :  { %24484 = vst [vmem:[#allocation78_spill] sm:$0xff] %v20283_v62  ;;  %24485 = vst [vmem:[#allocation79_spill] sm:$0xff] %v20285_v34  ;;  %1189 = vmatprep.mubr.f32.mxu0 %v24486_v3  ;;  %15832 = vmatprep.subr.bf16.mxu0 %v20271_v0  ;;  %v20309_v55 = vpack.c.bf16 %v329_v46, %v325_v6  ;;  %v20321_v36 = vpack.c.bf16 %v331_v61, %v327_v24  ;;  %v326_v6 = vld [vmem:[%s23927_s11 + $0x90] sm:$0xff]  ;;  %v333_v24 = vld [vmem:[%s23927_s11 + $0xc8] sm:$0xff] }
  0xa0   :  { %24487 = vst [vmem:[#allocation80_spill] sm:$0xff] %v20295_v25  ;;  %1260 = vmatprep.mubr.f32.mxu1 %v24486_v3  ;;  %15864 = vmatprep.subr.bf16.mxu1 %v20283_v62  ;;  %v328_v62 = vld [vmem:[%s23927_s11 + $0xa0] sm:$0xff]  ;;  %v330_v46 = vld [vmem:[%s23927_s11 + $0xb0] sm:$0xff]  ;;  %v335_v61 = vld [vmem:[%s23927_s11 + $0xd8] sm:$0xff] }
  0xa1   :  { %24488 = vst [vmem:[#allocation81_spill] sm:$0xff] %v20309_v55  ;;  %24489 = vst [vmem:[#allocation82_spill] sm:$0xff] %v20321_v36  ;;  %v20323_v0 = vpack.c.bf16 %v328_v62, %v324_v33  ;;  %v337_v62 = vld [vmem:[%s23927_s11 + $0xe8] sm:$0xff] }
  0xa2   :  { %15834 = vmatpush1.bf16.msra.mxu0 %v20285_v34  ;;  %15866 = vmatpush1.bf16.msra.mxu1 %v20295_v25  ;;  %v20332_v34 = vpack.c.bf16 %v330_v46, %v326_v6  ;;  %v20345_v33 = vpack.c.bf16 %v337_v62, %v333_v24  ;;  %v339_v6 = vld [vmem:[%s23927_s11 + $0xf8] sm:$0xff]  ;;  %v332_v46 = vld [vmem:[%s23927_s11 + $0xc0] sm:$0xff]  ;;  %v334_v24 = vld [vmem:[%s23927_s11 + $0xd0] sm:$0xff] }
  0xa3   :  { %24490 = vst [vmem:[#allocation83_spill] sm:$0xff] %v20323_v0  ;;  %15836 = vmatprep.subr.bf16.mxu0 %v20309_v55  ;;  %15868 = vmatprep.subr.bf16.mxu1 %v20321_v36  ;;  %v336_v36 = vld [vmem:[%s23927_s11 + $0xe0] sm:$0xff]  ;;  %v20357_v25 = vpack.c.bf16 %v339_v6, %v335_v61  ;;  %v338_v62 = vld [vmem:[%s23927_s11 + $0xf0] sm:$0xff]  ;;  %v341_v61 = vld [vmem:[%s23927_s11 + $0x108] sm:$0xff] }
  0xa4   :  { %24491 = vst [vmem:[#allocation84_spill] sm:$0xff] %v20332_v34  ;;  %24492 = vst [vmem:[#allocation85_spill] sm:$0xff] %v20345_v33  ;;  %v20359_v55 = vpack.c.bf16 %v336_v36, %v332_v46  ;;  %v345_v36 = vld [vmem:[%s23927_s11 + $0x128] sm:$0xff]  ;;  %v343_v6 = vld [vmem:[%s23927_s11 + $0x118] sm:$0xff] }
  0xa5   :  { %24493 = vst [vmem:[#allocation86_spill] sm:$0xff] %v20357_v25  ;;  %v20381_v46 = vpack.c.bf16 %v345_v36, %v341_v61  ;;  %v342_v61 = vld [vmem:[%s23927_s11 + $0x110] sm:$0xff] }
  0xa6   :  { %15838 = vmatpush1.bf16.msra.mxu0 %v20323_v0  ;;  %15870 = vmatpush1.bf16.msra.mxu1 %v20332_v34  ;;  %24494 = vst [vmem:[#allocation87_spill] sm:$0xff] %v20359_v55  ;;  %v20368_v0 = vpack.c.bf16 %v338_v62, %v334_v24  ;;  %v347_v24 = vld [vmem:[%s23927_s11 + $0x138] sm:$0xff]  ;;  %v340_v62 = vld [vmem:[%s23927_s11 + $0x100] sm:$0xff]  ;;  %v346_v36 = vld [vmem:[%s23927_s11 + $0x130] sm:$0xff] }
  0xa7   :  { %15840 = vmatprep.subr.bf16.mxu0 %v20345_v33  ;;  %15872 = vmatprep.subr.bf16.mxu1 %v20357_v25  ;;  %24496 = vst [vmem:[#allocation89_spill] sm:$0xff] %v20381_v46  ;;  %v344_v25 = vld [vmem:[%s23927_s11 + $0x120] sm:$0xff]  ;;  %v20393_v34 = vpack.c.bf16 %v347_v24, %v343_v6  ;;  %v351_v6 = vld [vmem:[%s23927_s11 + $0x158] sm:$0xff] }
  0xa8   :  { %24495 = vst [vmem:[#allocation88_spill] sm:$0xff] %v20368_v0  ;;  %v20395_v33 = vpack.c.bf16 %v344_v25, %v340_v62  ;;  %v353_v25 = vld [vmem:[%s23927_s11 + $0x168] sm:$0xff]  ;;  %v355_v62 = vld [vmem:[%s23927_s11 + $0x178] sm:$0xff] }
  0xa9   :  { %24497 = vst [vmem:[#allocation90_spill] sm:$0xff] %v20393_v34 }
  0xaa   :  { %15842 = vmatpush1.bf16.msra.mxu0 %v20359_v55  ;;  %15874 = vmatpush1.bf16.msra.mxu1 %v20368_v0  ;;  %24498 = vst [vmem:[#allocation91_spill] sm:$0xff] %v20395_v33  ;;  %v20404_v55 = vpack.c.bf16 %v346_v36, %v342_v61  ;;  %v349_v0 = vld [vmem:[%s23927_s11 + $0x148] sm:$0xff]  ;;  %v348_v61 = vld [vmem:[%s23927_s11 + $0x140] sm:$0xff] }
  0xab   :  { %15844 = vmatprep.subr.bf16.mxu0 %v20381_v46  ;;  %15876 = vmatprep.subr.bf16.mxu1 %v20393_v34  ;;  %v20416_v24 = vpack.c.bf16 %v353_v25, %v349_v0  ;;  %v352_v36 = vld [vmem:[%s23927_s11 + $0x160] sm:$0xff]  ;;  %v20428_v46 = vpack.c.bf16 %v355_v62, %v351_v6  ;;  %v350_v0 = vld [vmem:[%s23927_s11 + $0x150] sm:$0xff]  ;;  %v357_v34 = vld [vmem:[%s23927_s11 + $0x188] sm:$0xff] }
  0xac   :  { %24499 = vst [vmem:[#allocation92_spill] sm:$0xff] %v20404_v55  ;;  %v20430_v51 = vpack.c.bf16 %v352_v36, %v348_v61  ;;  %v354_v25 = vld [vmem:[%s23927_s11 + $0x170] sm:$0xff]  ;;  %v361_v62 = vld [vmem:[%s23927_s11 + $0x1a8] sm:$0xff]  ;;  %v359_v61 = vld [vmem:[%s23927_s11 + $0x198] sm:$0xff] }
  0xad   :  { %24500 = vst [vmem:[#allocation93_spill] sm:$0xff] %v20416_v24  ;;  %24501 = vst [vmem:[#allocation94_spill] sm:$0xff] %v20428_v46  ;;  %v20443_v6 = vpack.c.bf16 %v354_v25, %v350_v0  ;;  %v363_v36 = vld [vmem:[%s23927_s11 + $0x1b8] sm:$0xff]  ;;  %v356_v0 = vld [vmem:[%s23927_s11 + $0x180] sm:$0xff] }
  0xae   :  { %15846 = vmatpush1.bf16.msra.mxu0 %v20395_v33  ;;  %24502 = vst [vmem:[#allocation95_spill] sm:$0xff] %v20430_v51  ;;  %15878 = vmatpush1.bf16.msra.mxu1 %v20404_v55  ;;  %v20455_v33 = vpack.c.bf16 %v361_v62, %v357_v34  ;;  %v20457_v55 = vpack.c.bf16 %v363_v36, %v359_v61  ;;  %v360_v25 = vld [vmem:[%s23927_s11 + $0x1a0] sm:$0xff]  ;;  %v365_v34 = vld [vmem:[%s23927_s11 + $0x1c8] sm:$0xff]  ;;  %v367_v36 = vld [vmem:[%s23927_s11 + $0x1d8] sm:$0xff] }
  0xaf   :  { %15848 = vmatprep.subr.bf16.mxu0 %v20416_v24  ;;  %24503 = vst [vmem:[#allocation96_spill] sm:$0xff] %v20443_v6  ;;  %15880 = vmatprep.subr.bf16.mxu1 %v20428_v46  ;;  %v358_v24 = vld [vmem:[%s23927_s11 + $0x190] sm:$0xff]  ;;  %v369_v62 = vld [vmem:[%s23927_s11 + $0x1e8] sm:$0xff]  ;;  %v20478_v61 = vpack.c.bf16 %v360_v25, %v356_v0  ;;  %v364_v0 = vld [vmem:[%s23927_s11 + $0x1c0] sm:$0xff] }
  0xb0   :  { %24504 = vst [vmem:[#allocation97_spill] sm:$0xff] %v20455_v33  ;;  %24505 = vst [vmem:[#allocation98_spill] sm:$0xff] %v20457_v55  ;;  %v362_v46 = vld [vmem:[%s23927_s11 + $0x1b0] sm:$0xff]  ;;  %v20490_v49 = vpack.c.bf16 %v369_v62, %v365_v34  ;;  %v368_v25 = vld [vmem:[%s23927_s11 + $0x1e0] sm:$0xff] }
  0xb1   :  { %24506 = vst [vmem:[#allocation99_spill] sm:$0xff] %v20478_v61  ;;  %v20488_v7 = vpack.c.bf16 %v362_v46, %v358_v24  ;;  %v370_v46 = vld [vmem:[%s23927_s11 + $0x1f0] sm:$0xff]  ;;  %v20508_v24 = vpack.c.bf16 %v368_v25, %v364_v0  ;;  %v405_v62 = vld [vmem:[%s23928_s13 + $0x88] sm:$0xff] }
  0xb2   :  { %15850 = vmatpush1.bf16.msra.mxu0 %v20430_v51  ;;  %15882 = vmatpush1.bf16.msra.mxu1 %v20443_v6  ;;  %24508 = vst [vmem:[#allocation101_spill] sm:$0xff] %v20490_v49  ;;  %v20499_v51 = vpack.c.bf16 %v371_v14, %v367_v36  ;;  %v366_v6 = vld [vmem:[%s23927_s11 + $0x1d0] sm:$0xff]  ;;  %v404_v14 = vld [vmem:[%s23928_s13 + $0x80] sm:$0xff]  ;;  %v437_v0 = vld [vmem:[%s23928_s13 + $0x188] sm:$0xff] }
  0xb3   :  { %15852 = vmatprep.subr.bf16.mxu0 %v20455_v33  ;;  %24507 = vst [vmem:[#allocation100_spill] sm:$0xff] %v20488_v7  ;;  %15884 = vmatprep.subr.bf16.mxu1 %v20457_v55  ;;  %24510 = vst [vmem:[#allocation103_spill] sm:$0xff] %v20508_v24  ;;  %v20512_v34 = vpack.c.bf16 %v370_v46, %v366_v6  ;;  %v436_v36 = vld [vmem:[%s23928_s13 + $0x180] sm:$0xff]  ;;  %v20526_v6 = vpack.c.bf16 %v405_v62, %v404_v14 }
  0xb4   :  { %24509 = vst [vmem:[#allocation102_spill] sm:$0xff] %v20499_v51  ;;  %v20531_v25 = vpack.c.bf16 %v437_v0, %v436_v36  ;;  %v194_v14 = vld [vmem:[%s23929_s6] sm:$0xf] }
  0xb5   :  { %24511 = vst [vmem:[#allocation104_spill] sm:$0xff] %v20512_v34  ;;  %24512 = vst [vmem:[#allocation105_spill] sm:$0xff] %v20526_v6 }
  0xb6   :  { %15854 = vmatpush1.bf16.msra.mxu0 %v20478_v61  ;;  %15886 = vmatpush1.bf16.msra.mxu1 %v20488_v7  ;;  %24513 = vst [vmem:[#allocation106_spill] sm:$0xff] %v20531_v25 }
  0xb7   :  { %15856 = vmatprep.subr.bf16.mxu0 %v20490_v49  ;;  %15888 = vmatprep.subr.bf16.mxu1 %v20499_v51  ;;  %v924_v51 = vlaneseq }
  0xb9   :  { %v20535_v7 = vshrl.u32 %v924_v51, 7 }
  0xba   :  { %15858 = vmatpush1.bf16.msra.mxu0 %v20508_v24  ;;  %15890 = vmatpush1.bf16.msra.mxu1 %v20512_v34 }
  0xbb   :  { %15892 = vmatprep.subr.bf16.mxu0 %v20526_v6  ;;  %15924 = vmatprep.subr.bf16.mxu1 %v20531_v25  ;;  %24514 = vst [vmem:[#allocation107_spill] sm:$0xff] %v20535_v7  ;;  %v24052_v55 = vsub.s32 1, %v20535_v7  ;;  %v24055_v24 = vsub.s32 0, %v20535_v7 }
  0xbd   :  { %v20544_v6 = vrot.slane %v194_v14, %v24052_v55  ;;  %v20548_v51 = vrot.slane %v194_v14, %v24055_v24 }
  0xbf   :  { %24515 = vst [vmem:[#allocation108_spill] sm:$0xff] %v20544_v6  ;;  %24516 = vst [vmem:[#allocation109_spill] sm:$0xff] %v20548_v51 }
  0xf0   :  { %v555_v46 = vpop.f32.mrb[0].mxu1 }
  0xf1   :  { %v557_v34 = vpop.f32.mrb[1].mxu1 }
 0x109   :  { %v843_v62 = vpop.f32.mrb[0].mxu0 }
 0x10a   :  { %v18979_v36 = vadd.f32 %v843_v62, %v555_v46  ;;  %v845_v0 = vpop.f32.mrb[1].mxu0  ;;  %v24058_v46 = vsub.s32 2, %v20535_v7 }
 0x10b   :  { %v18980_v49 = vadd.f32 %v845_v0, %v557_v34  ;;  %v24065_v34 = vsub.s32 3, %v20535_v7 }
 0x10c   :  { %v944_v33 = vadd.f32 %v18979_v36, %v20548_v51  ;;  %v20556_v32 = vrot.slane %v194_v14, %v24058_v46  ;;  %v478_v51 = vld [vmem:[#allocation3] sm:$0x3] }
 0x10d   :  { %v945_v61 = vadd.f32 %v18980_v49, %v20544_v6  ;;  %v20560_v49 = vrot.slane %v194_v14, %v24065_v34 }
 0x10e   :  { %v14155_v48 = vmul.f32 -1.442695, %v944_v33  ;;  %24517 = vst [vmem:[#allocation110_spill] sm:$0xff] %v20556_v32 }
 0x10f   :  { %v14156_v25 = vmul.f32 -1.442695, %v945_v61  ;;  %24518 = vst [vmem:[#allocation111_spill] sm:$0xff] %v20560_v49 }
 0x111   :  { %19146 = vpow2.f32 %v14156_v25 }
 0x112   :  { %19148 = vpow2.f32 %v14155_v48 }
 0x11b   :  { %v19147_v62 = vpop.eup %19146 }
 0x11c   :  { %v19149_v0 = vpop.eup %19148  ;;  %v957_v55 = vadd.f32 1.0, %v19147_v62 }
 0x11d   :  { %v951_v24 = vadd.f32 1.0, %v19149_v0 }
 0x11e   :  { %19150 = vrcp.f32 %v957_v55  ;;  %v972_v55 = vld [vmem:[%s23930_s17] sm:$0x3] }
 0x11f   :  { %19152 = vrcp.f32 %v951_v24  ;;  %v388_v24 = vld [vmem:[%s23928_s13] sm:$0xff] }
 0x128   :  { %v914_v61 = vpop.f32.mrb[2].mxu1  ;;  %v19151_v62 = vpop.eup %19150 }
 0x129   :  { %v946_v48 = vadd.f32 %v20556_v32, %v914_v61  ;;  %v916_v33 = vpop.f32.mrb[3].mxu1  ;;  %v19153_v46 = vpop.eup %19152  ;;  %v967_v0 = vmul.f32 %v19151_v62, %v478_v51  ;;  %v389_v51 = vld [vmem:[%s23928_s13 + $0x8] sm:$0xff]  ;;  %v407_v61 = vld [vmem:[%s23928_s13 + $0x98] sm:$0xff] }
 0x12a   :  { %v947_v25 = vadd.f32 %v20560_v49, %v916_v33  ;;  %v439_v33 = vld [vmem:[%s23928_s13 + $0x198] sm:$0xff] }
 0x12b   :  { %19154 = vtanh.f32 %v946_v48  ;;  %v438_v48 = vld [vmem:[%s23928_s13 + $0x190] sm:$0xff] }
 0x12c   :  { %v14157_v36 = vmul.f32 -1.442695, %v947_v25  ;;  %v20608_v10 = vpack.c.bf16 %v439_v33, %v438_v48  ;;  %v393_v48 = vld [vmem:[%s23928_s13 + $0x28] sm:$0xff] }
 0x12e   :  { %19156 = vpow2.f32 %v14157_v36  ;;  %v20594_v36 = vpack.c.bf16 %v389_v51, %v388_v24  ;;  %24523 = vst [vmem:[#allocation116_spill] sm:$0xff] %v20608_v10  ;;  %v422_v24 = vld [vmem:[%s23928_s13 + $0x110] sm:$0xff]  ;;  %v423_v51 = vld [vmem:[%s23928_s13 + $0x118] sm:$0xff] }
 0x130   :  { %24520 = vst [vmem:[#allocation113_spill] sm:$0xff] %v20594_v36 }
 0x135   :  { %v19155_v6 = vpop.eup %19154 }
 0x136   :  { %v968_v28 = vmul.f32 %v19155_v6, %v19153_v46  ;;  %v406_v46 = vld [vmem:[%s23928_s13 + $0x90] sm:$0xff] }
 0x137   :  { %v20606_v32 = vpack.c.bf16 %v407_v61, %v406_v46  ;;  %v392_v61 = vld [vmem:[%s23928_s13 + $0x20] sm:$0xff] }
 0x138   :  { %v19157_v12 = vpop.eup %19156  ;;  %v20564_v14 = vadd.f32 %v968_v28, %v967_v0  ;;  %v421_v28 = vld [vmem:[%s23928_s13 + $0x108] sm:$0xff]  ;;  %v390_v0 = vld [vmem:[%s23928_s13 + $0x10] sm:$0xff] }
 0x139   :  { %v964_v34 = vadd.f32 1.0, %v19157_v12  ;;  %v420_v12 = vld [vmem:[%s23928_s13 + $0x100] sm:$0xff]  ;;  %24522 = vst [vmem:[#allocation115_spill] sm:$0xff] %v20606_v32 }
 0x13a   :  { %24519 = vst [vmem:[#allocation112_spill] sm:$0xff] %v20564_v14  ;;  %19158 = vtanh.f32 %v20564_v14  ;;  %v20596_v62 = vpack.c.bf16 %v421_v28, %v420_v12  ;;  %v391_v14 = vld [vmem:[%s23928_s13 + $0x18] sm:$0xff]  ;;  %v440_v12 = vld [vmem:[%s23928_s13 + $0x1a0] sm:$0xff]  ;;  %v441_v28 = vld [vmem:[%s23928_s13 + $0x1a8] sm:$0xff] }
 0x13b   :  { %19160 = vrcp.f32 %v964_v34  ;;  %v20632_v46 = vpack.c.bf16 %v391_v14, %v390_v0  ;;  %v424_v14 = vld [vmem:[%s23928_s13 + $0x120] sm:$0xff]  ;;  %v425_v0 = vld [vmem:[%s23928_s13 + $0x128] sm:$0xff] }
 0x13c   :  { %24521 = vst [vmem:[#allocation114_spill] sm:$0xff] %v20596_v62 }
 0x13d   :  { %24524 = vst [vmem:[#allocation117_spill] sm:$0xff] %v20632_v46 }
 0x144   :  { %v19159_v6 = vpop.eup %19158 }
 0x145   :  { %v19161_v34 = vpop.eup %19160 }
 0x146   :  { %v971_v25 = vmul.f32 %v19161_v34, %v19159_v6  ;;  %v408_v6 = vld [vmem:[%s23928_s13 + $0xa0] sm:$0xff]  ;;  %v20634_v34 = vpack.c.bf16 %v423_v51, %v422_v24  ;;  %v410_v24 = vld [vmem:[%s23928_s13 + $0xb0] sm:$0xff]  ;;  %v411_v51 = vld [vmem:[%s23928_s13 + $0xb8] sm:$0xff] }
 0x148   :  { %v20604_v49 = vmul.f32 %v972_v55, %v971_v25  ;;  %v409_v55 = vld [vmem:[%s23928_s13 + $0xa8] sm:$0xff]  ;;  %24525 = vst [vmem:[#allocation118_spill] sm:$0xff] %v20634_v34  ;;  %v20646_v25 = vpack.c.bf16 %v441_v28, %v440_v12  ;;  %v20668_v12 = vpack.c.bf16 %v393_v48, %v392_v61  ;;  %v20670_v28 = vpack.c.bf16 %v425_v0, %v424_v14  ;;  %v426_v61 = vld [vmem:[%s23928_s13 + $0x130] sm:$0xff]  ;;  %v427_v48 = vld [vmem:[%s23928_s13 + $0x138] sm:$0xff] }
 0x149   :  { %v20644_v33 = vpack.c.bf16 %v409_v55, %v408_v6  ;;  %v442_v6 = vld [vmem:[%s23928_s13 + $0x1b0] sm:$0xff]  ;;  %v443_v55 = vld [vmem:[%s23928_s13 + $0x1b8] sm:$0xff]  ;;  %v20694_v0 = vpack.c.bf16 %v427_v48, %v426_v61  ;;  %v396_v61 = vld [vmem:[%s23928_s13 + $0x40] sm:$0xff] }
 0x14a   :  { %1190 = vmatmul.mubr.f32.vlgmr.msra.gmra.mrb[2].mxu0 %v20604_v49  ;;  %1261 = vmatmul.mubr.f32.vlgmr.msra.gmra.mrb[4].mxu1 %v20604_v49  ;;  %24527 = vst [vmem:[#allocation120_spill] sm:$0xff] %v20646_v25  ;;  %24528 = vst [vmem:[#allocation121_spill] sm:$0xff] %v20668_v12  ;;  %v397_v48 = vld [vmem:[%s23928_s13 + $0x48] sm:$0xff] }
 0x14b   :  { %15894 = vmatpush3.bf16.msra.mxu0 %v20594_v36  ;;  %15926 = vmatpush3.bf16.msra.mxu1 %v20596_v62  ;;  %24526 = vst [vmem:[#allocation119_spill] sm:$0xff] %v20644_v33  ;;  %24529 = vst [vmem:[#allocation122_spill] sm:$0xff] %v20670_v28  ;;  %v20677_v36 = vpack.c.bf16 %v411_v51, %v410_v24  ;;  %v412_v24 = vld [vmem:[%s23928_s13 + $0xc0] sm:$0xff]  ;;  %v413_v51 = vld [vmem:[%s23928_s13 + $0xc8] sm:$0xff] }
 0x14c   :  { %15896 = vmatprep.subr.bf16.mxu0 %v20606_v32  ;;  %15928 = vmatprep.subr.bf16.mxu1 %v20608_v10  ;;  %v394_v32 = vld [vmem:[%s23928_s13 + $0x30] sm:$0xff]  ;;  %v20679_v10 = vpack.c.bf16 %v443_v55, %v442_v6  ;;  %24533 = vst [vmem:[#allocation126_spill] sm:$0xff] %v20694_v0  ;;  %v445_v6 = vld [vmem:[%s23928_s13 + $0x1c8] sm:$0xff] }
 0x14d   :  { %24530 = vst [vmem:[#allocation123_spill] sm:$0xff] %v20677_v36 }
 0x14e   :  { %24531 = vst [vmem:[#allocation124_spill] sm:$0xff] %v20679_v10 }
 0x14f   :  { %15898 = vmatpush3.bf16.msra.mxu0 %v20632_v46  ;;  %15930 = vmatpush3.bf16.msra.mxu1 %v20634_v34  ;;  %v395_v46 = vld [vmem:[%s23928_s13 + $0x38] sm:$0xff] }
 0x150   :  { %15900 = vmatprep.subr.bf16.mxu0 %v20644_v33  ;;  %15932 = vmatprep.subr.bf16.mxu1 %v20646_v25  ;;  %v20692_v14 = vpack.c.bf16 %v395_v46, %v394_v32  ;;  %v444_v32 = vld [vmem:[%s23928_s13 + $0x1c0] sm:$0xff]  ;;  %v20709_v46 = vpack.c.bf16 %v413_v51, %v412_v24  ;;  %v20726_v24 = vpack.c.bf16 %v397_v48, %v396_v61  ;;  %v429_v51 = vld [vmem:[%s23928_s13 + $0x148] sm:$0xff]  ;;  %v446_v61 = vld [vmem:[%s23928_s13 + $0x1d0] sm:$0xff] }
 0x151   :  { %v20714_v55 = vpack.c.bf16 %v445_v6, %v444_v32  ;;  %v414_v6 = vld [vmem:[%s23928_s13 + $0xd0] sm:$0xff] }
 0x152   :  { %24532 = vst [vmem:[#allocation125_spill] sm:$0xff] %v20692_v14  ;;  %24534 = vst [vmem:[#allocation127_spill] sm:$0xff] %v20709_v46 }
 0x153   :  { %15902 = vmatpush3.bf16.msra.mxu0 %v20668_v12  ;;  %15934 = vmatpush3.bf16.msra.mxu1 %v20670_v28  ;;  %24535 = vst [vmem:[#allocation128_spill] sm:$0xff] %v20714_v55  ;;  %24536 = vst [vmem:[#allocation129_spill] sm:$0xff] %v20726_v24 }
 0x154   :  { %15904 = vmatprep.subr.bf16.mxu0 %v20677_v36  ;;  %15936 = vmatprep.subr.bf16.mxu1 %v20679_v10 }
 0x157   :  { %15906 = vmatpush3.bf16.msra.mxu0 %v20692_v14  ;;  %15938 = vmatpush3.bf16.msra.mxu1 %v20694_v0  ;;  %v428_v14 = vld [vmem:[%s23928_s13 + $0x140] sm:$0xff] }
 0x158   :  { %15908 = vmatprep.subr.bf16.mxu0 %v20709_v46  ;;  %15940 = vmatprep.subr.bf16.mxu1 %v20714_v55  ;;  %v20732_v32 = vpack.c.bf16 %v429_v51, %v428_v14  ;;  %v415_v46 = vld [vmem:[%s23928_s13 + $0xd8] sm:$0xff]  ;;  %v398_v51 = vld [vmem:[%s23928_s13 + $0x50] sm:$0xff] }
 0x159   :  { %v20745_v48 = vpack.c.bf16 %v415_v46, %v414_v6  ;;  %v447_v14 = vld [vmem:[%s23928_s13 + $0x1d8] sm:$0xff]  ;;  %v430_v46 = vld [vmem:[%s23928_s13 + $0x150] sm:$0xff] }
 0x15a   :  { %24537 = vst [vmem:[#allocation130_spill] sm:$0xff] %v20732_v32  ;;  %v20756_v36 = vpack.c.bf16 %v447_v14, %v446_v61  ;;  %v431_v6 = vld [vmem:[%s23928_s13 + $0x158] sm:$0xff]  ;;  %v448_v61 = vld [vmem:[%s23928_s13 + $0x1e0] sm:$0xff] }
 0x15b   :  { %15910 = vmatpush3.bf16.msra.mxu0 %v20726_v24  ;;  %15942 = vmatpush3.bf16.msra.mxu1 %v20732_v32  ;;  %24538 = vst [vmem:[#allocation131_spill] sm:$0xff] %v20745_v48  ;;  %v399_v24 = vld [vmem:[%s23928_s13 + $0x58] sm:$0xff]  ;;  %v20767_v33 = vpack.c.bf16 %v431_v6, %v430_v46  ;;  %v416_v32 = vld [vmem:[%s23928_s13 + $0xe0] sm:$0xff]  ;;  %v401_v6 = vld [vmem:[%s23928_s13 + $0x68] sm:$0xff] }
 0x15c   :  { %24539 = vst [vmem:[#allocation132_spill] sm:$0xff] %v20756_v36  ;;  %v20758_v12 = vpack.c.bf16 %v399_v24, %v398_v51  ;;  %15912 = vmatprep.subr.bf16.mxu0 %v20745_v48  ;;  %v417_v24 = vld [vmem:[%s23928_s13 + $0xe8] sm:$0xff]  ;;  %15944 = vmatprep.subr.bf16.mxu1 %v20756_v36  ;;  %v400_v46 = vld [vmem:[%s23928_s13 + $0x60] sm:$0xff] }
 0x15d   :  { %24541 = vst [vmem:[#allocation134_spill] sm:$0xff] %v20767_v33  ;;  %v20780_v14 = vpack.c.bf16 %v417_v24, %v416_v32  ;;  %v449_v51 = vld [vmem:[%s23928_s13 + $0x1e8] sm:$0xff]  ;;  %v20794_v36 = vpack.c.bf16 %v401_v6, %v400_v46  ;;  %v432_v32 = vld [vmem:[%s23928_s13 + $0x160] sm:$0xff]  ;;  %v451_v46 = vld [vmem:[%s23928_s13 + $0x1f8] sm:$0xff] }
 0x15e   :  { %24540 = vst [vmem:[#allocation133_spill] sm:$0xff] %v20758_v12  ;;  %v20792_v48 = vpack.c.bf16 %v449_v51, %v448_v61  ;;  %v433_v24 = vld [vmem:[%s23928_s13 + $0x168] sm:$0xff]  ;;  %v419_v61 = vld [vmem:[%s23928_s13 + $0xf8] sm:$0xff]  ;;  %v450_v51 = vld [vmem:[%s23928_s13 + $0x1f0] sm:$0xff] }
 0x15f   :  { %15914 = vmatpush3.bf16.msra.mxu0 %v20758_v12  ;;  %24542 = vst [vmem:[#allocation135_spill] sm:$0xff] %v20780_v14  ;;  %15946 = vmatpush3.bf16.msra.mxu1 %v20767_v33  ;;  %24544 = vst [vmem:[#allocation137_spill] sm:$0xff] %v20794_v36  ;;  %v418_v12 = vld [vmem:[%s23928_s13 + $0xf0] sm:$0xff]  ;;  %v20806_v55 = vpack.c.bf16 %v433_v24, %v432_v32  ;;  %v20820_v33 = vpack.c.bf16 %v451_v46, %v450_v51  ;;  %v403_v24 = vld [vmem:[%s23928_s13 + $0x78] sm:$0xff]  ;;  %v19505_v51 = vmov 1983009808  }
 0x160   :  { %24543 = vst [vmem:[#allocation136_spill] sm:$0xff] %v20792_v48  ;;  %15916 = vmatprep.subr.bf16.mxu0 %v20780_v14  ;;  %15948 = vmatprep.subr.bf16.mxu1 %v20792_v48  ;;  %v20818_v6 = vpack.c.bf16 %v419_v61, %v418_v12  ;;  %v402_v32 = vld [vmem:[%s23928_s13 + $0x70] sm:$0xff]  ;;  %v435_v12 = vld [vmem:[%s23928_s13 + $0x178] sm:$0xff]  ;;  %v1270_v46 = vunpack.c.l.s4 %v19505_v51 }
 0x161   :  { %24545 = vst [vmem:[#allocation138_spill] sm:$0xff] %v20806_v55  ;;  %24547 = vst [vmem:[#allocation140_spill] sm:$0xff] %v20820_v33  ;;  %v434_v14 = vld [vmem:[%s23928_s13 + $0x170] sm:$0xff]  ;;  %v20832_v0 = vpack.c.bf16 %v403_v24, %v402_v32  ;;  %v81_v24 = vld [vmem:[%s23931_s2] sm:$0xff] }
 0x162   :  { %24546 = vst [vmem:[#allocation139_spill] sm:$0xff] %v20818_v6  ;;  %v20839_v61 = vpack.c.bf16 %v435_v12, %v434_v14  ;;  %v1271_v32 = vunpack.c.0.s8 %v1270_v46 }
 0x163   :  { %15918 = vmatpush3.bf16.msra.mxu0 %v20794_v36  ;;  %24548 = vst [vmem:[#allocation141_spill] sm:$0xff] %v20832_v0  ;;  %15950 = vmatpush3.bf16.msra.mxu1 %v20806_v55  ;;  %v1268_v55 = vcombine.high %v81_v24, %v81_v24 }
 0x164   :  { %15920 = vmatprep.subr.bf16.mxu0 %v20818_v6  ;;  %24549 = vst [vmem:[#allocation142_spill] sm:$0xff] %v20839_v61  ;;  %15952 = vmatprep.subr.bf16.mxu1 %v20820_v33  ;;  %v1274_v36 = vsub.s32 %v1271_v32, %v20535_v7 }
 0x166   :  { %v20848_v48 = vrot.slane %v81_v24, %v1274_v36  ;;  %v20850_v14 = vrot.slane %v1268_v55, %v1274_v36 }
 0x167   :  { %15922 = vmatpush3.bf16.msra.mxu0 %v20832_v0  ;;  %15954 = vmatpush3.bf16.msra.mxu1 %v20839_v61 }
 0x168   :  { %24550 = vst [vmem:[#allocation143_spill] sm:$0xff] %v20848_v48  ;;  %24551 = vst [vmem:[#allocation144_spill] sm:$0xff] %v20850_v14  ;;  %v20854_v12 = vcombine.high %v20848_v48, %v20848_v48  ;;  %v20858_v0 = vcombine.high %v20850_v14, %v20850_v14 }
 0x16a   :  { %24552 = vst [vmem:[#allocation145_spill] sm:$0xff] %v20854_v12  ;;  %24553 = vst [vmem:[#allocation146_spill] sm:$0xff] %v20858_v0 }
 0x21d   :  { %v1191_v51 = vpop.f32.mrb[2].mxu0  ;;  %v1262_v46 = vpop.f32.mrb[4].mxu1 }
 0x21e   :  { %v1289_v6 = vadd.f32 %v20848_v48, %v1191_v51  ;;  %v1193_v61 = vpop.f32.mrb[3].mxu0  ;;  %v1264_v33 = vpop.f32.mrb[5].mxu1  ;;  %v1291_v36 = vadd.f32 %v20850_v14, %v1262_v46  ;;  %v215_v48 = vld [vmem:[%s23933_s8 + $0x20] sm:$0xff] }
 0x21f   :  { %v1290_v32 = vadd.f32 %v20854_v12, %v1193_v61  ;;  %v1292_v24 = vadd.f32 %v20858_v0, %v1264_v33 }
 0x220   :  { %19162 = vtanh.f32 %v1289_v6 }
 0x221   :  { %19164 = vtanh.f32 %v1290_v32 }
 0x222   :  { %19166 = vtanh.f32 %v1292_v24 }
 0x223   :  { %19168 = vtanh.f32 %v1291_v36 }
 0x22a   :  { %v19163_v55 = vpop.eup %19162 }
 0x22b   :  { %v19165_v10 = vpop.eup %19164 }
 0x22c   :  { %v19167_v28 = vpop.eup %19166  ;;  %1361 = vmatprep.mubr.f32.mxu0 %v19165_v10 }
 0x22d   :  { %v19169_v25 = vpop.eup %19168  ;;  %1431 = vmatprep.mubr.f32.mxu1 %v19167_v28  ;;  %1362 = vmatmul.mubr.f32.vlgmr.msra.gmra.mrb[4].mxu0 %v19163_v55  ;;  %v24135_v55 = vmov 0.0|0.0  }
 0x22e   :  { %1432 = vmatmul.mubr.f32.vlgmr.msra.gmra.mrb[6].mxu1 %v19169_v25  ;;  %v77_v25 = vld [vmem:[%s23932_s1] sm:$0xff]  ;;  %15955 = vmatprep.subr.bf16.mxu0 %v24135_v55 }
 0x22f   :  { %1759 = vmatprep.mubr.f32.mxu1 %v24486_v3  ;;  %15159 = vmatprep.mubr.msk.f32.mxu0 %vm19507_vm5, %v24486_v3 }
 0x300   :  { %v14371_v51 = vpop.f32.mrb[4].mxu0 }
 0x301   :  { %v14406_v61 = vpop.f32.mrb[6].mxu1  ;;  %v14372_v12 = vpop.f32.mrb[5].mxu0 }
 0x302   :  { %v14373_v33 = vadd.f32 %v14372_v12, %v14371_v51  ;;  %v14407_v0 = vpop.f32.mrb[7].mxu1  ;;  %v19508_v51 = vmov 1966171168  }
 0x303   :  { %v14408_v46 = vadd.f32 %v14407_v0, %v14406_v61  ;;  %v78_v0 = vld [vmem:[%s23932_s1 + $0x8] sm:$0xff]  ;;  %v1451_v61 = vunpack.c.l.s4 %v19508_v51  ;;  %v221_v51 = vld [vmem:[%s23933_s8 + $0x50] sm:$0xff] }
 0x304   :  { %v20873_v12 = vpack.c.bf16 %v78_v0, %v77_v25  ;;  %v222_v25 = vld [vmem:[%s23933_s8 + $0x58] sm:$0xff] }
 0x305   :  { %v1434_v6 = vadd.f32 %v14408_v46, %v14373_v33  ;;  %v214_v33 = vld [vmem:[%s23933_s8 + $0x18] sm:$0xff] }
 0x306   :  { %24554 = vst [vmem:[#allocation147_spill] sm:$0xff] %v20873_v12  ;;  %15957 = vmatpush3.bf16.msra.mxu0 %v20873_v12  ;;  %v218_v46 = vld [vmem:[%s23933_s8 + $0x38] sm:$0xff] }
 0x307   :  { %v1438_v32 = vsel %vm72_vm1, %v1434_v6, -inf  ;;  %15958 = vmatprep.subr.bf16.mxu0 %v24135_v55  ;;  %v226_v0 = vld [vmem:[%s23933_s8 + $0x78] sm:$0xff] }
 0x308   :  { %1439 = vmax.xlane.f32.xlu0 %v1438_v32  ;;  %v20886_v32 = vpack.c.bf16 %v218_v46, %v214_v33 }
 0x30a   :  { %24555 = vst [vmem:[#allocation148_spill] sm:$0xff] %v20886_v32  ;;  %15978 = vmatprep.subr.bf16.mxu1 %v20886_v32 }
 0x395   :  { %v1440_v24 = vpop.xlane.xlu0 %1439 }
 0x396   :  { %v1441_v36 = vsub.f32 %v1434_v6, %v1440_v24  ;;  %v1452_v6 = vunpack.c.0.s8 %v1451_v61  ;;  %v213_v24 = vld [vmem:[%s23933_s8 + $0x10] sm:$0xff] }
 0x397   :  { %v225_v61 = vld [vmem:[%s23933_s8 + $0x70] sm:$0xff] }
 0x398   :  { %v1442_v14 = vmul.f32 1.442695, %v1441_v36  ;;  %v217_v36 = vld [vmem:[%s23933_s8 + $0x30] sm:$0xff]  ;;  %v20913_v33 = vsub.s32 %v1452_v6, %v20535_v7  ;;  %v20916_v46 = vpack.c.bf16 %v225_v61, %v221_v51  ;;  %v80_v51 = vld [vmem:[%s23932_s1 + $0x18] sm:$0xff]  ;;  %v212_v61 = vld [vmem:[%s23933_s8 + $0x8] sm:$0xff] }
 0x399   :  { %v79_v6 = vld [vmem:[%s23932_s1 + $0x10] sm:$0xff]  ;;  %v207_v7 = vld [vmem:[%s23935_s7 + $0x60] sm:$0xff] }
 0x39a   :  { %19170 = vpow2.f32 %v1442_v14  ;;  %24558 = vst [vmem:[#allocation151_spill] sm:$0xff] %v20913_v33  ;;  %24559 = vst [vmem:[#allocation152_spill] sm:$0xff] %v20916_v46 }
 0x3a4   :  { %v19171_v10 = vpop.eup %19170 }
 0x3a5   :  { %v1444_v28 = vsel %vm72_vm1, %v19171_v10, 0.0 }
 0x3a6   :  { %1445 = vadd.xlane.f32.xlu1 %v1444_v28  ;;  %v20894_v28 = vpack.c.bf16 %v217_v36, %v213_v24  ;;  %v230_v24 = vld [vmem:[%s23933_s8 + $0x98] sm:$0xff] }
 0x3a7   :  { %v234_v36 = vld [vmem:[%s23933_s8 + $0xb8] sm:$0xff] }
 0x3a8   :  { %24556 = vst [vmem:[#allocation149_spill] sm:$0xff] %v20894_v28  ;;  %15980 = vmatpush1.bf16.msra.mxu1 %v20894_v28 }
 0x433   :  { %v1446_v14 = vpop.xlane.xlu1 %1445 }
 0x434   :  { %19172 = vrcp.f32 %v1446_v14  ;;  %v20903_v14 = vpack.c.bf16 %v226_v0, %v222_v25  ;;  %v20924_v0 = vpack.c.bf16 %v234_v36, %v230_v24 }
 0x436   :  { %24557 = vst [vmem:[#allocation150_spill] sm:$0xff] %v20903_v14  ;;  %15982 = vmatprep.subr.bf16.mxu1 %v20903_v14  ;;  %24560 = vst [vmem:[#allocation153_spill] sm:$0xff] %v20924_v0  ;;  %v216_v14 = vld [vmem:[%s23933_s8 + $0x28] sm:$0xff] }
 0x437   :  { %15984 = vmatpush1.bf16.msra.mxu1 %v20916_v46  ;;  %v20957_v12 = vpack.c.bf16 %v216_v14, %v212_v61 }
 0x438   :  { %15986 = vmatprep.subr.bf16.mxu1 %v20924_v0 }
 0x439   :  { %24564 = vst [vmem:[#allocation157_spill] sm:$0xff] %v20957_v12 }
 0x43e   :  { %v19173_v25 = vpop.eup %19172 }
 0x43f   :  { %v20926_v55 = vmul.f32 %v19173_v25, %v19171_v10  ;;  %v19498_v10 = vld [vmem:[#allocation7] sm:$0x3]  ;;  %v20952_v25 = vpack.c.bf16 %v80_v51, %v79_v6 }
 0x440   :  { %v220_v6 = vld [vmem:[%s23933_s8 + $0x48] sm:$0xff] }
 0x441   :  { %24561 = vst [vmem:[#allocation154_spill] sm:$0xff] %v20926_v55  ;;  %2254 = vst.msk [vmem:[%s23934_s20] sm:$0x3] %vm72_vm1, %v20926_v55  ;;  %v20947_v24 = vadd.f32 %v19498_v10, %v20926_v55  ;;  %v1456_v36 = vrot.slane %v20926_v55, %v20913_v33  ;;  %v211_v10 = vld [vmem:[%s23933_s8] sm:$0xff]  ;;  %v224_v51 = vld [vmem:[%s23933_s8 + $0x68] sm:$0xff] }
 0x442   :  { %24563 = vst [vmem:[#allocation156_spill] sm:$0xff] %v20952_v25  ;;  %v20975_v14 = vpack.c.bf16 %v215_v48, %v211_v10  ;;  %v232_v48 = vld [vmem:[%s23933_s8 + $0xa8] sm:$0xff]  ;;  %v203_v55 = vld [vmem:[%s23935_s7 + $0x40] sm:$0xff] }
 0x443   :  { %24562 = vst [vmem:[#allocation155_spill] sm:$0xff] %v20947_v24  ;;  %2722 = vrot.lane.b32.xlu1 %v20947_v24, %s19504_s4  ;;  %v1464_v46 = vrot.slane %v1456_v36, %v20913_v33  ;;  %v1457_v28 = vcombine.high %v1456_v36, %v1456_v36  ;;  %v20979_v36 = vpack.c.bf16 %v224_v51, %v220_v6  ;;  %v219_v24 = vld [vmem:[%s23933_s8 + $0x40] sm:$0xff] }
 0x444   :  { %24565 = vst [vmem:[#allocation158_spill] sm:$0xff] %v20975_v14  ;;  %v227_v6 = vld [vmem:[%s23933_s8 + $0x80] sm:$0xff] }
 0x445   :  { %15160 = vmatmul.mubr.msk.f32.vlgmr.msra.gmra.mrb[6].mxu0 %vm978_vm4, %v1464_v46  ;;  %v1471_v61 = vrot.slane %v1457_v28, %v20913_v33  ;;  %24566 = vst [vmem:[#allocation159_spill] sm:$0xff] %v20979_v36  ;;  %v223_v46 = vld [vmem:[%s23933_s8 + $0x60] sm:$0xff]  ;;  %v210_v33 = vld [vmem:[%s23935_s7 + $0x78] sm:$0xff] }
 0x446   :  { %15960 = vmatpush3.bf16.msra.mxu0 %v20952_v25  ;;  %15166 = vmatprep.mubr.msk.f32.mxu0 %vm19507_vm5, %v24486_v3  ;;  %v228_v25 = vld [vmem:[%s23933_s8 + $0x88] sm:$0xff]  ;;  %v20995_v28 = vpack.c.bf16 %v223_v46, %v219_v24  ;;  %v231_v51 = vld [vmem:[%s23933_s8 + $0xa0] sm:$0xff]  ;;  %v229_v24 = vld [vmem:[%s23933_s8 + $0x90] sm:$0xff] }
 0x447   :  { %15962 = vmatprep.subr.bf16.mxu0 %v20957_v12  ;;  %v20999_v10 = vpack.c.bf16 %v232_v48, %v228_v25  ;;  %v233_v25 = vld [vmem:[%s23933_s8 + $0xb0] sm:$0xff]  ;;  %v236_v48 = vld [vmem:[%s23933_s8 + $0xc8] sm:$0xff]  ;;  %v195_v12 = vld [vmem:[%s23935_s7] sm:$0xff] }
 0x448   :  { %24567 = vst [vmem:[#allocation160_spill] sm:$0xff] %v20995_v28  ;;  %v21017_v46 = vpack.c.bf16 %v233_v25, %v229_v24  ;;  %v242_v24 = vld [vmem:[%s23933_s8 + $0xf8] sm:$0xff]  ;;  %v235_v25 = vld [vmem:[%s23933_s8 + $0xc0] sm:$0xff] }
 0x449   :  { %15167 = vmatmul.mubr.msk.f32.vlgmr.msra.gmra.mrb[8].mxu0 %vm978_vm4, %v1471_v61  ;;  %24568 = vst [vmem:[#allocation161_spill] sm:$0xff] %v20999_v10  ;;  %v21012_v61 = vpack.c.bf16 %v231_v51, %v227_v6  ;;  %v238_v6 = vld [vmem:[%s23933_s8 + $0xd8] sm:$0xff] }
 0x44a   :  { %15964 = vmatpush1.bf16.msra.mxu0 %v20975_v14  ;;  %1688 = vmatprep.mubr.f32.mxu0 %v24486_v3  ;;  %24570 = vst [vmem:[#allocation163_spill] sm:$0xff] %v21017_v46 }
 0x44b   :  { %15966 = vmatprep.subr.bf16.mxu0 %v20979_v36  ;;  %24569 = vst [vmem:[#allocation162_spill] sm:$0xff] %v21012_v61  ;;  %15988 = vmatpush1.bf16.msra.mxu1 %v21017_v46 }
 0x44e   :  { %15968 = vmatpush1.bf16.msra.mxu0 %v20995_v28  ;;  %v21041_v28 = vpack.c.bf16 %v242_v24, %v238_v6  ;;  %v200_v6 = vld [vmem:[%s23935_s7 + $0x28] sm:$0xff]  ;;  %v198_v24 = vld [vmem:[%s23935_s7 + $0x18] sm:$0xff] }
 0x44f   :  { %15970 = vmatprep.subr.bf16.mxu0 %v20999_v10  ;;  %v240_v10 = vld [vmem:[%s23933_s8 + $0xe8] sm:$0xff] }
 0x450   :  { %v21030_v51 = vpack.c.bf16 %v240_v10, %v236_v48  ;;  %24572 = vst [vmem:[#allocation165_spill] sm:$0xff] %v21041_v28  ;;  %v237_v10 = vld [vmem:[%s23933_s8 + $0xd0] sm:$0xff]  ;;  %15990 = vmatprep.subr.bf16.mxu1 %v21041_v28 }
 0x451   :  { %v241_v48 = vld [vmem:[%s23933_s8 + $0xf0] sm:$0xff] }
 0x452   :  { %15972 = vmatpush1.bf16.msra.mxu0 %v21012_v61  ;;  %24571 = vst [vmem:[#allocation164_spill] sm:$0xff] %v21030_v51  ;;  %v239_v61 = vld [vmem:[%s23933_s8 + $0xe0] sm:$0xff]  ;;  %v21052_v14 = vpack.c.bf16 %v241_v48, %v237_v10  ;;  %v202_v10 = vld [vmem:[%s23935_s7 + $0x38] sm:$0xff] }
 0x453   :  { %v21043_v36 = vpack.c.bf16 %v239_v61, %v235_v25  ;;  %15974 = vmatprep.subr.bf16.mxu0 %v21030_v51  ;;  %v196_v61 = vld [vmem:[%s23935_s7 + $0x8] sm:$0xff]  ;;  %v21071_v48 = vpack.c.bf16 %v202_v10, %v198_v24  ;;  %v201_v24 = vld [vmem:[%s23935_s7 + $0x30] sm:$0xff] }
 0x454   :  { %24574 = vst [vmem:[#allocation167_spill] sm:$0xff] %v21052_v14  ;;  %15992 = vmatpush1.bf16.msra.mxu1 %v21052_v14  ;;  %v21066_v25 = vpack.c.bf16 %v200_v6, %v196_v61  ;;  %v199_v61 = vld [vmem:[%s23935_s7 + $0x20] sm:$0xff]  ;;  %v197_v6 = vld [vmem:[%s23935_s7 + $0x10] sm:$0xff]  ;;  %v208_v10 = vld [vmem:[%s23935_s7 + $0x68] sm:$0xff] }
 0x455   :  { %24573 = vst [vmem:[#allocation166_spill] sm:$0xff] %v21043_v36  ;;  %24576 = vst [vmem:[#allocation169_spill] sm:$0xff] %v21071_v48  ;;  %16002 = vmatprep.subr.bf16.mxu1 %v21071_v48  ;;  %v21099_v46 = vpack.c.bf16 %v199_v61, %v195_v12  ;;  %v21101_v0 = vpack.c.bf16 %v201_v24, %v197_v6  ;;  %v209_v12 = vld [vmem:[%s23935_s7 + $0x70] sm:$0xff]  ;;  %v250_v6 = vld [vmem:[%s23936_s9 + $0x38] sm:$0xff] }
 0x456   :  { %15976 = vmatpush1.bf16.msra.mxu0 %v21043_v36  ;;  %24575 = vst [vmem:[#allocation168_spill] sm:$0xff] %v21066_v25  ;;  %v243_v24 = vld [vmem:[%s23936_s9] sm:$0xff] }
 0x457   :  { %15994 = vmatprep.subr.bf16.mxu0 %v21066_v25  ;;  %v206_v25 = vld [vmem:[%s23935_s7 + $0x58] sm:$0xff]  ;;  %24577 = vst [vmem:[#allocation170_spill] sm:$0xff] %v21099_v46  ;;  %24578 = vst [vmem:[#allocation171_spill] sm:$0xff] %v21101_v0 }
 0x458   :  { %v21111_v34 = vpack.c.bf16 %v210_v33, %v206_v25  ;;  %v248_v33 = vld [vmem:[%s23936_s9 + $0x28] sm:$0xff]  ;;  %v246_v25 = vld [vmem:[%s23936_s9 + $0x18] sm:$0xff] }
 0x45a   :  { %24580 = vst [vmem:[#allocation173_spill] sm:$0xff] %v21111_v34 }
 0x518   :  { %v1540_v36 = vpop.f32.mrb[6].mxu0 }
 0x519   :  { %v15161_v51 = vpop.f32.mrb[7].mxu0 }
 0x51a   :  { %v204_v51 = vld [vmem:[%s23935_s7 + $0x48] sm:$0xff] }
 0x51b   :  { %v21109_v32 = vpack.c.bf16 %v208_v10, %v204_v51  ;;  %v247_v51 = vld [vmem:[%s23936_s9 + $0x20] sm:$0xff] }
 0x51c   :  { %v1612_v48 = vpop.f32.mrb[8].mxu0 }
 0x51d   :  { %v1619_v14 = vrot.slane %v1612_v48, 7  ;;  %v15168_v28 = vpop.f32.mrb[9].mxu0  ;;  %24579 = vst [vmem:[#allocation172_spill] sm:$0xff] %v21109_v32  ;;  %v244_v48 = vld [vmem:[%s23936_s9 + $0x8] sm:$0xff] }
 0x51e   :  { %v205_v28 = vld [vmem:[%s23935_s7 + $0x50] sm:$0xff]  ;;  %v21152_v10 = vpack.c.bf16 %v248_v33, %v244_v48  ;;  %v254_v48 = vld [vmem:[%s23936_s9 + $0x58] sm:$0xff] }
 0x51f   :  { %v21123_v61 = vsel %vm1620_vm6, %v1619_v14, %v1540_v36  ;;  %v21140_v14 = vpack.c.bf16 %v207_v7, %v203_v55  ;;  %v21142_v36 = vpack.c.bf16 %v209_v12, %v205_v28  ;;  %v245_v7 = vld [vmem:[%s23936_s9 + $0x10] sm:$0xff]  ;;  %v252_v28 = vld [vmem:[%s23936_s9 + $0x48] sm:$0xff]  ;;  %v258_v33 = vld [vmem:[%s23936_s9 + $0x78] sm:$0xff] }
 0x520   :  { %14162 = vmatmul.mubr.msk.f32.vlgmr.msra.gmra.mrb[10].mxu0 %vm485_vm3, %v21123_v61  ;;  %14163 = vmatmul.mubr.msk.f32.vlgmr.msra.gmra.mrb[8].mxu1 %vm485_vm3, %v21123_v61  ;;  %24583 = vst [vmem:[#allocation176_spill] sm:$0xff] %v21152_v10  ;;  %v249_v55 = vld [vmem:[%s23936_s9 + $0x30] sm:$0xff]  ;;  %v256_v12 = vld [vmem:[%s23936_s9 + $0x68] sm:$0xff] }
 0x521   :  { %15996 = vmatpush1.bf16.msra.mxu0 %v21099_v46  ;;  %16004 = vmatpush1.bf16.msra.mxu1 %v21101_v0  ;;  %24581 = vst [vmem:[#allocation174_spill] sm:$0xff] %v21140_v14  ;;  %24582 = vst [vmem:[#allocation175_spill] sm:$0xff] %v21142_v36  ;;  %v21154_v46 = vpack.c.bf16 %v250_v6, %v246_v25  ;;  %v21178_v25 = vpack.c.bf16 %v247_v51, %v243_v24  ;;  %v253_v24 = vld [vmem:[%s23936_s9 + $0x50] sm:$0xff] }
 0x522   :  { %15998 = vmatprep.subr.bf16.mxu0 %v21109_v32  ;;  %16006 = vmatprep.subr.bf16.mxu1 %v21111_v34  ;;  %v21180_v6 = vpack.c.bf16 %v249_v55, %v245_v7  ;;  %v251_v34 = vld [vmem:[%s23936_s9 + $0x40] sm:$0xff]  ;;  %v21190_v0 = vpack.c.bf16 %v256_v12, %v252_v28  ;;  %v257_v51 = vld [vmem:[%s23936_s9 + $0x70] sm:$0xff]  ;;  %v260_v7 = vld [vmem:[%s23936_s9 + $0x88] sm:$0xff] }
 0x523   :  { %24584 = vst [vmem:[#allocation177_spill] sm:$0xff] %v21154_v46  ;;  %1830 = vmatprep.mubr.f32.mxu0 %v24486_v3  ;;  %1901 = vmatprep.mubr.f32.mxu1 %v24486_v3  ;;  %24585 = vst [vmem:[#allocation178_spill] sm:$0xff] %v21178_v25  ;;  %v255_v32 = vld [vmem:[%s23936_s9 + $0x60] sm:$0xff]  ;;  %v264_v55 = vld [vmem:[%s23936_s9 + $0xa8] sm:$0xff] }
 0x524   :  { %24586 = vst [vmem:[#allocation179_spill] sm:$0xff] %v21180_v6  ;;  %24587 = vst [vmem:[#allocation180_spill] sm:$0xff] %v21190_v0  ;;  %v262_v28 = vld [vmem:[%s23936_s9 + $0x98] sm:$0xff] }
 0x525   :  { %16000 = vmatpush1.bf16.msra.mxu0 %v21140_v14  ;;  %16008 = vmatpush1.bf16.msra.mxu1 %v21142_v36  ;;  %v21192_v14 = vpack.c.bf16 %v258_v33, %v254_v48  ;;  %v266_v12 = vld [vmem:[%s23936_s9 + $0xb8] sm:$0xff]  ;;  %v19499_v48 = vld [vmem:[%s24423_s12] sm:$0x3]  ;;  %v21219_v33 = vpack.c.bf16 %v255_v32, %v251_v34  ;;  %v261_v34 = vld [vmem:[%s23936_s9 + $0x90] sm:$0xff] }
 0x526   :  { %16010 = vmatprep.subr.bf16.mxu0 %v21152_v10  ;;  %16042 = vmatprep.subr.bf16.mxu1 %v21154_v46  ;;  %v21221_v46 = vpack.c.bf16 %v257_v51, %v253_v24  ;;  %v259_v10 = vld [vmem:[%s23936_s9 + $0x80] sm:$0xff]  ;;  %v265_v32 = vld [vmem:[%s23936_s9 + $0xb0] sm:$0xff]  ;;  %v268_v24 = vld [vmem:[%s23936_s9 + $0xc8] sm:$0xff] }
 0x527   :  { %24588 = vst [vmem:[#allocation181_spill] sm:$0xff] %v21192_v14  ;;  %24589 = vst [vmem:[#allocation182_spill] sm:$0xff] %v21219_v33  ;;  %v263_v36 = vld [vmem:[%s23936_s9 + $0xa0] sm:$0xff]  ;;  %v272_v51 = vld [vmem:[%s23936_s9 + $0xe8] sm:$0xff] }
 0x528   :  { %14164 = vmatmul.mubr.msk.f32.vlgmr.msra.gmra.mrb[10].mxu0 %vm631_vm2, %v19499_v48  ;;  %14165 = vmatmul.mubr.msk.f32.vlgmr.msra.gmra.mrb[8].mxu1 %vm631_vm2, %v19499_v48  ;;  %24590 = vst [vmem:[#allocation183_spill] sm:$0xff] %v21221_v46  ;;  %v21231_v48 = vpack.c.bf16 %v264_v55, %v260_v7  ;;  %v270_v7 = vld [vmem:[%s23936_s9 + $0xd8] sm:$0xff] }
 0x529   :  { %16012 = vmatpush1.bf16.msra.mxu0 %v21178_v25  ;;  %16044 = vmatpush1.bf16.msra.mxu1 %v21180_v6  ;;  %v21233_v25 = vpack.c.bf16 %v266_v12, %v262_v28  ;;  %v274_v55 = vld [vmem:[%s23936_s9 + $0xf8] sm:$0xff]  ;;  %v21257_v28 = vpack.c.bf16 %v263_v36, %v259_v10  ;;  %v21259_v12 = vpack.c.bf16 %v265_v32, %v261_v34  ;;  %v269_v36 = vld [vmem:[%s23936_s9 + $0xd0] sm:$0xff]  ;;  %v276_v34 = vld [vmem:[%s23936_s9 + $0x108] sm:$0xff] }
 0x52a   :  { %16014 = vmatprep.subr.bf16.mxu0 %v21190_v0  ;;  %16046 = vmatprep.subr.bf16.mxu1 %v21192_v14  ;;  %24591 = vst [vmem:[#allocation184_spill] sm:$0xff] %v21231_v48  ;;  %v267_v14 = vld [vmem:[%s23936_s9 + $0xc0] sm:$0xff]  ;;  %v21269_v6 = vpack.c.bf16 %v272_v51, %v268_v24  ;;  %v273_v10 = vld [vmem:[%s23936_s9 + $0xf0] sm:$0xff]  ;;  %v280_v32 = vld [vmem:[%s23936_s9 + $0x128] sm:$0xff] }
 0x52b   :  { %24592 = vst [vmem:[#allocation185_spill] sm:$0xff] %v21233_v25  ;;  %1972 = vmatprep.mubr.f32.mxu0 %v24486_v3  ;;  %2043 = vmatprep.mubr.f32.mxu1 %v24486_v3  ;;  %24593 = vst [vmem:[#allocation186_spill] sm:$0xff] %v21257_v28  ;;  %v271_v0 = vld [vmem:[%s23936_s9 + $0xe0] sm:$0xff]  ;;  %v278_v24 = vld [vmem:[%s23936_s9 + $0x118] sm:$0xff] }
 0x52c   :  { %24594 = vst [vmem:[#allocation187_spill] sm:$0xff] %v21259_v12  ;;  %24595 = vst [vmem:[#allocation188_spill] sm:$0xff] %v21269_v6  ;;  %v282_v51 = vld [vmem:[%s23936_s9 + $0x138] sm:$0xff] }
 0x52d   :  { %16016 = vmatpush1.bf16.msra.mxu0 %v21219_v33  ;;  %16048 = vmatpush1.bf16.msra.mxu1 %v21221_v46  ;;  %v21271_v33 = vpack.c.bf16 %v274_v55, %v270_v7  ;;  %v21293_v7 = vpack.c.bf16 %v271_v0, %v267_v14  ;;  %v21295_v55 = vpack.c.bf16 %v273_v10, %v269_v36  ;;  %v277_v0 = vld [vmem:[%s23936_s9 + $0x110] sm:$0xff]  ;;  %v284_v36 = vld [vmem:[%s23936_s9 + $0x148] sm:$0xff] }
 0x52e   :  { %16018 = vmatprep.subr.bf16.mxu0 %v21231_v48  ;;  %16050 = vmatprep.subr.bf16.mxu1 %v21233_v25  ;;  %v275_v25 = vld [vmem:[%s23936_s9 + $0x100] sm:$0xff]  ;;  %v21305_v46 = vpack.c.bf16 %v280_v32, %v276_v34  ;;  %v281_v14 = vld [vmem:[%s23936_s9 + $0x130] sm:$0xff]  ;;  %v288_v10 = vld [vmem:[%s23936_s9 + $0x168] sm:$0xff] }
 0x52f   :  { %24596 = vst [vmem:[#allocation189_spill] sm:$0xff] %v21271_v33  ;;  %24597 = vst [vmem:[#allocation190_spill] sm:$0xff] %v21293_v7  ;;  %v279_v48 = vld [vmem:[%s23936_s9 + $0x120] sm:$0xff]  ;;  %v286_v34 = vld [vmem:[%s23936_s9 + $0x158] sm:$0xff] }
 0x530   :  { %24598 = vst [vmem:[#allocation191_spill] sm:$0xff] %v21295_v55  ;;  %24599 = vst [vmem:[#allocation192_spill] sm:$0xff] %v21305_v46  ;;  %v290_v32 = vld [vmem:[%s23936_s9 + $0x178] sm:$0xff] }
 0x531   :  { %16020 = vmatpush1.bf16.msra.mxu0 %v21257_v28  ;;  %16052 = vmatpush1.bf16.msra.mxu1 %v21259_v12  ;;  %v21307_v28 = vpack.c.bf16 %v282_v51, %v278_v24  ;;  %v21329_v24 = vpack.c.bf16 %v279_v48, %v275_v25  ;;  %v21331_v51 = vpack.c.bf16 %v281_v14, %v277_v0  ;;  %v285_v25 = vld [vmem:[%s23936_s9 + $0x150] sm:$0xff]  ;;  %v292_v0 = vld [vmem:[%s23936_s9 + $0x188] sm:$0xff] }
 0x532   :  { %16022 = vmatprep.subr.bf16.mxu0 %v21269_v6  ;;  %16054 = vmatprep.subr.bf16.mxu1 %v21271_v33  ;;  %v283_v33 = vld [vmem:[%s23936_s9 + $0x140] sm:$0xff]  ;;  %v21341_v12 = vpack.c.bf16 %v288_v10, %v284_v36  ;;  %v289_v48 = vld [vmem:[%s23936_s9 + $0x170] sm:$0xff]  ;;  %v296_v14 = vld [vmem:[%s23936_s9 + $0x1a8] sm:$0xff] }
 0x533   :  { %24600 = vst [vmem:[#allocation193_spill] sm:$0xff] %v21307_v28  ;;  %24601 = vst [vmem:[#allocation194_spill] sm:$0xff] %v21329_v24  ;;  %v287_v6 = vld [vmem:[%s23936_s9 + $0x160] sm:$0xff]  ;;  %v294_v36 = vld [vmem:[%s23936_s9 + $0x198] sm:$0xff] }
 0x534   :  { %24602 = vst [vmem:[#allocation195_spill] sm:$0xff] %v21331_v51  ;;  %24603 = vst [vmem:[#allocation196_spill] sm:$0xff] %v21341_v12  ;;  %v298_v10 = vld [vmem:[%s23936_s9 + $0x1b8] sm:$0xff] }
 0x535   :  { %16024 = vmatpush1.bf16.msra.mxu0 %v21293_v7  ;;  %16056 = vmatpush1.bf16.msra.mxu1 %v21295_v55  ;;  %v21343_v7 = vpack.c.bf16 %v290_v32, %v286_v34  ;;  %v21365_v34 = vpack.c.bf16 %v287_v6, %v283_v33  ;;  %v21367_v32 = vpack.c.bf16 %v289_v48, %v285_v25  ;;  %v293_v6 = vld [vmem:[%s23936_s9 + $0x190] sm:$0xff]  ;;  %v300_v25 = vld [vmem:[%s23936_s9 + $0x1c8] sm:$0xff] }
 0x536   :  { %16026 = vmatprep.subr.bf16.mxu0 %v21305_v46  ;;  %16058 = vmatprep.subr.bf16.mxu1 %v21307_v28  ;;  %v291_v28 = vld [vmem:[%s23936_s9 + $0x180] sm:$0xff]  ;;  %v21377_v55 = vpack.c.bf16 %v296_v14, %v292_v0  ;;  %v297_v33 = vld [vmem:[%s23936_s9 + $0x1b0] sm:$0xff]  ;;  %v304_v48 = vld [vmem:[%s23936_s9 + $0x1e8] sm:$0xff] }
 0x537   :  { %24604 = vst [vmem:[#allocation197_spill] sm:$0xff] %v21343_v7  ;;  %24605 = vst [vmem:[#allocation198_spill] sm:$0xff] %v21365_v34  ;;  %v295_v46 = vld [vmem:[%s23936_s9 + $0x1a0] sm:$0xff]  ;;  %v302_v0 = vld [vmem:[%s23936_s9 + $0x1d8] sm:$0xff] }
 0x538   :  { %24606 = vst [vmem:[#allocation199_spill] sm:$0xff] %v21367_v32  ;;  %24607 = vst [vmem:[#allocation200_spill] sm:$0xff] %v21377_v55  ;;  %v306_v14 = vld [vmem:[%s23936_s9 + $0x1f8] sm:$0xff] }
 0x539   :  { %16028 = vmatpush1.bf16.msra.mxu0 %v21329_v24  ;;  %16060 = vmatpush1.bf16.msra.mxu1 %v21331_v51  ;;  %v21379_v24 = vpack.c.bf16 %v298_v10, %v294_v36  ;;  %v21401_v36 = vpack.c.bf16 %v295_v46, %v291_v28  ;;  %v21403_v10 = vpack.c.bf16 %v297_v33, %v293_v6  ;;  %v301_v46 = vld [vmem:[%s23936_s9 + $0x1d0] sm:$0xff] }
 0x53a   :  { %16030 = vmatprep.subr.bf16.mxu0 %v21341_v12  ;;  %16062 = vmatprep.subr.bf16.mxu1 %v21343_v7  ;;  %v299_v7 = vld [vmem:[%s23936_s9 + $0x1c0] sm:$0xff]  ;;  %v21410_v12 = vpack.c.bf16 %v304_v48, %v300_v25  ;;  %v21412_v51 = vpack.c.bf16 %v306_v14, %v302_v0  ;;  %v305_v28 = vld [vmem:[%s23936_s9 + $0x1f0] sm:$0xff]  ;;  %v469_v48 = vld [vmem:[%s23937_s15 + $0x8] sm:$0xff]  ;;  %v24616_v0 = vmov 0.0|0.0  }
 0x53b   :  { %24608 = vst [vmem:[#allocation201_spill] sm:$0xff] %v21379_v24  ;;  %24609 = vst [vmem:[#allocation202_spill] sm:$0xff] %v21401_v36  ;;  %v21427_v33 = vpack.c.bf16 %v305_v28, %v301_v46  ;;  %v468_v25 = vld [vmem:[%s23937_s15] sm:$0xff]  ;;  %v470_v14 = vld [vmem:[%s23937_s15 + $0x10] sm:$0xff] }
 0x53c   :  { %24610 = vst [vmem:[#allocation203_spill] sm:$0xff] %v21403_v10  ;;  %24611 = vst [vmem:[#allocation204_spill] sm:$0xff] %v21410_v12  ;;  %v471_v46 = vld [vmem:[%s23937_s15 + $0x18] sm:$0xff] }
 0x53d   :  { %16032 = vmatpush1.bf16.msra.mxu0 %v21365_v34  ;;  %16064 = vmatpush1.bf16.msra.mxu1 %v21367_v32  ;;  %24612 = vst [vmem:[#allocation205_spill] sm:$0xff] %v21412_v51  ;;  %v303_v32 = vld [vmem:[%s23936_s9 + $0x1e0] sm:$0xff]  ;;  %24614 = vst [vmem:[#allocation207_spill] sm:$0xff] %v21427_v33  ;;  %v21450_v28 = vpack.c.bf16 %v471_v46, %v470_v14  ;;  %v474_v14 = vld [vmem:[%s23937_s15 + $0x30] sm:$0xff] }
 0x53e   :  { %16034 = vmatprep.subr.bf16.mxu0 %v21377_v55  ;;  %16066 = vmatprep.subr.bf16.mxu1 %v21379_v24  ;;  %v21425_v6 = vpack.c.bf16 %v303_v32, %v299_v7  ;;  %v479_v7 = vld [vmem:[#allocation4] sm:$0x3]  ;;  %v21439_v32 = vpack.c.bf16 %v469_v48, %v468_v25  ;;  %v473_v48 = vld [vmem:[%s23937_s15 + $0x28] sm:$0xff]  ;;  %v475_v46 = vld [vmem:[%s23937_s15 + $0x38] sm:$0xff] }
 0x53f   :  { %24617 = vst [vmem:[#allocation209_spill] sm:$0xff] %v21450_v28  ;;  %v472_v25 = vld [vmem:[%s23937_s15 + $0x20] sm:$0xff] }
 0x540   :  { %24613 = vst [vmem:[#allocation206_spill] sm:$0xff] %v21425_v6  ;;  %24615 = vst [vmem:[#allocation208_spill] sm:$0xff] %v21439_v32 }
 0x541   :  { %16036 = vmatpush1.bf16.msra.mxu0 %v21401_v36  ;;  %16068 = vmatpush1.bf16.msra.mxu1 %v21403_v10 }
 0x542   :  { %16038 = vmatprep.subr.bf16.mxu0 %v21410_v12  ;;  %16070 = vmatprep.subr.bf16.mxu1 %v21412_v51 }
 0x545   :  { %16040 = vmatpush1.bf16.msra.mxu0 %v21425_v6  ;;  %16072 = vmatpush1.bf16.msra.mxu1 %v21427_v33 }
 0x546   :  { %16073 = vmatprep.subr.bf16.mxu0 %v24616_v0  ;;  %16085 = vmatprep.subr.bf16.mxu1 %v24616_v0 }
 0x548   :  { %1973 = vmatmul.mubr.f32.vlgmr.msra.gmra.mrb[10].mxu0 %v479_v7  ;;  %2044 = vmatmul.mubr.f32.vlgmr.msra.gmra.mrb[8].mxu1 %v479_v7  ;;  %v21464_v7 = vpack.c.bf16 %v473_v48, %v472_v25  ;;  %v21510_v25 = vld [vmem:[%s24423_s12 + $0x2] sm:$0x3]  ;;  %v453_v48 = vld [vmem:[%s23938_s14 + $0x8] sm:$0xff] }
 0x549   :  { %16075 = vmatpush3.bf16.msra.mxu0 %v21439_v32  ;;  %15185 = vmatprep.mubr.msk.f32.mxu0 %vm19507_vm5, %v24486_v3  ;;  %v21474_v32 = vpack.c.bf16 %v475_v46, %v474_v14  ;;  %v24621_v46 = vld [vmem:[#allocation52_spill] sm:$0xff] }
 0x54a   :  { %16076 = vmatprep.subr.bf16.mxu0 %v24616_v0  ;;  %15220 = vmatprep.mubr.msk.f32.mxu1 %vm19507_vm5, %v24486_v3  ;;  %24618 = vst [vmem:[#allocation210_spill] sm:$0xff] %v21464_v7 }
 0x54b   :  { %24619 = vst [vmem:[#allocation211_spill] sm:$0xff] %v21474_v32 }
 0x54d   :  { %16078 = vmatpush3.bf16.msra.mxu0 %v21450_v28 }
 0x54e   :  { %16079 = vmatprep.subr.bf16.mxu0 %v24616_v0 }
 0x551   :  { %16081 = vmatpush3.bf16.msra.mxu0 %v21464_v7 }
 0x552   :  { %16082 = vmatprep.subr.bf16.mxu0 %v24616_v0 }
 0x555   :  { %16084 = vmatpush3.bf16.msra.mxu0 %v21474_v32 }
 0x556   :  { %16110 = vmatprep.subr.bf16.mxu0 %v19631_v4 }
 0x558   :  { %15186 = vmatmul.mubr.msk.f32.vlgmr.msra.gmra.mrb[12].mxu0 %vm485_vm3, %v21123_v61 }
 0x559   :  { %16112 = vmatpush1.bf16.msra.mxu0 %v19648_v9  ;;  %2321 = vmatprep.mubr.f32.mxu0 %v24486_v3 }
 0x55a   :  { %16114 = vmatprep.subr.bf16.mxu0 %v19673_v17 }
 0x55d   :  { %16116 = vmatpush1.bf16.msra.mxu0 %v19687_v22 }
 0x55e   :  { %16118 = vmatprep.subr.bf16.mxu0 %v19702_v27 }
 0x561   :  { %16120 = vmatpush1.bf16.msra.mxu0 %v19727_v35 }
 0x562   :  { %16122 = vmatprep.subr.bf16.mxu0 %v19742_v40 }
 0x565   :  { %16124 = vmatpush1.bf16.msra.mxu0 %v19774_v50 }
 0x566   :  { %16126 = vmatprep.subr.bf16.mxu0 %v19786_v54 }
 0x568   :  { %14172 = vmatmul.mubr.msk.f32.vlgmr.msra.gmra.mrb[14].mxu0 %vm485_vm3, %v21123_v61 }
 0x569   :  { %16128 = vmatpush1.bf16.msra.mxu0 %v19819_v1  ;;  %2392 = vmatprep.mubr.f32.mxu0 %v24486_v3 }
 0x56a   :  { %16130 = vmatprep.subr.bf16.mxu0 %v19825_v5 }
 0x56d   :  { %16132 = vmatpush1.bf16.msra.mxu0 %v19857_v20 }
 0x56e   :  { %16134 = vmatprep.subr.bf16.mxu0 %v19864_v23 }
 0x571   :  { %16136 = vmatpush1.bf16.msra.mxu0 %v19894_v38 }
 0x572   :  { %16138 = vmatprep.subr.bf16.mxu0 %v19900_v42 }
 0x575   :  { %16140 = vmatpush1.bf16.msra.mxu0 %v19930_v56 }
 0x576   :  { %16142 = vmatprep.subr.bf16.mxu0 %v19646_v8 }
 0x578   :  { %14173 = vmatmul.mubr.msk.f32.vlgmr.msra.gmra.mrb[16].mxu0 %vm485_vm3, %v21123_v61  ;;  %v452_v61 = vld [vmem:[%s23938_s14] sm:$0xff] }
 0x579   :  { %16144 = vmatpush1.bf16.msra.mxu0 %v19660_v13  ;;  %2466 = vmatprep.mubr.f32.mxu0 %v24486_v3  ;;  %v21549_v14 = vpack.c.bf16 %v453_v48, %v452_v61  ;;  %v24624_v61 = vld [vmem:[#allocation54_spill] sm:$0xff]  ;;  %v24625_v48 = vld [vmem:[#allocation55_spill] sm:$0xff] }
 0x57a   :  { %16146 = vmatprep.subr.bf16.mxu0 %v19675_v18 }
 0x57b   :  { %24620 = vst [vmem:[#allocation212_spill] sm:$0xff] %v21549_v14  ;;  %16087 = vmatpush3.bf16.msra.mxu1 %v21549_v14 }
 0x57c   :  { %16088 = vmatprep.subr.bf16.mxu1 %v24616_v0 }
 0x57d   :  { %16148 = vmatpush1.bf16.msra.mxu0 %v19700_v26 }
 0x57e   :  { %16150 = vmatprep.subr.bf16.mxu0 %v19936_v59 }
 0x580   :  { %14174 = vmatmul.mubr.msk.f32.vlgmr.msra.gmra.mrb[14].mxu0 %vm631_vm2, %v21510_v25 }
 0x581   :  { %16152 = vmatpush1.bf16.msra.mxu0 %v19966_v15  ;;  %2537 = vmatprep.mubr.f32.mxu0 %v24486_v3 }
 0x582   :  { %16154 = vmatprep.subr.bf16.mxu0 %v19972_v19 }
 0x585   :  { %16156 = vmatpush1.bf16.msra.mxu0 %v19998_v37 }
 0x586   :  { %16158 = vmatprep.subr.bf16.mxu0 %v19713_v31 }
 0x588   :  { %14175 = vmatmul.mubr.msk.f32.vlgmr.msra.gmra.mrb[16].mxu0 %vm631_vm2, %v21510_v25 }
 0x589   :  { %16160 = vmatpush1.bf16.msra.mxu0 %v19740_v39  ;;  %2608 = vmatprep.mubr.f32.mxu0 %v24486_v3 }
 0x58a   :  { %16162 = vmatprep.subr.bf16.mxu0 %v19754_v44 }
 0x58d   :  { %16164 = vmatpush1.bf16.msra.mxu0 %v19784_v53 }
 0x58e   :  { %16166 = vmatprep.subr.bf16.mxu0 %v19798_v58 }
 0x591   :  { %16168 = vmatpush1.bf16.msra.mxu0 %v19823_v2  ;;  %v24653_v2 = vld [vmem:[#allocation136_spill] sm:$0xff] }
 0x592   :  { %16170 = vmatprep.subr.bf16.mxu0 %v19837_v11  ;;  %v24651_v11 = vld [vmem:[#allocation132_spill] sm:$0xff] }
 0x595   :  { %16172 = vmatpush1.bf16.msra.mxu0 %v19862_v21  ;;  %v24648_v21 = vld [vmem:[#allocation126_spill] sm:$0xff] }
 0x596   :  { %16174 = vmatprep.subr.bf16.mxu0 %v19876_v29  ;;  %v24644_v29 = vld [vmem:[#allocation118_spill] sm:$0xff] }
 0x599   :  { %16176 = vmatpush1.bf16.msra.mxu0 %v19898_v41  ;;  %v24638_v41 = vld [vmem:[#allocation63_spill] sm:$0xff] }
 0x59a   :  { %16178 = vmatprep.subr.bf16.mxu0 %v19912_v47 }
 0x59d   :  { %16180 = vmatpush1.bf16.msra.mxu0 %v19934_v57 }
 0x59e   :  { %16182 = vmatprep.subr.bf16.mxu0 %v19948_v63 }
 0x5a1   :  { %16184 = vmatpush1.bf16.msra.mxu0 %v19970_v16 }
 0x5a2   :  { %16186 = vmatprep.subr.bf16.mxu0 %v19984_v30 }
 0x5a5   :  { %16188 = vmatpush1.bf16.msra.mxu0 %v20003_v43 }
 0x5a6   :  { %16190 = vmatprep.subr.bf16.mxu0 %v20005_v45  ;;  %v24622_v45 = vld [vmem:[#allocation53_spill] sm:$0xff] }
 0x5a8   :  { %2609 = vmatmul.mubr.f32.vlgmr.msra.gmra.mrb[14].mxu0 %v20604_v49 }
 0x5a9   :  { %16192 = vmatpush1.bf16.msra.mxu0 %v20022_v52  ;;  %2679 = vmatprep.mubr.f32.mxu0 %v24486_v3  ;;  %v455_v52 = vld [vmem:[%s23938_s14 + $0x18] sm:$0xff] }
 0x5aa   :  { %16194 = vmatprep.subr.bf16.mxu0 %v20026_v60  ;;  %v454_v60 = vld [vmem:[%s23938_s14 + $0x10] sm:$0xff] }
 0x5ab   :  { %v21561_v43 = vpack.c.bf16 %v455_v52, %v454_v60  ;;  %v24627_v52 = vld [vmem:[#allocation56_spill] sm:$0xff]  ;;  %v24628_v60 = vld [vmem:[#allocation57_spill] sm:$0xff] }
 0x5ad   :  { %16196 = vmatpush1.bf16.msra.mxu0 %v24621_v46  ;;  %24623 = vst [vmem:[#allocation213_spill] sm:$0xff] %v21561_v43  ;;  %16090 = vmatpush3.bf16.msra.mxu1 %v21561_v43  ;;  %v457_v46 = vld [vmem:[%s23938_s14 + $0x28] sm:$0xff] }
 0x5ae   :  { %16198 = vmatprep.subr.bf16.mxu0 %v24622_v45  ;;  %16091 = vmatprep.subr.bf16.mxu1 %v24616_v0  ;;  %v456_v45 = vld [vmem:[%s23938_s14 + $0x20] sm:$0xff] }
 0x5af   :  { %v21573_v30 = vpack.c.bf16 %v457_v46, %v456_v45  ;;  %v24630_v45 = vld [vmem:[#allocation58_spill] sm:$0xff]  ;;  %v24631_v46 = vld [vmem:[#allocation59_spill] sm:$0xff] }
 0x5b1   :  { %16200 = vmatpush1.bf16.msra.mxu0 %v24624_v61  ;;  %24626 = vst [vmem:[#allocation214_spill] sm:$0xff] %v21573_v30  ;;  %16093 = vmatpush3.bf16.msra.mxu1 %v21573_v30  ;;  %v459_v61 = vld [vmem:[%s23938_s14 + $0x38] sm:$0xff] }
 0x5b2   :  { %16202 = vmatprep.subr.bf16.mxu0 %v24625_v48  ;;  %16094 = vmatprep.subr.bf16.mxu1 %v24616_v0  ;;  %v458_v48 = vld [vmem:[%s23938_s14 + $0x30] sm:$0xff] }
 0x5b3   :  { %v21585_v16 = vpack.c.bf16 %v459_v61, %v458_v48  ;;  %v24633_v61 = vld [vmem:[#allocation60_spill] sm:$0xff]  ;;  %v462_v48 = vld [vmem:[%s23938_s14 + $0x50] sm:$0xff] }
 0x5b5   :  { %16204 = vmatpush1.bf16.msra.mxu0 %v24627_v52  ;;  %24629 = vst [vmem:[#allocation215_spill] sm:$0xff] %v21585_v16  ;;  %16096 = vmatpush3.bf16.msra.mxu1 %v21585_v16  ;;  %v461_v52 = vld [vmem:[%s23938_s14 + $0x48] sm:$0xff] }
 0x5b6   :  { %16206 = vmatprep.subr.bf16.mxu0 %v24628_v60  ;;  %16097 = vmatprep.subr.bf16.mxu1 %v24616_v0  ;;  %v460_v60 = vld [vmem:[%s23938_s14 + $0x40] sm:$0xff] }
 0x5b7   :  { %v21597_v63 = vpack.c.bf16 %v461_v52, %v460_v60  ;;  %v464_v52 = vld [vmem:[%s23938_s14 + $0x60] sm:$0xff]  ;;  %v465_v60 = vld [vmem:[%s23938_s14 + $0x68] sm:$0xff] }
 0x5b8   :  { %v21619_v47 = vpack.c.bf16 %v465_v60, %v464_v52  ;;  %v24641_v52 = vld [vmem:[#allocation106_spill] sm:$0xff]  ;;  %v24642_v60 = vld [vmem:[#allocation65_spill] sm:$0xff] }
 0x5b9   :  { %16208 = vmatpush1.bf16.msra.mxu0 %v24630_v45  ;;  %24632 = vst [vmem:[#allocation216_spill] sm:$0xff] %v21597_v63  ;;  %16099 = vmatpush3.bf16.msra.mxu1 %v21597_v63  ;;  %v24634_v45 = vld [vmem:[#allocation61_spill] sm:$0xff] }
 0x5ba   :  { %16210 = vmatprep.subr.bf16.mxu0 %v24631_v46  ;;  %v463_v46 = vld [vmem:[%s23938_s14 + $0x58] sm:$0xff]  ;;  %16100 = vmatprep.subr.bf16.mxu1 %v24616_v0  ;;  %24637 = vst [vmem:[#allocation218_spill] sm:$0xff] %v21619_v47 }
 0x5bb   :  { %v21609_v57 = vpack.c.bf16 %v463_v46, %v462_v48  ;;  %v466_v46 = vld [vmem:[%s23938_s14 + $0x70] sm:$0xff]  ;;  %v467_v48 = vld [vmem:[%s23938_s14 + $0x78] sm:$0xff] }
 0x5bd   :  { %16212 = vmatpush1.bf16.msra.mxu0 %v24633_v61  ;;  %24635 = vst [vmem:[#allocation217_spill] sm:$0xff] %v21609_v57  ;;  %v24636_v61 = vld [vmem:[#allocation62_spill] sm:$0xff]  ;;  %16102 = vmatpush3.bf16.msra.mxu1 %v21609_v57 }
 0x5be   :  { %16214 = vmatprep.subr.bf16.mxu0 %v24634_v45  ;;  %16103 = vmatprep.subr.bf16.mxu1 %v24616_v0  ;;  %v24639_v45 = vld [vmem:[#allocation64_spill] sm:$0xff] }
 0x5c1   :  { %16216 = vmatpush1.bf16.msra.mxu0 %v24636_v61  ;;  %16105 = vmatpush3.bf16.msra.mxu1 %v21619_v47  ;;  %v21631_v61 = vpack.c.bf16 %v467_v48, %v466_v46  ;;  %v24646_v46 = vld [vmem:[#allocation122_spill] sm:$0xff]  ;;  %v24647_v48 = vld [vmem:[#allocation124_spill] sm:$0xff] }
 0x5c2   :  { %16218 = vmatprep.subr.bf16.mxu0 %v24638_v41  ;;  %16106 = vmatprep.subr.bf16.mxu1 %v24616_v0  ;;  %v24643_v41 = vld [vmem:[#allocation116_spill] sm:$0xff] }
 0x5c3   :  { %24640 = vst [vmem:[#allocation219_spill] sm:$0xff] %v21631_v61 }
 0x5c5   :  { %16220 = vmatpush1.bf16.msra.mxu0 %v24639_v45  ;;  %16108 = vmatpush3.bf16.msra.mxu1 %v21631_v61  ;;  %v24645_v45 = vld [vmem:[#allocation120_spill] sm:$0xff] }
 0x5c6   :  { %16334 = vmatprep.subr.bf16.mxu0 %v24641_v52  ;;  %16222 = vmatprep.subr.bf16.mxu1 %v24642_v60  ;;  %v24649_v52 = vld [vmem:[#allocation128_spill] sm:$0xff] }
 0x5c8   :  { %2680 = vmatmul.mubr.f32.vlgmr.msra.gmra.mrb[16].mxu0 %v20604_v49  ;;  %v24650_v49 = vld [vmem:[#allocation130_spill] sm:$0xff] }
 0x5c9   :  { %16336 = vmatpush3.bf16.msra.mxu0 %v20596_v62  ;;  %v24652_v62 = vld [vmem:[#allocation134_spill] sm:$0xff] }
 0x5ca   :  { %16338 = vmatprep.subr.bf16.mxu0 %v24643_v41  ;;  %v24654_v41 = vld [vmem:[#allocation138_spill] sm:$0xff] }
 0x5cd   :  { %16340 = vmatpush3.bf16.msra.mxu0 %v24644_v29  ;;  %v24655_v29 = vld [vmem:[#allocation140_spill] sm:$0xff] }
 0x5ce   :  { %16342 = vmatprep.subr.bf16.mxu0 %v24645_v45  ;;  %v24656_v45 = vld [vmem:[#allocation142_spill] sm:$0xff] }
 0x5d1   :  { %16344 = vmatpush3.bf16.msra.mxu0 %v24646_v46  ;;  %v24657_v46 = vld [vmem:[#allocation148_spill] sm:$0xff] }
 0x5d2   :  { %16346 = vmatprep.subr.bf16.mxu0 %v24647_v48 }
 0x5d5   :  { %16348 = vmatpush3.bf16.msra.mxu0 %v24648_v21  ;;  %v24658_v21 = vld [vmem:[#allocation107_spill] sm:$0xff] }
 0x5d6   :  { %16350 = vmatprep.subr.bf16.mxu0 %v24649_v52  ;;  %v307_v52 = vld [vmem:[%s23939_s10] sm:$0xf]  ;;  %v24663_v39 = vsub.s32 3, %v24658_v21 }
 0x5d8   :  { %v21669_v31 = vrot.slane %v307_v52, %v24663_v39 }
 0x5d9   :  { %16352 = vmatpush3.bf16.msra.mxu0 %v24650_v49  ;;  %v24659_v49 = vsub.s32 0, %v24658_v21 }
 0x5da   :  { %16354 = vmatprep.subr.bf16.mxu0 %v24651_v11  ;;  %24664 = vst [vmem:[#allocation221_spill] sm:$0xff] %v21669_v31 }
 0x5db   :  { %v21659_v48 = vrot.slane %v307_v52, %v24659_v49 }
 0x5dd   :  { %16356 = vmatpush3.bf16.msra.mxu0 %v24652_v62  ;;  %24660 = vst [vmem:[#allocation107_spill] sm:$0xff] %v21659_v48  ;;  %v24661_v62 = vsub.s32 1, %v24658_v21 }
 0x5de   :  { %16358 = vmatprep.subr.bf16.mxu0 %v24653_v2 }
 0x5df   :  { %v21663_v11 = vrot.slane %v307_v52, %v24661_v62  ;;  %v24665_v62 = vsub.s32 2, %v24658_v21 }
 0x5e1   :  { %16360 = vmatpush3.bf16.msra.mxu0 %v24654_v41  ;;  %24662 = vst [vmem:[#allocation220_spill] sm:$0xff] %v21663_v11  ;;  %v21674_v37 = vrot.slane %v307_v52, %v24665_v62 }
 0x5e2   :  { %16362 = vmatprep.subr.bf16.mxu0 %v24655_v29 }
 0x5e3   :  { %24666 = vst [vmem:[#allocation222_spill] sm:$0xff] %v21674_v37 }
 0x5e5   :  { %16364 = vmatpush3.bf16.msra.mxu0 %v24656_v45 }
 0x5e6   :  { %16388 = vmatprep.subr.bf16.mxu0 %v24657_v46 }
 0x61b   :  { %v1974_v2 = vpop.f32.mrb[10].mxu0  ;;  %v2045_v41 = vpop.f32.mrb[8].mxu1 }
 0x61c   :  { %v2075_v29 = vadd.f32 %v21659_v48, %v1974_v2  ;;  %v1976_v58 = vpop.f32.mrb[11].mxu0  ;;  %v2047_v45 = vpop.f32.mrb[9].mxu1  ;;  %v2077_v2 = vadd.f32 %v21674_v37, %v2045_v41 }
 0x61d   :  { %v2076_v46 = vadd.f32 %v21663_v11, %v1976_v58  ;;  %v2078_v49 = vadd.f32 %v21669_v31, %v2047_v45  ;;  %v480_v45 = vld [vmem:[#allocation5] sm:$0x3] }
 0x61e   :  { %v14166_v53 = vmul.f32 -1.442695, %v2075_v29 }
 0x61f   :  { %v14167_v44 = vmul.f32 -1.442695, %v2076_v46  ;;  %v14168_v19 = vmul.f32 -1.442695, %v2078_v49 }
 0x620   :  { %19174 = vpow2.f32 %v14166_v53 }
 0x621   :  { %19176 = vpow2.f32 %v14167_v44 }
 0x622   :  { %19178 = vpow2.f32 %v14168_v19 }
 0x623   :  { %19180 = vtanh.f32 %v2077_v2 }
 0x62a   :  { %v19175_v48 = vpop.eup %19174 }
 0x62b   :  { %v19177_v15 = vpop.eup %19176  ;;  %v2082_v58 = vadd.f32 1.0, %v19175_v48  ;;  %v21677_v29 = vpop.f32.mrb[12].mxu0 }
 0x62c   :  { %v2088_v39 = vadd.f32 1.0, %v19177_v15  ;;  %v15187_v46 = vpop.f32.mrb[13].mxu0  ;;  %v19179_v44 = vpop.eup %19178  ;;  %v2103_v15 = vld [vmem:[%s23940_s18] sm:$0x3] }
 0x62d   :  { %19182 = vrcp.f32 %v2082_v58  ;;  %v19181_v53 = vpop.eup %19180  ;;  %v2095_v49 = vadd.f32 1.0, %v19179_v44  ;;  %v2723_v46 = vpop.permute.xlu1 %2722  ;;  %v24670_v44 = vld [vmem:[#allocation71_spill] sm:$0xff] }
 0x62e   :  { %19184 = vrcp.f32 %v2088_v39  ;;  %v24668_v39 = vld [vmem:[#allocation67_spill] sm:$0xff] }
 0x62f   :  { %19186 = vrcp.f32 %v2095_v49  ;;  %v24675_v49 = vld [vmem:[#allocation72_spill] sm:$0xff] }
 0x637   :  { %v19183_v21 = vpop.eup %19182 }
 0x638   :  { %v19185_v52 = vpop.eup %19184  ;;  %v2099_v62 = vmul.f32 %v19183_v21, %v19181_v53  ;;  %v24671_v53 = vld [vmem:[#allocation66_spill] sm:$0xff] }
 0x639   :  { %v2098_v31 = vmul.f32 %v19185_v52, %v480_v45  ;;  %v19187_v19 = vpop.eup %19186  ;;  %v24672_v45 = vld [vmem:[#allocation154_spill] sm:$0xff]  ;;  %v24673_v52 = vld [vmem:[#allocation68_spill] sm:$0xff] }
 0x63a   :  { %v2725_v21 = vsel %vm978_vm4, %v24672_v45, %v2723_v46  ;;  %v24680_v46 = vld [vmem:[#allocation81_spill] sm:$0xff]  ;;  %v24681_v45 = vld [vmem:[#allocation83_spill] sm:$0xff] }
 0x63b   :  { %v21679_v41 = vadd.f32 %v2099_v62, %v2098_v31  ;;  %v24669_v31 = vld [vmem:[#allocation69_spill] sm:$0xff]  ;;  %v24674_v62 = vld [vmem:[#allocation70_spill] sm:$0xff] }
 0x63d   :  { %24667 = vst [vmem:[#allocation223_spill] sm:$0xff] %v21679_v41  ;;  %19188 = vtanh.f32 %v21679_v41 }
 0x647   :  { %v19189_v48 = vpop.eup %19188 }
 0x648   :  { %v2102_v2 = vmul.f32 %v19189_v48, %v19187_v19  ;;  %v24676_v19 = vld [vmem:[#allocation73_spill] sm:$0xff]  ;;  %v24677_v48 = vld [vmem:[#allocation75_spill] sm:$0xff] }
 0x64a   :  { %v21685_v58 = vmul.f32 %v2103_v15, %v2102_v2  ;;  %v24678_v15 = vld [vmem:[#allocation77_spill] sm:$0xff]  ;;  %v24679_v2 = vld [vmem:[#allocation79_spill] sm:$0xff] }
 0x64c   :  { %15221 = vmatmul.mubr.f32.vlgmr.msra.gmra.mrb[10].mxu1 %v21685_v58 }
 0x64d   :  { %16224 = vmatpush1.bf16.msra.mxu1 %v24668_v39  ;;  %2793 = vmatprep.mubr.f32.mxu1 %v24486_v3 }
 0x64e   :  { %16226 = vmatprep.subr.bf16.mxu1 %v24669_v31  ;;  %v24694_v31 = vld [vmem:[#allocation109_spill] sm:$0xff] }
 0x651   :  { %16228 = vmatpush1.bf16.msra.mxu1 %v24670_v44  ;;  %v24693_v44 = vld [vmem:[#allocation108_spill] sm:$0xff] }
 0x652   :  { %16230 = vmatprep.subr.bf16.mxu1 %v24671_v53  ;;  %v24688_v53 = vld [vmem:[#allocation97_spill] sm:$0xff] }
 0x654   :  { %14180 = vmatmul.mubr.msk.f32.vlgmr.msra.gmra.mrb[12].mxu1 %vm631_vm2, %v2725_v21 }
 0x655   :  { %16232 = vmatpush1.bf16.msra.mxu1 %v24673_v52  ;;  %2864 = vmatprep.mubr.f32.mxu1 %v24486_v3  ;;  %v24682_v52 = vld [vmem:[#allocation85_spill] sm:$0xff] }
 0x656   :  { %16234 = vmatprep.subr.bf16.mxu1 %v24674_v62  ;;  %v24683_v62 = vld [vmem:[#allocation87_spill] sm:$0xff] }
 0x659   :  { %16236 = vmatpush1.bf16.msra.mxu1 %v24675_v49  ;;  %v24684_v49 = vld [vmem:[#allocation89_spill] sm:$0xff] }
 0x65a   :  { %16238 = vmatprep.subr.bf16.mxu1 %v24676_v19  ;;  %v24685_v19 = vld [vmem:[#allocation91_spill] sm:$0xff] }
 0x65c   :  { %14181 = vmatmul.mubr.msk.f32.vlgmr.msra.gmra.mrb[14].mxu1 %vm631_vm2, %v2725_v21  ;;  %v24686_v21 = vld [vmem:[#allocation93_spill] sm:$0xff] }
 0x65d   :  { %16240 = vmatpush1.bf16.msra.mxu1 %v24677_v48  ;;  %2935 = vmatprep.mubr.f32.mxu1 %v24486_v3  ;;  %v24687_v48 = vld [vmem:[#allocation95_spill] sm:$0xff] }
 0x65e   :  { %16242 = vmatprep.subr.bf16.mxu1 %v24678_v15  ;;  %v24689_v15 = vld [vmem:[#allocation99_spill] sm:$0xff] }
 0x661   :  { %16244 = vmatpush1.bf16.msra.mxu1 %v24679_v2  ;;  %v24690_v2 = vld [vmem:[#allocation101_spill] sm:$0xff] }
 0x662   :  { %16246 = vmatprep.subr.bf16.mxu1 %v24680_v46  ;;  %v24691_v46 = vld [vmem:[#allocation103_spill] sm:$0xff] }
 0x665   :  { %16248 = vmatpush1.bf16.msra.mxu1 %v24681_v45  ;;  %v24692_v45 = vld [vmem:[#allocation74_spill] sm:$0xff] }
 0x666   :  { %16250 = vmatprep.subr.bf16.mxu1 %v24682_v52 }
 0x669   :  { %16252 = vmatpush1.bf16.msra.mxu1 %v24683_v62 }
 0x66a   :  { %16254 = vmatprep.subr.bf16.mxu1 %v24684_v49 }
 0x66d   :  { %16256 = vmatpush1.bf16.msra.mxu1 %v24685_v19 }
 0x66e   :  { %16258 = vmatprep.subr.bf16.mxu1 %v24686_v21 }
 0x671   :  { %16260 = vmatpush1.bf16.msra.mxu1 %v24687_v48 }
 0x672   :  { %16262 = vmatprep.subr.bf16.mxu1 %v24688_v53 }
 0x675   :  { %16264 = vmatpush1.bf16.msra.mxu1 %v24689_v15 }
 0x676   :  { %16266 = vmatprep.subr.bf16.mxu1 %v24690_v2  ;;  %v24695_v2 = vld [vmem:[#allocation110_spill] sm:$0xff] }
 0x679   :  { %16268 = vmatpush1.bf16.msra.mxu1 %v24691_v46 }
 0x67a   :  { %16270 = vmatprep.subr.bf16.mxu1 %v24692_v45  ;;  %v24696_v45 = vld [vmem:[#allocation111_spill] sm:$0xff] }
 0x67b   :  { %v2610_v52 = vpop.f32.mrb[14].mxu0 }
 0x67c   :  { %v2612_v62 = vpop.f32.mrb[15].mxu0  ;;  %v2690_v19 = vadd.f32 %v2610_v52, %v24694_v31 }
 0x67d   :  { %v2691_v49 = vadd.f32 %v2612_v62, %v24693_v44 }
 0x67e   :  { %v14176_v21 = vmul.f32 -1.442695, %v2690_v19 }
 0x67f   :  { %v14177_v39 = vmul.f32 -1.442695, %v2691_v49 }
 0x681   :  { %19190 = vpow2.f32 %v14177_v39  ;;  %v24697_v39 = vld [vmem:[#allocation112_spill] sm:$0xff] }
 0x682   :  { %19192 = vpow2.f32 %v14176_v21 }
 0x68b   :  { %v19191_v48 = vpop.eup %19190 }
 0x68c   :  { %v19193_v53 = vpop.eup %19192  ;;  %v2703_v41 = vadd.f32 1.0, %v19191_v48 }
 0x68d   :  { %v2697_v15 = vadd.f32 1.0, %v19193_v53 }
 0x68e   :  { %19194 = vrcp.f32 %v2703_v41 }
 0x68f   :  { %19196 = vrcp.f32 %v2697_v15 }
 0x698   :  { %v19195_v52 = vpop.eup %19194 }
 0x699   :  { %v19197_v49 = vpop.eup %19196  ;;  %v2713_v21 = vmul.f32 %v19195_v52, %v24697_v39  ;;  %v24703_v52 = vld [vmem:[#allocation84_spill] sm:$0xff]  ;;  %v24706_v39 = vld [vmem:[#allocation90_spill] sm:$0xff] }
 0x69b   :  { %v2681_v37 = vpop.f32.mrb[16].mxu0 }
 0x69c   :  { %v2692_v46 = vadd.f32 %v2681_v37, %v24695_v2  ;;  %v2683_v11 = vpop.f32.mrb[17].mxu0 }
 0x69d   :  { %v2693_v59 = vadd.f32 %v2683_v11, %v24696_v45  ;;  %v14179_v11 = vld [vmem:[%s23930_s17 + $0x2] sm:$0x3] }
 0x69e   :  { %19198 = vtanh.f32 %v2692_v46  ;;  %v24699_v46 = vld [vmem:[#allocation76_spill] sm:$0xff] }
 0x69f   :  { %v14178_v62 = vmul.f32 -1.442695, %v2693_v59 }
 0x6a1   :  { %19200 = vpow2.f32 %v14178_v62  ;;  %v24702_v62 = vld [vmem:[#allocation82_spill] sm:$0xff] }
 0x6a8   :  { %v19199_v19 = vpop.eup %19198 }
 0x6a9   :  { %v2714_v31 = vmul.f32 %v19199_v19, %v19197_v49  ;;  %v24704_v49 = vld [vmem:[#allocation86_spill] sm:$0xff]  ;;  %v24705_v19 = vld [vmem:[#allocation88_spill] sm:$0xff] }
 0x6ab   :  { %v19201_v44 = vpop.eup %19200  ;;  %v21724_v48 = vadd.f32 %v2714_v31, %v2713_v21  ;;  %v24700_v31 = vld [vmem:[#allocation78_spill] sm:$0xff]  ;;  %v24707_v21 = vld [vmem:[#allocation92_spill] sm:$0xff] }
 0x6ac   :  { %v2710_v53 = vadd.f32 1.0, %v19201_v44  ;;  %v24701_v44 = vld [vmem:[#allocation80_spill] sm:$0xff] }
 0x6ad   :  { %24698 = vst [vmem:[#allocation154_spill] sm:$0xff] %v21724_v48  ;;  %19202 = vtanh.f32 %v21724_v48 }
 0x6ae   :  { %19204 = vrcp.f32 %v2710_v53  ;;  %v24708_v53 = vld [vmem:[#allocation94_spill] sm:$0xff] }
 0x6b7   :  { %v19203_v37 = vpop.eup %19202 }
 0x6b8   :  { %v19205_v41 = vpop.eup %19204 }
 0x6b9   :  { %v2717_v59 = vmul.f32 %v19205_v41, %v19203_v37  ;;  %v24709_v37 = vld [vmem:[#allocation96_spill] sm:$0xff]  ;;  %v24710_v41 = vld [vmem:[#allocation98_spill] sm:$0xff] }
 0x6bb   :  { %v21730_v15 = vmul.f32 %v14179_v11, %v2717_v59  ;;  %v24711_v11 = vld [vmem:[#allocation100_spill] sm:$0xff]  ;;  %v24712_v59 = vld [vmem:[#allocation102_spill] sm:$0xff] }
 0x6bd   :  { %2936 = vmatmul.mubr.f32.vlgmr.msra.gmra.mrb[12].mxu1 %v21730_v15 }
 0x6be   :  { %16272 = vmatpush1.bf16.msra.mxu1 %v24699_v46  ;;  %3006 = vmatprep.mubr.f32.mxu1 %v24486_v3 }
 0x6bf   :  { %16274 = vmatprep.subr.bf16.mxu1 %v24700_v31 }
 0x6c2   :  { %16276 = vmatpush1.bf16.msra.mxu1 %v24701_v44 }
 0x6c3   :  { %16278 = vmatprep.subr.bf16.mxu1 %v24702_v62  ;;  %v24713_v62 = vld [vmem:[#allocation104_spill] sm:$0xff] }
 0x6c6   :  { %16280 = vmatpush1.bf16.msra.mxu1 %v24703_v52  ;;  %v24714_v52 = vld [vmem:[#allocation105_spill] sm:$0xff] }
 0x6c7   :  { %16282 = vmatprep.subr.bf16.mxu1 %v24704_v49  ;;  %v24725_v49 = vld [vmem:[#allocation133_spill] sm:$0xff] }
 0x6ca   :  { %16284 = vmatpush1.bf16.msra.mxu1 %v24705_v19  ;;  %v24715_v19 = vld [vmem:[#allocation113_spill] sm:$0xff] }
 0x6cb   :  { %16286 = vmatprep.subr.bf16.mxu1 %v24706_v39  ;;  %v24716_v39 = vld [vmem:[#allocation115_spill] sm:$0xff] }
 0x6ce   :  { %16288 = vmatpush1.bf16.msra.mxu1 %v24707_v21  ;;  %v24717_v21 = vld [vmem:[#allocation117_spill] sm:$0xff] }
 0x6cf   :  { %16290 = vmatprep.subr.bf16.mxu1 %v24708_v53  ;;  %v24718_v53 = vld [vmem:[#allocation119_spill] sm:$0xff] }
 0x6d2   :  { %16292 = vmatpush1.bf16.msra.mxu1 %v24709_v37  ;;  %v24719_v37 = vld [vmem:[#allocation121_spill] sm:$0xff] }
 0x6d3   :  { %16294 = vmatprep.subr.bf16.mxu1 %v24710_v41  ;;  %v24720_v41 = vld [vmem:[#allocation123_spill] sm:$0xff] }
 0x6d6   :  { %16296 = vmatpush1.bf16.msra.mxu1 %v24711_v11  ;;  %v24721_v11 = vld [vmem:[#allocation125_spill] sm:$0xff] }
 0x6d7   :  { %16298 = vmatprep.subr.bf16.mxu1 %v24712_v59  ;;  %v24722_v59 = vld [vmem:[#allocation127_spill] sm:$0xff] }
 0x6da   :  { %16300 = vmatpush1.bf16.msra.mxu1 %v24713_v62  ;;  %v24723_v62 = vld [vmem:[#allocation129_spill] sm:$0xff] }
 0x6db   :  { %16302 = vmatprep.subr.bf16.mxu1 %v24714_v52  ;;  %v24724_v52 = vld [vmem:[#allocation131_spill] sm:$0xff] }
 0x6dd   :  { %3007 = vmatmul.mubr.f32.vlgmr.msra.gmra.mrb[14].mxu1 %v21730_v15 }
 0x6de   :  { %16304 = vmatpush3.bf16.msra.mxu1 %v24715_v19  ;;  %v24726_v19 = vld [vmem:[#allocation135_spill] sm:$0xff] }
 0x6df   :  { %16306 = vmatprep.subr.bf16.mxu1 %v24716_v39  ;;  %v24727_v39 = vld [vmem:[#allocation137_spill] sm:$0xff] }
 0x6e2   :  { %16308 = vmatpush3.bf16.msra.mxu1 %v24717_v21  ;;  %v24728_v21 = vld [vmem:[#allocation139_spill] sm:$0xff] }
 0x6e3   :  { %16310 = vmatprep.subr.bf16.mxu1 %v24718_v53  ;;  %v24729_v53 = vld [vmem:[#allocation141_spill] sm:$0xff] }
 0x6e6   :  { %16312 = vmatpush3.bf16.msra.mxu1 %v24719_v37 }
 0x6e7   :  { %16314 = vmatprep.subr.bf16.mxu1 %v24720_v41  ;;  %v24732_v41 = vld [vmem:[#allocation145_spill] sm:$0xff] }
 0x6ea   :  { %16316 = vmatpush3.bf16.msra.mxu1 %v24721_v11 }
 0x6eb   :  { %16318 = vmatprep.subr.bf16.mxu1 %v24722_v59  ;;  %v21770_v59 = vld [vmem:[%s23941_s16] ss:$0 sm:$0xff] }
 0x6ec   :  { %24730 = vst [vmem:[#allocation110_spill] sm:$0xff] %v21770_v59 }
 0x6ee   :  { %16320 = vmatpush3.bf16.msra.mxu1 %v24723_v62 }
 0x6ef   :  { %16322 = vmatprep.subr.bf16.mxu1 %v24724_v52 }
 0x6f2   :  { %16324 = vmatpush3.bf16.msra.mxu1 %v24725_v49 }
 0x6f3   :  { %16326 = vmatprep.subr.bf16.mxu1 %v24726_v19 }
 0x6f6   :  { %16328 = vmatpush3.bf16.msra.mxu1 %v24727_v39 }
 0x6f7   :  { %16330 = vmatprep.subr.bf16.mxu1 %v24728_v21  ;;  %v24731_v21 = vld [vmem:[#allocation143_spill] sm:$0xff] }
 0x6fa   :  { %16332 = vmatpush3.bf16.msra.mxu1 %v24729_v53 }
 0x6fb   :  { %16365 = vmatprep.subr.bf16.mxu1 %v24616_v0 }
 0x71f   :  { %v2241_v62 = vpop.f32.mrb[10].mxu1 }
 0x720   :  { %v2242_v52 = vadd.f32 %v2241_v62, %v21677_v29  ;;  %v15222_v11 = vpop.f32.mrb[11].mxu1  ;;  %v24733_v29 = vld [vmem:[#allocation147_spill] sm:$0xff] }
 0x721   :  { %v24735_v11 = vld [vmem:[#allocation146_spill] sm:$0xff] }
 0x722   :  { %v2251_v19 = vadd.f32 %v21770_v59, %v2242_v52  ;;  %v24734_v52 = vld [vmem:[#allocation144_spill] sm:$0xff] }
 0x724   :  { %2253 = vst.msk [vmem:[%s23942_s19] sm:$0x3] %vm2252_vm7, %v2251_v19 }
 0x790   :  { %v2937_v53 = vpop.f32.mrb[12].mxu1 }
 0x791   :  { %v3013_v39 = vadd.f32 %v2937_v53, %v24731_v21  ;;  %v2939_v49 = vpop.f32.mrb[13].mxu1 }
 0x792   :  { %v3014_v37 = vadd.f32 %v2939_v49, %v24732_v41 }
 0x794   :  { %19206 = vtanh.f32 %v3014_v37  ;;  %v24738_v37 = vld [vmem:[#allocation152_spill] sm:$0xff] }
 0x795   :  { %19208 = vtanh.f32 %v3013_v39 }
 0x79e   :  { %v19207_v44 = vpop.eup %19206 }
 0x79f   :  { %v19209_v31 = vpop.eup %19208  ;;  %3085 = vmatprep.mubr.f32.mxu1 %v19207_v44  ;;  %v24737_v44 = vld [vmem:[#allocation150_spill] sm:$0xff] }
 0x7a0   :  { %3086 = vmatmul.mubr.f32.vlgmr.msra.gmra.mrb[16].mxu1 %v19209_v31  ;;  %v24736_v31 = vld [vmem:[#allocation149_spill] sm:$0xff] }
 0x7a1   :  { %16367 = vmatpush3.bf16.msra.mxu1 %v24733_v29  ;;  %15227 = vmatprep.mubr.msk.f32.mxu1 %vm19507_vm5, %v24486_v3  ;;  %v24739_v29 = vld [vmem:[#allocation153_spill] sm:$0xff] }
 0x7a2   :  { %16368 = vmatprep.subr.bf16.mxu1 %v24616_v0 }
 0x7b0   :  { %v3008_v62 = vpop.f32.mrb[14].mxu1 }
 0x7b1   :  { %v3015_v19 = vadd.f32 %v3008_v62, %v24734_v52  ;;  %v3010_v53 = vpop.f32.mrb[15].mxu1  ;;  %v24740_v62 = vld [vmem:[#allocation163_spill] sm:$0xff]  ;;  %v24741_v52 = vld [vmem:[#allocation165_spill] sm:$0xff] }
 0x7b2   :  { %v3016_v21 = vadd.f32 %v3010_v53, %v24735_v11 }
 0x7b4   :  { %19210 = vtanh.f32 %v3016_v21  ;;  %v24742_v21 = vld [vmem:[#allocation167_spill] sm:$0xff] }
 0x7b5   :  { %19212 = vtanh.f32 %v3015_v19  ;;  %v24743_v19 = vld [vmem:[#allocation169_spill] sm:$0xff] }
 0x7be   :  { %v19211_v49 = vpop.eup %19210 }
 0x7bf   :  { %v19213_v39 = vpop.eup %19212  ;;  %3155 = vmatprep.mubr.f32.mxu0 %v19211_v49 }
 0x7c0   :  { %3156 = vmatmul.mubr.f32.vlgmr.msra.gmra.mrb[18].mxu0 %v19213_v39 }
 0x7c1   :  { %16390 = vmatpush1.bf16.msra.mxu0 %v24736_v31  ;;  %3481 = vmatprep.mubr.f32.mxu0 %v24486_v3 }
 0x7c2   :  { %16392 = vmatprep.subr.bf16.mxu0 %v24737_v44 }
 0x7c5   :  { %16394 = vmatpush1.bf16.msra.mxu0 %v24738_v37 }
 0x7c6   :  { %16396 = vmatprep.subr.bf16.mxu0 %v24739_v29 }
 0x7c9   :  { %16398 = vmatpush1.bf16.msra.mxu0 %v24740_v62 }
 0x7ca   :  { %16400 = vmatprep.subr.bf16.mxu0 %v24741_v52 }
 0x7cd   :  { %16402 = vmatpush1.bf16.msra.mxu0 %v24742_v21 }
 0x7ce   :  { %16412 = vmatprep.subr.bf16.mxu0 %v24743_v19 }
 0x873   :  { %v14473_v53 = vpop.f32.mrb[16].mxu1 }
 0x874   :  { %v14474_v49 = vpop.f32.mrb[17].mxu1 }
 0x875   :  { %v14475_v39 = vadd.f32 %v14474_v49, %v14473_v53  ;;  %v24751_v53 = vld [vmem:[#allocation161_spill] sm:$0xff]  ;;  %v24752_v49 = vld [vmem:[#allocation162_spill] sm:$0xff] }
 0x893   :  { %v14508_v31 = vpop.f32.mrb[18].mxu0 }
 0x894   :  { %v14509_v11 = vpop.f32.mrb[19].mxu0 }
 0x895   :  { %v14510_v41 = vadd.f32 %v14509_v11, %v14508_v31  ;;  %v24746_v31 = vld [vmem:[#allocation156_spill] sm:$0xff] }
 0x897   :  { %v3158_v59 = vadd.f32 %v14510_v41, %v14475_v39  ;;  %v24744_v41 = vld [vmem:[#allocation155_spill] sm:$0xff]  ;;  %v24753_v39 = vld [vmem:[#allocation164_spill] sm:$0xff] }
 0x899   :  { %v3161_v44 = vsel %vm72_vm1, %v3158_v59, -inf }
 0x89a   :  { %3162 = vmax.xlane.f32.xlu1 %v3161_v44 }
 0x927   :  { %v3163_v37 = vpop.xlane.xlu1 %3162 }
 0x928   :  { %v3164_v29 = vsub.f32 %v3158_v59, %v3163_v37  ;;  %v24747_v37 = vld [vmem:[#allocation157_spill] sm:$0xff] }
 0x92a   :  { %v3165_v46 = vmul.f32 1.442695, %v3164_v29 }
 0x92c   :  { %19214 = vpow2.f32 %v3165_v46  ;;  %v24745_v46 = vld [vmem:[#allocation151_spill] sm:$0xff] }
 0x936   :  { %v19215_v62 = vpop.eup %19214 }
 0x937   :  { %v3167_v52 = vsel %vm72_vm1, %v19215_v62, 0.0 }
 0x938   :  { %3168 = vadd.xlane.f32.xlu0 %v3167_v52 }
 0x9c5   :  { %v3169_v21 = vpop.xlane.xlu0 %3168 }
 0x9c6   :  { %19216 = vrcp.f32 %v3169_v21  ;;  %v24749_v21 = vld [vmem:[#allocation159_spill] sm:$0xff] }
 0x9d0   :  { %v19217_v19 = vpop.eup %19216 }
 0x9d1   :  { %v21797_v48 = vmul.f32 %v19217_v19, %v19215_v62  ;;  %v24748_v62 = vld [vmem:[#allocation158_spill] sm:$0xff]  ;;  %v24750_v19 = vld [vmem:[#allocation160_spill] sm:$0xff] }
 0x9d3   :  { %14194 = vst.msk [vmem:[%s23934_s20 + $0x2] sm:$0x3] %vm72_vm1, %v21797_v48  ;;  %v21806_v59 = vadd.f32 %v21797_v48, %v24744_v41  ;;  %v3179_v29 = vrot.slane %v21797_v48, %v24745_v46  ;;  %v24754_v41 = vld [vmem:[#allocation166_spill] sm:$0xff] }
 0x9d5   :  { %4419 = vrot.lane.b32.xlu0 %v21806_v59, %s19504_s4  ;;  %v3187_v52 = vrot.slane %v3179_v29, %v24745_v46  ;;  %v3180_v11 = vcombine.high %v3179_v29, %v3179_v29  ;;  %v24755_v29 = vld [vmem:[#allocation168_spill] sm:$0xff] }
 0x9d7   :  { %15228 = vmatmul.mubr.msk.f32.vlgmr.msra.gmra.mrb[18].mxu1 %vm978_vm4, %v3187_v52  ;;  %v3194_v44 = vrot.slane %v3180_v11, %v24745_v46 }
 0x9d8   :  { %16370 = vmatpush3.bf16.msra.mxu1 %v24746_v31  ;;  %15234 = vmatprep.mubr.msk.f32.mxu1 %vm19507_vm5, %v24486_v3 }
 0x9d9   :  { %16372 = vmatprep.subr.bf16.mxu1 %v24747_v37 }
 0x9db   :  { %15235 = vmatmul.mubr.msk.f32.vlgmr.msra.gmra.mrb[20].mxu1 %vm978_vm4, %v3194_v44 }
 0x9dc   :  { %16374 = vmatpush1.bf16.msra.mxu1 %v24748_v62  ;;  %3410 = vmatprep.mubr.f32.mxu1 %v24486_v3 }
 0x9dd   :  { %16376 = vmatprep.subr.bf16.mxu1 %v24749_v21 }
 0x9e0   :  { %16378 = vmatpush1.bf16.msra.mxu1 %v24750_v19 }
 0x9e1   :  { %16380 = vmatprep.subr.bf16.mxu1 %v24751_v53  ;;  %v24778_v53 = vld [vmem:[#allocation192_spill] sm:$0xff] }
 0x9e4   :  { %16382 = vmatpush1.bf16.msra.mxu1 %v24752_v49  ;;  %v24756_v49 = vld [vmem:[#allocation170_spill] sm:$0xff] }
 0x9e5   :  { %16384 = vmatprep.subr.bf16.mxu1 %v24753_v39  ;;  %v24757_v39 = vld [vmem:[#allocation171_spill] sm:$0xff] }
 0x9e8   :  { %16386 = vmatpush1.bf16.msra.mxu1 %v24754_v41  ;;  %v24758_v41 = vld [vmem:[#allocation172_spill] sm:$0xff] }
 0x9e9   :  { %16404 = vmatprep.subr.bf16.mxu1 %v24755_v29  ;;  %v24759_v29 = vld [vmem:[#allocation173_spill] sm:$0xff] }
 0xaaa   :  { %v3263_v52 = vpop.f32.mrb[18].mxu1 }
 0xaab   :  { %v15229_v11 = vpop.f32.mrb[19].mxu1 }
 0xaac   :  { %v24763_v11 = vld [vmem:[#allocation177_spill] sm:$0xff] }
 0xaae   :  { %v3335_v44 = vpop.f32.mrb[20].mxu1 }
 0xaaf   :  { %v3342_v62 = vrot.slane %v3335_v44, 7  ;;  %v15236_v37 = vpop.f32.mrb[21].mxu1  ;;  %v24764_v44 = vld [vmem:[#allocation178_spill] sm:$0xff] }
 0xab0   :  { %v24760_v37 = vld [vmem:[#allocation174_spill] sm:$0xff] }
 0xab1   :  { %v21830_v31 = vsel %vm1620_vm6, %v3342_v62, %v3263_v52  ;;  %v24761_v62 = vld [vmem:[#allocation175_spill] sm:$0xff]  ;;  %v24762_v52 = vld [vmem:[#allocation176_spill] sm:$0xff] }
 0xab2   :  { %14184 = vmatmul.mubr.msk.f32.vlgmr.msra.gmra.mrb[22].mxu1 %vm485_vm3, %v21830_v31  ;;  %14185 = vmatmul.mubr.msk.f32.vlgmr.msra.gmra.mrb[20].mxu0 %vm485_vm3, %v21830_v31 }
 0xab3   :  { %16406 = vmatpush1.bf16.msra.mxu1 %v24756_v49  ;;  %16414 = vmatpush1.bf16.msra.mxu0 %v24757_v39  ;;  %v24767_v39 = vld [vmem:[#allocation181_spill] sm:$0xff]  ;;  %v24777_v49 = vld [vmem:[#allocation191_spill] sm:$0xff] }
 0xab4   :  { %16408 = vmatprep.subr.bf16.mxu1 %v24758_v41  ;;  %16416 = vmatprep.subr.bf16.mxu0 %v24759_v29  ;;  %v24765_v29 = vld [vmem:[#allocation179_spill] sm:$0xff]  ;;  %v24766_v41 = vld [vmem:[#allocation180_spill] sm:$0xff] }
 0xab5   :  { %3552 = vmatprep.mubr.f32.mxu1 %v24486_v3  ;;  %3623 = vmatprep.mubr.f32.mxu0 %v24486_v3 }
 0xab7   :  { %16410 = vmatpush1.bf16.msra.mxu1 %v24760_v37  ;;  %16418 = vmatpush1.bf16.msra.mxu0 %v24761_v62  ;;  %v24770_v62 = vld [vmem:[#allocation184_spill] sm:$0xff]  ;;  %v24771_v37 = vld [vmem:[#allocation185_spill] sm:$0xff] }
 0xab8   :  { %16420 = vmatprep.subr.bf16.mxu1 %v24762_v52  ;;  %16452 = vmatprep.subr.bf16.mxu0 %v24763_v11  ;;  %v24768_v52 = vld [vmem:[#allocation182_spill] sm:$0xff]  ;;  %v24769_v11 = vld [vmem:[#allocation183_spill] sm:$0xff] }
 0xaba   :  { %14186 = vmatmul.mubr.msk.f32.vlgmr.msra.gmra.mrb[22].mxu1 %vm631_vm2, %v21510_v25  ;;  %14187 = vmatmul.mubr.msk.f32.vlgmr.msra.gmra.mrb[20].mxu0 %vm631_vm2, %v21510_v25  ;;  %v24772_v25 = vld [vmem:[#allocation186_spill] sm:$0xff] }
 0xabb   :  { %16422 = vmatpush1.bf16.msra.mxu1 %v24764_v44  ;;  %16454 = vmatpush1.bf16.msra.mxu0 %v24765_v29  ;;  %v24773_v44 = vld [vmem:[#allocation187_spill] sm:$0xff]  ;;  %v24774_v29 = vld [vmem:[#allocation188_spill] sm:$0xff] }
 0xabc   :  { %16424 = vmatprep.subr.bf16.mxu1 %v24766_v41  ;;  %16456 = vmatprep.subr.bf16.mxu0 %v24767_v39  ;;  %v24775_v41 = vld [vmem:[#allocation189_spill] sm:$0xff]  ;;  %v24776_v39 = vld [vmem:[#allocation190_spill] sm:$0xff] }
 0xabd   :  { %3694 = vmatprep.mubr.f32.mxu1 %v24486_v3  ;;  %3765 = vmatprep.mubr.f32.mxu0 %v24486_v3 }
 0xabf   :  { %16426 = vmatpush1.bf16.msra.mxu1 %v24768_v52  ;;  %16458 = vmatpush1.bf16.msra.mxu0 %v24769_v11  ;;  %v24779_v52 = vld [vmem:[#allocation193_spill] sm:$0xff]  ;;  %v24780_v11 = vld [vmem:[#allocation194_spill] sm:$0xff] }
 0xac0   :  { %16428 = vmatprep.subr.bf16.mxu1 %v24770_v62  ;;  %16460 = vmatprep.subr.bf16.mxu0 %v24771_v37  ;;  %v24781_v62 = vld [vmem:[#allocation195_spill] sm:$0xff]  ;;  %v24782_v37 = vld [vmem:[#allocation196_spill] sm:$0xff] }
 0xac3   :  { %16430 = vmatpush1.bf16.msra.mxu1 %v24772_v25  ;;  %16462 = vmatpush1.bf16.msra.mxu0 %v24773_v44  ;;  %v24783_v25 = vld [vmem:[#allocation197_spill] sm:$0xff] }
 0xac4   :  { %16432 = vmatprep.subr.bf16.mxu1 %v24774_v29  ;;  %16464 = vmatprep.subr.bf16.mxu0 %v24775_v41  ;;  %v24784_v29 = vld [vmem:[#allocation199_spill] sm:$0xff] }
 0xac7   :  { %16434 = vmatpush1.bf16.msra.mxu1 %v24776_v39  ;;  %16466 = vmatpush1.bf16.msra.mxu0 %v24777_v49 }
 0xac8   :  { %16436 = vmatprep.subr.bf16.mxu1 %v24778_v53  ;;  %16468 = vmatprep.subr.bf16.mxu0 %v24779_v52 }
 0xacb   :  { %16438 = vmatpush1.bf16.msra.mxu1 %v24780_v11  ;;  %16470 = vmatpush1.bf16.msra.mxu0 %v24781_v62 }
 0xacc   :  { %16440 = vmatprep.subr.bf16.mxu1 %v24782_v37  ;;  %16472 = vmatprep.subr.bf16.mxu0 %v24783_v25 }
 0xacf   :  { %16442 = vmatpush1.bf16.msra.mxu1 %v21365_v34  ;;  %16474 = vmatpush1.bf16.msra.mxu0 %v24784_v29 }
 0xad0   :  { %16444 = vmatprep.subr.bf16.mxu1 %v21377_v55  ;;  %16476 = vmatprep.subr.bf16.mxu0 %v21379_v24  ;;  %v24785_v24 = vld [vmem:[#allocation208_spill] sm:$0xff] }
 0xad3   :  { %16446 = vmatpush1.bf16.msra.mxu1 %v21401_v36  ;;  %16478 = vmatpush1.bf16.msra.mxu0 %v21403_v10 }
 0xad4   :  { %16448 = vmatprep.subr.bf16.mxu1 %v21410_v12  ;;  %16480 = vmatprep.subr.bf16.mxu0 %v21412_v51 }
 0xad7   :  { %16450 = vmatpush1.bf16.msra.mxu1 %v21425_v6  ;;  %16482 = vmatpush1.bf16.msra.mxu0 %v21427_v33 }
 0xad8   :  { %16483 = vmatprep.subr.bf16.mxu1 %v24616_v0  ;;  %16495 = vmatprep.subr.bf16.mxu0 %v24616_v0 }
 0xada   :  { %3695 = vmatmul.mubr.f32.vlgmr.msra.gmra.mrb[22].mxu1 %v21685_v58  ;;  %3766 = vmatmul.mubr.f32.vlgmr.msra.gmra.mrb[20].mxu0 %v21685_v58  ;;  %v21945_v58 = vld [vmem:[%s24423_s12 + $0x4] sm:$0x3] }
 0xadb   :  { %16485 = vmatpush3.bf16.msra.mxu1 %v24785_v24  ;;  %15253 = vmatprep.mubr.msk.f32.mxu1 %vm19507_vm5, %v24486_v3 }
 0xadc   :  { %16486 = vmatprep.subr.bf16.mxu1 %v24616_v0  ;;  %16497 = vmatpush3.bf16.msra.mxu0 %v21549_v14 }
 0xadd   :  { %16498 = vmatprep.subr.bf16.mxu0 %v24616_v0  ;;  %15288 = vmatprep.mubr.msk.f32.mxu0 %vm19507_vm5, %v24486_v3 }
 0xadf   :  { %16488 = vmatpush3.bf16.msra.mxu1 %v21450_v28 }
 0xae0   :  { %16489 = vmatprep.subr.bf16.mxu1 %v24616_v0  ;;  %16500 = vmatpush3.bf16.msra.mxu0 %v21561_v43 }
 0xae1   :  { %16501 = vmatprep.subr.bf16.mxu0 %v24616_v0 }
 0xae3   :  { %16491 = vmatpush3.bf16.msra.mxu1 %v21464_v7 }
 0xae4   :  { %16492 = vmatprep.subr.bf16.mxu1 %v24616_v0  ;;  %16503 = vmatpush3.bf16.msra.mxu0 %v21573_v30 }
 0xae5   :  { %16504 = vmatprep.subr.bf16.mxu0 %v24616_v0 }
 0xae7   :  { %16494 = vmatpush3.bf16.msra.mxu1 %v21474_v32 }
 0xae8   :  { %16520 = vmatprep.subr.bf16.mxu1 %v19631_v4  ;;  %16506 = vmatpush3.bf16.msra.mxu0 %v21585_v16 }
 0xae9   :  { %16507 = vmatprep.subr.bf16.mxu0 %v24616_v0 }
 0xaea   :  { %15254 = vmatmul.mubr.msk.f32.vlgmr.msra.gmra.mrb[24].mxu1 %vm485_vm3, %v21830_v31 }
 0xaeb   :  { %16522 = vmatpush1.bf16.msra.mxu1 %v19648_v9  ;;  %4018 = vmatprep.mubr.f32.mxu1 %v24486_v3 }
 0xaec   :  { %16524 = vmatprep.subr.bf16.mxu1 %v19673_v17  ;;  %16509 = vmatpush3.bf16.msra.mxu0 %v21597_v63 }
 0xaed   :  { %16510 = vmatprep.subr.bf16.mxu0 %v24616_v0 }
 0xaef   :  { %16526 = vmatpush1.bf16.msra.mxu1 %v19687_v22 }
 0xaf0   :  { %16528 = vmatprep.subr.bf16.mxu1 %v19702_v27  ;;  %16512 = vmatpush3.bf16.msra.mxu0 %v21609_v57 }
 0xaf1   :  { %16513 = vmatprep.subr.bf16.mxu0 %v24616_v0 }
 0xaf3   :  { %16530 = vmatpush1.bf16.msra.mxu1 %v19727_v35 }
 0xaf4   :  { %16532 = vmatprep.subr.bf16.mxu1 %v19742_v40  ;;  %16515 = vmatpush3.bf16.msra.mxu0 %v21619_v47 }
 0xaf5   :  { %16516 = vmatprep.subr.bf16.mxu0 %v24616_v0 }
 0xaf7   :  { %16534 = vmatpush1.bf16.msra.mxu1 %v19774_v50 }
 0xaf8   :  { %16536 = vmatprep.subr.bf16.mxu1 %v19786_v54  ;;  %16518 = vmatpush3.bf16.msra.mxu0 %v21631_v61 }
 0xaf9   :  { %16632 = vmatprep.subr.bf16.mxu0 %v24642_v60  ;;  %v24840_v60 = vld [vmem:[#allocation220_spill] sm:$0xff] }
 0xafa   :  { %14196 = vmatmul.mubr.msk.f32.vlgmr.msra.gmra.mrb[26].mxu1 %vm485_vm3, %v21830_v31 }
 0xafb   :  { %16538 = vmatpush1.bf16.msra.mxu1 %v19819_v1  ;;  %4089 = vmatprep.mubr.f32.mxu1 %v24486_v3 }
 0xafc   :  { %16540 = vmatprep.subr.bf16.mxu1 %v19825_v5  ;;  %v24802_v5 = vld [vmem:[#allocation42_spill] sm:$0xff] }
 0xaff   :  { %16542 = vmatpush1.bf16.msra.mxu1 %v19857_v20  ;;  %v24800_v20 = vld [vmem:[#allocation38_spill] sm:$0xff] }
 0xb00   :  { %16544 = vmatprep.subr.bf16.mxu1 %v19864_v23  ;;  %v24799_v23 = vld [vmem:[#allocation36_spill] sm:$0xff] }
 0xb03   :  { %16546 = vmatpush1.bf16.msra.mxu1 %v19894_v38  ;;  %v24795_v38 = vld [vmem:[#allocation28_spill] sm:$0xff] }
 0xb04   :  { %16548 = vmatprep.subr.bf16.mxu1 %v19900_v42  ;;  %v24786_v42 = vld [vmem:[#allocation41_spill] sm:$0xff] }
 0xb07   :  { %16550 = vmatpush1.bf16.msra.mxu1 %v19930_v56  ;;  %v24793_v56 = vld [vmem:[#allocation24_spill] sm:$0xff] }
 0xb08   :  { %16552 = vmatprep.subr.bf16.mxu1 %v19646_v8  ;;  %v24787_v8 = vld [vmem:[#allocation43_spill] sm:$0xff] }
 0xb0a   :  { %14197 = vmatmul.mubr.msk.f32.vlgmr.msra.gmra.mrb[28].mxu1 %vm485_vm3, %v21830_v31  ;;  %v24788_v31 = vld [vmem:[#allocation45_spill] sm:$0xff] }
 0xb0b   :  { %16554 = vmatpush1.bf16.msra.mxu1 %v19660_v13  ;;  %4163 = vmatprep.mubr.f32.mxu1 %v24486_v3  ;;  %v24789_v13 = vld [vmem:[#allocation47_spill] sm:$0xff] }
 0xb0c   :  { %16556 = vmatprep.subr.bf16.mxu1 %v19675_v18  ;;  %v24790_v18 = vld [vmem:[#allocation18_spill] sm:$0xff] }
 0xb0f   :  { %16558 = vmatpush1.bf16.msra.mxu1 %v19700_v26  ;;  %v24791_v26 = vld [vmem:[#allocation20_spill] sm:$0xff] }
 0xb10   :  { %16560 = vmatprep.subr.bf16.mxu1 %v24786_v42  ;;  %v24792_v42 = vld [vmem:[#allocation22_spill] sm:$0xff] }
 0xb12   :  { %14198 = vmatmul.mubr.msk.f32.vlgmr.msra.gmra.mrb[26].mxu1 %vm631_vm2, %v21945_v58 }
 0xb13   :  { %16562 = vmatpush1.bf16.msra.mxu1 %v24787_v8  ;;  %4234 = vmatprep.mubr.f32.mxu1 %v24486_v3  ;;  %v24794_v8 = vld [vmem:[#allocation26_spill] sm:$0xff] }
 0xb14   :  { %16564 = vmatprep.subr.bf16.mxu1 %v24788_v31  ;;  %v24796_v31 = vld [vmem:[#allocation30_spill] sm:$0xff] }
 0xb17   :  { %16566 = vmatpush1.bf16.msra.mxu1 %v24789_v13  ;;  %v24797_v13 = vld [vmem:[#allocation32_spill] sm:$0xff] }
 0xb18   :  { %16568 = vmatprep.subr.bf16.mxu1 %v24790_v18  ;;  %v24798_v18 = vld [vmem:[#allocation34_spill] sm:$0xff] }
 0xb1a   :  { %14199 = vmatmul.mubr.msk.f32.vlgmr.msra.gmra.mrb[28].mxu1 %vm631_vm2, %v21945_v58 }
 0xb1b   :  { %16570 = vmatpush1.bf16.msra.mxu1 %v24791_v26  ;;  %4305 = vmatprep.mubr.f32.mxu1 %v24486_v3  ;;  %v24801_v26 = vld [vmem:[#allocation40_spill] sm:$0xff] }
 0xb1c   :  { %16572 = vmatprep.subr.bf16.mxu1 %v24792_v42  ;;  %v24803_v42 = vld [vmem:[#allocation44_spill] sm:$0xff] }
 0xb1f   :  { %16574 = vmatpush1.bf16.msra.mxu1 %v24793_v56  ;;  %v24804_v56 = vld [vmem:[#allocation46_spill] sm:$0xff] }
 0xb20   :  { %16576 = vmatprep.subr.bf16.mxu1 %v24794_v8  ;;  %v24805_v8 = vld [vmem:[#allocation48_spill] sm:$0xff] }
 0xb23   :  { %16578 = vmatpush1.bf16.msra.mxu1 %v24795_v38  ;;  %v24806_v38 = vld [vmem:[#allocation49_spill] sm:$0xff] }
 0xb24   :  { %16580 = vmatprep.subr.bf16.mxu1 %v24796_v31  ;;  %v24818_v31 = vld [vmem:[#allocation61_spill] sm:$0xff] }
 0xb27   :  { %16582 = vmatpush1.bf16.msra.mxu1 %v24797_v13  ;;  %v24807_v13 = vld [vmem:[#allocation50_spill] sm:$0xff] }
 0xb28   :  { %16584 = vmatprep.subr.bf16.mxu1 %v24798_v18  ;;  %v24816_v18 = vld [vmem:[#allocation59_spill] sm:$0xff] }
 0xb2b   :  { %16586 = vmatpush1.bf16.msra.mxu1 %v24799_v23  ;;  %v24808_v23 = vld [vmem:[#allocation51_spill] sm:$0xff] }
 0xb2c   :  { %16588 = vmatprep.subr.bf16.mxu1 %v24800_v20  ;;  %v24809_v20 = vld [vmem:[#allocation52_spill] sm:$0xff] }
 0xb2f   :  { %16590 = vmatpush1.bf16.msra.mxu1 %v24801_v26  ;;  %v24810_v26 = vld [vmem:[#allocation53_spill] sm:$0xff] }
 0xb30   :  { %16592 = vmatprep.subr.bf16.mxu1 %v24802_v5  ;;  %v24811_v5 = vld [vmem:[#allocation54_spill] sm:$0xff] }
 0xb33   :  { %16594 = vmatpush1.bf16.msra.mxu1 %v24803_v42  ;;  %v24812_v42 = vld [vmem:[#allocation55_spill] sm:$0xff] }
 0xb34   :  { %16596 = vmatprep.subr.bf16.mxu1 %v24804_v56  ;;  %v24813_v56 = vld [vmem:[#allocation56_spill] sm:$0xff] }
 0xb37   :  { %16598 = vmatpush1.bf16.msra.mxu1 %v24805_v8  ;;  %v24814_v8 = vld [vmem:[#allocation57_spill] sm:$0xff] }
 0xb38   :  { %16600 = vmatprep.subr.bf16.mxu1 %v24806_v38  ;;  %v24815_v38 = vld [vmem:[#allocation58_spill] sm:$0xff] }
 0xb3a   :  { %4306 = vmatmul.mubr.f32.vlgmr.msra.gmra.mrb[26].mxu1 %v21730_v15 }
 0xb3b   :  { %16602 = vmatpush1.bf16.msra.mxu1 %v24807_v13  ;;  %4376 = vmatprep.mubr.f32.mxu1 %v24486_v3  ;;  %v24817_v13 = vld [vmem:[#allocation60_spill] sm:$0xff] }
 0xb3c   :  { %16604 = vmatprep.subr.bf16.mxu1 %v24808_v23  ;;  %v24819_v23 = vld [vmem:[#allocation62_spill] sm:$0xff] }
 0xb3f   :  { %16606 = vmatpush1.bf16.msra.mxu1 %v24809_v20  ;;  %v24820_v20 = vld [vmem:[#allocation63_spill] sm:$0xff] }
 0xb40   :  { %16608 = vmatprep.subr.bf16.mxu1 %v24810_v26  ;;  %v24821_v26 = vld [vmem:[#allocation64_spill] sm:$0xff] }
 0xb43   :  { %16610 = vmatpush1.bf16.msra.mxu1 %v24811_v5  ;;  %v24822_v5 = vld [vmem:[#allocation106_spill] sm:$0xff] }
 0xb44   :  { %16612 = vmatprep.subr.bf16.mxu1 %v24812_v42  ;;  %v24839_v42 = vld [vmem:[#allocation107_spill] sm:$0xff] }
 0xb47   :  { %16614 = vmatpush1.bf16.msra.mxu1 %v24813_v56  ;;  %v24823_v56 = vld [vmem:[#allocation114_spill] sm:$0xff] }
 0xb48   :  { %16616 = vmatprep.subr.bf16.mxu1 %v24814_v8  ;;  %v24824_v8 = vld [vmem:[#allocation116_spill] sm:$0xff] }
 0xb4b   :  { %16618 = vmatpush1.bf16.msra.mxu1 %v24815_v38  ;;  %v24825_v38 = vld [vmem:[#allocation118_spill] sm:$0xff] }
 0xb4c   :  { %16620 = vmatprep.subr.bf16.mxu1 %v24816_v18  ;;  %v24826_v18 = vld [vmem:[#allocation120_spill] sm:$0xff] }
 0xb4f   :  { %16622 = vmatpush1.bf16.msra.mxu1 %v24817_v13  ;;  %v24827_v13 = vld [vmem:[#allocation122_spill] sm:$0xff] }
 0xb50   :  { %16624 = vmatprep.subr.bf16.mxu1 %v24818_v31  ;;  %v24828_v31 = vld [vmem:[#allocation124_spill] sm:$0xff] }
 0xb53   :  { %16626 = vmatpush1.bf16.msra.mxu1 %v24819_v23  ;;  %v24829_v23 = vld [vmem:[#allocation126_spill] sm:$0xff] }
 0xb54   :  { %16628 = vmatprep.subr.bf16.mxu1 %v24820_v20  ;;  %v24830_v20 = vld [vmem:[#allocation128_spill] sm:$0xff] }
 0xb57   :  { %16630 = vmatpush1.bf16.msra.mxu1 %v24821_v26  ;;  %v24831_v26 = vld [vmem:[#allocation130_spill] sm:$0xff] }
 0xb58   :  { %16744 = vmatprep.subr.bf16.mxu1 %v24822_v5  ;;  %v24832_v5 = vld [vmem:[#allocation132_spill] sm:$0xff] }
 0xb5a   :  { %4377 = vmatmul.mubr.f32.vlgmr.msra.gmra.mrb[28].mxu1 %v21730_v15  ;;  %v24833_v15 = vld [vmem:[#allocation134_spill] sm:$0xff] }
 0xb5b   :  { %16746 = vmatpush3.bf16.msra.mxu1 %v24823_v56  ;;  %v24834_v56 = vld [vmem:[#allocation136_spill] sm:$0xff] }
 0xb5c   :  { %16748 = vmatprep.subr.bf16.mxu1 %v24824_v8  ;;  %v24835_v8 = vld [vmem:[#allocation138_spill] sm:$0xff] }
 0xb5f   :  { %16750 = vmatpush3.bf16.msra.mxu1 %v24825_v38  ;;  %v24836_v38 = vld [vmem:[#allocation140_spill] sm:$0xff] }
 0xb60   :  { %16752 = vmatprep.subr.bf16.mxu1 %v24826_v18  ;;  %v24837_v18 = vld [vmem:[#allocation142_spill] sm:$0xff] }
 0xb63   :  { %16754 = vmatpush3.bf16.msra.mxu1 %v24827_v13  ;;  %v24838_v13 = vld [vmem:[#allocation148_spill] sm:$0xff] }
 0xb64   :  { %16756 = vmatprep.subr.bf16.mxu1 %v24828_v31 }
 0xb67   :  { %16758 = vmatpush3.bf16.msra.mxu1 %v24829_v23 }
 0xb68   :  { %16760 = vmatprep.subr.bf16.mxu1 %v24830_v20 }
 0xb6b   :  { %16762 = vmatpush3.bf16.msra.mxu1 %v24831_v26 }
 0xb6c   :  { %16764 = vmatprep.subr.bf16.mxu1 %v24832_v5 }
 0xb6f   :  { %16766 = vmatpush3.bf16.msra.mxu1 %v24833_v15 }
 0xb70   :  { %16768 = vmatprep.subr.bf16.mxu1 %v24834_v56  ;;  %v24841_v56 = vld [vmem:[#allocation221_spill] sm:$0xff] }
 0xb73   :  { %16770 = vmatpush3.bf16.msra.mxu1 %v24835_v8 }
 0xb74   :  { %16772 = vmatprep.subr.bf16.mxu1 %v24836_v38  ;;  %v24842_v38 = vld [vmem:[#allocation222_spill] sm:$0xff] }
 0xb77   :  { %16774 = vmatpush3.bf16.msra.mxu1 %v24837_v18 }
 0xb78   :  { %16798 = vmatprep.subr.bf16.mxu1 %v24838_v13 }
 0xbad   :  { %v3696_v31 = vpop.f32.mrb[22].mxu1  ;;  %v3767_v23 = vpop.f32.mrb[20].mxu0 }
 0xbae   :  { %v3776_v20 = vadd.f32 %v3696_v31, %v24839_v42  ;;  %v3698_v1 = vpop.f32.mrb[23].mxu1  ;;  %v3769_v26 = vpop.f32.mrb[21].mxu0  ;;  %v3778_v50 = vadd.f32 %v3767_v23, %v24842_v38 }
 0xbaf   :  { %v3777_v5 = vadd.f32 %v3698_v1, %v24840_v60  ;;  %v3779_v8 = vadd.f32 %v3769_v26, %v24841_v56 }
 0xbb0   :  { %v14188_v61 = vmul.f32 -1.442695, %v3776_v20 }
 0xbb1   :  { %v14189_v15 = vmul.f32 -1.442695, %v3777_v5  ;;  %v14190_v54 = vmul.f32 -1.442695, %v3779_v8  ;;  %v24843_v8 = vld [vmem:[#allocation223_spill] sm:$0xff] }
 0xbb2   :  { %19218 = vpow2.f32 %v14188_v61 }
 0xbb3   :  { %19220 = vpow2.f32 %v14189_v15 }
 0xbb4   :  { %19222 = vpow2.f32 %v14190_v54 }
 0xbb5   :  { %19224 = vtanh.f32 %v3778_v50 }
 0xbbc   :  { %v19219_v18 = vpop.eup %19218 }
 0xbbd   :  { %v19221_v47 = vpop.eup %19220  ;;  %v3783_v13 = vadd.f32 1.0, %v19219_v18  ;;  %v22013_v40 = vpop.f32.mrb[24].mxu1 }
 0xbbe   :  { %v3789_v31 = vadd.f32 1.0, %v19221_v47  ;;  %v15255_v42 = vpop.f32.mrb[25].mxu1  ;;  %v19223_v1 = vpop.eup %19222  ;;  %v24845_v47 = vld [vmem:[#allocation67_spill] sm:$0xff] }
 0xbbf   :  { %19226 = vrcp.f32 %v3783_v13  ;;  %v19225_v5 = vpop.eup %19224  ;;  %v3796_v26 = vadd.f32 1.0, %v19223_v1  ;;  %v14191_v13 = vld [vmem:[%s23940_s18 + $0x2] sm:$0x3] }
 0xbc0   :  { %19228 = vrcp.f32 %v3789_v31  ;;  %v4420_v31 = vpop.permute.xlu0 %4419  ;;  %v24847_v1 = vld [vmem:[#allocation71_spill] sm:$0xff] }
 0xbc1   :  { %19230 = vrcp.f32 %v3796_v26  ;;  %v24851_v26 = vld [vmem:[#allocation72_spill] sm:$0xff] }
 0xbc9   :  { %v19227_v20 = vpop.eup %19226 }
 0xbca   :  { %v19229_v61 = vpop.eup %19228  ;;  %v3800_v15 = vmul.f32 %v19227_v20, %v19225_v5  ;;  %v24848_v5 = vld [vmem:[#allocation66_spill] sm:$0xff]  ;;  %v4422_v20 = vsel %vm978_vm4, %v21797_v48, %v4420_v31  ;;  %v24855_v48 = vld [vmem:[#allocation79_spill] sm:$0xff]  ;;  %v24858_v31 = vld [vmem:[#allocation85_spill] sm:$0xff] }
 0xbcb   :  { %v3799_v56 = vmul.f32 %v19229_v61, %v24843_v8  ;;  %v19231_v18 = vpop.eup %19230  ;;  %v24849_v61 = vld [vmem:[#allocation68_spill] sm:$0xff]  ;;  %v24852_v8 = vld [vmem:[#allocation73_spill] sm:$0xff] }
 0xbcd   :  { %v22016_v23 = vadd.f32 %v3800_v15, %v3799_v56  ;;  %v24846_v56 = vld [vmem:[#allocation69_spill] sm:$0xff]  ;;  %v24850_v15 = vld [vmem:[#allocation70_spill] sm:$0xff] }
 0xbcf   :  { %24844 = vst [vmem:[#allocation111_spill] sm:$0xff] %v22016_v23  ;;  %19232 = vtanh.f32 %v22016_v23 }
 0xbd9   :  { %v19233_v54 = vpop.eup %19232 }
 0xbda   :  { %v3803_v50 = vmul.f32 %v19233_v54, %v19231_v18  ;;  %v24853_v18 = vld [vmem:[#allocation75_spill] sm:$0xff]  ;;  %v24854_v54 = vld [vmem:[#allocation77_spill] sm:$0xff] }
 0xbdc   :  { %v22022_v42 = vmul.f32 %v14191_v13, %v3803_v50  ;;  %v24856_v13 = vld [vmem:[#allocation81_spill] sm:$0xff]  ;;  %v24857_v50 = vld [vmem:[#allocation83_spill] sm:$0xff] }
 0xbde   :  { %15289 = vmatmul.mubr.f32.vlgmr.msra.gmra.mrb[22].mxu0 %v22022_v42 }
 0xbdf   :  { %16634 = vmatpush1.bf16.msra.mxu0 %v24845_v47  ;;  %4490 = vmatprep.mubr.f32.mxu0 %v24486_v3 }
 0xbe0   :  { %16636 = vmatprep.subr.bf16.mxu0 %v24846_v56 }
 0xbe3   :  { %16638 = vmatpush1.bf16.msra.mxu0 %v24847_v1  ;;  %v24870_v1 = vld [vmem:[#allocation109_spill] sm:$0xff] }
 0xbe4   :  { %16640 = vmatprep.subr.bf16.mxu0 %v24848_v5  ;;  %v24869_v5 = vld [vmem:[#allocation108_spill] sm:$0xff] }
 0xbe6   :  { %14204 = vmatmul.mubr.msk.f32.vlgmr.msra.gmra.mrb[24].mxu0 %vm631_vm2, %v4422_v20 }
 0xbe7   :  { %16642 = vmatpush1.bf16.msra.mxu0 %v24849_v61  ;;  %4561 = vmatprep.mubr.f32.mxu0 %v24486_v3  ;;  %v24864_v61 = vld [vmem:[#allocation97_spill] sm:$0xff] }
 0xbe8   :  { %16644 = vmatprep.subr.bf16.mxu0 %v24850_v15  ;;  %v24859_v15 = vld [vmem:[#allocation87_spill] sm:$0xff] }
 0xbeb   :  { %16646 = vmatpush1.bf16.msra.mxu0 %v24851_v26  ;;  %v24860_v26 = vld [vmem:[#allocation89_spill] sm:$0xff] }
 0xbec   :  { %16648 = vmatprep.subr.bf16.mxu0 %v24852_v8  ;;  %v24861_v8 = vld [vmem:[#allocation91_spill] sm:$0xff] }
 0xbee   :  { %14205 = vmatmul.mubr.msk.f32.vlgmr.msra.gmra.mrb[26].mxu0 %vm631_vm2, %v4422_v20  ;;  %v24862_v20 = vld [vmem:[#allocation93_spill] sm:$0xff] }
 0xbef   :  { %16650 = vmatpush1.bf16.msra.mxu0 %v24853_v18  ;;  %4632 = vmatprep.mubr.f32.mxu0 %v24486_v3  ;;  %v24863_v18 = vld [vmem:[#allocation95_spill] sm:$0xff] }
 0xbf0   :  { %16652 = vmatprep.subr.bf16.mxu0 %v24854_v54  ;;  %v24865_v54 = vld [vmem:[#allocation99_spill] sm:$0xff] }
 0xbf3   :  { %16654 = vmatpush1.bf16.msra.mxu0 %v24855_v48  ;;  %v24866_v48 = vld [vmem:[#allocation101_spill] sm:$0xff] }
 0xbf4   :  { %16656 = vmatprep.subr.bf16.mxu0 %v24856_v13  ;;  %v24867_v13 = vld [vmem:[#allocation103_spill] sm:$0xff] }
 0xbf7   :  { %16658 = vmatpush1.bf16.msra.mxu0 %v24857_v50  ;;  %v24868_v50 = vld [vmem:[#allocation74_spill] sm:$0xff] }
 0xbf8   :  { %16660 = vmatprep.subr.bf16.mxu0 %v24858_v31 }
 0xbfb   :  { %16662 = vmatpush1.bf16.msra.mxu0 %v24859_v15 }
 0xbfc   :  { %16664 = vmatprep.subr.bf16.mxu0 %v24860_v26 }
 0xbff   :  { %16666 = vmatpush1.bf16.msra.mxu0 %v24861_v8 }
 0xc00   :  { %16668 = vmatprep.subr.bf16.mxu0 %v24862_v20 }
 0xc03   :  { %16670 = vmatpush1.bf16.msra.mxu0 %v24863_v18 }
 0xc04   :  { %16672 = vmatprep.subr.bf16.mxu0 %v24864_v61 }
 0xc07   :  { %16674 = vmatpush1.bf16.msra.mxu0 %v24865_v54 }
 0xc08   :  { %16676 = vmatprep.subr.bf16.mxu0 %v24866_v48 }
 0xc0b   :  { %16678 = vmatpush1.bf16.msra.mxu0 %v24867_v13 }
 0xc0c   :  { %16680 = vmatprep.subr.bf16.mxu0 %v24868_v50 }
 0xc0d   :  { %v4307_v31 = vpop.f32.mrb[26].mxu1 }
 0xc0e   :  { %v4309_v15 = vpop.f32.mrb[27].mxu1  ;;  %v4387_v8 = vadd.f32 %v4307_v31, %v24870_v1 }
 0xc0f   :  { %v4388_v26 = vadd.f32 %v4309_v15, %v24869_v5 }
 0xc10   :  { %v14200_v20 = vmul.f32 -1.442695, %v4387_v8 }
 0xc11   :  { %v14201_v56 = vmul.f32 -1.442695, %v4388_v26 }
 0xc13   :  { %19234 = vpow2.f32 %v14201_v56  ;;  %v24871_v56 = vld [vmem:[#allocation154_spill] sm:$0xff] }
 0xc14   :  { %19236 = vpow2.f32 %v14200_v20 }
 0xc1d   :  { %v19235_v18 = vpop.eup %19234 }
 0xc1e   :  { %v19237_v61 = vpop.eup %19236  ;;  %v4400_v47 = vadd.f32 1.0, %v19235_v18 }
 0xc1f   :  { %v4394_v54 = vadd.f32 1.0, %v19237_v61 }
 0xc20   :  { %19238 = vrcp.f32 %v4400_v47 }
 0xc21   :  { %19240 = vrcp.f32 %v4394_v54  ;;  %v14203_v54 = vld [vmem:[%s23930_s17 + $0x4] sm:$0x3] }
 0xc2a   :  { %v19239_v31 = vpop.eup %19238 }
 0xc2b   :  { %v19241_v26 = vpop.eup %19240  ;;  %v4410_v20 = vmul.f32 %v19239_v31, %v24871_v56  ;;  %v24877_v31 = vld [vmem:[#allocation84_spill] sm:$0xff]  ;;  %v24880_v56 = vld [vmem:[#allocation90_spill] sm:$0xff] }
 0xc2d   :  { %v4378_v23 = vpop.f32.mrb[28].mxu1 }
 0xc2e   :  { %v4389_v13 = vadd.f32 %v4378_v23, %v24695_v2  ;;  %v4380_v48 = vpop.f32.mrb[29].mxu1 }
 0xc2f   :  { %v4390_v50 = vadd.f32 %v4380_v48, %v24696_v45 }
 0xc30   :  { %19242 = vtanh.f32 %v4389_v13 }
 0xc31   :  { %v14202_v15 = vmul.f32 -1.442695, %v4390_v50  ;;  %v24873_v50 = vld [vmem:[#allocation76_spill] sm:$0xff] }
 0xc33   :  { %19244 = vpow2.f32 %v14202_v15  ;;  %v24876_v15 = vld [vmem:[#allocation82_spill] sm:$0xff] }
 0xc3a   :  { %v19243_v8 = vpop.eup %19242 }
 0xc3b   :  { %v4411_v1 = vmul.f32 %v19243_v8, %v19241_v26  ;;  %v24878_v26 = vld [vmem:[#allocation86_spill] sm:$0xff]  ;;  %v24879_v8 = vld [vmem:[#allocation88_spill] sm:$0xff] }
 0xc3d   :  { %v19245_v5 = vpop.eup %19244  ;;  %v22061_v18 = vadd.f32 %v4411_v1, %v4410_v20  ;;  %v24874_v1 = vld [vmem:[#allocation78_spill] sm:$0xff]  ;;  %v24881_v20 = vld [vmem:[#allocation92_spill] sm:$0xff] }
 0xc3e   :  { %v4407_v61 = vadd.f32 1.0, %v19245_v5  ;;  %v24875_v5 = vld [vmem:[#allocation80_spill] sm:$0xff] }
 0xc3f   :  { %24872 = vst [vmem:[#allocation112_spill] sm:$0xff] %v22061_v18  ;;  %19246 = vtanh.f32 %v22061_v18 }
 0xc40   :  { %19248 = vrcp.f32 %v4407_v61  ;;  %v24882_v61 = vld [vmem:[#allocation94_spill] sm:$0xff] }
 0xc49   :  { %v19247_v23 = vpop.eup %19246 }
 0xc4a   :  { %v19249_v47 = vpop.eup %19248 }
 0xc4b   :  { %v4414_v48 = vmul.f32 %v19249_v47, %v19247_v23  ;;  %v24883_v23 = vld [vmem:[#allocation96_spill] sm:$0xff]  ;;  %v24884_v47 = vld [vmem:[#allocation98_spill] sm:$0xff] }
 0xc4d   :  { %v22067_v13 = vmul.f32 %v14203_v54, %v4414_v48  ;;  %v24885_v54 = vld [vmem:[#allocation100_spill] sm:$0xff]  ;;  %v24886_v48 = vld [vmem:[#allocation102_spill] sm:$0xff] }
 0xc4f   :  { %4633 = vmatmul.mubr.f32.vlgmr.msra.gmra.mrb[24].mxu0 %v22067_v13 }
 0xc50   :  { %16682 = vmatpush1.bf16.msra.mxu0 %v24873_v50  ;;  %4703 = vmatprep.mubr.f32.mxu0 %v24486_v3 }
 0xc51   :  { %16684 = vmatprep.subr.bf16.mxu0 %v24874_v1 }
 0xc54   :  { %16686 = vmatpush1.bf16.msra.mxu0 %v24875_v5 }
 0xc55   :  { %16688 = vmatprep.subr.bf16.mxu0 %v24876_v15  ;;  %v24887_v15 = vld [vmem:[#allocation104_spill] sm:$0xff] }
 0xc58   :  { %16690 = vmatpush1.bf16.msra.mxu0 %v24877_v31  ;;  %v24888_v31 = vld [vmem:[#allocation105_spill] sm:$0xff] }
 0xc59   :  { %16692 = vmatprep.subr.bf16.mxu0 %v24878_v26  ;;  %v24899_v26 = vld [vmem:[#allocation133_spill] sm:$0xff] }
 0xc5c   :  { %16694 = vmatpush1.bf16.msra.mxu0 %v24879_v8  ;;  %v24889_v8 = vld [vmem:[#allocation113_spill] sm:$0xff] }
 0xc5d   :  { %16696 = vmatprep.subr.bf16.mxu0 %v24880_v56  ;;  %v24890_v56 = vld [vmem:[#allocation115_spill] sm:$0xff] }
 0xc60   :  { %16698 = vmatpush1.bf16.msra.mxu0 %v24881_v20  ;;  %v24891_v20 = vld [vmem:[#allocation117_spill] sm:$0xff] }
 0xc61   :  { %16700 = vmatprep.subr.bf16.mxu0 %v24882_v61  ;;  %v24892_v61 = vld [vmem:[#allocation119_spill] sm:$0xff] }
 0xc64   :  { %16702 = vmatpush1.bf16.msra.mxu0 %v24883_v23  ;;  %v24893_v23 = vld [vmem:[#allocation121_spill] sm:$0xff] }
 0xc65   :  { %16704 = vmatprep.subr.bf16.mxu0 %v24884_v47  ;;  %v24894_v47 = vld [vmem:[#allocation123_spill] sm:$0xff] }
 0xc68   :  { %16706 = vmatpush1.bf16.msra.mxu0 %v24885_v54  ;;  %v24895_v54 = vld [vmem:[#allocation125_spill] sm:$0xff] }
 0xc69   :  { %16708 = vmatprep.subr.bf16.mxu0 %v24886_v48  ;;  %v24896_v48 = vld [vmem:[#allocation127_spill] sm:$0xff] }
 0xc6c   :  { %16710 = vmatpush1.bf16.msra.mxu0 %v24887_v15  ;;  %v24897_v15 = vld [vmem:[#allocation129_spill] sm:$0xff] }
 0xc6d   :  { %16712 = vmatprep.subr.bf16.mxu0 %v24888_v31  ;;  %v24898_v31 = vld [vmem:[#allocation131_spill] sm:$0xff] }
 0xc6f   :  { %4704 = vmatmul.mubr.f32.vlgmr.msra.gmra.mrb[26].mxu0 %v22067_v13 }
 0xc70   :  { %16714 = vmatpush3.bf16.msra.mxu0 %v24889_v8  ;;  %v24900_v8 = vld [vmem:[#allocation135_spill] sm:$0xff] }
 0xc71   :  { %16716 = vmatprep.subr.bf16.mxu0 %v24890_v56  ;;  %v24901_v56 = vld [vmem:[#allocation137_spill] sm:$0xff] }
 0xc74   :  { %16718 = vmatpush3.bf16.msra.mxu0 %v24891_v20  ;;  %v24902_v20 = vld [vmem:[#allocation139_spill] sm:$0xff] }
 0xc75   :  { %16720 = vmatprep.subr.bf16.mxu0 %v24892_v61  ;;  %v24903_v61 = vld [vmem:[#allocation141_spill] sm:$0xff] }
 0xc78   :  { %16722 = vmatpush3.bf16.msra.mxu0 %v24893_v23  ;;  %v24904_v23 = vld [vmem:[#allocation110_spill] sm:$0xff] }
 0xc79   :  { %16724 = vmatprep.subr.bf16.mxu0 %v24894_v47 }
 0xc7c   :  { %16726 = vmatpush3.bf16.msra.mxu0 %v24895_v54 }
 0xc7d   :  { %16728 = vmatprep.subr.bf16.mxu0 %v24896_v48 }
 0xc80   :  { %16730 = vmatpush3.bf16.msra.mxu0 %v24897_v15 }
 0xc81   :  { %16732 = vmatprep.subr.bf16.mxu0 %v24898_v31 }
 0xc84   :  { %16734 = vmatpush3.bf16.msra.mxu0 %v24899_v26  ;;  %v24905_v26 = vld [vmem:[#allocation143_spill] sm:$0xff] }
 0xc85   :  { %16736 = vmatprep.subr.bf16.mxu0 %v24900_v8 }
 0xc88   :  { %16738 = vmatpush3.bf16.msra.mxu0 %v24901_v56 }
 0xc89   :  { %16740 = vmatprep.subr.bf16.mxu0 %v24902_v20  ;;  %v24906_v20 = vld [vmem:[#allocation145_spill] sm:$0xff] }
 0xc8c   :  { %16742 = vmatpush3.bf16.msra.mxu0 %v24903_v61 }
 0xc8d   :  { %16775 = vmatprep.subr.bf16.mxu0 %v24616_v0 }
 0xcb1   :  { %v3943_v47 = vpop.f32.mrb[22].mxu0 }
 0xcb2   :  { %v3944_v54 = vadd.f32 %v3943_v47, %v22013_v40  ;;  %v15290_v48 = vpop.f32.mrb[23].mxu0  ;;  %v24907_v40 = vld [vmem:[#allocation147_spill] sm:$0xff] }
 0xcb4   :  { %v3947_v15 = vadd.f32 %v24904_v23, %v3944_v54  ;;  %v24908_v23 = vld [vmem:[#allocation144_spill] sm:$0xff]  ;;  %v24909_v54 = vld [vmem:[#allocation146_spill] sm:$0xff] }
 0xcb6   :  { %14193 = vst.msk [vmem:[%s23942_s19 + $0x2] sm:$0x3] %vm2252_vm7, %v3947_v15 }
 0xd22   :  { %v4634_v8 = vpop.f32.mrb[24].mxu0 }
 0xd23   :  { %v4710_v56 = vadd.f32 %v4634_v8, %v24905_v26  ;;  %v4636_v31 = vpop.f32.mrb[25].mxu0 }
 0xd24   :  { %v4711_v5 = vadd.f32 %v4636_v31, %v24906_v20 }
 0xd26   :  { %19250 = vtanh.f32 %v4711_v5 }
 0xd27   :  { %19252 = vtanh.f32 %v4710_v56  ;;  %v24911_v56 = vld [vmem:[#allocation150_spill] sm:$0xff] }
 0xd30   :  { %v19251_v61 = vpop.eup %19250 }
 0xd31   :  { %v19253_v1 = vpop.eup %19252  ;;  %4782 = vmatprep.mubr.f32.mxu0 %v19251_v61  ;;  %v24912_v61 = vld [vmem:[#allocation152_spill] sm:$0xff] }
 0xd32   :  { %4783 = vmatmul.mubr.f32.vlgmr.msra.gmra.mrb[28].mxu0 %v19253_v1  ;;  %v24910_v1 = vld [vmem:[#allocation149_spill] sm:$0xff] }
 0xd33   :  { %16777 = vmatpush3.bf16.msra.mxu0 %v24907_v40  ;;  %15295 = vmatprep.mubr.msk.f32.mxu0 %vm19507_vm5, %v24486_v3  ;;  %v24913_v40 = vld [vmem:[#allocation153_spill] sm:$0xff] }
 0xd34   :  { %16778 = vmatprep.subr.bf16.mxu0 %v24616_v0 }
 0xd42   :  { %v4705_v15 = vpop.f32.mrb[26].mxu0 }
 0xd43   :  { %v4712_v47 = vadd.f32 %v4705_v15, %v24908_v23  ;;  %v4707_v8 = vpop.f32.mrb[27].mxu0  ;;  %v24914_v15 = vld [vmem:[#allocation163_spill] sm:$0xff]  ;;  %v24915_v23 = vld [vmem:[#allocation165_spill] sm:$0xff] }
 0xd44   :  { %v4713_v48 = vadd.f32 %v4707_v8, %v24909_v54  ;;  %v24916_v8 = vld [vmem:[#allocation167_spill] sm:$0xff] }
 0xd46   :  { %19254 = vtanh.f32 %v4713_v48 }
 0xd47   :  { %19256 = vtanh.f32 %v4712_v47  ;;  %v24917_v47 = vld [vmem:[#allocation169_spill] sm:$0xff] }
 0xd50   :  { %v19255_v5 = vpop.eup %19254 }
 0xd51   :  { %v19257_v31 = vpop.eup %19256  ;;  %4852 = vmatprep.mubr.f32.mxu1 %v19255_v5 }
 0xd52   :  { %4853 = vmatmul.mubr.f32.vlgmr.msra.gmra.mrb[30].mxu1 %v19257_v31 }
 0xd53   :  { %16800 = vmatpush1.bf16.msra.mxu1 %v24910_v1  ;;  %5178 = vmatprep.mubr.f32.mxu1 %v24486_v3 }
 0xd54   :  { %16802 = vmatprep.subr.bf16.mxu1 %v24911_v56 }
 0xd57   :  { %16804 = vmatpush1.bf16.msra.mxu1 %v24912_v61 }
 0xd58   :  { %16806 = vmatprep.subr.bf16.mxu1 %v24913_v40 }
 0xd5b   :  { %16808 = vmatpush1.bf16.msra.mxu1 %v24914_v15 }
 0xd5c   :  { %16810 = vmatprep.subr.bf16.mxu1 %v24915_v23 }
 0xd5f   :  { %16812 = vmatpush1.bf16.msra.mxu1 %v24916_v8 }
 0xd60   :  { %16822 = vmatprep.subr.bf16.mxu1 %v24917_v47 }
 0xe05   :  { %v14575_v48 = vpop.f32.mrb[28].mxu0 }
 0xe06   :  { %v14576_v5 = vpop.f32.mrb[29].mxu0 }
 0xe07   :  { %v14577_v31 = vadd.f32 %v14576_v5, %v14575_v48 }
 0xe25   :  { %v14610_v1 = vpop.f32.mrb[30].mxu1 }
 0xe26   :  { %v14611_v54 = vpop.f32.mrb[31].mxu1 }
 0xe27   :  { %v14612_v20 = vadd.f32 %v14611_v54, %v14610_v1  ;;  %v24920_v1 = vld [vmem:[#allocation158_spill] sm:$0xff] }
 0xe29   :  { %v4855_v26 = vadd.f32 %v14612_v20, %v14577_v31 }
 0xe2b   :  { %v4858_v56 = vsel %vm72_vm1, %v4855_v26, -inf }
 0xe2c   :  { %4859 = vmax.xlane.f32.xlu1 %v4858_v56  ;;  %v24921_v56 = vld [vmem:[#allocation161_spill] sm:$0xff] }
 0xeb9   :  { %v4860_v61 = vpop.xlane.xlu1 %4859 }
 0xeba   :  { %v4861_v40 = vsub.f32 %v4855_v26, %v4860_v61  ;;  %v24922_v61 = vld [vmem:[#allocation162_spill] sm:$0xff] }
 0xebc   :  { %v4862_v50 = vmul.f32 1.442695, %v4861_v40 }
 0xebe   :  { %19258 = vpow2.f32 %v4862_v50 }
 0xec8   :  { %v19259_v15 = vpop.eup %19258 }
 0xec9   :  { %v4864_v23 = vsel %vm72_vm1, %v19259_v15, 0.0 }
 0xeca   :  { %4865 = vadd.xlane.f32.xlu0 %v4864_v23  ;;  %v24918_v23 = vld [vmem:[#allocation156_spill] sm:$0xff] }
 0xf57   :  { %v4866_v8 = vpop.xlane.xlu0 %4865 }
 0xf58   :  { %19260 = vrcp.f32 %v4866_v8  ;;  %v24924_v8 = vld [vmem:[#allocation166_spill] sm:$0xff] }
 0xf62   :  { %v19261_v47 = vpop.eup %19260 }
 0xf63   :  { %v22129_v18 = vmul.f32 %v19261_v47, %v19259_v15  ;;  %v24923_v15 = vld [vmem:[#allocation164_spill] sm:$0xff] }
 0xf64   :  { %v24925_v47 = vld [vmem:[#allocation168_spill] sm:$0xff] }
 0xf65   :  { %14218 = vst.msk [vmem:[%s23934_s20 + $0x4] sm:$0x3] %vm72_vm1, %v22129_v18  ;;  %v22138_v26 = vadd.f32 %v22129_v18, %v21806_v59  ;;  %v4876_v50 = vrot.slane %v22129_v18, %v24745_v46  ;;  %v24919_v59 = vld [vmem:[#allocation157_spill] sm:$0xff] }
 0xf67   :  { %6116 = vrot.lane.b32.xlu1 %v22138_v26, %s19504_s4  ;;  %v4884_v20 = vrot.slane %v4876_v50, %v24745_v46  ;;  %v4877_v40 = vcombine.high %v4876_v50, %v4876_v50 }
 0xf69   :  { %15296 = vmatmul.mubr.msk.f32.vlgmr.msra.gmra.mrb[30].mxu0 %vm978_vm4, %v4884_v20  ;;  %v4891_v54 = vrot.slane %v4877_v40, %v24745_v46 }
 0xf6a   :  { %16780 = vmatpush3.bf16.msra.mxu0 %v24918_v23  ;;  %15302 = vmatprep.mubr.msk.f32.mxu0 %vm19507_vm5, %v24486_v3 }
 0xf6b   :  { %16782 = vmatprep.subr.bf16.mxu0 %v24919_v59 }
 0xf6d   :  { %15303 = vmatmul.mubr.msk.f32.vlgmr.msra.gmra.mrb[32].mxu0 %vm978_vm4, %v4891_v54  ;;  %v24926_v54 = vld [vmem:[#allocation170_spill] sm:$0xff] }
 0xf6e   :  { %16784 = vmatpush1.bf16.msra.mxu0 %v24920_v1  ;;  %5107 = vmatprep.mubr.f32.mxu0 %v24486_v3 }
 0xf6f   :  { %16786 = vmatprep.subr.bf16.mxu0 %v24749_v21 }
 0xf72   :  { %16788 = vmatpush1.bf16.msra.mxu0 %v24750_v19 }
 0xf73   :  { %16790 = vmatprep.subr.bf16.mxu0 %v24921_v56 }
 0xf76   :  { %16792 = vmatpush1.bf16.msra.mxu0 %v24922_v61 }
 0xf77   :  { %16794 = vmatprep.subr.bf16.mxu0 %v24923_v15  ;;  %v24927_v15 = vld [vmem:[#allocation171_spill] sm:$0xff] }
 0xf7a   :  { %16796 = vmatpush1.bf16.msra.mxu0 %v24924_v8  ;;  %v24928_v8 = vld [vmem:[#allocation172_spill] sm:$0xff] }
 0xf7b   :  { %16814 = vmatprep.subr.bf16.mxu0 %v24925_v47  ;;  %v24929_v47 = vld [vmem:[#allocation173_spill] sm:$0xff] }
0x103c   :  { %v4960_v48 = vpop.f32.mrb[30].mxu0 }
0x103d   :  { %v15297_v5 = vpop.f32.mrb[31].mxu0 }
0x103e   :  { %v24931_v5 = vld [vmem:[#allocation175_spill] sm:$0xff] }
0x1040   :  { %v5032_v31 = vpop.f32.mrb[32].mxu0 }
0x1041   :  { %v5039_v50 = vrot.slane %v5032_v31, 7  ;;  %v15304_v20 = vpop.f32.mrb[33].mxu0  ;;  %v24932_v31 = vld [vmem:[#allocation176_spill] sm:$0xff] }
0x1042   :  { %v24934_v20 = vld [vmem:[#allocation178_spill] sm:$0xff] }
0x1043   :  { %v22162_v40 = vsel %vm1620_vm6, %v5039_v50, %v4960_v48  ;;  %v24930_v48 = vld [vmem:[#allocation174_spill] sm:$0xff]  ;;  %v24933_v50 = vld [vmem:[#allocation177_spill] sm:$0xff] }
0x1044   :  { %14208 = vmatmul.mubr.msk.f32.vlgmr.msra.gmra.mrb[34].mxu0 %vm485_vm3, %v22162_v40  ;;  %14209 = vmatmul.mubr.msk.f32.vlgmr.msra.gmra.mrb[32].mxu1 %vm485_vm3, %v22162_v40 }
0x1045   :  { %16816 = vmatpush1.bf16.msra.mxu0 %v24926_v54  ;;  %16824 = vmatpush1.bf16.msra.mxu1 %v24927_v15  ;;  %v24937_v15 = vld [vmem:[#allocation181_spill] sm:$0xff] }
0x1046   :  { %16818 = vmatprep.subr.bf16.mxu0 %v24928_v8  ;;  %16826 = vmatprep.subr.bf16.mxu1 %v24929_v47  ;;  %v24935_v47 = vld [vmem:[#allocation179_spill] sm:$0xff]  ;;  %v24936_v8 = vld [vmem:[#allocation180_spill] sm:$0xff] }
0x1047   :  { %5249 = vmatprep.mubr.f32.mxu0 %v24486_v3  ;;  %5320 = vmatprep.mubr.f32.mxu1 %v24486_v3 }
0x1049   :  { %16820 = vmatpush1.bf16.msra.mxu0 %v24930_v48  ;;  %16828 = vmatpush1.bf16.msra.mxu1 %v24931_v5  ;;  %v24940_v5 = vld [vmem:[#allocation184_spill] sm:$0xff]  ;;  %v24941_v48 = vld [vmem:[#allocation185_spill] sm:$0xff] }
0x104a   :  { %16830 = vmatprep.subr.bf16.mxu0 %v24932_v31  ;;  %16862 = vmatprep.subr.bf16.mxu1 %v24933_v50  ;;  %v24938_v31 = vld [vmem:[#allocation182_spill] sm:$0xff]  ;;  %v24939_v50 = vld [vmem:[#allocation183_spill] sm:$0xff] }
0x104c   :  { %14210 = vmatmul.mubr.msk.f32.vlgmr.msra.gmra.mrb[34].mxu0 %vm631_vm2, %v21945_v58  ;;  %14211 = vmatmul.mubr.msk.f32.vlgmr.msra.gmra.mrb[32].mxu1 %vm631_vm2, %v21945_v58  ;;  %v24942_v58 = vld [vmem:[#allocation186_spill] sm:$0xff] }
0x104d   :  { %16832 = vmatpush1.bf16.msra.mxu0 %v24934_v20  ;;  %16864 = vmatpush1.bf16.msra.mxu1 %v24935_v47  ;;  %v24943_v47 = vld [vmem:[#allocation188_spill] sm:$0xff] }
0x104e   :  { %16834 = vmatprep.subr.bf16.mxu0 %v24936_v8  ;;  %16866 = vmatprep.subr.bf16.mxu1 %v24937_v15 }
0x104f   :  { %5391 = vmatprep.mubr.f32.mxu0 %v24486_v3  ;;  %5462 = vmatprep.mubr.f32.mxu1 %v24486_v3 }
0x1051   :  { %16836 = vmatpush1.bf16.msra.mxu0 %v24938_v31  ;;  %16868 = vmatpush1.bf16.msra.mxu1 %v24939_v50 }
0x1052   :  { %16838 = vmatprep.subr.bf16.mxu0 %v24940_v5  ;;  %16870 = vmatprep.subr.bf16.mxu1 %v24941_v48 }
0x1055   :  { %16840 = vmatpush1.bf16.msra.mxu0 %v24942_v58  ;;  %16872 = vmatpush1.bf16.msra.mxu1 %v24773_v44 }
0x1056   :  { %16842 = vmatprep.subr.bf16.mxu0 %v24943_v47  ;;  %16874 = vmatprep.subr.bf16.mxu1 %v24775_v41 }
0x1059   :  { %16844 = vmatpush1.bf16.msra.mxu0 %v24776_v39  ;;  %16876 = vmatpush1.bf16.msra.mxu1 %v24777_v49  ;;  %v24944_v39 = vld [vmem:[#allocation201_spill] sm:$0xff] }
0x105a   :  { %16846 = vmatprep.subr.bf16.mxu0 %v24778_v53  ;;  %16878 = vmatprep.subr.bf16.mxu1 %v24779_v52 }
0x105d   :  { %16848 = vmatpush1.bf16.msra.mxu0 %v24780_v11  ;;  %16880 = vmatpush1.bf16.msra.mxu1 %v24781_v62 }
0x105e   :  { %16850 = vmatprep.subr.bf16.mxu0 %v24782_v37  ;;  %16882 = vmatprep.subr.bf16.mxu1 %v24783_v25 }
0x1061   :  { %16852 = vmatpush1.bf16.msra.mxu0 %v21365_v34  ;;  %16884 = vmatpush1.bf16.msra.mxu1 %v24784_v29 }
0x1062   :  { %16854 = vmatprep.subr.bf16.mxu0 %v21377_v55  ;;  %16886 = vmatprep.subr.bf16.mxu1 %v24944_v39 }
0x1065   :  { %16856 = vmatpush1.bf16.msra.mxu0 %v21401_v36  ;;  %16888 = vmatpush1.bf16.msra.mxu1 %v21403_v10 }
0x1066   :  { %16858 = vmatprep.subr.bf16.mxu0 %v21410_v12  ;;  %16890 = vmatprep.subr.bf16.mxu1 %v21412_v51 }
0x1069   :  { %16860 = vmatpush1.bf16.msra.mxu0 %v21425_v6  ;;  %16892 = vmatpush1.bf16.msra.mxu1 %v21427_v33 }
0x106a   :  { %16893 = vmatprep.subr.bf16.mxu0 %v24616_v0  ;;  %16905 = vmatprep.subr.bf16.mxu1 %v24616_v0 }
0x106c   :  { %5392 = vmatmul.mubr.f32.vlgmr.msra.gmra.mrb[34].mxu0 %v22022_v42  ;;  %5463 = vmatmul.mubr.f32.vlgmr.msra.gmra.mrb[32].mxu1 %v22022_v42  ;;  %v24945_v42 = vld [vmem:[#allocation21_spill] sm:$0xff] }
0x106d   :  { %16895 = vmatpush3.bf16.msra.mxu0 %v24785_v24  ;;  %15321 = vmatprep.mubr.msk.f32.mxu0 %vm19507_vm5, %v24486_v3 }
0x106e   :  { %16896 = vmatprep.subr.bf16.mxu0 %v24616_v0  ;;  %16907 = vmatpush3.bf16.msra.mxu1 %v21549_v14 }
0x106f   :  { %16908 = vmatprep.subr.bf16.mxu1 %v24616_v0  ;;  %15356 = vmatprep.mubr.msk.f32.mxu1 %vm19507_vm5, %v24486_v3 }
0x1071   :  { %16898 = vmatpush3.bf16.msra.mxu0 %v21450_v28 }
0x1072   :  { %16899 = vmatprep.subr.bf16.mxu0 %v24616_v0  ;;  %16910 = vmatpush3.bf16.msra.mxu1 %v21561_v43 }
0x1073   :  { %16911 = vmatprep.subr.bf16.mxu1 %v24616_v0 }
0x1075   :  { %16901 = vmatpush3.bf16.msra.mxu0 %v21464_v7 }
0x1076   :  { %16902 = vmatprep.subr.bf16.mxu0 %v24616_v0  ;;  %16913 = vmatpush3.bf16.msra.mxu1 %v21573_v30 }
0x1077   :  { %16914 = vmatprep.subr.bf16.mxu1 %v24616_v0 }
0x1079   :  { %16904 = vmatpush3.bf16.msra.mxu0 %v21474_v32  ;;  %v24978_v32 = vld [vmem:[#allocation42_spill] sm:$0xff] }
0x107a   :  { %16930 = vmatprep.subr.bf16.mxu0 %v19631_v4  ;;  %16916 = vmatpush3.bf16.msra.mxu1 %v21585_v16  ;;  %v24949_v16 = vld [vmem:[#allocation219_spill] sm:$0xff]  ;;  %v24976_v4 = vld [vmem:[#allocation38_spill] sm:$0xff] }
0x107b   :  { %16917 = vmatprep.subr.bf16.mxu1 %v24616_v0 }
0x107c   :  { %15322 = vmatmul.mubr.msk.f32.vlgmr.msra.gmra.mrb[36].mxu0 %vm485_vm3, %v22162_v40 }
0x107d   :  { %16932 = vmatpush1.bf16.msra.mxu0 %v19648_v9  ;;  %5715 = vmatprep.mubr.f32.mxu0 %v24486_v3  ;;  %v24946_v9 = vld [vmem:[#allocation218_spill] sm:$0xff] }
0x107e   :  { %16934 = vmatprep.subr.bf16.mxu0 %v19673_v17  ;;  %16919 = vmatpush3.bf16.msra.mxu1 %v21597_v63  ;;  %v24947_v17 = vld [vmem:[#allocation23_spill] sm:$0xff]  ;;  %v24948_v63 = vld [vmem:[#allocation25_spill] sm:$0xff] }
0x107f   :  { %16920 = vmatprep.subr.bf16.mxu1 %v24616_v0 }
0x1081   :  { %16936 = vmatpush1.bf16.msra.mxu0 %v19687_v22  ;;  %v24950_v22 = vld [vmem:[#allocation65_spill] sm:$0xff] }
0x1082   :  { %16938 = vmatprep.subr.bf16.mxu0 %v19702_v27  ;;  %16922 = vmatpush3.bf16.msra.mxu1 %v21609_v57  ;;  %v24951_v57 = vld [vmem:[#allocation27_spill] sm:$0xff]  ;;  %v24975_v27 = vld [vmem:[#allocation36_spill] sm:$0xff] }
0x1083   :  { %16923 = vmatprep.subr.bf16.mxu1 %v24616_v0 }
0x1085   :  { %16940 = vmatpush1.bf16.msra.mxu0 %v19727_v35  ;;  %v24954_v35 = vld [vmem:[#allocation33_spill] sm:$0xff] }
0x1086   :  { %16942 = vmatprep.subr.bf16.mxu0 %v24945_v42  ;;  %16925 = vmatpush3.bf16.msra.mxu1 %v24946_v9  ;;  %v24952_v42 = vld [vmem:[#allocation29_spill] sm:$0xff]  ;;  %v24953_v9 = vld [vmem:[#allocation31_spill] sm:$0xff] }
0x1087   :  { %16926 = vmatprep.subr.bf16.mxu1 %v24616_v0 }
0x1089   :  { %16944 = vmatpush1.bf16.msra.mxu0 %v24947_v17  ;;  %v24955_v17 = vld [vmem:[#allocation35_spill] sm:$0xff] }
0x108a   :  { %16946 = vmatprep.subr.bf16.mxu0 %v24948_v63  ;;  %16928 = vmatpush3.bf16.msra.mxu1 %v24949_v16  ;;  %v24956_v63 = vld [vmem:[#allocation37_spill] sm:$0xff]  ;;  %v24957_v16 = vld [vmem:[#allocation39_spill] sm:$0xff] }
0x108b   :  { %17042 = vmatprep.subr.bf16.mxu1 %v24950_v22  ;;  %v24958_v22 = vld [vmem:[#allocation10_spill] sm:$0xff] }
0x108c   :  { %14220 = vmatmul.mubr.msk.f32.vlgmr.msra.gmra.mrb[38].mxu0 %vm485_vm3, %v22162_v40 }
0x108d   :  { %16948 = vmatpush1.bf16.msra.mxu0 %v24951_v57  ;;  %5786 = vmatprep.mubr.f32.mxu0 %v24486_v3  ;;  %v24959_v57 = vld [vmem:[#allocation12_spill] sm:$0xff] }
0x108e   :  { %16950 = vmatprep.subr.bf16.mxu0 %v24952_v42  ;;  %v24960_v42 = vld [vmem:[#allocation14_spill] sm:$0xff] }
0x1091   :  { %16952 = vmatpush1.bf16.msra.mxu0 %v24953_v9  ;;  %v24961_v9 = vld [vmem:[#allocation16_spill] sm:$0xff] }
0x1092   :  { %16954 = vmatprep.subr.bf16.mxu0 %v24954_v35  ;;  %v24971_v35 = vld [vmem:[#allocation28_spill] sm:$0xff] }
0x1095   :  { %16956 = vmatpush1.bf16.msra.mxu0 %v24955_v17  ;;  %v22277_v17 = vld [vmem:[%s24423_s12 + $0x6] sm:$0x3] }
0x1096   :  { %16958 = vmatprep.subr.bf16.mxu0 %v24956_v63  ;;  %v24962_v63 = vld [vmem:[#allocation41_spill] sm:$0xff] }
0x1099   :  { %16960 = vmatpush1.bf16.msra.mxu0 %v24957_v16  ;;  %v24969_v16 = vld [vmem:[#allocation24_spill] sm:$0xff] }
0x109a   :  { %16962 = vmatprep.subr.bf16.mxu0 %v24958_v22  ;;  %v24963_v22 = vld [vmem:[#allocation43_spill] sm:$0xff] }
0x109c   :  { %14221 = vmatmul.mubr.msk.f32.vlgmr.msra.gmra.mrb[40].mxu0 %vm485_vm3, %v22162_v40  ;;  %v24964_v40 = vld [vmem:[#allocation45_spill] sm:$0xff] }
0x109d   :  { %16964 = vmatpush1.bf16.msra.mxu0 %v24959_v57  ;;  %5860 = vmatprep.mubr.f32.mxu0 %v24486_v3  ;;  %v24965_v57 = vld [vmem:[#allocation47_spill] sm:$0xff] }
0x109e   :  { %16966 = vmatprep.subr.bf16.mxu0 %v24960_v42  ;;  %v24966_v42 = vld [vmem:[#allocation18_spill] sm:$0xff] }
0x10a1   :  { %16968 = vmatpush1.bf16.msra.mxu0 %v24961_v9  ;;  %v24967_v9 = vld [vmem:[#allocation20_spill] sm:$0xff] }
0x10a2   :  { %16970 = vmatprep.subr.bf16.mxu0 %v24962_v63  ;;  %v24968_v63 = vld [vmem:[#allocation22_spill] sm:$0xff] }
0x10a4   :  { %14222 = vmatmul.mubr.msk.f32.vlgmr.msra.gmra.mrb[38].mxu0 %vm631_vm2, %v22277_v17 }
0x10a5   :  { %16972 = vmatpush1.bf16.msra.mxu0 %v24963_v22  ;;  %5931 = vmatprep.mubr.f32.mxu0 %v24486_v3  ;;  %v24970_v22 = vld [vmem:[#allocation26_spill] sm:$0xff] }
0x10a6   :  { %16974 = vmatprep.subr.bf16.mxu0 %v24964_v40  ;;  %v24972_v40 = vld [vmem:[#allocation30_spill] sm:$0xff] }
0x10a9   :  { %16976 = vmatpush1.bf16.msra.mxu0 %v24965_v57  ;;  %v24973_v57 = vld [vmem:[#allocation32_spill] sm:$0xff] }
0x10aa   :  { %16978 = vmatprep.subr.bf16.mxu0 %v24966_v42  ;;  %v24974_v42 = vld [vmem:[#allocation34_spill] sm:$0xff] }
0x10ac   :  { %14223 = vmatmul.mubr.msk.f32.vlgmr.msra.gmra.mrb[40].mxu0 %vm631_vm2, %v22277_v17 }
0x10ad   :  { %16980 = vmatpush1.bf16.msra.mxu0 %v24967_v9  ;;  %6002 = vmatprep.mubr.f32.mxu0 %v24486_v3  ;;  %v24977_v9 = vld [vmem:[#allocation40_spill] sm:$0xff] }
0x10ae   :  { %16982 = vmatprep.subr.bf16.mxu0 %v24968_v63  ;;  %v24979_v63 = vld [vmem:[#allocation44_spill] sm:$0xff] }
0x10b1   :  { %16984 = vmatpush1.bf16.msra.mxu0 %v24969_v16  ;;  %v24980_v16 = vld [vmem:[#allocation46_spill] sm:$0xff] }
0x10b2   :  { %16986 = vmatprep.subr.bf16.mxu0 %v24970_v22  ;;  %v24981_v22 = vld [vmem:[#allocation48_spill] sm:$0xff] }
0x10b5   :  { %16988 = vmatpush1.bf16.msra.mxu0 %v24971_v35  ;;  %v24982_v35 = vld [vmem:[#allocation49_spill] sm:$0xff] }
0x10b6   :  { %16990 = vmatprep.subr.bf16.mxu0 %v24972_v40  ;;  %v24994_v40 = vld [vmem:[#allocation61_spill] sm:$0xff] }
0x10b9   :  { %16992 = vmatpush1.bf16.msra.mxu0 %v24973_v57  ;;  %v24983_v57 = vld [vmem:[#allocation50_spill] sm:$0xff] }
0x10ba   :  { %16994 = vmatprep.subr.bf16.mxu0 %v24974_v42  ;;  %v24992_v42 = vld [vmem:[#allocation59_spill] sm:$0xff] }
0x10bd   :  { %16996 = vmatpush1.bf16.msra.mxu0 %v24975_v27  ;;  %v24984_v27 = vld [vmem:[#allocation51_spill] sm:$0xff] }
0x10be   :  { %16998 = vmatprep.subr.bf16.mxu0 %v24976_v4  ;;  %v24985_v4 = vld [vmem:[#allocation52_spill] sm:$0xff] }
0x10c1   :  { %17000 = vmatpush1.bf16.msra.mxu0 %v24977_v9  ;;  %v24986_v9 = vld [vmem:[#allocation53_spill] sm:$0xff] }
0x10c2   :  { %17002 = vmatprep.subr.bf16.mxu0 %v24978_v32  ;;  %v24987_v32 = vld [vmem:[#allocation54_spill] sm:$0xff] }
0x10c5   :  { %17004 = vmatpush1.bf16.msra.mxu0 %v24979_v63  ;;  %v24988_v63 = vld [vmem:[#allocation55_spill] sm:$0xff] }
0x10c6   :  { %17006 = vmatprep.subr.bf16.mxu0 %v24980_v16  ;;  %v24989_v16 = vld [vmem:[#allocation56_spill] sm:$0xff] }
0x10c9   :  { %17008 = vmatpush1.bf16.msra.mxu0 %v24981_v22  ;;  %v24990_v22 = vld [vmem:[#allocation57_spill] sm:$0xff] }
0x10ca   :  { %17010 = vmatprep.subr.bf16.mxu0 %v24982_v35  ;;  %v24991_v35 = vld [vmem:[#allocation58_spill] sm:$0xff] }
0x10cc   :  { %6003 = vmatmul.mubr.f32.vlgmr.msra.gmra.mrb[38].mxu0 %v22067_v13 }
0x10cd   :  { %17012 = vmatpush1.bf16.msra.mxu0 %v24983_v57  ;;  %6073 = vmatprep.mubr.f32.mxu0 %v24486_v3  ;;  %v24993_v57 = vld [vmem:[#allocation60_spill] sm:$0xff] }
0x10ce   :  { %17014 = vmatprep.subr.bf16.mxu0 %v24984_v27  ;;  %v24995_v27 = vld [vmem:[#allocation62_spill] sm:$0xff] }
0x10d1   :  { %17016 = vmatpush1.bf16.msra.mxu0 %v24985_v4  ;;  %v24996_v4 = vld [vmem:[#allocation63_spill] sm:$0xff] }
0x10d2   :  { %17018 = vmatprep.subr.bf16.mxu0 %v24986_v9  ;;  %v24997_v9 = vld [vmem:[#allocation64_spill] sm:$0xff] }
0x10d5   :  { %17020 = vmatpush1.bf16.msra.mxu0 %v24987_v32  ;;  %v24998_v32 = vld [vmem:[#allocation106_spill] sm:$0xff] }
0x10d6   :  { %17022 = vmatprep.subr.bf16.mxu0 %v24988_v63  ;;  %v25015_v63 = vld [vmem:[#allocation107_spill] sm:$0xff] }
0x10d9   :  { %17024 = vmatpush1.bf16.msra.mxu0 %v24989_v16  ;;  %v24999_v16 = vld [vmem:[#allocation114_spill] sm:$0xff] }
0x10da   :  { %17026 = vmatprep.subr.bf16.mxu0 %v24990_v22  ;;  %v25000_v22 = vld [vmem:[#allocation116_spill] sm:$0xff] }
0x10dd   :  { %17028 = vmatpush1.bf16.msra.mxu0 %v24991_v35  ;;  %v25001_v35 = vld [vmem:[#allocation118_spill] sm:$0xff] }
0x10de   :  { %17030 = vmatprep.subr.bf16.mxu0 %v24992_v42  ;;  %v25002_v42 = vld [vmem:[#allocation120_spill] sm:$0xff] }
0x10e1   :  { %17032 = vmatpush1.bf16.msra.mxu0 %v24993_v57  ;;  %v25003_v57 = vld [vmem:[#allocation122_spill] sm:$0xff] }
0x10e2   :  { %17034 = vmatprep.subr.bf16.mxu0 %v24994_v40  ;;  %v25004_v40 = vld [vmem:[#allocation124_spill] sm:$0xff] }
0x10e5   :  { %17036 = vmatpush1.bf16.msra.mxu0 %v24995_v27  ;;  %v25005_v27 = vld [vmem:[#allocation126_spill] sm:$0xff] }
0x10e6   :  { %17038 = vmatprep.subr.bf16.mxu0 %v24996_v4  ;;  %v25006_v4 = vld [vmem:[#allocation128_spill] sm:$0xff] }
0x10e9   :  { %17040 = vmatpush1.bf16.msra.mxu0 %v24997_v9  ;;  %v25007_v9 = vld [vmem:[#allocation130_spill] sm:$0xff] }
0x10ea   :  { %17154 = vmatprep.subr.bf16.mxu0 %v24998_v32  ;;  %v25008_v32 = vld [vmem:[#allocation132_spill] sm:$0xff] }
0x10ec   :  { %6074 = vmatmul.mubr.f32.vlgmr.msra.gmra.mrb[40].mxu0 %v22067_v13  ;;  %v25009_v13 = vld [vmem:[#allocation134_spill] sm:$0xff] }
0x10ed   :  { %17156 = vmatpush3.bf16.msra.mxu0 %v24999_v16  ;;  %v25010_v16 = vld [vmem:[#allocation136_spill] sm:$0xff] }
0x10ee   :  { %17158 = vmatprep.subr.bf16.mxu0 %v25000_v22  ;;  %v25011_v22 = vld [vmem:[#allocation138_spill] sm:$0xff] }
0x10f1   :  { %17160 = vmatpush3.bf16.msra.mxu0 %v25001_v35  ;;  %v25012_v35 = vld [vmem:[#allocation140_spill] sm:$0xff] }
0x10f2   :  { %17162 = vmatprep.subr.bf16.mxu0 %v25002_v42  ;;  %v25013_v42 = vld [vmem:[#allocation142_spill] sm:$0xff] }
0x10f5   :  { %17164 = vmatpush3.bf16.msra.mxu0 %v25003_v57  ;;  %v25014_v57 = vld [vmem:[#allocation148_spill] sm:$0xff] }
0x10f6   :  { %17166 = vmatprep.subr.bf16.mxu0 %v25004_v40 }
0x10f9   :  { %17168 = vmatpush3.bf16.msra.mxu0 %v25005_v27 }
0x10fa   :  { %17170 = vmatprep.subr.bf16.mxu0 %v25006_v4 }
0x10fd   :  { %17172 = vmatpush3.bf16.msra.mxu0 %v25007_v9 }
0x10fe   :  { %17174 = vmatprep.subr.bf16.mxu0 %v25008_v32 }
0x1101   :  { %17176 = vmatpush3.bf16.msra.mxu0 %v25009_v13 }
0x1102   :  { %17178 = vmatprep.subr.bf16.mxu0 %v25010_v16  ;;  %v25016_v16 = vld [vmem:[#allocation221_spill] sm:$0xff] }
0x1105   :  { %17180 = vmatpush3.bf16.msra.mxu0 %v25011_v22 }
0x1106   :  { %17182 = vmatprep.subr.bf16.mxu0 %v25012_v35 }
0x1109   :  { %17184 = vmatpush3.bf16.msra.mxu0 %v25013_v42 }
0x110a   :  { %17208 = vmatprep.subr.bf16.mxu0 %v25014_v57 }
0x113f   :  { %v5393_v40 = vpop.f32.mrb[34].mxu0  ;;  %v5464_v27 = vpop.f32.mrb[32].mxu1 }
0x1140   :  { %v5473_v4 = vadd.f32 %v5393_v40, %v25015_v63  ;;  %v5395_v30 = vpop.f32.mrb[35].mxu0  ;;  %v5466_v9 = vpop.f32.mrb[33].mxu1  ;;  %v5475_v35 = vadd.f32 %v5464_v27, %v24842_v38 }
0x1141   :  { %v5474_v32 = vadd.f32 %v5395_v30, %v24840_v60  ;;  %v5476_v22 = vadd.f32 %v5466_v9, %v25016_v16 }
0x1142   :  { %v14212_v7 = vmul.f32 -1.442695, %v5473_v4 }
0x1143   :  { %v14213_v13 = vmul.f32 -1.442695, %v5474_v32  ;;  %v14214_v43 = vmul.f32 -1.442695, %v5476_v22  ;;  %v25017_v22 = vld [vmem:[#allocation111_spill] sm:$0xff] }
0x1144   :  { %19262 = vpow2.f32 %v14212_v7 }
0x1145   :  { %19264 = vpow2.f32 %v14213_v13 }
0x1146   :  { %19266 = vpow2.f32 %v14214_v43 }
0x1147   :  { %19268 = vtanh.f32 %v5475_v35  ;;  %v14215_v35 = vld [vmem:[%s23940_s18 + $0x4] sm:$0x3] }
0x114e   :  { %v19263_v42 = vpop.eup %19262 }
0x114f   :  { %v19265_v28 = vpop.eup %19264  ;;  %v5480_v57 = vadd.f32 1.0, %v19263_v42  ;;  %v22345_v14 = vpop.f32.mrb[36].mxu0 }
0x1150   :  { %v5486_v40 = vadd.f32 1.0, %v19265_v28  ;;  %v15323_v63 = vpop.f32.mrb[37].mxu0  ;;  %v19267_v4 = vpop.eup %19266  ;;  %v25019_v28 = vld [vmem:[#allocation67_spill] sm:$0xff] }
0x1151   :  { %19270 = vrcp.f32 %v5480_v57  ;;  %v19269_v30 = vpop.eup %19268  ;;  %v5493_v9 = vadd.f32 1.0, %v19267_v4  ;;  %v25021_v4 = vld [vmem:[#allocation71_spill] sm:$0xff] }
0x1152   :  { %19272 = vrcp.f32 %v5486_v40  ;;  %v6117_v40 = vpop.permute.xlu1 %6116 }
0x1153   :  { %19274 = vrcp.f32 %v5493_v9  ;;  %v25025_v9 = vld [vmem:[#allocation72_spill] sm:$0xff] }
0x115b   :  { %v19271_v32 = vpop.eup %19270 }
0x115c   :  { %v19273_v7 = vpop.eup %19272  ;;  %v5497_v13 = vmul.f32 %v19271_v32, %v19269_v30  ;;  %v25022_v30 = vld [vmem:[#allocation66_spill] sm:$0xff]  ;;  %v6119_v32 = vsel %vm978_vm4, %v22129_v18, %v6117_v40  ;;  %v25029_v18 = vld [vmem:[#allocation79_spill] sm:$0xff]  ;;  %v25032_v40 = vld [vmem:[#allocation85_spill] sm:$0xff] }
0x115d   :  { %v5496_v16 = vmul.f32 %v19273_v7, %v25017_v22  ;;  %v19275_v43 = vpop.eup %19274  ;;  %v25023_v7 = vld [vmem:[#allocation68_spill] sm:$0xff]  ;;  %v25026_v22 = vld [vmem:[#allocation73_spill] sm:$0xff] }
0x115f   :  { %v22348_v27 = vadd.f32 %v5497_v13, %v5496_v16  ;;  %v25020_v16 = vld [vmem:[#allocation69_spill] sm:$0xff]  ;;  %v25024_v13 = vld [vmem:[#allocation70_spill] sm:$0xff] }
0x1161   :  { %25018 = vst [vmem:[#allocation155_spill] sm:$0xff] %v22348_v27  ;;  %19276 = vtanh.f32 %v22348_v27 }
0x116b   :  { %v19277_v42 = vpop.eup %19276 }
0x116c   :  { %v5500_v57 = vmul.f32 %v19277_v42, %v19275_v43  ;;  %v25027_v43 = vld [vmem:[#allocation75_spill] sm:$0xff]  ;;  %v25028_v42 = vld [vmem:[#allocation77_spill] sm:$0xff] }
0x116e   :  { %v22354_v63 = vmul.f32 %v14215_v35, %v5500_v57  ;;  %v25030_v35 = vld [vmem:[#allocation81_spill] sm:$0xff]  ;;  %v25031_v57 = vld [vmem:[#allocation83_spill] sm:$0xff] }
0x1170   :  { %15357 = vmatmul.mubr.f32.vlgmr.msra.gmra.mrb[34].mxu1 %v22354_v63 }
0x1171   :  { %17044 = vmatpush1.bf16.msra.mxu1 %v25019_v28  ;;  %6187 = vmatprep.mubr.f32.mxu1 %v24486_v3 }
0x1172   :  { %17046 = vmatprep.subr.bf16.mxu1 %v25020_v16 }
0x1175   :  { %17048 = vmatpush1.bf16.msra.mxu1 %v25021_v4  ;;  %v25044_v4 = vld [vmem:[#allocation109_spill] sm:$0xff] }
0x1176   :  { %17050 = vmatprep.subr.bf16.mxu1 %v25022_v30  ;;  %v25043_v30 = vld [vmem:[#allocation108_spill] sm:$0xff] }
0x1178   :  { %14228 = vmatmul.mubr.msk.f32.vlgmr.msra.gmra.mrb[36].mxu1 %vm631_vm2, %v6119_v32 }
0x1179   :  { %17052 = vmatpush1.bf16.msra.mxu1 %v25023_v7  ;;  %6258 = vmatprep.mubr.f32.mxu1 %v24486_v3  ;;  %v25038_v7 = vld [vmem:[#allocation97_spill] sm:$0xff] }
0x117a   :  { %17054 = vmatprep.subr.bf16.mxu1 %v25024_v13  ;;  %v25033_v13 = vld [vmem:[#allocation87_spill] sm:$0xff] }
0x117d   :  { %17056 = vmatpush1.bf16.msra.mxu1 %v25025_v9  ;;  %v25034_v9 = vld [vmem:[#allocation89_spill] sm:$0xff] }
0x117e   :  { %17058 = vmatprep.subr.bf16.mxu1 %v25026_v22  ;;  %v25035_v22 = vld [vmem:[#allocation91_spill] sm:$0xff] }
0x1180   :  { %14229 = vmatmul.mubr.msk.f32.vlgmr.msra.gmra.mrb[38].mxu1 %vm631_vm2, %v6119_v32  ;;  %v25036_v32 = vld [vmem:[#allocation93_spill] sm:$0xff] }
0x1181   :  { %17060 = vmatpush1.bf16.msra.mxu1 %v25027_v43  ;;  %6329 = vmatprep.mubr.f32.mxu1 %v24486_v3  ;;  %v25037_v43 = vld [vmem:[#allocation95_spill] sm:$0xff] }
0x1182   :  { %17062 = vmatprep.subr.bf16.mxu1 %v25028_v42  ;;  %v25039_v42 = vld [vmem:[#allocation99_spill] sm:$0xff] }
0x1185   :  { %17064 = vmatpush1.bf16.msra.mxu1 %v25029_v18  ;;  %v25040_v18 = vld [vmem:[#allocation101_spill] sm:$0xff] }
0x1186   :  { %17066 = vmatprep.subr.bf16.mxu1 %v25030_v35  ;;  %v25041_v35 = vld [vmem:[#allocation103_spill] sm:$0xff] }
0x1189   :  { %17068 = vmatpush1.bf16.msra.mxu1 %v25031_v57  ;;  %v25042_v57 = vld [vmem:[#allocation74_spill] sm:$0xff] }
0x118a   :  { %17070 = vmatprep.subr.bf16.mxu1 %v25032_v40 }
0x118d   :  { %17072 = vmatpush1.bf16.msra.mxu1 %v25033_v13 }
0x118e   :  { %17074 = vmatprep.subr.bf16.mxu1 %v25034_v9 }
0x1191   :  { %17076 = vmatpush1.bf16.msra.mxu1 %v25035_v22 }
0x1192   :  { %17078 = vmatprep.subr.bf16.mxu1 %v25036_v32 }
0x1195   :  { %17080 = vmatpush1.bf16.msra.mxu1 %v25037_v43 }
0x1196   :  { %17082 = vmatprep.subr.bf16.mxu1 %v25038_v7 }
0x1199   :  { %17084 = vmatpush1.bf16.msra.mxu1 %v25039_v42 }
0x119a   :  { %17086 = vmatprep.subr.bf16.mxu1 %v25040_v18 }
0x119d   :  { %17088 = vmatpush1.bf16.msra.mxu1 %v25041_v35 }
0x119e   :  { %17090 = vmatprep.subr.bf16.mxu1 %v25042_v57 }
0x119f   :  { %v6004_v40 = vpop.f32.mrb[38].mxu0 }
0x11a0   :  { %v6006_v13 = vpop.f32.mrb[39].mxu0  ;;  %v6084_v22 = vadd.f32 %v6004_v40, %v25044_v4 }
0x11a1   :  { %v6085_v9 = vadd.f32 %v6006_v13, %v25043_v30 }
0x11a2   :  { %v14224_v32 = vmul.f32 -1.442695, %v6084_v22 }
0x11a3   :  { %v14225_v16 = vmul.f32 -1.442695, %v6085_v9 }
0x11a5   :  { %19278 = vpow2.f32 %v14225_v16  ;;  %v25045_v16 = vld [vmem:[#allocation112_spill] sm:$0xff] }
0x11a6   :  { %19280 = vpow2.f32 %v14224_v32 }
0x11af   :  { %v19279_v43 = vpop.eup %19278 }
0x11b0   :  { %v19281_v7 = vpop.eup %19280  ;;  %v6097_v28 = vadd.f32 1.0, %v19279_v43 }
0x11b1   :  { %v6091_v42 = vadd.f32 1.0, %v19281_v7 }
0x11b2   :  { %19282 = vrcp.f32 %v6097_v28 }
0x11b3   :  { %19284 = vrcp.f32 %v6091_v42  ;;  %v14227_v42 = vld [vmem:[%s23930_s17 + $0x6] sm:$0x3] }
0x11bc   :  { %v19283_v40 = vpop.eup %19282 }
0x11bd   :  { %v19285_v9 = vpop.eup %19284  ;;  %v6107_v32 = vmul.f32 %v19283_v40, %v25045_v16  ;;  %v25051_v40 = vld [vmem:[#allocation84_spill] sm:$0xff]  ;;  %v25054_v16 = vld [vmem:[#allocation90_spill] sm:$0xff] }
0x11bf   :  { %v6075_v27 = vpop.f32.mrb[40].mxu0 }
0x11c0   :  { %v6086_v35 = vadd.f32 %v6075_v27, %v24695_v2  ;;  %v6077_v18 = vpop.f32.mrb[41].mxu0 }
0x11c1   :  { %v6087_v57 = vadd.f32 %v6077_v18, %v24696_v45 }
0x11c2   :  { %19286 = vtanh.f32 %v6086_v35 }
0x11c3   :  { %v14226_v13 = vmul.f32 -1.442695, %v6087_v57  ;;  %v25047_v57 = vld [vmem:[#allocation76_spill] sm:$0xff] }
0x11c5   :  { %19288 = vpow2.f32 %v14226_v13  ;;  %v25050_v13 = vld [vmem:[#allocation82_spill] sm:$0xff] }
0x11cc   :  { %v19287_v22 = vpop.eup %19286 }
0x11cd   :  { %v6108_v4 = vmul.f32 %v19287_v22, %v19285_v9  ;;  %v25052_v9 = vld [vmem:[#allocation86_spill] sm:$0xff]  ;;  %v25053_v22 = vld [vmem:[#allocation88_spill] sm:$0xff] }
0x11cf   :  { %v19289_v30 = vpop.eup %19288  ;;  %v22393_v43 = vadd.f32 %v6108_v4, %v6107_v32  ;;  %v25048_v4 = vld [vmem:[#allocation78_spill] sm:$0xff]  ;;  %v25055_v32 = vld [vmem:[#allocation92_spill] sm:$0xff] }
0x11d0   :  { %v6104_v7 = vadd.f32 1.0, %v19289_v30  ;;  %v25049_v30 = vld [vmem:[#allocation80_spill] sm:$0xff] }
0x11d1   :  { %25046 = vst [vmem:[#allocation151_spill] sm:$0xff] %v22393_v43  ;;  %19290 = vtanh.f32 %v22393_v43 }
0x11d2   :  { %19292 = vrcp.f32 %v6104_v7  ;;  %v25056_v7 = vld [vmem:[#allocation94_spill] sm:$0xff] }
0x11db   :  { %v19291_v27 = vpop.eup %19290 }
0x11dc   :  { %v19293_v28 = vpop.eup %19292 }
0x11dd   :  { %v6111_v18 = vmul.f32 %v19293_v28, %v19291_v27  ;;  %v25057_v27 = vld [vmem:[#allocation96_spill] sm:$0xff]  ;;  %v25058_v28 = vld [vmem:[#allocation98_spill] sm:$0xff] }
0x11df   :  { %v22399_v35 = vmul.f32 %v14227_v42, %v6111_v18  ;;  %v25059_v42 = vld [vmem:[#allocation100_spill] sm:$0xff]  ;;  %v25060_v18 = vld [vmem:[#allocation102_spill] sm:$0xff] }
0x11e1   :  { %6330 = vmatmul.mubr.f32.vlgmr.msra.gmra.mrb[36].mxu1 %v22399_v35 }
0x11e2   :  { %17092 = vmatpush1.bf16.msra.mxu1 %v25047_v57  ;;  %6400 = vmatprep.mubr.f32.mxu1 %v24486_v3 }
0x11e3   :  { %17094 = vmatprep.subr.bf16.mxu1 %v25048_v4 }
0x11e6   :  { %17096 = vmatpush1.bf16.msra.mxu1 %v25049_v30 }
0x11e7   :  { %17098 = vmatprep.subr.bf16.mxu1 %v25050_v13  ;;  %v25061_v13 = vld [vmem:[#allocation104_spill] sm:$0xff] }
0x11ea   :  { %17100 = vmatpush1.bf16.msra.mxu1 %v25051_v40  ;;  %v25062_v40 = vld [vmem:[#allocation105_spill] sm:$0xff] }
0x11eb   :  { %17102 = vmatprep.subr.bf16.mxu1 %v25052_v9  ;;  %v25073_v9 = vld [vmem:[#allocation133_spill] sm:$0xff] }
0x11ee   :  { %17104 = vmatpush1.bf16.msra.mxu1 %v25053_v22  ;;  %v25063_v22 = vld [vmem:[#allocation113_spill] sm:$0xff] }
0x11ef   :  { %17106 = vmatprep.subr.bf16.mxu1 %v25054_v16  ;;  %v25064_v16 = vld [vmem:[#allocation115_spill] sm:$0xff] }
0x11f2   :  { %17108 = vmatpush1.bf16.msra.mxu1 %v25055_v32  ;;  %v25065_v32 = vld [vmem:[#allocation117_spill] sm:$0xff] }
0x11f3   :  { %17110 = vmatprep.subr.bf16.mxu1 %v25056_v7  ;;  %v25066_v7 = vld [vmem:[#allocation119_spill] sm:$0xff] }
0x11f6   :  { %17112 = vmatpush1.bf16.msra.mxu1 %v25057_v27  ;;  %v25067_v27 = vld [vmem:[#allocation121_spill] sm:$0xff] }
0x11f7   :  { %17114 = vmatprep.subr.bf16.mxu1 %v25058_v28  ;;  %v25068_v28 = vld [vmem:[#allocation123_spill] sm:$0xff] }
0x11fa   :  { %17116 = vmatpush1.bf16.msra.mxu1 %v25059_v42  ;;  %v25069_v42 = vld [vmem:[#allocation125_spill] sm:$0xff] }
0x11fb   :  { %17118 = vmatprep.subr.bf16.mxu1 %v25060_v18  ;;  %v25070_v18 = vld [vmem:[#allocation127_spill] sm:$0xff] }
0x11fe   :  { %17120 = vmatpush1.bf16.msra.mxu1 %v25061_v13  ;;  %v25071_v13 = vld [vmem:[#allocation129_spill] sm:$0xff] }
0x11ff   :  { %17122 = vmatprep.subr.bf16.mxu1 %v25062_v40  ;;  %v25072_v40 = vld [vmem:[#allocation131_spill] sm:$0xff] }
0x1201   :  { %6401 = vmatmul.mubr.f32.vlgmr.msra.gmra.mrb[38].mxu1 %v22399_v35 }
0x1202   :  { %17124 = vmatpush3.bf16.msra.mxu1 %v25063_v22  ;;  %v25074_v22 = vld [vmem:[#allocation135_spill] sm:$0xff] }
0x1203   :  { %17126 = vmatprep.subr.bf16.mxu1 %v25064_v16  ;;  %v25075_v16 = vld [vmem:[#allocation137_spill] sm:$0xff] }
0x1206   :  { %17128 = vmatpush3.bf16.msra.mxu1 %v25065_v32  ;;  %v25076_v32 = vld [vmem:[#allocation139_spill] sm:$0xff] }
0x1207   :  { %17130 = vmatprep.subr.bf16.mxu1 %v25066_v7  ;;  %v25077_v7 = vld [vmem:[#allocation141_spill] sm:$0xff] }
0x120a   :  { %17132 = vmatpush3.bf16.msra.mxu1 %v25067_v27 }
0x120b   :  { %17134 = vmatprep.subr.bf16.mxu1 %v25068_v28 }
0x120e   :  { %17136 = vmatpush3.bf16.msra.mxu1 %v25069_v42 }
0x120f   :  { %17138 = vmatprep.subr.bf16.mxu1 %v25070_v18 }
0x1212   :  { %17140 = vmatpush3.bf16.msra.mxu1 %v25071_v13  ;;  %v25080_v13 = vld [vmem:[#allocation145_spill] sm:$0xff] }
0x1213   :  { %17142 = vmatprep.subr.bf16.mxu1 %v25072_v40  ;;  %v22440_v40 = vld [vmem:[%s23941_s16] ss:$0 sm:$0xff] }
0x1214   :  { %25078 = vst [vmem:[#allocation159_spill] sm:$0xff] %v22440_v40 }
0x1216   :  { %17144 = vmatpush3.bf16.msra.mxu1 %v25073_v9 }
0x1217   :  { %17146 = vmatprep.subr.bf16.mxu1 %v25074_v22 }
0x121a   :  { %17148 = vmatpush3.bf16.msra.mxu1 %v25075_v16 }
0x121b   :  { %17150 = vmatprep.subr.bf16.mxu1 %v25076_v32 }
0x121e   :  { %17152 = vmatpush3.bf16.msra.mxu1 %v25077_v7  ;;  %v25079_v7 = vld [vmem:[#allocation143_spill] sm:$0xff] }
0x121f   :  { %17185 = vmatprep.subr.bf16.mxu1 %v24616_v0 }
0x1243   :  { %v5640_v28 = vpop.f32.mrb[34].mxu1 }
0x1244   :  { %v5641_v42 = vadd.f32 %v5640_v28, %v22345_v14  ;;  %v15358_v18 = vpop.f32.mrb[35].mxu1 }
0x1245   :  { %v25081_v18 = vld [vmem:[#allocation147_spill] sm:$0xff] }
0x1246   :  { %v5644_v9 = vadd.f32 %v22440_v40, %v5641_v42  ;;  %v25082_v42 = vld [vmem:[#allocation144_spill] sm:$0xff] }
0x1248   :  { %14217 = vst.msk [vmem:[%s23942_s19 + $0x4] sm:$0x3] %vm2252_vm7, %v5644_v9 }
0x12b4   :  { %v6331_v32 = vpop.f32.mrb[36].mxu1 }
0x12b5   :  { %v6407_v16 = vadd.f32 %v6331_v32, %v25079_v7  ;;  %v6333_v22 = vpop.f32.mrb[37].mxu1  ;;  %v25083_v7 = vld [vmem:[#allocation146_spill] sm:$0xff] }
0x12b6   :  { %v6408_v27 = vadd.f32 %v6333_v22, %v25080_v13 }
0x12b8   :  { %19294 = vtanh.f32 %v6408_v27  ;;  %v25084_v27 = vld [vmem:[#allocation149_spill] sm:$0xff] }
0x12b9   :  { %19296 = vtanh.f32 %v6407_v16 }
0x12c2   :  { %v19295_v14 = vpop.eup %19294 }
0x12c3   :  { %v19297_v28 = vpop.eup %19296  ;;  %6479 = vmatprep.mubr.f32.mxu1 %v19295_v14  ;;  %v25085_v14 = vld [vmem:[#allocation150_spill] sm:$0xff] }
0x12c4   :  { %6480 = vmatmul.mubr.f32.vlgmr.msra.gmra.mrb[40].mxu1 %v19297_v28  ;;  %v25086_v28 = vld [vmem:[#allocation152_spill] sm:$0xff] }
0x12c5   :  { %17187 = vmatpush3.bf16.msra.mxu1 %v25081_v18  ;;  %15363 = vmatprep.mubr.msk.f32.mxu1 %vm19507_vm5, %v24486_v3  ;;  %v25087_v18 = vld [vmem:[#allocation153_spill] sm:$0xff] }
0x12c6   :  { %17188 = vmatprep.subr.bf16.mxu1 %v24616_v0 }
0x12d4   :  { %v6402_v9 = vpop.f32.mrb[38].mxu1 }
0x12d5   :  { %v6409_v40 = vadd.f32 %v6402_v9, %v25082_v42  ;;  %v6404_v32 = vpop.f32.mrb[39].mxu1  ;;  %v25088_v9 = vld [vmem:[#allocation163_spill] sm:$0xff]  ;;  %v25089_v42 = vld [vmem:[#allocation165_spill] sm:$0xff] }
0x12d6   :  { %v6410_v30 = vadd.f32 %v6404_v32, %v25083_v7 }
0x12d8   :  { %19298 = vtanh.f32 %v6410_v30  ;;  %v25090_v30 = vld [vmem:[#allocation167_spill] sm:$0xff] }
0x12d9   :  { %19300 = vtanh.f32 %v6409_v40  ;;  %v25091_v40 = vld [vmem:[#allocation169_spill] sm:$0xff] }
0x12e2   :  { %v19299_v22 = vpop.eup %19298 }
0x12e3   :  { %v19301_v16 = vpop.eup %19300  ;;  %6549 = vmatprep.mubr.f32.mxu0 %v19299_v22 }
0x12e4   :  { %6550 = vmatmul.mubr.f32.vlgmr.msra.gmra.mrb[42].mxu0 %v19301_v16 }
0x12e5   :  { %17210 = vmatpush1.bf16.msra.mxu0 %v25084_v27  ;;  %6875 = vmatprep.mubr.f32.mxu0 %v24486_v3 }
0x12e6   :  { %17212 = vmatprep.subr.bf16.mxu0 %v25085_v14 }
0x12e9   :  { %17214 = vmatpush1.bf16.msra.mxu0 %v25086_v28 }
0x12ea   :  { %17216 = vmatprep.subr.bf16.mxu0 %v25087_v18 }
0x12ed   :  { %17218 = vmatpush1.bf16.msra.mxu0 %v25088_v9 }
0x12ee   :  { %17220 = vmatprep.subr.bf16.mxu0 %v25089_v42 }
0x12f1   :  { %17222 = vmatpush1.bf16.msra.mxu0 %v25090_v30 }
0x12f2   :  { %17232 = vmatprep.subr.bf16.mxu0 %v25091_v40 }
0x1397   :  { %v14677_v32 = vpop.f32.mrb[40].mxu1 }
0x1398   :  { %v14678_v22 = vpop.f32.mrb[41].mxu1 }
0x1399   :  { %v14679_v16 = vadd.f32 %v14678_v22, %v14677_v32  ;;  %v25095_v22 = vld [vmem:[#allocation171_spill] sm:$0xff] }
0x13b7   :  { %v14712_v27 = vpop.f32.mrb[42].mxu0 }
0x13b8   :  { %v14713_v7 = vpop.f32.mrb[43].mxu0 }
0x13b9   :  { %v14714_v13 = vadd.f32 %v14713_v7, %v14712_v27  ;;  %v25094_v27 = vld [vmem:[#allocation168_spill] sm:$0xff] }
0x13bb   :  { %v6552_v4 = vadd.f32 %v14714_v13, %v14679_v16  ;;  %v25096_v16 = vld [vmem:[#allocation172_spill] sm:$0xff] }
0x13bd   :  { %v6555_v14 = vsel %vm72_vm1, %v6552_v4, -inf }
0x13be   :  { %6556 = vmax.xlane.f32.xlu1 %v6555_v14 }
0x144b   :  { %v6557_v28 = vpop.xlane.xlu1 %6556 }
0x144c   :  { %v6558_v18 = vsub.f32 %v6552_v4, %v6557_v28 }
0x144e   :  { %v6559_v57 = vmul.f32 1.442695, %v6558_v18 }
0x1450   :  { %19302 = vpow2.f32 %v6559_v57 }
0x145a   :  { %v19303_v9 = vpop.eup %19302 }
0x145b   :  { %v6561_v42 = vsel %vm72_vm1, %v19303_v9, 0.0 }
0x145c   :  { %6562 = vadd.xlane.f32.xlu0 %v6561_v42  ;;  %v25093_v42 = vld [vmem:[#allocation166_spill] sm:$0xff] }
0x14e9   :  { %v6563_v30 = vpop.xlane.xlu0 %6562 }
0x14ea   :  { %19304 = vrcp.f32 %v6563_v30 }
0x14f4   :  { %v19305_v40 = vpop.eup %19304 }
0x14f5   :  { %v22466_v43 = vmul.f32 %v19305_v40, %v19303_v9 }
0x14f7   :  { %14242 = vst.msk [vmem:[%s23934_s20 + $0x6] sm:$0x3] %vm72_vm1, %v22466_v43  ;;  %v22475_v4 = vadd.f32 %v22466_v43, %v22138_v26  ;;  %v6573_v57 = vrot.slane %v22466_v43, %v24745_v46  ;;  %v25092_v26 = vld [vmem:[#allocation164_spill] sm:$0xff] }
0x14f9   :  { %7813 = vrot.lane.b32.xlu0 %v22475_v4, %s19504_s4  ;;  %v6581_v13 = vrot.slane %v6573_v57, %v24745_v46  ;;  %v6574_v7 = vcombine.high %v6573_v57, %v6573_v57  ;;  %v25097_v57 = vld [vmem:[#allocation173_spill] sm:$0xff] }
0x14fb   :  { %15364 = vmatmul.mubr.msk.f32.vlgmr.msra.gmra.mrb[42].mxu1 %vm978_vm4, %v6581_v13  ;;  %v6588_v18 = vrot.slane %v6574_v7, %v24745_v46  ;;  %v25098_v13 = vld [vmem:[#allocation174_spill] sm:$0xff]  ;;  %v25099_v7 = vld [vmem:[#allocation175_spill] sm:$0xff] }
0x14fc   :  { %17190 = vmatpush3.bf16.msra.mxu1 %v24918_v23  ;;  %15370 = vmatprep.mubr.msk.f32.mxu1 %vm19507_vm5, %v24486_v3 }
0x14fd   :  { %17192 = vmatprep.subr.bf16.mxu1 %v24919_v59 }
0x14ff   :  { %15371 = vmatmul.mubr.msk.f32.vlgmr.msra.gmra.mrb[44].mxu1 %vm978_vm4, %v6588_v18  ;;  %v25100_v18 = vld [vmem:[#allocation176_spill] sm:$0xff] }
0x1500   :  { %17194 = vmatpush1.bf16.msra.mxu1 %v24920_v1  ;;  %6804 = vmatprep.mubr.f32.mxu1 %v24486_v3 }
0x1501   :  { %17196 = vmatprep.subr.bf16.mxu1 %v24749_v21 }
0x1504   :  { %17198 = vmatpush1.bf16.msra.mxu1 %v24750_v19 }
0x1505   :  { %17200 = vmatprep.subr.bf16.mxu1 %v24921_v56 }
0x1508   :  { %17202 = vmatpush1.bf16.msra.mxu1 %v24922_v61 }
0x1509   :  { %17204 = vmatprep.subr.bf16.mxu1 %v25092_v26 }
0x150c   :  { %17206 = vmatpush1.bf16.msra.mxu1 %v25093_v42 }
0x150d   :  { %17224 = vmatprep.subr.bf16.mxu1 %v25094_v27 }
0x15ce   :  { %v6657_v14 = vpop.f32.mrb[42].mxu1 }
0x15cf   :  { %v15365_v28 = vpop.f32.mrb[43].mxu1 }
0x15d0   :  { %v25102_v28 = vld [vmem:[#allocation179_spill] sm:$0xff] }
0x15d2   :  { %v6729_v9 = vpop.f32.mrb[44].mxu1 }
0x15d3   :  { %v6736_v30 = vrot.slane %v6729_v9, 7  ;;  %v15372_v40 = vpop.f32.mrb[45].mxu1  ;;  %v25104_v9 = vld [vmem:[#allocation212_spill] sm:$0xff] }
0x15d4   :  { %v25106_v40 = vld [vmem:[#allocation213_spill] sm:$0xff] }
0x15d5   :  { %v22499_v32 = vsel %vm1620_vm6, %v6736_v30, %v6657_v14  ;;  %v25101_v14 = vld [vmem:[#allocation177_spill] sm:$0xff] }
0x15d6   :  { %14232 = vmatmul.mubr.msk.f32.vlgmr.msra.gmra.mrb[46].mxu1 %vm485_vm3, %v22499_v32  ;;  %14233 = vmatmul.mubr.msk.f32.vlgmr.msra.gmra.mrb[44].mxu0 %vm485_vm3, %v22499_v32  ;;  %v25105_v30 = vld [vmem:[#allocation209_spill] sm:$0xff] }
0x15d7   :  { %17226 = vmatpush1.bf16.msra.mxu1 %v24926_v54  ;;  %17234 = vmatpush1.bf16.msra.mxu0 %v25095_v22 }
0x15d8   :  { %17228 = vmatprep.subr.bf16.mxu1 %v25096_v16  ;;  %17236 = vmatprep.subr.bf16.mxu0 %v25097_v57 }
0x15d9   :  { %6946 = vmatprep.mubr.f32.mxu1 %v24486_v3  ;;  %7017 = vmatprep.mubr.f32.mxu0 %v24486_v3 }
0x15db   :  { %17230 = vmatpush1.bf16.msra.mxu1 %v25098_v13  ;;  %17238 = vmatpush1.bf16.msra.mxu0 %v25099_v7 }
0x15dc   :  { %17240 = vmatprep.subr.bf16.mxu1 %v25100_v18  ;;  %17272 = vmatprep.subr.bf16.mxu0 %v25101_v14 }
0x15de   :  { %14234 = vmatmul.mubr.msk.f32.vlgmr.msra.gmra.mrb[46].mxu1 %vm631_vm2, %v22277_v17  ;;  %14235 = vmatmul.mubr.msk.f32.vlgmr.msra.gmra.mrb[44].mxu0 %vm631_vm2, %v22277_v17  ;;  %v25103_v17 = vld [vmem:[#allocation190_spill] sm:$0xff] }
0x15df   :  { %17242 = vmatpush1.bf16.msra.mxu1 %v24934_v20  ;;  %17274 = vmatpush1.bf16.msra.mxu0 %v25102_v28 }
0x15e0   :  { %17244 = vmatprep.subr.bf16.mxu1 %v24936_v8  ;;  %17276 = vmatprep.subr.bf16.mxu0 %v24937_v15 }
0x15e1   :  { %7088 = vmatprep.mubr.f32.mxu1 %v24486_v3  ;;  %7159 = vmatprep.mubr.f32.mxu0 %v24486_v3 }
0x15e3   :  { %17246 = vmatpush1.bf16.msra.mxu1 %v24938_v31  ;;  %17278 = vmatpush1.bf16.msra.mxu0 %v24939_v50 }
0x15e4   :  { %17248 = vmatprep.subr.bf16.mxu1 %v24940_v5  ;;  %17280 = vmatprep.subr.bf16.mxu0 %v24941_v48 }
0x15e7   :  { %17250 = vmatpush1.bf16.msra.mxu1 %v24942_v58  ;;  %17282 = vmatpush1.bf16.msra.mxu0 %v24773_v44 }
0x15e8   :  { %17252 = vmatprep.subr.bf16.mxu1 %v24943_v47  ;;  %17284 = vmatprep.subr.bf16.mxu0 %v24775_v41 }
0x15eb   :  { %17254 = vmatpush1.bf16.msra.mxu1 %v25103_v17  ;;  %17286 = vmatpush1.bf16.msra.mxu0 %v24777_v49 }
0x15ec   :  { %17256 = vmatprep.subr.bf16.mxu1 %v24778_v53  ;;  %17288 = vmatprep.subr.bf16.mxu0 %v24779_v52 }
0x15ef   :  { %17258 = vmatpush1.bf16.msra.mxu1 %v24780_v11  ;;  %17290 = vmatpush1.bf16.msra.mxu0 %v24781_v62 }
0x15f0   :  { %17260 = vmatprep.subr.bf16.mxu1 %v24782_v37  ;;  %17292 = vmatprep.subr.bf16.mxu0 %v24783_v25 }
0x15f3   :  { %17262 = vmatpush1.bf16.msra.mxu1 %v21365_v34  ;;  %17294 = vmatpush1.bf16.msra.mxu0 %v24784_v29 }
0x15f4   :  { %17264 = vmatprep.subr.bf16.mxu1 %v21377_v55  ;;  %17296 = vmatprep.subr.bf16.mxu0 %v24944_v39 }
0x15f7   :  { %17266 = vmatpush1.bf16.msra.mxu1 %v21401_v36  ;;  %17298 = vmatpush1.bf16.msra.mxu0 %v21403_v10  ;;  %v25150_v10 = vld [vmem:[#allocation38_spill] sm:$0xff] }
0x15f8   :  { %17268 = vmatprep.subr.bf16.mxu1 %v21410_v12  ;;  %17300 = vmatprep.subr.bf16.mxu0 %v21412_v51  ;;  %v25119_v51 = vld [vmem:[#allocation21_spill] sm:$0xff]  ;;  %v25123_v12 = vld [vmem:[#allocation219_spill] sm:$0xff]  ;;  %v25152_v36 = vld [vmem:[#allocation42_spill] sm:$0xff] }
0x15fb   :  { %17270 = vmatpush1.bf16.msra.mxu1 %v21425_v6  ;;  %17302 = vmatpush1.bf16.msra.mxu0 %v21427_v33  ;;  %v25110_v33 = vld [vmem:[#allocation9_spill] sm:$0xff]  ;;  %v25111_v6 = vld [vmem:[#allocation215_spill] sm:$0xff] }
0x15fc   :  { %17303 = vmatprep.subr.bf16.mxu1 %v24616_v0  ;;  %17315 = vmatprep.subr.bf16.mxu0 %v24616_v0 }
0x15fe   :  { %7089 = vmatmul.mubr.f32.vlgmr.msra.gmra.mrb[46].mxu1 %v22354_v63  ;;  %7160 = vmatmul.mubr.f32.vlgmr.msra.gmra.mrb[44].mxu0 %v22354_v63  ;;  %v25107_v63 = vld [vmem:[#allocation210_spill] sm:$0xff] }
0x15ff   :  { %17305 = vmatpush3.bf16.msra.mxu1 %v24785_v24  ;;  %15389 = vmatprep.mubr.msk.f32.mxu1 %vm19507_vm5, %v24486_v3  ;;  %v25108_v24 = vld [vmem:[#allocation214_spill] sm:$0xff] }
0x1600   :  { %17306 = vmatprep.subr.bf16.mxu1 %v24616_v0  ;;  %17317 = vmatpush3.bf16.msra.mxu0 %v25104_v9  ;;  %v25109_v9 = vld [vmem:[#allocation211_spill] sm:$0xff] }
0x1601   :  { %17318 = vmatprep.subr.bf16.mxu0 %v24616_v0  ;;  %15424 = vmatprep.mubr.msk.f32.mxu0 %vm19507_vm5, %v24486_v3 }
0x1603   :  { %17308 = vmatpush3.bf16.msra.mxu1 %v25105_v30  ;;  %v25118_v30 = vld [vmem:[#allocation19_spill] sm:$0xff] }
0x1604   :  { %17309 = vmatprep.subr.bf16.mxu1 %v24616_v0  ;;  %17320 = vmatpush3.bf16.msra.mxu0 %v25106_v40  ;;  %v25112_v40 = vld [vmem:[#allocation11_spill] sm:$0xff] }
0x1605   :  { %17321 = vmatprep.subr.bf16.mxu0 %v24616_v0 }
0x1607   :  { %17311 = vmatpush3.bf16.msra.mxu1 %v25107_v63  ;;  %v25113_v63 = vld [vmem:[#allocation13_spill] sm:$0xff] }
0x1608   :  { %17312 = vmatprep.subr.bf16.mxu1 %v24616_v0  ;;  %17323 = vmatpush3.bf16.msra.mxu0 %v25108_v24  ;;  %v25114_v24 = vld [vmem:[#allocation216_spill] sm:$0xff] }
0x1609   :  { %17324 = vmatprep.subr.bf16.mxu0 %v24616_v0 }
0x160b   :  { %17314 = vmatpush3.bf16.msra.mxu1 %v25109_v9  ;;  %v25115_v9 = vld [vmem:[#allocation15_spill] sm:$0xff] }
0x160c   :  { %17340 = vmatprep.subr.bf16.mxu1 %v25110_v33  ;;  %17326 = vmatpush3.bf16.msra.mxu0 %v25111_v6  ;;  %v25116_v33 = vld [vmem:[#allocation17_spill] sm:$0xff] }
0x160d   :  { %17327 = vmatprep.subr.bf16.mxu0 %v24616_v0  ;;  %v25117_v6 = vld [vmem:[#allocation217_spill] sm:$0xff] }
0x160e   :  { %15390 = vmatmul.mubr.msk.f32.vlgmr.msra.gmra.mrb[48].mxu1 %vm485_vm3, %v22499_v32 }
0x160f   :  { %17342 = vmatpush1.bf16.msra.mxu1 %v25112_v40  ;;  %7412 = vmatprep.mubr.f32.mxu1 %v24486_v3  ;;  %v25120_v40 = vld [vmem:[#allocation218_spill] sm:$0xff] }
0x1610   :  { %17344 = vmatprep.subr.bf16.mxu1 %v25113_v63  ;;  %17329 = vmatpush3.bf16.msra.mxu0 %v25114_v24  ;;  %v25121_v63 = vld [vmem:[#allocation23_spill] sm:$0xff]  ;;  %v25122_v24 = vld [vmem:[#allocation25_spill] sm:$0xff] }
0x1611   :  { %17330 = vmatprep.subr.bf16.mxu0 %v24616_v0 }
0x1613   :  { %17346 = vmatpush1.bf16.msra.mxu1 %v25115_v9  ;;  %v25124_v9 = vld [vmem:[#allocation65_spill] sm:$0xff] }
0x1614   :  { %17348 = vmatprep.subr.bf16.mxu1 %v25116_v33  ;;  %17332 = vmatpush3.bf16.msra.mxu0 %v25117_v6  ;;  %v25125_v6 = vld [vmem:[#allocation27_spill] sm:$0xff]  ;;  %v25149_v33 = vld [vmem:[#allocation36_spill] sm:$0xff] }
0x1615   :  { %17333 = vmatprep.subr.bf16.mxu0 %v24616_v0 }
0x1617   :  { %17350 = vmatpush1.bf16.msra.mxu1 %v25118_v30  ;;  %v25128_v30 = vld [vmem:[#allocation33_spill] sm:$0xff] }
0x1618   :  { %17352 = vmatprep.subr.bf16.mxu1 %v25119_v51  ;;  %17335 = vmatpush3.bf16.msra.mxu0 %v25120_v40  ;;  %v25126_v51 = vld [vmem:[#allocation29_spill] sm:$0xff]  ;;  %v25127_v40 = vld [vmem:[#allocation31_spill] sm:$0xff] }
0x1619   :  { %17336 = vmatprep.subr.bf16.mxu0 %v24616_v0 }
0x161b   :  { %17354 = vmatpush1.bf16.msra.mxu1 %v25121_v63  ;;  %v25129_v63 = vld [vmem:[#allocation35_spill] sm:$0xff] }
0x161c   :  { %17356 = vmatprep.subr.bf16.mxu1 %v25122_v24  ;;  %17338 = vmatpush3.bf16.msra.mxu0 %v25123_v12  ;;  %v25130_v24 = vld [vmem:[#allocation37_spill] sm:$0xff]  ;;  %v25131_v12 = vld [vmem:[#allocation39_spill] sm:$0xff] }
0x161d   :  { %17452 = vmatprep.subr.bf16.mxu0 %v25124_v9  ;;  %v25132_v9 = vld [vmem:[#allocation10_spill] sm:$0xff] }
0x161e   :  { %14244 = vmatmul.mubr.msk.f32.vlgmr.msra.gmra.mrb[50].mxu1 %vm485_vm3, %v22499_v32 }
0x161f   :  { %17358 = vmatpush1.bf16.msra.mxu1 %v25125_v6  ;;  %7483 = vmatprep.mubr.f32.mxu1 %v24486_v3  ;;  %v25133_v6 = vld [vmem:[#allocation12_spill] sm:$0xff] }
0x1620   :  { %17360 = vmatprep.subr.bf16.mxu1 %v25126_v51  ;;  %v25134_v51 = vld [vmem:[#allocation14_spill] sm:$0xff] }
0x1623   :  { %17362 = vmatpush1.bf16.msra.mxu1 %v25127_v40  ;;  %v25135_v40 = vld [vmem:[#allocation16_spill] sm:$0xff] }
0x1624   :  { %17364 = vmatprep.subr.bf16.mxu1 %v25128_v30  ;;  %v25145_v30 = vld [vmem:[#allocation28_spill] sm:$0xff] }
0x1627   :  { %17366 = vmatpush1.bf16.msra.mxu1 %v25129_v63  ;;  %v22614_v63 = vld [vmem:[%s24423_s12 + $0x8] sm:$0x3] }
0x1628   :  { %17368 = vmatprep.subr.bf16.mxu1 %v25130_v24  ;;  %v25136_v24 = vld [vmem:[#allocation41_spill] sm:$0xff] }
0x162b   :  { %17370 = vmatpush1.bf16.msra.mxu1 %v25131_v12  ;;  %v25143_v12 = vld [vmem:[#allocation24_spill] sm:$0xff] }
0x162c   :  { %17372 = vmatprep.subr.bf16.mxu1 %v25132_v9  ;;  %v25137_v9 = vld [vmem:[#allocation43_spill] sm:$0xff] }
0x162e   :  { %14245 = vmatmul.mubr.msk.f32.vlgmr.msra.gmra.mrb[52].mxu1 %vm485_vm3, %v22499_v32  ;;  %v25138_v32 = vld [vmem:[#allocation45_spill] sm:$0xff] }
0x162f   :  { %17374 = vmatpush1.bf16.msra.mxu1 %v25133_v6  ;;  %7557 = vmatprep.mubr.f32.mxu1 %v24486_v3  ;;  %v25139_v6 = vld [vmem:[#allocation47_spill] sm:$0xff] }
0x1630   :  { %17376 = vmatprep.subr.bf16.mxu1 %v25134_v51  ;;  %v25140_v51 = vld [vmem:[#allocation18_spill] sm:$0xff] }
0x1633   :  { %17378 = vmatpush1.bf16.msra.mxu1 %v25135_v40  ;;  %v25141_v40 = vld [vmem:[#allocation20_spill] sm:$0xff] }
0x1634   :  { %17380 = vmatprep.subr.bf16.mxu1 %v25136_v24  ;;  %v25142_v24 = vld [vmem:[#allocation22_spill] sm:$0xff] }
0x1636   :  { %14246 = vmatmul.mubr.msk.f32.vlgmr.msra.gmra.mrb[50].mxu1 %vm631_vm2, %v22614_v63 }
0x1637   :  { %17382 = vmatpush1.bf16.msra.mxu1 %v25137_v9  ;;  %7628 = vmatprep.mubr.f32.mxu1 %v24486_v3  ;;  %v25144_v9 = vld [vmem:[#allocation26_spill] sm:$0xff] }
0x1638   :  { %17384 = vmatprep.subr.bf16.mxu1 %v25138_v32  ;;  %v25146_v32 = vld [vmem:[#allocation30_spill] sm:$0xff] }
0x163b   :  { %17386 = vmatpush1.bf16.msra.mxu1 %v25139_v6  ;;  %v25147_v6 = vld [vmem:[#allocation32_spill] sm:$0xff] }
0x163c   :  { %17388 = vmatprep.subr.bf16.mxu1 %v25140_v51  ;;  %v25148_v51 = vld [vmem:[#allocation34_spill] sm:$0xff] }
0x163e   :  { %14247 = vmatmul.mubr.msk.f32.vlgmr.msra.gmra.mrb[52].mxu1 %vm631_vm2, %v22614_v63 }
0x163f   :  { %17390 = vmatpush1.bf16.msra.mxu1 %v25141_v40  ;;  %7699 = vmatprep.mubr.f32.mxu1 %v24486_v3  ;;  %v25151_v40 = vld [vmem:[#allocation40_spill] sm:$0xff] }
0x1640   :  { %17392 = vmatprep.subr.bf16.mxu1 %v25142_v24  ;;  %v25153_v24 = vld [vmem:[#allocation44_spill] sm:$0xff] }
0x1643   :  { %17394 = vmatpush1.bf16.msra.mxu1 %v25143_v12  ;;  %v25154_v12 = vld [vmem:[#allocation46_spill] sm:$0xff] }
0x1644   :  { %17396 = vmatprep.subr.bf16.mxu1 %v25144_v9  ;;  %v25155_v9 = vld [vmem:[#allocation48_spill] sm:$0xff] }
0x1647   :  { %17398 = vmatpush1.bf16.msra.mxu1 %v25145_v30  ;;  %v25156_v30 = vld [vmem:[#allocation49_spill] sm:$0xff] }
0x1648   :  { %17400 = vmatprep.subr.bf16.mxu1 %v25146_v32  ;;  %v25168_v32 = vld [vmem:[#allocation61_spill] sm:$0xff] }
0x164b   :  { %17402 = vmatpush1.bf16.msra.mxu1 %v25147_v6  ;;  %v25157_v6 = vld [vmem:[#allocation50_spill] sm:$0xff] }
0x164c   :  { %17404 = vmatprep.subr.bf16.mxu1 %v25148_v51  ;;  %v25166_v51 = vld [vmem:[#allocation59_spill] sm:$0xff] }
0x164f   :  { %17406 = vmatpush1.bf16.msra.mxu1 %v25149_v33  ;;  %v25158_v33 = vld [vmem:[#allocation51_spill] sm:$0xff] }
0x1650   :  { %17408 = vmatprep.subr.bf16.mxu1 %v25150_v10  ;;  %v25159_v10 = vld [vmem:[#allocation52_spill] sm:$0xff] }
0x1653   :  { %17410 = vmatpush1.bf16.msra.mxu1 %v25151_v40  ;;  %v25160_v40 = vld [vmem:[#allocation53_spill] sm:$0xff] }
0x1654   :  { %17412 = vmatprep.subr.bf16.mxu1 %v25152_v36  ;;  %v25161_v36 = vld [vmem:[#allocation54_spill] sm:$0xff] }
0x1657   :  { %17414 = vmatpush1.bf16.msra.mxu1 %v25153_v24  ;;  %v25162_v24 = vld [vmem:[#allocation55_spill] sm:$0xff] }
0x1658   :  { %17416 = vmatprep.subr.bf16.mxu1 %v25154_v12  ;;  %v25163_v12 = vld [vmem:[#allocation56_spill] sm:$0xff] }
0x165b   :  { %17418 = vmatpush1.bf16.msra.mxu1 %v25155_v9  ;;  %v25164_v9 = vld [vmem:[#allocation57_spill] sm:$0xff] }
0x165c   :  { %17420 = vmatprep.subr.bf16.mxu1 %v25156_v30  ;;  %v25165_v30 = vld [vmem:[#allocation58_spill] sm:$0xff] }
0x165e   :  { %7700 = vmatmul.mubr.f32.vlgmr.msra.gmra.mrb[50].mxu1 %v22399_v35 }
0x165f   :  { %17422 = vmatpush1.bf16.msra.mxu1 %v25157_v6  ;;  %7770 = vmatprep.mubr.f32.mxu1 %v24486_v3  ;;  %v25167_v6 = vld [vmem:[#allocation60_spill] sm:$0xff] }
0x1660   :  { %17424 = vmatprep.subr.bf16.mxu1 %v25158_v33  ;;  %v25169_v33 = vld [vmem:[#allocation62_spill] sm:$0xff] }
0x1663   :  { %17426 = vmatpush1.bf16.msra.mxu1 %v25159_v10  ;;  %v25170_v10 = vld [vmem:[#allocation63_spill] sm:$0xff] }
0x1664   :  { %17428 = vmatprep.subr.bf16.mxu1 %v25160_v40  ;;  %v25171_v40 = vld [vmem:[#allocation64_spill] sm:$0xff] }
0x1667   :  { %17430 = vmatpush1.bf16.msra.mxu1 %v25161_v36  ;;  %v25172_v36 = vld [vmem:[#allocation106_spill] sm:$0xff] }
0x1668   :  { %17432 = vmatprep.subr.bf16.mxu1 %v25162_v24  ;;  %v25189_v24 = vld [vmem:[#allocation107_spill] sm:$0xff] }
0x166b   :  { %17434 = vmatpush1.bf16.msra.mxu1 %v25163_v12  ;;  %v25173_v12 = vld [vmem:[#allocation114_spill] sm:$0xff] }
0x166c   :  { %17436 = vmatprep.subr.bf16.mxu1 %v25164_v9  ;;  %v25174_v9 = vld [vmem:[#allocation116_spill] sm:$0xff] }
0x166f   :  { %17438 = vmatpush1.bf16.msra.mxu1 %v25165_v30  ;;  %v25175_v30 = vld [vmem:[#allocation118_spill] sm:$0xff] }
0x1670   :  { %17440 = vmatprep.subr.bf16.mxu1 %v25166_v51  ;;  %v25176_v51 = vld [vmem:[#allocation120_spill] sm:$0xff] }
0x1673   :  { %17442 = vmatpush1.bf16.msra.mxu1 %v25167_v6  ;;  %v25177_v6 = vld [vmem:[#allocation122_spill] sm:$0xff] }
0x1674   :  { %17444 = vmatprep.subr.bf16.mxu1 %v25168_v32  ;;  %v25178_v32 = vld [vmem:[#allocation124_spill] sm:$0xff] }
0x1677   :  { %17446 = vmatpush1.bf16.msra.mxu1 %v25169_v33  ;;  %v25179_v33 = vld [vmem:[#allocation126_spill] sm:$0xff] }
0x1678   :  { %17448 = vmatprep.subr.bf16.mxu1 %v25170_v10  ;;  %v25180_v10 = vld [vmem:[#allocation128_spill] sm:$0xff] }
0x167b   :  { %17450 = vmatpush1.bf16.msra.mxu1 %v25171_v40  ;;  %v25181_v40 = vld [vmem:[#allocation130_spill] sm:$0xff] }
0x167c   :  { %17564 = vmatprep.subr.bf16.mxu1 %v25172_v36  ;;  %v25182_v36 = vld [vmem:[#allocation132_spill] sm:$0xff] }
0x167e   :  { %7771 = vmatmul.mubr.f32.vlgmr.msra.gmra.mrb[52].mxu1 %v22399_v35  ;;  %v25183_v35 = vld [vmem:[#allocation134_spill] sm:$0xff] }
0x167f   :  { %17566 = vmatpush3.bf16.msra.mxu1 %v25173_v12  ;;  %v25184_v12 = vld [vmem:[#allocation136_spill] sm:$0xff] }
0x1680   :  { %17568 = vmatprep.subr.bf16.mxu1 %v25174_v9  ;;  %v25185_v9 = vld [vmem:[#allocation138_spill] sm:$0xff] }
0x1683   :  { %17570 = vmatpush3.bf16.msra.mxu1 %v25175_v30  ;;  %v25186_v30 = vld [vmem:[#allocation140_spill] sm:$0xff] }
0x1684   :  { %17572 = vmatprep.subr.bf16.mxu1 %v25176_v51  ;;  %v25187_v51 = vld [vmem:[#allocation142_spill] sm:$0xff] }
0x1687   :  { %17574 = vmatpush3.bf16.msra.mxu1 %v25177_v6  ;;  %v25188_v6 = vld [vmem:[#allocation148_spill] sm:$0xff] }
0x1688   :  { %17576 = vmatprep.subr.bf16.mxu1 %v25178_v32 }
0x168b   :  { %17578 = vmatpush3.bf16.msra.mxu1 %v25179_v33 }
0x168c   :  { %17580 = vmatprep.subr.bf16.mxu1 %v25180_v10 }
0x168f   :  { %17582 = vmatpush3.bf16.msra.mxu1 %v25181_v40 }
0x1690   :  { %17584 = vmatprep.subr.bf16.mxu1 %v25182_v36 }
0x1693   :  { %17586 = vmatpush3.bf16.msra.mxu1 %v25183_v35 }
0x1694   :  { %17588 = vmatprep.subr.bf16.mxu1 %v25184_v12  ;;  %v25190_v12 = vld [vmem:[#allocation221_spill] sm:$0xff] }
0x1697   :  { %17590 = vmatpush3.bf16.msra.mxu1 %v25185_v9 }
0x1698   :  { %17592 = vmatprep.subr.bf16.mxu1 %v25186_v30 }
0x169b   :  { %17594 = vmatpush3.bf16.msra.mxu1 %v25187_v51 }
0x169c   :  { %17618 = vmatprep.subr.bf16.mxu1 %v25188_v6 }
0x16d1   :  { %v7090_v32 = vpop.f32.mrb[46].mxu1  ;;  %v7161_v33 = vpop.f32.mrb[44].mxu0 }
0x16d2   :  { %v7170_v10 = vadd.f32 %v7090_v32, %v25189_v24  ;;  %v7092_v39 = vpop.f32.mrb[47].mxu1  ;;  %v7163_v40 = vpop.f32.mrb[45].mxu0  ;;  %v7172_v30 = vadd.f32 %v7161_v33, %v24842_v38 }
0x16d3   :  { %v7171_v36 = vadd.f32 %v7092_v39, %v24840_v60  ;;  %v7173_v9 = vadd.f32 %v7163_v40, %v25190_v12 }
0x16d4   :  { %v14236_v55 = vmul.f32 -1.442695, %v7170_v10 }
0x16d5   :  { %v14237_v35 = vmul.f32 -1.442695, %v7171_v36  ;;  %v14238_v29 = vmul.f32 -1.442695, %v7173_v9  ;;  %v25191_v9 = vld [vmem:[#allocation155_spill] sm:$0xff] }
0x16d6   :  { %19306 = vpow2.f32 %v14236_v55 }
0x16d7   :  { %19308 = vpow2.f32 %v14237_v35 }
0x16d8   :  { %19310 = vpow2.f32 %v14238_v29 }
0x16d9   :  { %19312 = vtanh.f32 %v7172_v30  ;;  %v25193_v30 = vld [vmem:[#allocation67_spill] sm:$0xff] }
0x16e0   :  { %v19307_v51 = vpop.eup %19306 }
0x16e1   :  { %v19309_v34 = vpop.eup %19308  ;;  %v7177_v6 = vadd.f32 1.0, %v19307_v51  ;;  %v22682_v25 = vpop.f32.mrb[48].mxu1 }
0x16e2   :  { %v7183_v32 = vadd.f32 1.0, %v19309_v34  ;;  %v15391_v24 = vpop.f32.mrb[49].mxu1  ;;  %v19311_v10 = vpop.eup %19310 }
0x16e3   :  { %19314 = vrcp.f32 %v7177_v6  ;;  %v19313_v36 = vpop.eup %19312  ;;  %v7190_v40 = vadd.f32 1.0, %v19311_v10  ;;  %v14239_v24 = vld [vmem:[%s23940_s18 + $0x6] sm:$0x3]  ;;  %v25195_v10 = vld [vmem:[#allocation71_spill] sm:$0xff] }
0x16e4   :  { %19316 = vrcp.f32 %v7183_v32  ;;  %v7814_v32 = vpop.permute.xlu0 %7813 }
0x16e5   :  { %19318 = vrcp.f32 %v7190_v40  ;;  %v25199_v40 = vld [vmem:[#allocation72_spill] sm:$0xff] }
0x16ed   :  { %v19315_v55 = vpop.eup %19314 }
0x16ee   :  { %v19317_v39 = vpop.eup %19316  ;;  %v7194_v35 = vmul.f32 %v19315_v55, %v19313_v36  ;;  %v25196_v36 = vld [vmem:[#allocation66_spill] sm:$0xff]  ;;  %v7816_v55 = vsel %vm978_vm4, %v22466_v43, %v7814_v32  ;;  %v25203_v43 = vld [vmem:[#allocation79_spill] sm:$0xff]  ;;  %v25206_v32 = vld [vmem:[#allocation85_spill] sm:$0xff] }
0x16ef   :  { %v7193_v12 = vmul.f32 %v19317_v39, %v25191_v9  ;;  %v19319_v51 = vpop.eup %19318  ;;  %v25197_v39 = vld [vmem:[#allocation68_spill] sm:$0xff]  ;;  %v25200_v9 = vld [vmem:[#allocation73_spill] sm:$0xff] }
0x16f1   :  { %v22685_v33 = vadd.f32 %v7194_v35, %v7193_v12  ;;  %v25194_v12 = vld [vmem:[#allocation69_spill] sm:$0xff]  ;;  %v25198_v35 = vld [vmem:[#allocation70_spill] sm:$0xff] }
0x16f3   :  { %25192 = vst [vmem:[#allocation160_spill] sm:$0xff] %v22685_v33  ;;  %19320 = vtanh.f32 %v22685_v33 }
0x16fd   :  { %v19321_v29 = vpop.eup %19320 }
0x16fe   :  { %v7197_v34 = vmul.f32 %v19321_v29, %v19319_v51  ;;  %v25201_v51 = vld [vmem:[#allocation75_spill] sm:$0xff]  ;;  %v25202_v29 = vld [vmem:[#allocation77_spill] sm:$0xff] }
0x1700   :  { %v22691_v6 = vmul.f32 %v14239_v24, %v7197_v34  ;;  %v25204_v24 = vld [vmem:[#allocation81_spill] sm:$0xff]  ;;  %v25205_v34 = vld [vmem:[#allocation83_spill] sm:$0xff] }
0x1702   :  { %15425 = vmatmul.mubr.f32.vlgmr.msra.gmra.mrb[46].mxu0 %v22691_v6 }
0x1703   :  { %17454 = vmatpush1.bf16.msra.mxu0 %v25193_v30  ;;  %7884 = vmatprep.mubr.f32.mxu0 %v24486_v3 }
0x1704   :  { %17456 = vmatprep.subr.bf16.mxu0 %v25194_v12 }
0x1707   :  { %17458 = vmatpush1.bf16.msra.mxu0 %v25195_v10  ;;  %v25218_v10 = vld [vmem:[#allocation109_spill] sm:$0xff] }
0x1708   :  { %17460 = vmatprep.subr.bf16.mxu0 %v25196_v36  ;;  %v25217_v36 = vld [vmem:[#allocation108_spill] sm:$0xff] }
0x170a   :  { %14252 = vmatmul.mubr.msk.f32.vlgmr.msra.gmra.mrb[48].mxu0 %vm631_vm2, %v7816_v55 }
0x170b   :  { %17462 = vmatpush1.bf16.msra.mxu0 %v25197_v39  ;;  %7955 = vmatprep.mubr.f32.mxu0 %v24486_v3  ;;  %v25212_v39 = vld [vmem:[#allocation97_spill] sm:$0xff] }
0x170c   :  { %17464 = vmatprep.subr.bf16.mxu0 %v25198_v35  ;;  %v25207_v35 = vld [vmem:[#allocation87_spill] sm:$0xff] }
0x170f   :  { %17466 = vmatpush1.bf16.msra.mxu0 %v25199_v40  ;;  %v25208_v40 = vld [vmem:[#allocation89_spill] sm:$0xff] }
0x1710   :  { %17468 = vmatprep.subr.bf16.mxu0 %v25200_v9  ;;  %v25209_v9 = vld [vmem:[#allocation91_spill] sm:$0xff] }
0x1712   :  { %14253 = vmatmul.mubr.msk.f32.vlgmr.msra.gmra.mrb[50].mxu0 %vm631_vm2, %v7816_v55  ;;  %v25210_v55 = vld [vmem:[#allocation93_spill] sm:$0xff] }
0x1713   :  { %17470 = vmatpush1.bf16.msra.mxu0 %v25201_v51  ;;  %8026 = vmatprep.mubr.f32.mxu0 %v24486_v3  ;;  %v25211_v51 = vld [vmem:[#allocation95_spill] sm:$0xff] }
0x1714   :  { %17472 = vmatprep.subr.bf16.mxu0 %v25202_v29  ;;  %v25213_v29 = vld [vmem:[#allocation99_spill] sm:$0xff] }
0x1717   :  { %17474 = vmatpush1.bf16.msra.mxu0 %v25203_v43  ;;  %v25214_v43 = vld [vmem:[#allocation101_spill] sm:$0xff] }
0x1718   :  { %17476 = vmatprep.subr.bf16.mxu0 %v25204_v24  ;;  %v25215_v24 = vld [vmem:[#allocation103_spill] sm:$0xff] }
0x171b   :  { %17478 = vmatpush1.bf16.msra.mxu0 %v25205_v34  ;;  %v25216_v34 = vld [vmem:[#allocation74_spill] sm:$0xff] }
0x171c   :  { %17480 = vmatprep.subr.bf16.mxu0 %v25206_v32 }
0x171f   :  { %17482 = vmatpush1.bf16.msra.mxu0 %v25207_v35 }
0x1720   :  { %17484 = vmatprep.subr.bf16.mxu0 %v25208_v40 }
0x1723   :  { %17486 = vmatpush1.bf16.msra.mxu0 %v25209_v9 }
0x1724   :  { %17488 = vmatprep.subr.bf16.mxu0 %v25210_v55 }
0x1727   :  { %17490 = vmatpush1.bf16.msra.mxu0 %v25211_v51 }
0x1728   :  { %17492 = vmatprep.subr.bf16.mxu0 %v25212_v39 }
0x172b   :  { %17494 = vmatpush1.bf16.msra.mxu0 %v25213_v29 }
0x172c   :  { %17496 = vmatprep.subr.bf16.mxu0 %v25214_v43 }
0x172f   :  { %17498 = vmatpush1.bf16.msra.mxu0 %v25215_v24 }
0x1730   :  { %17500 = vmatprep.subr.bf16.mxu0 %v25216_v34 }
0x1731   :  { %v7701_v32 = vpop.f32.mrb[50].mxu1 }
0x1732   :  { %v7703_v35 = vpop.f32.mrb[51].mxu1  ;;  %v7781_v9 = vadd.f32 %v7701_v32, %v25218_v10 }
0x1733   :  { %v7782_v40 = vadd.f32 %v7703_v35, %v25217_v36 }
0x1734   :  { %v14248_v55 = vmul.f32 -1.442695, %v7781_v9 }
0x1735   :  { %v14249_v12 = vmul.f32 -1.442695, %v7782_v40 }
0x1737   :  { %19322 = vpow2.f32 %v14249_v12  ;;  %v25219_v12 = vld [vmem:[#allocation151_spill] sm:$0xff] }
0x1738   :  { %19324 = vpow2.f32 %v14248_v55 }
0x1741   :  { %v19323_v51 = vpop.eup %19322 }
0x1742   :  { %v19325_v39 = vpop.eup %19324  ;;  %v7794_v30 = vadd.f32 1.0, %v19323_v51 }
0x1743   :  { %v7788_v29 = vadd.f32 1.0, %v19325_v39 }
0x1744   :  { %19326 = vrcp.f32 %v7794_v30 }
0x1745   :  { %19328 = vrcp.f32 %v7788_v29  ;;  %v14251_v29 = vld [vmem:[%s23930_s17 + $0x8] sm:$0x3] }
0x174e   :  { %v19327_v32 = vpop.eup %19326 }
0x174f   :  { %v19329_v40 = vpop.eup %19328  ;;  %v7804_v55 = vmul.f32 %v19327_v32, %v25219_v12  ;;  %v25225_v32 = vld [vmem:[#allocation84_spill] sm:$0xff]  ;;  %v25228_v12 = vld [vmem:[#allocation90_spill] sm:$0xff] }
0x1751   :  { %v7772_v33 = vpop.f32.mrb[52].mxu1 }
0x1752   :  { %v7783_v24 = vadd.f32 %v7772_v33, %v24695_v2  ;;  %v7774_v43 = vpop.f32.mrb[53].mxu1 }
0x1753   :  { %v7784_v34 = vadd.f32 %v7774_v43, %v24696_v45 }
0x1754   :  { %19330 = vtanh.f32 %v7783_v24 }
0x1755   :  { %v14250_v35 = vmul.f32 -1.442695, %v7784_v34  ;;  %v25221_v34 = vld [vmem:[#allocation76_spill] sm:$0xff] }
0x1757   :  { %19332 = vpow2.f32 %v14250_v35  ;;  %v25224_v35 = vld [vmem:[#allocation82_spill] sm:$0xff] }
0x175e   :  { %v19331_v9 = vpop.eup %19330 }
0x175f   :  { %v7805_v10 = vmul.f32 %v19331_v9, %v19329_v40  ;;  %v25226_v40 = vld [vmem:[#allocation86_spill] sm:$0xff]  ;;  %v25227_v9 = vld [vmem:[#allocation88_spill] sm:$0xff] }
0x1761   :  { %v19333_v36 = vpop.eup %19332  ;;  %v22730_v51 = vadd.f32 %v7805_v10, %v7804_v55  ;;  %v25222_v10 = vld [vmem:[#allocation78_spill] sm:$0xff]  ;;  %v25229_v55 = vld [vmem:[#allocation92_spill] sm:$0xff] }
0x1762   :  { %v7801_v39 = vadd.f32 1.0, %v19333_v36  ;;  %v25223_v36 = vld [vmem:[#allocation80_spill] sm:$0xff] }
0x1763   :  { %25220 = vst [vmem:[#allocation187_spill] sm:$0xff] %v22730_v51  ;;  %19334 = vtanh.f32 %v22730_v51 }
0x1764   :  { %19336 = vrcp.f32 %v7801_v39  ;;  %v25230_v39 = vld [vmem:[#allocation94_spill] sm:$0xff] }
0x176d   :  { %v19335_v33 = vpop.eup %19334 }
0x176e   :  { %v19337_v30 = vpop.eup %19336 }
0x176f   :  { %v7808_v43 = vmul.f32 %v19337_v30, %v19335_v33  ;;  %v25231_v33 = vld [vmem:[#allocation96_spill] sm:$0xff]  ;;  %v25232_v30 = vld [vmem:[#allocation98_spill] sm:$0xff] }
0x1771   :  { %v22736_v24 = vmul.f32 %v14251_v29, %v7808_v43  ;;  %v25233_v29 = vld [vmem:[#allocation100_spill] sm:$0xff]  ;;  %v25234_v43 = vld [vmem:[#allocation102_spill] sm:$0xff] }
0x1773   :  { %8027 = vmatmul.mubr.f32.vlgmr.msra.gmra.mrb[48].mxu0 %v22736_v24 }
0x1774   :  { %17502 = vmatpush1.bf16.msra.mxu0 %v25221_v34  ;;  %8097 = vmatprep.mubr.f32.mxu0 %v24486_v3 }
0x1775   :  { %17504 = vmatprep.subr.bf16.mxu0 %v25222_v10 }
0x1778   :  { %17506 = vmatpush1.bf16.msra.mxu0 %v25223_v36 }
0x1779   :  { %17508 = vmatprep.subr.bf16.mxu0 %v25224_v35  ;;  %v25235_v35 = vld [vmem:[#allocation104_spill] sm:$0xff] }
0x177c   :  { %17510 = vmatpush1.bf16.msra.mxu0 %v25225_v32  ;;  %v25236_v32 = vld [vmem:[#allocation105_spill] sm:$0xff] }
0x177d   :  { %17512 = vmatprep.subr.bf16.mxu0 %v25226_v40  ;;  %v25247_v40 = vld [vmem:[#allocation133_spill] sm:$0xff] }
0x1780   :  { %17514 = vmatpush1.bf16.msra.mxu0 %v25227_v9  ;;  %v25237_v9 = vld [vmem:[#allocation113_spill] sm:$0xff] }
0x1781   :  { %17516 = vmatprep.subr.bf16.mxu0 %v25228_v12  ;;  %v25238_v12 = vld [vmem:[#allocation115_spill] sm:$0xff] }
0x1784   :  { %17518 = vmatpush1.bf16.msra.mxu0 %v25229_v55  ;;  %v25239_v55 = vld [vmem:[#allocation117_spill] sm:$0xff] }
0x1785   :  { %17520 = vmatprep.subr.bf16.mxu0 %v25230_v39  ;;  %v25240_v39 = vld [vmem:[#allocation119_spill] sm:$0xff] }
0x1788   :  { %17522 = vmatpush1.bf16.msra.mxu0 %v25231_v33  ;;  %v25241_v33 = vld [vmem:[#allocation121_spill] sm:$0xff] }
0x1789   :  { %17524 = vmatprep.subr.bf16.mxu0 %v25232_v30  ;;  %v25242_v30 = vld [vmem:[#allocation123_spill] sm:$0xff] }
0x178c   :  { %17526 = vmatpush1.bf16.msra.mxu0 %v25233_v29  ;;  %v25243_v29 = vld [vmem:[#allocation125_spill] sm:$0xff] }
0x178d   :  { %17528 = vmatprep.subr.bf16.mxu0 %v25234_v43  ;;  %v25244_v43 = vld [vmem:[#allocation127_spill] sm:$0xff] }
0x1790   :  { %17530 = vmatpush1.bf16.msra.mxu0 %v25235_v35  ;;  %v25245_v35 = vld [vmem:[#allocation129_spill] sm:$0xff] }
0x1791   :  { %17532 = vmatprep.subr.bf16.mxu0 %v25236_v32  ;;  %v25246_v32 = vld [vmem:[#allocation131_spill] sm:$0xff] }
0x1793   :  { %8098 = vmatmul.mubr.f32.vlgmr.msra.gmra.mrb[50].mxu0 %v22736_v24 }
0x1794   :  { %17534 = vmatpush3.bf16.msra.mxu0 %v25237_v9  ;;  %v25248_v9 = vld [vmem:[#allocation135_spill] sm:$0xff] }
0x1795   :  { %17536 = vmatprep.subr.bf16.mxu0 %v25238_v12  ;;  %v25249_v12 = vld [vmem:[#allocation137_spill] sm:$0xff] }
0x1798   :  { %17538 = vmatpush3.bf16.msra.mxu0 %v25239_v55  ;;  %v25250_v55 = vld [vmem:[#allocation139_spill] sm:$0xff] }
0x1799   :  { %17540 = vmatprep.subr.bf16.mxu0 %v25240_v39  ;;  %v25251_v39 = vld [vmem:[#allocation141_spill] sm:$0xff] }
0x179c   :  { %17542 = vmatpush3.bf16.msra.mxu0 %v25241_v33  ;;  %v25252_v33 = vld [vmem:[#allocation159_spill] sm:$0xff] }
0x179d   :  { %17544 = vmatprep.subr.bf16.mxu0 %v25242_v30 }
0x17a0   :  { %17546 = vmatpush3.bf16.msra.mxu0 %v25243_v29 }
0x17a1   :  { %17548 = vmatprep.subr.bf16.mxu0 %v25244_v43 }
0x17a4   :  { %17550 = vmatpush3.bf16.msra.mxu0 %v25245_v35 }
0x17a5   :  { %17552 = vmatprep.subr.bf16.mxu0 %v25246_v32 }
0x17a8   :  { %17554 = vmatpush3.bf16.msra.mxu0 %v25247_v40  ;;  %v25253_v40 = vld [vmem:[#allocation143_spill] sm:$0xff] }
0x17a9   :  { %17556 = vmatprep.subr.bf16.mxu0 %v25248_v9 }
0x17ac   :  { %17558 = vmatpush3.bf16.msra.mxu0 %v25249_v12 }
0x17ad   :  { %17560 = vmatprep.subr.bf16.mxu0 %v25250_v55  ;;  %v25254_v55 = vld [vmem:[#allocation145_spill] sm:$0xff] }
0x17b0   :  { %17562 = vmatpush3.bf16.msra.mxu0 %v25251_v39 }
0x17b1   :  { %17595 = vmatprep.subr.bf16.mxu0 %v24616_v0 }
0x17d5   :  { %v7337_v30 = vpop.f32.mrb[46].mxu0 }
0x17d6   :  { %v7338_v29 = vadd.f32 %v7337_v30, %v22682_v25  ;;  %v15426_v43 = vpop.f32.mrb[47].mxu0  ;;  %v25255_v25 = vld [vmem:[#allocation147_spill] sm:$0xff] }
0x17d8   :  { %v7341_v35 = vadd.f32 %v25252_v33, %v7338_v29  ;;  %v25256_v33 = vld [vmem:[#allocation144_spill] sm:$0xff]  ;;  %v25257_v29 = vld [vmem:[#allocation146_spill] sm:$0xff] }
0x17da   :  { %14241 = vst.msk [vmem:[%s23942_s19 + $0x6] sm:$0x3] %vm2252_vm7, %v7341_v35 }
0x1846   :  { %v8028_v9 = vpop.f32.mrb[48].mxu0 }
0x1847   :  { %v8104_v12 = vadd.f32 %v8028_v9, %v25253_v40  ;;  %v8030_v32 = vpop.f32.mrb[49].mxu0 }
0x1848   :  { %v8105_v36 = vadd.f32 %v8030_v32, %v25254_v55 }
0x184a   :  { %19338 = vtanh.f32 %v8105_v36 }
0x184b   :  { %19340 = vtanh.f32 %v8104_v12  ;;  %v25259_v12 = vld [vmem:[#allocation150_spill] sm:$0xff] }
0x1854   :  { %v19339_v39 = vpop.eup %19338 }
0x1855   :  { %v19341_v10 = vpop.eup %19340  ;;  %8176 = vmatprep.mubr.f32.mxu0 %v19339_v39  ;;  %v25260_v39 = vld [vmem:[#allocation152_spill] sm:$0xff] }
0x1856   :  { %8177 = vmatmul.mubr.f32.vlgmr.msra.gmra.mrb[52].mxu0 %v19341_v10  ;;  %v25258_v10 = vld [vmem:[#allocation149_spill] sm:$0xff] }
0x1857   :  { %17597 = vmatpush3.bf16.msra.mxu0 %v25255_v25  ;;  %15431 = vmatprep.mubr.msk.f32.mxu0 %vm19507_vm5, %v24486_v3  ;;  %v25261_v25 = vld [vmem:[#allocation153_spill] sm:$0xff] }
0x1858   :  { %17598 = vmatprep.subr.bf16.mxu0 %v24616_v0 }
0x1866   :  { %v8099_v35 = vpop.f32.mrb[50].mxu0 }
0x1867   :  { %v8106_v30 = vadd.f32 %v8099_v35, %v25256_v33  ;;  %v8101_v9 = vpop.f32.mrb[51].mxu0  ;;  %v25262_v35 = vld [vmem:[#allocation163_spill] sm:$0xff]  ;;  %v25263_v33 = vld [vmem:[#allocation165_spill] sm:$0xff] }
0x1868   :  { %v8107_v43 = vadd.f32 %v8101_v9, %v25257_v29  ;;  %v25264_v9 = vld [vmem:[#allocation167_spill] sm:$0xff] }
0x186a   :  { %19342 = vtanh.f32 %v8107_v43 }
0x186b   :  { %19344 = vtanh.f32 %v8106_v30  ;;  %v25265_v30 = vld [vmem:[#allocation169_spill] sm:$0xff] }
0x1874   :  { %v19343_v36 = vpop.eup %19342 }
0x1875   :  { %v19345_v32 = vpop.eup %19344  ;;  %8246 = vmatprep.mubr.f32.mxu1 %v19343_v36 }
0x1876   :  { %8247 = vmatmul.mubr.f32.vlgmr.msra.gmra.mrb[54].mxu1 %v19345_v32 }
0x1877   :  { %17620 = vmatpush1.bf16.msra.mxu1 %v25258_v10  ;;  %8572 = vmatprep.mubr.f32.mxu1 %v24486_v3 }
0x1878   :  { %17622 = vmatprep.subr.bf16.mxu1 %v25259_v12 }
0x187b   :  { %17624 = vmatpush1.bf16.msra.mxu1 %v25260_v39 }
0x187c   :  { %17626 = vmatprep.subr.bf16.mxu1 %v25261_v25 }
0x187f   :  { %17628 = vmatpush1.bf16.msra.mxu1 %v25262_v35 }
0x1880   :  { %17630 = vmatprep.subr.bf16.mxu1 %v25263_v33 }
0x1883   :  { %17632 = vmatpush1.bf16.msra.mxu1 %v25264_v9 }
0x1884   :  { %17642 = vmatprep.subr.bf16.mxu1 %v25265_v30 }
0x1929   :  { %v14779_v43 = vpop.f32.mrb[52].mxu0 }
0x192a   :  { %v14780_v36 = vpop.f32.mrb[53].mxu0 }
0x192b   :  { %v14781_v32 = vadd.f32 %v14780_v36, %v14779_v43  ;;  %v25269_v43 = vld [vmem:[#allocation200_spill] sm:$0xff]  ;;  %v25270_v36 = vld [vmem:[#allocation201_spill] sm:$0xff] }
0x1949   :  { %v14814_v10 = vpop.f32.mrb[54].mxu1 }
0x194a   :  { %v14815_v29 = vpop.f32.mrb[55].mxu1 }
0x194b   :  { %v14816_v55 = vadd.f32 %v14815_v29, %v14814_v10 }
0x194d   :  { %v8249_v40 = vadd.f32 %v14816_v55, %v14781_v32  ;;  %v25271_v32 = vld [vmem:[#allocation202_spill] sm:$0xff] }
0x194f   :  { %v8252_v12 = vsel %vm72_vm1, %v8249_v40, -inf }
0x1950   :  { %8253 = vmax.xlane.f32.xlu1 %v8252_v12 }
0x19dd   :  { %v8254_v39 = vpop.xlane.xlu1 %8253 }
0x19de   :  { %v8255_v25 = vsub.f32 %v8249_v40, %v8254_v39 }
0x19e0   :  { %v8256_v34 = vmul.f32 1.442695, %v8255_v25 }
0x19e2   :  { %19346 = vpow2.f32 %v8256_v34 }
0x19ec   :  { %v19347_v35 = vpop.eup %19346 }
0x19ed   :  { %v8258_v33 = vsel %vm72_vm1, %v19347_v35, 0.0 }
0x19ee   :  { %8259 = vadd.xlane.f32.xlu0 %v8258_v33 }
0x1a7b   :  { %v8260_v9 = vpop.xlane.xlu0 %8259 }
0x1a7c   :  { %19348 = vrcp.f32 %v8260_v9  ;;  %v25267_v9 = vld [vmem:[#allocation198_spill] sm:$0xff] }
0x1a86   :  { %v19349_v30 = vpop.eup %19348 }
0x1a87   :  { %v22798_v51 = vmul.f32 %v19349_v30, %v19347_v35  ;;  %v25268_v30 = vld [vmem:[#allocation199_spill] sm:$0xff] }
0x1a89   :  { %14266 = vst.msk [vmem:[%s23934_s20 + $0x8] sm:$0x3] %vm72_vm1, %v22798_v51  ;;  %v22807_v40 = vadd.f32 %v22798_v51, %v22475_v4  ;;  %v8270_v34 = vrot.slane %v22798_v51, %v24745_v46 }
0x1a8b   :  { %9510 = vrot.lane.b32.xlu1 %v22807_v40, %s19504_s4  ;;  %v8278_v55 = vrot.slane %v8270_v34, %v24745_v46  ;;  %v8271_v25 = vcombine.high %v8270_v34, %v8270_v34  ;;  %v25272_v34 = vld [vmem:[#allocation203_spill] sm:$0xff] }
0x1a8d   :  { %15432 = vmatmul.mubr.msk.f32.vlgmr.msra.gmra.mrb[54].mxu0 %vm978_vm4, %v8278_v55  ;;  %v8285_v33 = vrot.slane %v8271_v25, %v24745_v46  ;;  %v25273_v55 = vld [vmem:[#allocation204_spill] sm:$0xff]  ;;  %v25274_v25 = vld [vmem:[#allocation205_spill] sm:$0xff] }
0x1a8e   :  { %17600 = vmatpush3.bf16.msra.mxu0 %v24918_v23  ;;  %15438 = vmatprep.mubr.msk.f32.mxu0 %vm19507_vm5, %v24486_v3 }
0x1a8f   :  { %17602 = vmatprep.subr.bf16.mxu0 %v24919_v59 }
0x1a91   :  { %15439 = vmatmul.mubr.msk.f32.vlgmr.msra.gmra.mrb[56].mxu0 %vm978_vm4, %v8285_v33  ;;  %v25275_v33 = vld [vmem:[#allocation206_spill] sm:$0xff] }
0x1a92   :  { %17604 = vmatpush1.bf16.msra.mxu0 %v24920_v1  ;;  %8501 = vmatprep.mubr.f32.mxu0 %v24486_v3 }
0x1a93   :  { %17606 = vmatprep.subr.bf16.mxu0 %v24749_v21 }
0x1a96   :  { %17608 = vmatpush1.bf16.msra.mxu0 %v24750_v19 }
0x1a97   :  { %17610 = vmatprep.subr.bf16.mxu0 %v24921_v56 }
0x1a9a   :  { %17612 = vmatpush1.bf16.msra.mxu0 %v24922_v61 }
0x1a9b   :  { %17614 = vmatprep.subr.bf16.mxu0 %v25092_v26 }
0x1a9e   :  { %17616 = vmatpush1.bf16.msra.mxu0 %v25093_v42 }
0x1a9f   :  { %17634 = vmatprep.subr.bf16.mxu0 %v25094_v27 }
0x1b60   :  { %v8354_v4 = vpop.f32.mrb[54].mxu0 }
0x1b61   :  { %v15433_v29 = vpop.f32.mrb[55].mxu0 }
0x1b62   :  { %v25277_v29 = vld [vmem:[#allocation208_spill] sm:$0xff] }
0x1b64   :  { %v8426_v10 = vpop.f32.mrb[56].mxu0 }
0x1b65   :  { %v8433_v12 = vrot.slane %v8426_v10, 7  ;;  %v15440_v39 = vpop.f32.mrb[57].mxu0  ;;  %v25278_v10 = vld [vmem:[#allocation212_spill] sm:$0xff] }
0x1b66   :  { %v25280_v39 = vld [vmem:[#allocation213_spill] sm:$0xff] }
0x1b67   :  { %v22831_v35 = vsel %vm1620_vm6, %v8433_v12, %v8354_v4  ;;  %v25276_v4 = vld [vmem:[#allocation207_spill] sm:$0xff]  ;;  %v25279_v12 = vld [vmem:[#allocation209_spill] sm:$0xff] }
0x1b68   :  { %14256 = vmatmul.mubr.msk.f32.vlgmr.msra.gmra.mrb[58].mxu0 %vm485_vm3, %v22831_v35  ;;  %14257 = vmatmul.mubr.msk.f32.vlgmr.msra.gmra.mrb[56].mxu1 %vm485_vm3, %v22831_v35 }
0x1b69   :  { %17636 = vmatpush1.bf16.msra.mxu0 %v24926_v54  ;;  %17644 = vmatpush1.bf16.msra.mxu1 %v25095_v22 }
0x1b6a   :  { %17638 = vmatprep.subr.bf16.mxu0 %v25096_v16  ;;  %17646 = vmatprep.subr.bf16.mxu1 %v25097_v57 }
0x1b6b   :  { %8643 = vmatprep.mubr.f32.mxu0 %v24486_v3  ;;  %8714 = vmatprep.mubr.f32.mxu1 %v24486_v3 }
0x1b6d   :  { %17640 = vmatpush1.bf16.msra.mxu0 %v25098_v13  ;;  %17648 = vmatpush1.bf16.msra.mxu1 %v25099_v7 }
0x1b6e   :  { %17650 = vmatprep.subr.bf16.mxu0 %v25100_v18  ;;  %17682 = vmatprep.subr.bf16.mxu1 %v25101_v14 }
0x1b70   :  { %14258 = vmatmul.mubr.msk.f32.vlgmr.msra.gmra.mrb[58].mxu0 %vm631_vm2, %v22614_v63  ;;  %14259 = vmatmul.mubr.msk.f32.vlgmr.msra.gmra.mrb[56].mxu1 %vm631_vm2, %v22614_v63  ;;  %v25266_v63 = vld [vmem:[#allocation197_spill] sm:$0xff] }
0x1b71   :  { %17652 = vmatpush1.bf16.msra.mxu0 %v24934_v20  ;;  %17684 = vmatpush1.bf16.msra.mxu1 %v25102_v28 }
0x1b72   :  { %17654 = vmatprep.subr.bf16.mxu0 %v24936_v8  ;;  %17686 = vmatprep.subr.bf16.mxu1 %v24937_v15 }
0x1b73   :  { %8785 = vmatprep.mubr.f32.mxu0 %v24486_v3  ;;  %8856 = vmatprep.mubr.f32.mxu1 %v24486_v3 }
0x1b75   :  { %17656 = vmatpush1.bf16.msra.mxu0 %v24938_v31  ;;  %17688 = vmatpush1.bf16.msra.mxu1 %v24939_v50 }
0x1b76   :  { %17658 = vmatprep.subr.bf16.mxu0 %v24940_v5  ;;  %17690 = vmatprep.subr.bf16.mxu1 %v24941_v48 }
0x1b79   :  { %17660 = vmatpush1.bf16.msra.mxu0 %v24942_v58  ;;  %17692 = vmatpush1.bf16.msra.mxu1 %v24773_v44 }
0x1b7a   :  { %17662 = vmatprep.subr.bf16.mxu0 %v24943_v47  ;;  %17694 = vmatprep.subr.bf16.mxu1 %v24775_v41 }
0x1b7d   :  { %17664 = vmatpush1.bf16.msra.mxu0 %v25103_v17  ;;  %17696 = vmatpush1.bf16.msra.mxu1 %v24777_v49 }
0x1b7e   :  { %17666 = vmatprep.subr.bf16.mxu0 %v24778_v53  ;;  %17698 = vmatprep.subr.bf16.mxu1 %v24779_v52 }
0x1b81   :  { %17668 = vmatpush1.bf16.msra.mxu0 %v24780_v11  ;;  %17700 = vmatpush1.bf16.msra.mxu1 %v24781_v62 }
0x1b82   :  { %17670 = vmatprep.subr.bf16.mxu0 %v24782_v37  ;;  %17702 = vmatprep.subr.bf16.mxu1 %v25266_v63 }
0x1b85   :  { %17672 = vmatpush1.bf16.msra.mxu0 %v25267_v9  ;;  %17704 = vmatpush1.bf16.msra.mxu1 %v25268_v30 }
0x1b86   :  { %17674 = vmatprep.subr.bf16.mxu0 %v25269_v43  ;;  %17706 = vmatprep.subr.bf16.mxu1 %v25270_v36 }
0x1b89   :  { %17676 = vmatpush1.bf16.msra.mxu0 %v25271_v32  ;;  %17708 = vmatpush1.bf16.msra.mxu1 %v25272_v34  ;;  %v25324_v34 = vld [vmem:[#allocation38_spill] sm:$0xff] }
0x1b8a   :  { %17678 = vmatprep.subr.bf16.mxu0 %v25273_v55  ;;  %17710 = vmatprep.subr.bf16.mxu1 %v25274_v25  ;;  %v25293_v25 = vld [vmem:[#allocation21_spill] sm:$0xff]  ;;  %v25297_v55 = vld [vmem:[#allocation219_spill] sm:$0xff]  ;;  %v25326_v32 = vld [vmem:[#allocation42_spill] sm:$0xff] }
0x1b8d   :  { %17680 = vmatpush1.bf16.msra.mxu0 %v25275_v33  ;;  %17712 = vmatpush1.bf16.msra.mxu1 %v25276_v4  ;;  %v25284_v4 = vld [vmem:[#allocation9_spill] sm:$0xff]  ;;  %v25285_v33 = vld [vmem:[#allocation215_spill] sm:$0xff] }
0x1b8e   :  { %17713 = vmatprep.subr.bf16.mxu0 %v24616_v0  ;;  %17725 = vmatprep.subr.bf16.mxu1 %v24616_v0 }
0x1b90   :  { %8786 = vmatmul.mubr.f32.vlgmr.msra.gmra.mrb[58].mxu0 %v22691_v6  ;;  %8857 = vmatmul.mubr.f32.vlgmr.msra.gmra.mrb[56].mxu1 %v22691_v6  ;;  %v25281_v6 = vld [vmem:[#allocation210_spill] sm:$0xff] }
0x1b91   :  { %17715 = vmatpush3.bf16.msra.mxu0 %v25277_v29  ;;  %15457 = vmatprep.mubr.msk.f32.mxu0 %vm19507_vm5, %v24486_v3  ;;  %v25282_v29 = vld [vmem:[#allocation214_spill] sm:$0xff] }
0x1b92   :  { %17716 = vmatprep.subr.bf16.mxu0 %v24616_v0  ;;  %17727 = vmatpush3.bf16.msra.mxu1 %v25278_v10  ;;  %v25283_v10 = vld [vmem:[#allocation211_spill] sm:$0xff] }
0x1b93   :  { %17728 = vmatprep.subr.bf16.mxu1 %v24616_v0  ;;  %15492 = vmatprep.mubr.msk.f32.mxu1 %vm19507_vm5, %v24486_v3 }
0x1b95   :  { %17718 = vmatpush3.bf16.msra.mxu0 %v25279_v12  ;;  %v25292_v12 = vld [vmem:[#allocation19_spill] sm:$0xff] }
0x1b96   :  { %17719 = vmatprep.subr.bf16.mxu0 %v24616_v0  ;;  %17730 = vmatpush3.bf16.msra.mxu1 %v25280_v39  ;;  %v25286_v39 = vld [vmem:[#allocation11_spill] sm:$0xff] }
0x1b97   :  { %17731 = vmatprep.subr.bf16.mxu1 %v24616_v0 }
0x1b99   :  { %17721 = vmatpush3.bf16.msra.mxu0 %v25281_v6  ;;  %v25287_v6 = vld [vmem:[#allocation13_spill] sm:$0xff] }
0x1b9a   :  { %17722 = vmatprep.subr.bf16.mxu0 %v24616_v0  ;;  %17733 = vmatpush3.bf16.msra.mxu1 %v25282_v29  ;;  %v25288_v29 = vld [vmem:[#allocation216_spill] sm:$0xff] }
0x1b9b   :  { %17734 = vmatprep.subr.bf16.mxu1 %v24616_v0 }
0x1b9d   :  { %17724 = vmatpush3.bf16.msra.mxu0 %v25283_v10  ;;  %v25289_v10 = vld [vmem:[#allocation15_spill] sm:$0xff] }
0x1b9e   :  { %17750 = vmatprep.subr.bf16.mxu0 %v25284_v4  ;;  %17736 = vmatpush3.bf16.msra.mxu1 %v25285_v33  ;;  %v25290_v4 = vld [vmem:[#allocation17_spill] sm:$0xff] }
0x1b9f   :  { %17737 = vmatprep.subr.bf16.mxu1 %v24616_v0  ;;  %v25291_v33 = vld [vmem:[#allocation217_spill] sm:$0xff] }
0x1ba0   :  { %15458 = vmatmul.mubr.msk.f32.vlgmr.msra.gmra.mrb[60].mxu0 %vm485_vm3, %v22831_v35 }
0x1ba1   :  { %17752 = vmatpush1.bf16.msra.mxu0 %v25286_v39  ;;  %9109 = vmatprep.mubr.f32.mxu0 %v24486_v3  ;;  %v25294_v39 = vld [vmem:[#allocation218_spill] sm:$0xff] }
0x1ba2   :  { %17754 = vmatprep.subr.bf16.mxu0 %v25287_v6  ;;  %17739 = vmatpush3.bf16.msra.mxu1 %v25288_v29  ;;  %v25295_v6 = vld [vmem:[#allocation23_spill] sm:$0xff]  ;;  %v25296_v29 = vld [vmem:[#allocation25_spill] sm:$0xff] }
0x1ba3   :  { %17740 = vmatprep.subr.bf16.mxu1 %v24616_v0 }
0x1ba5   :  { %17756 = vmatpush1.bf16.msra.mxu0 %v25289_v10  ;;  %v25298_v10 = vld [vmem:[#allocation65_spill] sm:$0xff] }
0x1ba6   :  { %17758 = vmatprep.subr.bf16.mxu0 %v25290_v4  ;;  %17742 = vmatpush3.bf16.msra.mxu1 %v25291_v33  ;;  %v25299_v33 = vld [vmem:[#allocation27_spill] sm:$0xff]  ;;  %v25323_v4 = vld [vmem:[#allocation36_spill] sm:$0xff] }
0x1ba7   :  { %17743 = vmatprep.subr.bf16.mxu1 %v24616_v0 }
0x1ba9   :  { %17760 = vmatpush1.bf16.msra.mxu0 %v25292_v12  ;;  %v25302_v12 = vld [vmem:[#allocation33_spill] sm:$0xff] }
0x1baa   :  { %17762 = vmatprep.subr.bf16.mxu0 %v25293_v25  ;;  %17745 = vmatpush3.bf16.msra.mxu1 %v25294_v39  ;;  %v25300_v25 = vld [vmem:[#allocation29_spill] sm:$0xff]  ;;  %v25301_v39 = vld [vmem:[#allocation31_spill] sm:$0xff] }
0x1bab   :  { %17746 = vmatprep.subr.bf16.mxu1 %v24616_v0 }
0x1bad   :  { %17764 = vmatpush1.bf16.msra.mxu0 %v25295_v6  ;;  %v25303_v6 = vld [vmem:[#allocation35_spill] sm:$0xff] }
0x1bae   :  { %17766 = vmatprep.subr.bf16.mxu0 %v25296_v29  ;;  %17748 = vmatpush3.bf16.msra.mxu1 %v25297_v55  ;;  %v25304_v29 = vld [vmem:[#allocation37_spill] sm:$0xff]  ;;  %v25305_v55 = vld [vmem:[#allocation39_spill] sm:$0xff] }
0x1baf   :  { %17862 = vmatprep.subr.bf16.mxu1 %v25298_v10  ;;  %v25306_v10 = vld [vmem:[#allocation10_spill] sm:$0xff] }
0x1bb0   :  { %14268 = vmatmul.mubr.msk.f32.vlgmr.msra.gmra.mrb[62].mxu0 %vm485_vm3, %v22831_v35 }
0x1bb1   :  { %17768 = vmatpush1.bf16.msra.mxu0 %v25299_v33  ;;  %9180 = vmatprep.mubr.f32.mxu0 %v24486_v3  ;;  %v25307_v33 = vld [vmem:[#allocation12_spill] sm:$0xff] }
0x1bb2   :  { %17770 = vmatprep.subr.bf16.mxu0 %v25300_v25  ;;  %v25308_v25 = vld [vmem:[#allocation14_spill] sm:$0xff] }
0x1bb5   :  { %17772 = vmatpush1.bf16.msra.mxu0 %v25301_v39  ;;  %v25309_v39 = vld [vmem:[#allocation16_spill] sm:$0xff] }
0x1bb6   :  { %17774 = vmatprep.subr.bf16.mxu0 %v25302_v12  ;;  %v25319_v12 = vld [vmem:[#allocation28_spill] sm:$0xff] }
0x1bb9   :  { %17776 = vmatpush1.bf16.msra.mxu0 %v25303_v6  ;;  %v22946_v6 = vld [vmem:[%s24423_s12 + $0xa] sm:$0x3] }
0x1bba   :  { %17778 = vmatprep.subr.bf16.mxu0 %v25304_v29  ;;  %v25310_v29 = vld [vmem:[#allocation41_spill] sm:$0xff] }
0x1bbd   :  { %17780 = vmatpush1.bf16.msra.mxu0 %v25305_v55  ;;  %v25317_v55 = vld [vmem:[#allocation24_spill] sm:$0xff] }
0x1bbe   :  { %17782 = vmatprep.subr.bf16.mxu0 %v25306_v10  ;;  %v25311_v10 = vld [vmem:[#allocation43_spill] sm:$0xff] }
0x1bc0   :  { %14269 = vmatmul.mubr.msk.f32.vlgmr.msra.gmra.mrb[64].mxu0 %vm485_vm3, %v22831_v35  ;;  %v25312_v35 = vld [vmem:[#allocation45_spill] sm:$0xff] }
0x1bc1   :  { %17784 = vmatpush1.bf16.msra.mxu0 %v25307_v33  ;;  %9254 = vmatprep.mubr.f32.mxu0 %v24486_v3  ;;  %v25313_v33 = vld [vmem:[#allocation47_spill] sm:$0xff] }
0x1bc2   :  { %17786 = vmatprep.subr.bf16.mxu0 %v25308_v25  ;;  %v25314_v25 = vld [vmem:[#allocation18_spill] sm:$0xff] }
0x1bc5   :  { %17788 = vmatpush1.bf16.msra.mxu0 %v25309_v39  ;;  %v25315_v39 = vld [vmem:[#allocation20_spill] sm:$0xff] }
0x1bc6   :  { %17790 = vmatprep.subr.bf16.mxu0 %v25310_v29  ;;  %v25316_v29 = vld [vmem:[#allocation22_spill] sm:$0xff] }
0x1bc8   :  { %14270 = vmatmul.mubr.msk.f32.vlgmr.msra.gmra.mrb[62].mxu0 %vm631_vm2, %v22946_v6 }
0x1bc9   :  { %17792 = vmatpush1.bf16.msra.mxu0 %v25311_v10  ;;  %9325 = vmatprep.mubr.f32.mxu0 %v24486_v3  ;;  %v25318_v10 = vld [vmem:[#allocation26_spill] sm:$0xff] }
0x1bca   :  { %17794 = vmatprep.subr.bf16.mxu0 %v25312_v35  ;;  %v25320_v35 = vld [vmem:[#allocation30_spill] sm:$0xff] }
0x1bcd   :  { %17796 = vmatpush1.bf16.msra.mxu0 %v25313_v33  ;;  %v25321_v33 = vld [vmem:[#allocation32_spill] sm:$0xff] }
0x1bce   :  { %17798 = vmatprep.subr.bf16.mxu0 %v25314_v25  ;;  %v25322_v25 = vld [vmem:[#allocation34_spill] sm:$0xff] }
0x1bd0   :  { %14271 = vmatmul.mubr.msk.f32.vlgmr.msra.gmra.mrb[64].mxu0 %vm631_vm2, %v22946_v6 }
0x1bd1   :  { %17800 = vmatpush1.bf16.msra.mxu0 %v25315_v39  ;;  %9396 = vmatprep.mubr.f32.mxu0 %v24486_v3  ;;  %v25325_v39 = vld [vmem:[#allocation40_spill] sm:$0xff] }
0x1bd2   :  { %17802 = vmatprep.subr.bf16.mxu0 %v25316_v29  ;;  %v25327_v29 = vld [vmem:[#allocation44_spill] sm:$0xff] }
0x1bd5   :  { %17804 = vmatpush1.bf16.msra.mxu0 %v25317_v55  ;;  %v25328_v55 = vld [vmem:[#allocation46_spill] sm:$0xff] }
0x1bd6   :  { %17806 = vmatprep.subr.bf16.mxu0 %v25318_v10  ;;  %v25329_v10 = vld [vmem:[#allocation48_spill] sm:$0xff] }
0x1bd9   :  { %17808 = vmatpush1.bf16.msra.mxu0 %v25319_v12  ;;  %v25330_v12 = vld [vmem:[#allocation49_spill] sm:$0xff] }
0x1bda   :  { %17810 = vmatprep.subr.bf16.mxu0 %v25320_v35  ;;  %v25342_v35 = vld [vmem:[#allocation61_spill] sm:$0xff] }
0x1bdd   :  { %17812 = vmatpush1.bf16.msra.mxu0 %v25321_v33  ;;  %v25331_v33 = vld [vmem:[#allocation50_spill] sm:$0xff] }
0x1bde   :  { %17814 = vmatprep.subr.bf16.mxu0 %v25322_v25  ;;  %v25340_v25 = vld [vmem:[#allocation59_spill] sm:$0xff] }
0x1be1   :  { %17816 = vmatpush1.bf16.msra.mxu0 %v25323_v4  ;;  %v25332_v4 = vld [vmem:[#allocation51_spill] sm:$0xff] }
0x1be2   :  { %17818 = vmatprep.subr.bf16.mxu0 %v25324_v34  ;;  %v25333_v34 = vld [vmem:[#allocation52_spill] sm:$0xff] }
0x1be5   :  { %17820 = vmatpush1.bf16.msra.mxu0 %v25325_v39  ;;  %v25334_v39 = vld [vmem:[#allocation53_spill] sm:$0xff] }
0x1be6   :  { %17822 = vmatprep.subr.bf16.mxu0 %v25326_v32  ;;  %v25335_v32 = vld [vmem:[#allocation54_spill] sm:$0xff] }
0x1be9   :  { %17824 = vmatpush1.bf16.msra.mxu0 %v25327_v29  ;;  %v25336_v29 = vld [vmem:[#allocation55_spill] sm:$0xff] }
0x1bea   :  { %17826 = vmatprep.subr.bf16.mxu0 %v25328_v55  ;;  %v25337_v55 = vld [vmem:[#allocation56_spill] sm:$0xff] }
0x1bed   :  { %17828 = vmatpush1.bf16.msra.mxu0 %v25329_v10  ;;  %v25338_v10 = vld [vmem:[#allocation57_spill] sm:$0xff] }
0x1bee   :  { %17830 = vmatprep.subr.bf16.mxu0 %v25330_v12  ;;  %v25339_v12 = vld [vmem:[#allocation58_spill] sm:$0xff] }
0x1bf0   :  { %9397 = vmatmul.mubr.f32.vlgmr.msra.gmra.mrb[62].mxu0 %v22736_v24 }
0x1bf1   :  { %17832 = vmatpush1.bf16.msra.mxu0 %v25331_v33  ;;  %9467 = vmatprep.mubr.f32.mxu0 %v24486_v3  ;;  %v25341_v33 = vld [vmem:[#allocation60_spill] sm:$0xff] }
0x1bf2   :  { %17834 = vmatprep.subr.bf16.mxu0 %v25332_v4  ;;  %v25343_v4 = vld [vmem:[#allocation62_spill] sm:$0xff] }
0x1bf5   :  { %17836 = vmatpush1.bf16.msra.mxu0 %v25333_v34  ;;  %v25344_v34 = vld [vmem:[#allocation63_spill] sm:$0xff] }
0x1bf6   :  { %17838 = vmatprep.subr.bf16.mxu0 %v25334_v39  ;;  %v25345_v39 = vld [vmem:[#allocation64_spill] sm:$0xff] }
0x1bf9   :  { %17840 = vmatpush1.bf16.msra.mxu0 %v25335_v32  ;;  %v25346_v32 = vld [vmem:[#allocation106_spill] sm:$0xff] }
0x1bfa   :  { %17842 = vmatprep.subr.bf16.mxu0 %v25336_v29  ;;  %v25363_v29 = vld [vmem:[#allocation107_spill] sm:$0xff] }
0x1bfd   :  { %17844 = vmatpush1.bf16.msra.mxu0 %v25337_v55  ;;  %v25347_v55 = vld [vmem:[#allocation114_spill] sm:$0xff] }
0x1bfe   :  { %17846 = vmatprep.subr.bf16.mxu0 %v25338_v10  ;;  %v25348_v10 = vld [vmem:[#allocation116_spill] sm:$0xff] }
0x1c01   :  { %17848 = vmatpush1.bf16.msra.mxu0 %v25339_v12  ;;  %v25349_v12 = vld [vmem:[#allocation118_spill] sm:$0xff] }
0x1c02   :  { %17850 = vmatprep.subr.bf16.mxu0 %v25340_v25  ;;  %v25350_v25 = vld [vmem:[#allocation120_spill] sm:$0xff] }
0x1c05   :  { %17852 = vmatpush1.bf16.msra.mxu0 %v25341_v33  ;;  %v25351_v33 = vld [vmem:[#allocation122_spill] sm:$0xff] }
0x1c06   :  { %17854 = vmatprep.subr.bf16.mxu0 %v25342_v35  ;;  %v25352_v35 = vld [vmem:[#allocation124_spill] sm:$0xff] }
0x1c09   :  { %17856 = vmatpush1.bf16.msra.mxu0 %v25343_v4  ;;  %v25353_v4 = vld [vmem:[#allocation126_spill] sm:$0xff] }
0x1c0a   :  { %17858 = vmatprep.subr.bf16.mxu0 %v25344_v34  ;;  %v25354_v34 = vld [vmem:[#allocation128_spill] sm:$0xff] }
0x1c0d   :  { %17860 = vmatpush1.bf16.msra.mxu0 %v25345_v39  ;;  %v25355_v39 = vld [vmem:[#allocation130_spill] sm:$0xff] }
0x1c0e   :  { %17974 = vmatprep.subr.bf16.mxu0 %v25346_v32  ;;  %v25356_v32 = vld [vmem:[#allocation132_spill] sm:$0xff] }
0x1c10   :  { %9468 = vmatmul.mubr.f32.vlgmr.msra.gmra.mrb[64].mxu0 %v22736_v24  ;;  %v25357_v24 = vld [vmem:[#allocation134_spill] sm:$0xff] }
0x1c11   :  { %17976 = vmatpush3.bf16.msra.mxu0 %v25347_v55  ;;  %v25358_v55 = vld [vmem:[#allocation136_spill] sm:$0xff] }
0x1c12   :  { %17978 = vmatprep.subr.bf16.mxu0 %v25348_v10  ;;  %v25359_v10 = vld [vmem:[#allocation138_spill] sm:$0xff] }
0x1c15   :  { %17980 = vmatpush3.bf16.msra.mxu0 %v25349_v12  ;;  %v25360_v12 = vld [vmem:[#allocation140_spill] sm:$0xff] }
0x1c16   :  { %17982 = vmatprep.subr.bf16.mxu0 %v25350_v25  ;;  %v25361_v25 = vld [vmem:[#allocation142_spill] sm:$0xff] }
0x1c19   :  { %17984 = vmatpush3.bf16.msra.mxu0 %v25351_v33  ;;  %v25362_v33 = vld [vmem:[#allocation148_spill] sm:$0xff] }
0x1c1a   :  { %17986 = vmatprep.subr.bf16.mxu0 %v25352_v35 }
0x1c1d   :  { %17988 = vmatpush3.bf16.msra.mxu0 %v25353_v4 }
0x1c1e   :  { %17990 = vmatprep.subr.bf16.mxu0 %v25354_v34 }
0x1c21   :  { %17992 = vmatpush3.bf16.msra.mxu0 %v25355_v39 }
0x1c22   :  { %17994 = vmatprep.subr.bf16.mxu0 %v25356_v32 }
0x1c25   :  { %17996 = vmatpush3.bf16.msra.mxu0 %v25357_v24 }
0x1c26   :  { %17998 = vmatprep.subr.bf16.mxu0 %v25358_v55  ;;  %v25364_v55 = vld [vmem:[#allocation221_spill] sm:$0xff] }
0x1c29   :  { %18000 = vmatpush3.bf16.msra.mxu0 %v25359_v10 }
0x1c2a   :  { %18002 = vmatprep.subr.bf16.mxu0 %v25360_v12 }
0x1c2d   :  { %18004 = vmatpush3.bf16.msra.mxu0 %v25361_v25 }
0x1c2e   :  { %18028 = vmatprep.subr.bf16.mxu0 %v25362_v33 }
0x1c63   :  { %v8787_v35 = vpop.f32.mrb[58].mxu0  ;;  %v8858_v4 = vpop.f32.mrb[56].mxu1 }
0x1c64   :  { %v8867_v34 = vadd.f32 %v8787_v35, %v25363_v29  ;;  %v8789_v36 = vpop.f32.mrb[59].mxu0  ;;  %v8860_v39 = vpop.f32.mrb[57].mxu1  ;;  %v8869_v12 = vadd.f32 %v8858_v4, %v24842_v38 }
0x1c65   :  { %v8868_v32 = vadd.f32 %v8789_v36, %v24840_v60  ;;  %v8870_v10 = vadd.f32 %v8860_v39, %v25364_v55 }
0x1c66   :  { %v14260_v43 = vmul.f32 -1.442695, %v8867_v34 }
0x1c67   :  { %v14261_v24 = vmul.f32 -1.442695, %v8868_v32  ;;  %v14262_v30 = vmul.f32 -1.442695, %v8870_v10  ;;  %v25365_v10 = vld [vmem:[#allocation160_spill] sm:$0xff] }
0x1c68   :  { %19350 = vpow2.f32 %v14260_v43 }
0x1c69   :  { %19352 = vpow2.f32 %v14261_v24 }
0x1c6a   :  { %19354 = vpow2.f32 %v14262_v30 }
0x1c6b   :  { %19356 = vtanh.f32 %v8869_v12  ;;  %v25367_v12 = vld [vmem:[#allocation67_spill] sm:$0xff] }
0x1c72   :  { %v19351_v25 = vpop.eup %19350 }
0x1c73   :  { %v19353_v9 = vpop.eup %19352  ;;  %v8874_v33 = vadd.f32 1.0, %v19351_v25  ;;  %v23014_v63 = vpop.f32.mrb[60].mxu0 }
0x1c74   :  { %v8880_v35 = vadd.f32 1.0, %v19353_v9  ;;  %v15459_v29 = vpop.f32.mrb[61].mxu0  ;;  %v19355_v36 = vpop.eup %19354  ;;  %v14263_v9 = vld [vmem:[%s23940_s18 + $0x8] sm:$0x3] }
0x1c75   :  { %19358 = vrcp.f32 %v8874_v33  ;;  %v19357_v32 = vpop.eup %19356  ;;  %v8887_v39 = vadd.f32 1.0, %v19355_v36  ;;  %v25369_v36 = vld [vmem:[#allocation71_spill] sm:$0xff] }
0x1c76   :  { %19360 = vrcp.f32 %v8880_v35  ;;  %v9511_v35 = vpop.permute.xlu1 %9510 }
0x1c77   :  { %19362 = vrcp.f32 %v8887_v39  ;;  %v25373_v39 = vld [vmem:[#allocation72_spill] sm:$0xff] }
0x1c7f   :  { %v19359_v43 = vpop.eup %19358 }
0x1c80   :  { %v19361_v34 = vpop.eup %19360  ;;  %v8891_v24 = vmul.f32 %v19359_v43, %v19357_v32  ;;  %v25370_v32 = vld [vmem:[#allocation66_spill] sm:$0xff]  ;;  %v9513_v43 = vsel %vm978_vm4, %v22798_v51, %v9511_v35  ;;  %v25377_v51 = vld [vmem:[#allocation79_spill] sm:$0xff]  ;;  %v25380_v35 = vld [vmem:[#allocation85_spill] sm:$0xff] }
0x1c81   :  { %v8890_v55 = vmul.f32 %v19361_v34, %v25365_v10  ;;  %v19363_v30 = vpop.eup %19362  ;;  %v25371_v34 = vld [vmem:[#allocation68_spill] sm:$0xff]  ;;  %v25374_v10 = vld [vmem:[#allocation73_spill] sm:$0xff] }
0x1c83   :  { %v23017_v4 = vadd.f32 %v8891_v24, %v8890_v55  ;;  %v25368_v55 = vld [vmem:[#allocation69_spill] sm:$0xff]  ;;  %v25372_v24 = vld [vmem:[#allocation70_spill] sm:$0xff] }
0x1c85   :  { %25366 = vst [vmem:[#allocation189_spill] sm:$0xff] %v23017_v4  ;;  %19364 = vtanh.f32 %v23017_v4 }
0x1c8f   :  { %v19365_v25 = vpop.eup %19364 }
0x1c90   :  { %v8894_v33 = vmul.f32 %v19365_v25, %v19363_v30  ;;  %v25375_v30 = vld [vmem:[#allocation75_spill] sm:$0xff]  ;;  %v25376_v25 = vld [vmem:[#allocation77_spill] sm:$0xff] }
0x1c92   :  { %v23023_v29 = vmul.f32 %v14263_v9, %v8894_v33  ;;  %v25378_v9 = vld [vmem:[#allocation81_spill] sm:$0xff]  ;;  %v25379_v33 = vld [vmem:[#allocation83_spill] sm:$0xff] }
0x1c94   :  { %15493 = vmatmul.mubr.f32.vlgmr.msra.gmra.mrb[58].mxu1 %v23023_v29 }
0x1c95   :  { %17864 = vmatpush1.bf16.msra.mxu1 %v25367_v12  ;;  %9581 = vmatprep.mubr.f32.mxu1 %v24486_v3 }
0x1c96   :  { %17866 = vmatprep.subr.bf16.mxu1 %v25368_v55 }
0x1c99   :  { %17868 = vmatpush1.bf16.msra.mxu1 %v25369_v36  ;;  %v25392_v36 = vld [vmem:[#allocation109_spill] sm:$0xff] }
0x1c9a   :  { %17870 = vmatprep.subr.bf16.mxu1 %v25370_v32  ;;  %v25391_v32 = vld [vmem:[#allocation108_spill] sm:$0xff] }
0x1c9c   :  { %14276 = vmatmul.mubr.msk.f32.vlgmr.msra.gmra.mrb[60].mxu1 %vm631_vm2, %v9513_v43 }
0x1c9d   :  { %17872 = vmatpush1.bf16.msra.mxu1 %v25371_v34  ;;  %9652 = vmatprep.mubr.f32.mxu1 %v24486_v3  ;;  %v25386_v34 = vld [vmem:[#allocation97_spill] sm:$0xff] }
0x1c9e   :  { %17874 = vmatprep.subr.bf16.mxu1 %v25372_v24  ;;  %v25381_v24 = vld [vmem:[#allocation87_spill] sm:$0xff] }
0x1ca1   :  { %17876 = vmatpush1.bf16.msra.mxu1 %v25373_v39  ;;  %v25382_v39 = vld [vmem:[#allocation89_spill] sm:$0xff] }
0x1ca2   :  { %17878 = vmatprep.subr.bf16.mxu1 %v25374_v10  ;;  %v25383_v10 = vld [vmem:[#allocation91_spill] sm:$0xff] }
0x1ca4   :  { %14277 = vmatmul.mubr.msk.f32.vlgmr.msra.gmra.mrb[62].mxu1 %vm631_vm2, %v9513_v43  ;;  %v25384_v43 = vld [vmem:[#allocation93_spill] sm:$0xff] }
0x1ca5   :  { %17880 = vmatpush1.bf16.msra.mxu1 %v25375_v30  ;;  %9723 = vmatprep.mubr.f32.mxu1 %v24486_v3  ;;  %v25385_v30 = vld [vmem:[#allocation95_spill] sm:$0xff] }
0x1ca6   :  { %17882 = vmatprep.subr.bf16.mxu1 %v25376_v25  ;;  %v25387_v25 = vld [vmem:[#allocation99_spill] sm:$0xff] }
0x1ca9   :  { %17884 = vmatpush1.bf16.msra.mxu1 %v25377_v51  ;;  %v25388_v51 = vld [vmem:[#allocation101_spill] sm:$0xff] }
0x1caa   :  { %17886 = vmatprep.subr.bf16.mxu1 %v25378_v9  ;;  %v25389_v9 = vld [vmem:[#allocation103_spill] sm:$0xff] }
0x1cad   :  { %17888 = vmatpush1.bf16.msra.mxu1 %v25379_v33  ;;  %v25390_v33 = vld [vmem:[#allocation74_spill] sm:$0xff] }
0x1cae   :  { %17890 = vmatprep.subr.bf16.mxu1 %v25380_v35 }
0x1cb1   :  { %17892 = vmatpush1.bf16.msra.mxu1 %v25381_v24 }
0x1cb2   :  { %17894 = vmatprep.subr.bf16.mxu1 %v25382_v39 }
0x1cb5   :  { %17896 = vmatpush1.bf16.msra.mxu1 %v25383_v10 }
0x1cb6   :  { %17898 = vmatprep.subr.bf16.mxu1 %v25384_v43 }
0x1cb9   :  { %17900 = vmatpush1.bf16.msra.mxu1 %v25385_v30 }
0x1cba   :  { %17902 = vmatprep.subr.bf16.mxu1 %v25386_v34 }
0x1cbd   :  { %17904 = vmatpush1.bf16.msra.mxu1 %v25387_v25 }
0x1cbe   :  { %17906 = vmatprep.subr.bf16.mxu1 %v25388_v51 }
0x1cc1   :  { %17908 = vmatpush1.bf16.msra.mxu1 %v25389_v9 }
0x1cc2   :  { %17910 = vmatprep.subr.bf16.mxu1 %v25390_v33 }
0x1cc3   :  { %v9398_v35 = vpop.f32.mrb[62].mxu0 }
0x1cc4   :  { %v9400_v24 = vpop.f32.mrb[63].mxu0  ;;  %v9478_v10 = vadd.f32 %v9398_v35, %v25392_v36 }
0x1cc5   :  { %v9479_v39 = vadd.f32 %v9400_v24, %v25391_v32 }
0x1cc6   :  { %v14272_v43 = vmul.f32 -1.442695, %v9478_v10 }
0x1cc7   :  { %v14273_v55 = vmul.f32 -1.442695, %v9479_v39 }
0x1cc9   :  { %19366 = vpow2.f32 %v14273_v55  ;;  %v25393_v55 = vld [vmem:[#allocation187_spill] sm:$0xff] }
0x1cca   :  { %19368 = vpow2.f32 %v14272_v43 }
0x1cd3   :  { %v19367_v30 = vpop.eup %19366 }
0x1cd4   :  { %v19369_v34 = vpop.eup %19368  ;;  %v9491_v12 = vadd.f32 1.0, %v19367_v30 }
0x1cd5   :  { %v9485_v25 = vadd.f32 1.0, %v19369_v34 }
0x1cd6   :  { %19370 = vrcp.f32 %v9491_v12 }
0x1cd7   :  { %19372 = vrcp.f32 %v9485_v25  ;;  %v14275_v25 = vld [vmem:[%s23930_s17 + $0xa] sm:$0x3] }
0x1ce0   :  { %v19371_v35 = vpop.eup %19370 }
0x1ce1   :  { %v19373_v39 = vpop.eup %19372  ;;  %v9501_v43 = vmul.f32 %v19371_v35, %v25393_v55  ;;  %v25399_v35 = vld [vmem:[#allocation84_spill] sm:$0xff]  ;;  %v25402_v55 = vld [vmem:[#allocation90_spill] sm:$0xff] }
0x1ce3   :  { %v9469_v4 = vpop.f32.mrb[64].mxu0 }
0x1ce4   :  { %v9480_v9 = vadd.f32 %v9469_v4, %v24695_v2  ;;  %v9471_v51 = vpop.f32.mrb[65].mxu0 }
0x1ce5   :  { %v9481_v33 = vadd.f32 %v9471_v51, %v24696_v45 }
0x1ce6   :  { %19374 = vtanh.f32 %v9480_v9 }
0x1ce7   :  { %v14274_v24 = vmul.f32 -1.442695, %v9481_v33  ;;  %v25395_v33 = vld [vmem:[#allocation76_spill] sm:$0xff] }
0x1ce9   :  { %19376 = vpow2.f32 %v14274_v24  ;;  %v25398_v24 = vld [vmem:[#allocation82_spill] sm:$0xff] }
0x1cf0   :  { %v19375_v10 = vpop.eup %19374 }
0x1cf1   :  { %v9502_v36 = vmul.f32 %v19375_v10, %v19373_v39  ;;  %v25400_v39 = vld [vmem:[#allocation86_spill] sm:$0xff]  ;;  %v25401_v10 = vld [vmem:[#allocation88_spill] sm:$0xff] }
0x1cf3   :  { %v19377_v32 = vpop.eup %19376  ;;  %v23062_v30 = vadd.f32 %v9502_v36, %v9501_v43  ;;  %v25396_v36 = vld [vmem:[#allocation78_spill] sm:$0xff]  ;;  %v25403_v43 = vld [vmem:[#allocation92_spill] sm:$0xff] }
0x1cf4   :  { %v9498_v34 = vadd.f32 1.0, %v19377_v32  ;;  %v25397_v32 = vld [vmem:[#allocation80_spill] sm:$0xff] }
0x1cf5   :  { %25394 = vst [vmem:[#allocation191_spill] sm:$0xff] %v23062_v30  ;;  %19378 = vtanh.f32 %v23062_v30 }
0x1cf6   :  { %19380 = vrcp.f32 %v9498_v34  ;;  %v25404_v34 = vld [vmem:[#allocation94_spill] sm:$0xff] }
0x1cff   :  { %v19379_v4 = vpop.eup %19378 }
0x1d00   :  { %v19381_v12 = vpop.eup %19380 }
0x1d01   :  { %v9505_v51 = vmul.f32 %v19381_v12, %v19379_v4  ;;  %v25405_v4 = vld [vmem:[#allocation96_spill] sm:$0xff]  ;;  %v25406_v12 = vld [vmem:[#allocation98_spill] sm:$0xff] }
0x1d03   :  { %v23068_v9 = vmul.f32 %v14275_v25, %v9505_v51  ;;  %v25407_v25 = vld [vmem:[#allocation100_spill] sm:$0xff]  ;;  %v25408_v51 = vld [vmem:[#allocation102_spill] sm:$0xff] }
0x1d05   :  { %9724 = vmatmul.mubr.f32.vlgmr.msra.gmra.mrb[60].mxu1 %v23068_v9 }
0x1d06   :  { %17912 = vmatpush1.bf16.msra.mxu1 %v25395_v33  ;;  %9794 = vmatprep.mubr.f32.mxu1 %v24486_v3 }
0x1d07   :  { %17914 = vmatprep.subr.bf16.mxu1 %v25396_v36 }
0x1d0a   :  { %17916 = vmatpush1.bf16.msra.mxu1 %v25397_v32 }
0x1d0b   :  { %17918 = vmatprep.subr.bf16.mxu1 %v25398_v24  ;;  %v25409_v24 = vld [vmem:[#allocation104_spill] sm:$0xff] }
0x1d0e   :  { %17920 = vmatpush1.bf16.msra.mxu1 %v25399_v35  ;;  %v25410_v35 = vld [vmem:[#allocation105_spill] sm:$0xff] }
0x1d0f   :  { %17922 = vmatprep.subr.bf16.mxu1 %v25400_v39  ;;  %v25421_v39 = vld [vmem:[#allocation133_spill] sm:$0xff] }
0x1d12   :  { %17924 = vmatpush1.bf16.msra.mxu1 %v25401_v10  ;;  %v25411_v10 = vld [vmem:[#allocation113_spill] sm:$0xff] }
0x1d13   :  { %17926 = vmatprep.subr.bf16.mxu1 %v25402_v55  ;;  %v25412_v55 = vld [vmem:[#allocation115_spill] sm:$0xff] }
0x1d16   :  { %17928 = vmatpush1.bf16.msra.mxu1 %v25403_v43  ;;  %v25413_v43 = vld [vmem:[#allocation117_spill] sm:$0xff] }
0x1d17   :  { %17930 = vmatprep.subr.bf16.mxu1 %v25404_v34  ;;  %v25414_v34 = vld [vmem:[#allocation119_spill] sm:$0xff] }
0x1d1a   :  { %17932 = vmatpush1.bf16.msra.mxu1 %v25405_v4  ;;  %v25415_v4 = vld [vmem:[#allocation121_spill] sm:$0xff] }
0x1d1b   :  { %17934 = vmatprep.subr.bf16.mxu1 %v25406_v12  ;;  %v25416_v12 = vld [vmem:[#allocation123_spill] sm:$0xff] }
0x1d1e   :  { %17936 = vmatpush1.bf16.msra.mxu1 %v25407_v25  ;;  %v25417_v25 = vld [vmem:[#allocation125_spill] sm:$0xff] }
0x1d1f   :  { %17938 = vmatprep.subr.bf16.mxu1 %v25408_v51  ;;  %v25418_v51 = vld [vmem:[#allocation127_spill] sm:$0xff] }
0x1d22   :  { %17940 = vmatpush1.bf16.msra.mxu1 %v25409_v24  ;;  %v25419_v24 = vld [vmem:[#allocation129_spill] sm:$0xff] }
0x1d23   :  { %17942 = vmatprep.subr.bf16.mxu1 %v25410_v35  ;;  %v25420_v35 = vld [vmem:[#allocation131_spill] sm:$0xff] }
0x1d25   :  { %9795 = vmatmul.mubr.f32.vlgmr.msra.gmra.mrb[62].mxu1 %v23068_v9 }
0x1d26   :  { %17944 = vmatpush3.bf16.msra.mxu1 %v25411_v10  ;;  %v25422_v10 = vld [vmem:[#allocation135_spill] sm:$0xff] }
0x1d27   :  { %17946 = vmatprep.subr.bf16.mxu1 %v25412_v55  ;;  %v25423_v55 = vld [vmem:[#allocation137_spill] sm:$0xff] }
0x1d2a   :  { %17948 = vmatpush3.bf16.msra.mxu1 %v25413_v43  ;;  %v25424_v43 = vld [vmem:[#allocation139_spill] sm:$0xff] }
0x1d2b   :  { %17950 = vmatprep.subr.bf16.mxu1 %v25414_v34  ;;  %v25425_v34 = vld [vmem:[#allocation141_spill] sm:$0xff] }
0x1d2e   :  { %17952 = vmatpush3.bf16.msra.mxu1 %v25415_v4 }
0x1d2f   :  { %17954 = vmatprep.subr.bf16.mxu1 %v25416_v12 }
0x1d32   :  { %17956 = vmatpush3.bf16.msra.mxu1 %v25417_v25 }
0x1d33   :  { %17958 = vmatprep.subr.bf16.mxu1 %v25418_v51 }
0x1d36   :  { %17960 = vmatpush3.bf16.msra.mxu1 %v25419_v24  ;;  %v25428_v24 = vld [vmem:[#allocation145_spill] sm:$0xff] }
0x1d37   :  { %17962 = vmatprep.subr.bf16.mxu1 %v25420_v35  ;;  %v23109_v35 = vld [vmem:[%s23941_s16] ss:$0 sm:$0xff] }
0x1d38   :  { %25426 = vst [vmem:[#allocation192_spill] sm:$0xff] %v23109_v35 }
0x1d3a   :  { %17964 = vmatpush3.bf16.msra.mxu1 %v25421_v39 }
0x1d3b   :  { %17966 = vmatprep.subr.bf16.mxu1 %v25422_v10 }
0x1d3e   :  { %17968 = vmatpush3.bf16.msra.mxu1 %v25423_v55 }
0x1d3f   :  { %17970 = vmatprep.subr.bf16.mxu1 %v25424_v43 }
0x1d42   :  { %17972 = vmatpush3.bf16.msra.mxu1 %v25425_v34  ;;  %v25427_v34 = vld [vmem:[#allocation143_spill] sm:$0xff] }
0x1d43   :  { %18005 = vmatprep.subr.bf16.mxu1 %v24616_v0 }
0x1d67   :  { %v9034_v12 = vpop.f32.mrb[58].mxu1 }
0x1d68   :  { %v9035_v25 = vadd.f32 %v9034_v12, %v23014_v63  ;;  %v15494_v51 = vpop.f32.mrb[59].mxu1 }
0x1d69   :  { %v25429_v51 = vld [vmem:[#allocation147_spill] sm:$0xff] }
0x1d6a   :  { %v9038_v39 = vadd.f32 %v23109_v35, %v9035_v25  ;;  %v25430_v25 = vld [vmem:[#allocation144_spill] sm:$0xff] }
0x1d6c   :  { %14265 = vst.msk [vmem:[%s23942_s19 + $0x8] sm:$0x3] %vm2252_vm7, %v9038_v39 }
0x1dd8   :  { %v9725_v43 = vpop.f32.mrb[60].mxu1 }
0x1dd9   :  { %v9801_v55 = vadd.f32 %v9725_v43, %v25427_v34  ;;  %v9727_v10 = vpop.f32.mrb[61].mxu1  ;;  %v25431_v34 = vld [vmem:[#allocation146_spill] sm:$0xff] }
0x1dda   :  { %v9802_v4 = vadd.f32 %v9727_v10, %v25428_v24 }
0x1ddc   :  { %19382 = vtanh.f32 %v9802_v4  ;;  %v25432_v4 = vld [vmem:[#allocation149_spill] sm:$0xff] }
0x1ddd   :  { %19384 = vtanh.f32 %v9801_v55 }
0x1de6   :  { %v19383_v63 = vpop.eup %19382 }
0x1de7   :  { %v19385_v12 = vpop.eup %19384  ;;  %9873 = vmatprep.mubr.f32.mxu1 %v19383_v63  ;;  %v25433_v63 = vld [vmem:[#allocation150_spill] sm:$0xff] }
0x1de8   :  { %9874 = vmatmul.mubr.f32.vlgmr.msra.gmra.mrb[64].mxu1 %v19385_v12  ;;  %v25434_v12 = vld [vmem:[#allocation152_spill] sm:$0xff] }
0x1de9   :  { %18007 = vmatpush3.bf16.msra.mxu1 %v25429_v51  ;;  %15499 = vmatprep.mubr.msk.f32.mxu1 %vm19507_vm5, %v24486_v3  ;;  %v25435_v51 = vld [vmem:[#allocation153_spill] sm:$0xff] }
0x1dea   :  { %18008 = vmatprep.subr.bf16.mxu1 %v24616_v0 }
0x1df8   :  { %v9796_v39 = vpop.f32.mrb[62].mxu1 }
0x1df9   :  { %v9803_v35 = vadd.f32 %v9796_v39, %v25430_v25  ;;  %v9798_v43 = vpop.f32.mrb[63].mxu1  ;;  %v25436_v39 = vld [vmem:[#allocation163_spill] sm:$0xff]  ;;  %v25437_v25 = vld [vmem:[#allocation165_spill] sm:$0xff] }
0x1dfa   :  { %v9804_v32 = vadd.f32 %v9798_v43, %v25431_v34 }
0x1dfc   :  { %19386 = vtanh.f32 %v9804_v32  ;;  %v25438_v32 = vld [vmem:[#allocation167_spill] sm:$0xff] }
0x1dfd   :  { %19388 = vtanh.f32 %v9803_v35  ;;  %v25439_v35 = vld [vmem:[#allocation169_spill] sm:$0xff] }
0x1e06   :  { %v19387_v10 = vpop.eup %19386 }
0x1e07   :  { %v19389_v55 = vpop.eup %19388  ;;  %9943 = vmatprep.mubr.f32.mxu0 %v19387_v10 }
0x1e08   :  { %9944 = vmatmul.mubr.f32.vlgmr.msra.gmra.mrb[66].mxu0 %v19389_v55 }
0x1e09   :  { %18030 = vmatpush1.bf16.msra.mxu0 %v25432_v4  ;;  %10269 = vmatprep.mubr.f32.mxu0 %v24486_v3 }
0x1e0a   :  { %18032 = vmatprep.subr.bf16.mxu0 %v25433_v63 }
0x1e0d   :  { %18034 = vmatpush1.bf16.msra.mxu0 %v25434_v12 }
0x1e0e   :  { %18036 = vmatprep.subr.bf16.mxu0 %v25435_v51 }
0x1e11   :  { %18038 = vmatpush1.bf16.msra.mxu0 %v25436_v39 }
0x1e12   :  { %18040 = vmatprep.subr.bf16.mxu0 %v25437_v25 }
0x1e15   :  { %18042 = vmatpush1.bf16.msra.mxu0 %v25438_v32 }
0x1e16   :  { %18052 = vmatprep.subr.bf16.mxu0 %v25439_v35 }
0x1ebb   :  { %v14881_v43 = vpop.f32.mrb[64].mxu1 }
0x1ebc   :  { %v14882_v10 = vpop.f32.mrb[65].mxu1 }
0x1ebd   :  { %v14883_v55 = vadd.f32 %v14882_v10, %v14881_v43  ;;  %v25443_v43 = vld [vmem:[#allocation200_spill] sm:$0xff]  ;;  %v25444_v10 = vld [vmem:[#allocation201_spill] sm:$0xff] }
0x1edb   :  { %v14916_v4 = vpop.f32.mrb[66].mxu0 }
0x1edc   :  { %v14917_v34 = vpop.f32.mrb[67].mxu0 }
0x1edd   :  { %v14918_v24 = vadd.f32 %v14917_v34, %v14916_v4 }
0x1edf   :  { %v9946_v36 = vadd.f32 %v14918_v24, %v14883_v55  ;;  %v25445_v55 = vld [vmem:[#allocation202_spill] sm:$0xff] }
0x1ee1   :  { %v9949_v63 = vsel %vm72_vm1, %v9946_v36, -inf }
0x1ee2   :  { %9950 = vmax.xlane.f32.xlu1 %v9949_v63 }
0x1f6f   :  { %v9951_v12 = vpop.xlane.xlu1 %9950 }
0x1f70   :  { %v9952_v51 = vsub.f32 %v9946_v36, %v9951_v12 }
0x1f72   :  { %v9953_v33 = vmul.f32 1.442695, %v9952_v51 }
0x1f74   :  { %19390 = vpow2.f32 %v9953_v33 }
0x1f7e   :  { %v19391_v39 = vpop.eup %19390 }
0x1f7f   :  { %v9955_v25 = vsel %vm72_vm1, %v19391_v39, 0.0 }
0x1f80   :  { %9956 = vadd.xlane.f32.xlu0 %v9955_v25 }
0x200d   :  { %v9957_v32 = vpop.xlane.xlu0 %9956 }
0x200e   :  { %19392 = vrcp.f32 %v9957_v32  ;;  %v25441_v32 = vld [vmem:[#allocation198_spill] sm:$0xff] }
0x2018   :  { %v19393_v35 = vpop.eup %19392 }
0x2019   :  { %v23135_v30 = vmul.f32 %v19393_v35, %v19391_v39  ;;  %v25442_v35 = vld [vmem:[#allocation199_spill] sm:$0xff] }
0x201b   :  { %14290 = vst.msk [vmem:[%s23934_s20 + $0xa] sm:$0x3] %vm72_vm1, %v23135_v30  ;;  %v23144_v36 = vadd.f32 %v23135_v30, %v22807_v40  ;;  %v9967_v33 = vrot.slane %v23135_v30, %v24745_v46 }
0x201d   :  { %11207 = vrot.lane.b32.xlu0 %v23144_v36, %s19504_s4  ;;  %v9975_v24 = vrot.slane %v9967_v33, %v24745_v46  ;;  %v9968_v34 = vcombine.high %v9967_v33, %v9967_v33  ;;  %v25446_v33 = vld [vmem:[#allocation203_spill] sm:$0xff] }
0x201f   :  { %15500 = vmatmul.mubr.msk.f32.vlgmr.msra.gmra.mrb[66].mxu1 %vm978_vm4, %v9975_v24  ;;  %v9982_v51 = vrot.slane %v9968_v34, %v24745_v46  ;;  %v25447_v24 = vld [vmem:[#allocation204_spill] sm:$0xff]  ;;  %v25448_v34 = vld [vmem:[#allocation205_spill] sm:$0xff] }
0x2020   :  { %18010 = vmatpush3.bf16.msra.mxu1 %v24918_v23  ;;  %15506 = vmatprep.mubr.msk.f32.mxu1 %vm19507_vm5, %v24486_v3 }
0x2021   :  { %18012 = vmatprep.subr.bf16.mxu1 %v24919_v59 }
0x2023   :  { %15507 = vmatmul.mubr.msk.f32.vlgmr.msra.gmra.mrb[68].mxu1 %vm978_vm4, %v9982_v51  ;;  %v25449_v51 = vld [vmem:[#allocation206_spill] sm:$0xff] }
0x2024   :  { %18014 = vmatpush1.bf16.msra.mxu1 %v24920_v1  ;;  %10198 = vmatprep.mubr.f32.mxu1 %v24486_v3 }
0x2025   :  { %18016 = vmatprep.subr.bf16.mxu1 %v24749_v21 }
0x2028   :  { %18018 = vmatpush1.bf16.msra.mxu1 %v24750_v19 }
0x2029   :  { %18020 = vmatprep.subr.bf16.mxu1 %v24921_v56 }
0x202c   :  { %18022 = vmatpush1.bf16.msra.mxu1 %v24922_v61 }
0x202d   :  { %18024 = vmatprep.subr.bf16.mxu1 %v25092_v26 }
0x2030   :  { %18026 = vmatpush1.bf16.msra.mxu1 %v25093_v42 }
0x2031   :  { %18044 = vmatprep.subr.bf16.mxu1 %v25094_v27 }
0x20f2   :  { %v10051_v40 = vpop.f32.mrb[66].mxu1 }
0x20f3   :  { %v15501_v25 = vpop.f32.mrb[67].mxu1 }
0x20f4   :  { %v25451_v25 = vld [vmem:[#allocation208_spill] sm:$0xff] }
0x20f6   :  { %v10123_v4 = vpop.f32.mrb[68].mxu1 }
0x20f7   :  { %v10130_v63 = vrot.slane %v10123_v4, 7  ;;  %v15508_v12 = vpop.f32.mrb[69].mxu1  ;;  %v25452_v4 = vld [vmem:[#allocation212_spill] sm:$0xff] }
0x20f8   :  { %v25454_v12 = vld [vmem:[#allocation213_spill] sm:$0xff] }
0x20f9   :  { %v23168_v39 = vsel %vm1620_vm6, %v10130_v63, %v10051_v40  ;;  %v25450_v40 = vld [vmem:[#allocation207_spill] sm:$0xff]  ;;  %v25453_v63 = vld [vmem:[#allocation209_spill] sm:$0xff] }
0x20fa   :  { %14280 = vmatmul.mubr.msk.f32.vlgmr.msra.gmra.mrb[70].mxu1 %vm485_vm3, %v23168_v39  ;;  %14281 = vmatmul.mubr.msk.f32.vlgmr.msra.gmra.mrb[68].mxu0 %vm485_vm3, %v23168_v39 }
0x20fb   :  { %18046 = vmatpush1.bf16.msra.mxu1 %v24926_v54  ;;  %18054 = vmatpush1.bf16.msra.mxu0 %v25095_v22 }
0x20fc   :  { %18048 = vmatprep.subr.bf16.mxu1 %v25096_v16  ;;  %18056 = vmatprep.subr.bf16.mxu0 %v25097_v57 }
0x20fd   :  { %10340 = vmatprep.mubr.f32.mxu1 %v24486_v3  ;;  %10411 = vmatprep.mubr.f32.mxu0 %v24486_v3 }
0x20ff   :  { %18050 = vmatpush1.bf16.msra.mxu1 %v25098_v13  ;;  %18058 = vmatpush1.bf16.msra.mxu0 %v25099_v7 }
0x2100   :  { %18060 = vmatprep.subr.bf16.mxu1 %v25100_v18  ;;  %18092 = vmatprep.subr.bf16.mxu0 %v25101_v14 }
0x2102   :  { %14282 = vmatmul.mubr.msk.f32.vlgmr.msra.gmra.mrb[70].mxu1 %vm631_vm2, %v22946_v6  ;;  %14283 = vmatmul.mubr.msk.f32.vlgmr.msra.gmra.mrb[68].mxu0 %vm631_vm2, %v22946_v6  ;;  %v25440_v6 = vld [vmem:[#allocation197_spill] sm:$0xff] }
0x2103   :  { %18062 = vmatpush1.bf16.msra.mxu1 %v24934_v20  ;;  %18094 = vmatpush1.bf16.msra.mxu0 %v25102_v28 }
0x2104   :  { %18064 = vmatprep.subr.bf16.mxu1 %v24936_v8  ;;  %18096 = vmatprep.subr.bf16.mxu0 %v24937_v15 }
0x2105   :  { %10482 = vmatprep.mubr.f32.mxu1 %v24486_v3  ;;  %10553 = vmatprep.mubr.f32.mxu0 %v24486_v3 }
0x2107   :  { %18066 = vmatpush1.bf16.msra.mxu1 %v24938_v31  ;;  %18098 = vmatpush1.bf16.msra.mxu0 %v24939_v50 }
0x2108   :  { %18068 = vmatprep.subr.bf16.mxu1 %v24940_v5  ;;  %18100 = vmatprep.subr.bf16.mxu0 %v24941_v48 }
0x210b   :  { %18070 = vmatpush1.bf16.msra.mxu1 %v24942_v58  ;;  %18102 = vmatpush1.bf16.msra.mxu0 %v24773_v44 }
0x210c   :  { %18072 = vmatprep.subr.bf16.mxu1 %v24943_v47  ;;  %18104 = vmatprep.subr.bf16.mxu0 %v24775_v41 }
0x210f   :  { %18074 = vmatpush1.bf16.msra.mxu1 %v25103_v17  ;;  %18106 = vmatpush1.bf16.msra.mxu0 %v24777_v49 }
0x2110   :  { %18076 = vmatprep.subr.bf16.mxu1 %v24778_v53  ;;  %18108 = vmatprep.subr.bf16.mxu0 %v24779_v52 }
0x2113   :  { %18078 = vmatpush1.bf16.msra.mxu1 %v24780_v11  ;;  %18110 = vmatpush1.bf16.msra.mxu0 %v24781_v62 }
0x2114   :  { %18080 = vmatprep.subr.bf16.mxu1 %v24782_v37  ;;  %18112 = vmatprep.subr.bf16.mxu0 %v25440_v6 }
0x2117   :  { %18082 = vmatpush1.bf16.msra.mxu1 %v25441_v32  ;;  %18114 = vmatpush1.bf16.msra.mxu0 %v25442_v35 }
0x2118   :  { %18084 = vmatprep.subr.bf16.mxu1 %v25443_v43  ;;  %18116 = vmatprep.subr.bf16.mxu0 %v25444_v10 }
0x211b   :  { %18086 = vmatpush1.bf16.msra.mxu1 %v25445_v55  ;;  %18118 = vmatpush1.bf16.msra.mxu0 %v25446_v33  ;;  %v25498_v33 = vld [vmem:[#allocation38_spill] sm:$0xff] }
0x211c   :  { %18088 = vmatprep.subr.bf16.mxu1 %v25447_v24  ;;  %18120 = vmatprep.subr.bf16.mxu0 %v25448_v34  ;;  %v25467_v34 = vld [vmem:[#allocation21_spill] sm:$0xff]  ;;  %v25471_v24 = vld [vmem:[#allocation219_spill] sm:$0xff]  ;;  %v25500_v55 = vld [vmem:[#allocation42_spill] sm:$0xff] }
0x211f   :  { %18090 = vmatpush1.bf16.msra.mxu1 %v25449_v51  ;;  %18122 = vmatpush1.bf16.msra.mxu0 %v25450_v40  ;;  %v25458_v40 = vld [vmem:[#allocation9_spill] sm:$0xff]  ;;  %v25459_v51 = vld [vmem:[#allocation215_spill] sm:$0xff] }
0x2120   :  { %18123 = vmatprep.subr.bf16.mxu1 %v24616_v0  ;;  %18135 = vmatprep.subr.bf16.mxu0 %v24616_v0 }
0x2122   :  { %10483 = vmatmul.mubr.f32.vlgmr.msra.gmra.mrb[70].mxu1 %v23023_v29  ;;  %10554 = vmatmul.mubr.f32.vlgmr.msra.gmra.mrb[68].mxu0 %v23023_v29  ;;  %v25455_v29 = vld [vmem:[#allocation210_spill] sm:$0xff] }
0x2123   :  { %18125 = vmatpush3.bf16.msra.mxu1 %v25451_v25  ;;  %15525 = vmatprep.mubr.msk.f32.mxu1 %vm19507_vm5, %v24486_v3  ;;  %v25456_v25 = vld [vmem:[#allocation214_spill] sm:$0xff] }
0x2124   :  { %18126 = vmatprep.subr.bf16.mxu1 %v24616_v0  ;;  %18137 = vmatpush3.bf16.msra.mxu0 %v25452_v4  ;;  %v25457_v4 = vld [vmem:[#allocation211_spill] sm:$0xff] }
0x2125   :  { %18138 = vmatprep.subr.bf16.mxu0 %v24616_v0  ;;  %15560 = vmatprep.mubr.msk.f32.mxu0 %vm19507_vm5, %v24486_v3 }
0x2127   :  { %18128 = vmatpush3.bf16.msra.mxu1 %v25453_v63  ;;  %v25466_v63 = vld [vmem:[#allocation19_spill] sm:$0xff] }
0x2128   :  { %18129 = vmatprep.subr.bf16.mxu1 %v24616_v0  ;;  %18140 = vmatpush3.bf16.msra.mxu0 %v25454_v12  ;;  %v25460_v12 = vld [vmem:[#allocation11_spill] sm:$0xff] }
0x2129   :  { %18141 = vmatprep.subr.bf16.mxu0 %v24616_v0 }
0x212b   :  { %18131 = vmatpush3.bf16.msra.mxu1 %v25455_v29  ;;  %v25461_v29 = vld [vmem:[#allocation13_spill] sm:$0xff] }
0x212c   :  { %18132 = vmatprep.subr.bf16.mxu1 %v24616_v0  ;;  %18143 = vmatpush3.bf16.msra.mxu0 %v25456_v25  ;;  %v25462_v25 = vld [vmem:[#allocation216_spill] sm:$0xff] }
0x212d   :  { %18144 = vmatprep.subr.bf16.mxu0 %v24616_v0 }
0x212f   :  { %18134 = vmatpush3.bf16.msra.mxu1 %v25457_v4  ;;  %v25463_v4 = vld [vmem:[#allocation15_spill] sm:$0xff] }
0x2130   :  { %18160 = vmatprep.subr.bf16.mxu1 %v25458_v40  ;;  %18146 = vmatpush3.bf16.msra.mxu0 %v25459_v51  ;;  %v25464_v40 = vld [vmem:[#allocation17_spill] sm:$0xff] }
0x2131   :  { %18147 = vmatprep.subr.bf16.mxu0 %v24616_v0  ;;  %v25465_v51 = vld [vmem:[#allocation217_spill] sm:$0xff] }
0x2132   :  { %15526 = vmatmul.mubr.msk.f32.vlgmr.msra.gmra.mrb[72].mxu1 %vm485_vm3, %v23168_v39 }
0x2133   :  { %18162 = vmatpush1.bf16.msra.mxu1 %v25460_v12  ;;  %10806 = vmatprep.mubr.f32.mxu1 %v24486_v3  ;;  %v25468_v12 = vld [vmem:[#allocation218_spill] sm:$0xff] }
0x2134   :  { %18164 = vmatprep.subr.bf16.mxu1 %v25461_v29  ;;  %18149 = vmatpush3.bf16.msra.mxu0 %v25462_v25  ;;  %v25469_v29 = vld [vmem:[#allocation23_spill] sm:$0xff]  ;;  %v25470_v25 = vld [vmem:[#allocation25_spill] sm:$0xff] }
0x2135   :  { %18150 = vmatprep.subr.bf16.mxu0 %v24616_v0 }
0x2137   :  { %18166 = vmatpush1.bf16.msra.mxu1 %v25463_v4  ;;  %v25472_v4 = vld [vmem:[#allocation65_spill] sm:$0xff] }
0x2138   :  { %18168 = vmatprep.subr.bf16.mxu1 %v25464_v40  ;;  %18152 = vmatpush3.bf16.msra.mxu0 %v25465_v51  ;;  %v25473_v51 = vld [vmem:[#allocation27_spill] sm:$0xff]  ;;  %v25497_v40 = vld [vmem:[#allocation36_spill] sm:$0xff] }
0x2139   :  { %18153 = vmatprep.subr.bf16.mxu0 %v24616_v0 }
0x213b   :  { %18170 = vmatpush1.bf16.msra.mxu1 %v25466_v63  ;;  %v25476_v63 = vld [vmem:[#allocation33_spill] sm:$0xff] }
0x213c   :  { %18172 = vmatprep.subr.bf16.mxu1 %v25467_v34  ;;  %18155 = vmatpush3.bf16.msra.mxu0 %v25468_v12  ;;  %v25474_v34 = vld [vmem:[#allocation29_spill] sm:$0xff]  ;;  %v25475_v12 = vld [vmem:[#allocation31_spill] sm:$0xff] }
0x213d   :  { %18156 = vmatprep.subr.bf16.mxu0 %v24616_v0 }
0x213f   :  { %18174 = vmatpush1.bf16.msra.mxu1 %v25469_v29  ;;  %v25477_v29 = vld [vmem:[#allocation35_spill] sm:$0xff] }
0x2140   :  { %18176 = vmatprep.subr.bf16.mxu1 %v25470_v25  ;;  %18158 = vmatpush3.bf16.msra.mxu0 %v25471_v24  ;;  %v25478_v25 = vld [vmem:[#allocation37_spill] sm:$0xff]  ;;  %v25479_v24 = vld [vmem:[#allocation39_spill] sm:$0xff] }
0x2141   :  { %18272 = vmatprep.subr.bf16.mxu0 %v25472_v4  ;;  %v25480_v4 = vld [vmem:[#allocation10_spill] sm:$0xff] }
0x2142   :  { %14292 = vmatmul.mubr.msk.f32.vlgmr.msra.gmra.mrb[74].mxu1 %vm485_vm3, %v23168_v39 }
0x2143   :  { %18178 = vmatpush1.bf16.msra.mxu1 %v25473_v51  ;;  %10877 = vmatprep.mubr.f32.mxu1 %v24486_v3  ;;  %v25481_v51 = vld [vmem:[#allocation12_spill] sm:$0xff] }
0x2144   :  { %18180 = vmatprep.subr.bf16.mxu1 %v25474_v34  ;;  %v25482_v34 = vld [vmem:[#allocation14_spill] sm:$0xff] }
0x2147   :  { %18182 = vmatpush1.bf16.msra.mxu1 %v25475_v12  ;;  %v25483_v12 = vld [vmem:[#allocation16_spill] sm:$0xff] }
0x2148   :  { %18184 = vmatprep.subr.bf16.mxu1 %v25476_v63  ;;  %v25493_v63 = vld [vmem:[#allocation28_spill] sm:$0xff] }
0x214b   :  { %18186 = vmatpush1.bf16.msra.mxu1 %v25477_v29  ;;  %v23283_v29 = vld [vmem:[%s24423_s12 + $0xc] sm:$0x3] }
0x214c   :  { %18188 = vmatprep.subr.bf16.mxu1 %v25478_v25  ;;  %v25484_v25 = vld [vmem:[#allocation41_spill] sm:$0xff] }
0x214f   :  { %18190 = vmatpush1.bf16.msra.mxu1 %v25479_v24  ;;  %v25491_v24 = vld [vmem:[#allocation24_spill] sm:$0xff] }
0x2150   :  { %18192 = vmatprep.subr.bf16.mxu1 %v25480_v4  ;;  %v25485_v4 = vld [vmem:[#allocation43_spill] sm:$0xff] }
0x2152   :  { %14293 = vmatmul.mubr.msk.f32.vlgmr.msra.gmra.mrb[76].mxu1 %vm485_vm3, %v23168_v39  ;;  %v25486_v39 = vld [vmem:[#allocation45_spill] sm:$0xff] }
0x2153   :  { %18194 = vmatpush1.bf16.msra.mxu1 %v25481_v51  ;;  %10951 = vmatprep.mubr.f32.mxu1 %v24486_v3  ;;  %v25487_v51 = vld [vmem:[#allocation47_spill] sm:$0xff] }
0x2154   :  { %18196 = vmatprep.subr.bf16.mxu1 %v25482_v34  ;;  %v25488_v34 = vld [vmem:[#allocation18_spill] sm:$0xff] }
0x2157   :  { %18198 = vmatpush1.bf16.msra.mxu1 %v25483_v12  ;;  %v25489_v12 = vld [vmem:[#allocation20_spill] sm:$0xff] }
0x2158   :  { %18200 = vmatprep.subr.bf16.mxu1 %v25484_v25  ;;  %v25490_v25 = vld [vmem:[#allocation22_spill] sm:$0xff] }
0x215a   :  { %14294 = vmatmul.mubr.msk.f32.vlgmr.msra.gmra.mrb[74].mxu1 %vm631_vm2, %v23283_v29 }
0x215b   :  { %18202 = vmatpush1.bf16.msra.mxu1 %v25485_v4  ;;  %11022 = vmatprep.mubr.f32.mxu1 %v24486_v3  ;;  %v25492_v4 = vld [vmem:[#allocation26_spill] sm:$0xff] }
0x215c   :  { %18204 = vmatprep.subr.bf16.mxu1 %v25486_v39  ;;  %v25494_v39 = vld [vmem:[#allocation30_spill] sm:$0xff] }
0x215f   :  { %18206 = vmatpush1.bf16.msra.mxu1 %v25487_v51  ;;  %v25495_v51 = vld [vmem:[#allocation32_spill] sm:$0xff] }
0x2160   :  { %18208 = vmatprep.subr.bf16.mxu1 %v25488_v34  ;;  %v25496_v34 = vld [vmem:[#allocation34_spill] sm:$0xff] }
0x2162   :  { %14295 = vmatmul.mubr.msk.f32.vlgmr.msra.gmra.mrb[76].mxu1 %vm631_vm2, %v23283_v29 }
0x2163   :  { %18210 = vmatpush1.bf16.msra.mxu1 %v25489_v12  ;;  %11093 = vmatprep.mubr.f32.mxu1 %v24486_v3  ;;  %v25499_v12 = vld [vmem:[#allocation40_spill] sm:$0xff] }
0x2164   :  { %18212 = vmatprep.subr.bf16.mxu1 %v25490_v25  ;;  %v25501_v25 = vld [vmem:[#allocation44_spill] sm:$0xff] }
0x2167   :  { %18214 = vmatpush1.bf16.msra.mxu1 %v25491_v24  ;;  %v25502_v24 = vld [vmem:[#allocation46_spill] sm:$0xff] }
0x2168   :  { %18216 = vmatprep.subr.bf16.mxu1 %v25492_v4  ;;  %v25503_v4 = vld [vmem:[#allocation48_spill] sm:$0xff] }
0x216b   :  { %18218 = vmatpush1.bf16.msra.mxu1 %v25493_v63  ;;  %v25504_v63 = vld [vmem:[#allocation49_spill] sm:$0xff] }
0x216c   :  { %18220 = vmatprep.subr.bf16.mxu1 %v25494_v39  ;;  %v25516_v39 = vld [vmem:[#allocation61_spill] sm:$0xff] }
0x216f   :  { %18222 = vmatpush1.bf16.msra.mxu1 %v25495_v51  ;;  %v25505_v51 = vld [vmem:[#allocation50_spill] sm:$0xff] }
0x2170   :  { %18224 = vmatprep.subr.bf16.mxu1 %v25496_v34  ;;  %v25514_v34 = vld [vmem:[#allocation59_spill] sm:$0xff] }
0x2173   :  { %18226 = vmatpush1.bf16.msra.mxu1 %v25497_v40  ;;  %v25506_v40 = vld [vmem:[#allocation51_spill] sm:$0xff] }
0x2174   :  { %18228 = vmatprep.subr.bf16.mxu1 %v25498_v33  ;;  %v25507_v33 = vld [vmem:[#allocation52_spill] sm:$0xff] }
0x2177   :  { %18230 = vmatpush1.bf16.msra.mxu1 %v25499_v12  ;;  %v25508_v12 = vld [vmem:[#allocation53_spill] sm:$0xff] }
0x2178   :  { %18232 = vmatprep.subr.bf16.mxu1 %v25500_v55  ;;  %v25509_v55 = vld [vmem:[#allocation54_spill] sm:$0xff] }
0x217b   :  { %18234 = vmatpush1.bf16.msra.mxu1 %v25501_v25  ;;  %v25510_v25 = vld [vmem:[#allocation55_spill] sm:$0xff] }
0x217c   :  { %18236 = vmatprep.subr.bf16.mxu1 %v25502_v24  ;;  %v25511_v24 = vld [vmem:[#allocation56_spill] sm:$0xff] }
0x217f   :  { %18238 = vmatpush1.bf16.msra.mxu1 %v25503_v4  ;;  %v25512_v4 = vld [vmem:[#allocation57_spill] sm:$0xff] }
0x2180   :  { %18240 = vmatprep.subr.bf16.mxu1 %v25504_v63  ;;  %v25513_v63 = vld [vmem:[#allocation58_spill] sm:$0xff] }
0x2182   :  { %11094 = vmatmul.mubr.f32.vlgmr.msra.gmra.mrb[74].mxu1 %v23068_v9 }
0x2183   :  { %18242 = vmatpush1.bf16.msra.mxu1 %v25505_v51  ;;  %11164 = vmatprep.mubr.f32.mxu1 %v24486_v3  ;;  %v25515_v51 = vld [vmem:[#allocation60_spill] sm:$0xff] }
0x2184   :  { %18244 = vmatprep.subr.bf16.mxu1 %v25506_v40  ;;  %v25517_v40 = vld [vmem:[#allocation62_spill] sm:$0xff] }
0x2187   :  { %18246 = vmatpush1.bf16.msra.mxu1 %v25507_v33  ;;  %v25518_v33 = vld [vmem:[#allocation63_spill] sm:$0xff] }
0x2188   :  { %18248 = vmatprep.subr.bf16.mxu1 %v25508_v12  ;;  %v25519_v12 = vld [vmem:[#allocation64_spill] sm:$0xff] }
0x218b   :  { %18250 = vmatpush1.bf16.msra.mxu1 %v25509_v55  ;;  %v25520_v55 = vld [vmem:[#allocation106_spill] sm:$0xff] }
0x218c   :  { %18252 = vmatprep.subr.bf16.mxu1 %v25510_v25  ;;  %v25537_v25 = vld [vmem:[#allocation107_spill] sm:$0xff] }
0x218f   :  { %18254 = vmatpush1.bf16.msra.mxu1 %v25511_v24  ;;  %v25521_v24 = vld [vmem:[#allocation114_spill] sm:$0xff] }
0x2190   :  { %18256 = vmatprep.subr.bf16.mxu1 %v25512_v4  ;;  %v25522_v4 = vld [vmem:[#allocation116_spill] sm:$0xff] }
0x2193   :  { %18258 = vmatpush1.bf16.msra.mxu1 %v25513_v63  ;;  %v25523_v63 = vld [vmem:[#allocation118_spill] sm:$0xff] }
0x2194   :  { %18260 = vmatprep.subr.bf16.mxu1 %v25514_v34  ;;  %v25524_v34 = vld [vmem:[#allocation120_spill] sm:$0xff] }
0x2197   :  { %18262 = vmatpush1.bf16.msra.mxu1 %v25515_v51  ;;  %v25525_v51 = vld [vmem:[#allocation122_spill] sm:$0xff] }
0x2198   :  { %18264 = vmatprep.subr.bf16.mxu1 %v25516_v39  ;;  %v25526_v39 = vld [vmem:[#allocation124_spill] sm:$0xff] }
0x219b   :  { %18266 = vmatpush1.bf16.msra.mxu1 %v25517_v40  ;;  %v25527_v40 = vld [vmem:[#allocation126_spill] sm:$0xff] }
0x219c   :  { %18268 = vmatprep.subr.bf16.mxu1 %v25518_v33  ;;  %v25528_v33 = vld [vmem:[#allocation128_spill] sm:$0xff] }
0x219f   :  { %18270 = vmatpush1.bf16.msra.mxu1 %v25519_v12  ;;  %v25529_v12 = vld [vmem:[#allocation130_spill] sm:$0xff] }
0x21a0   :  { %18384 = vmatprep.subr.bf16.mxu1 %v25520_v55  ;;  %v25530_v55 = vld [vmem:[#allocation132_spill] sm:$0xff] }
0x21a2   :  { %11165 = vmatmul.mubr.f32.vlgmr.msra.gmra.mrb[76].mxu1 %v23068_v9  ;;  %v25531_v9 = vld [vmem:[#allocation134_spill] sm:$0xff] }
0x21a3   :  { %18386 = vmatpush3.bf16.msra.mxu1 %v25521_v24  ;;  %v25532_v24 = vld [vmem:[#allocation136_spill] sm:$0xff] }
0x21a4   :  { %18388 = vmatprep.subr.bf16.mxu1 %v25522_v4  ;;  %v25533_v4 = vld [vmem:[#allocation138_spill] sm:$0xff] }
0x21a7   :  { %18390 = vmatpush3.bf16.msra.mxu1 %v25523_v63  ;;  %v25534_v63 = vld [vmem:[#allocation140_spill] sm:$0xff] }
0x21a8   :  { %18392 = vmatprep.subr.bf16.mxu1 %v25524_v34  ;;  %v25535_v34 = vld [vmem:[#allocation142_spill] sm:$0xff] }
0x21ab   :  { %18394 = vmatpush3.bf16.msra.mxu1 %v25525_v51  ;;  %v25536_v51 = vld [vmem:[#allocation148_spill] sm:$0xff] }
0x21ac   :  { %18396 = vmatprep.subr.bf16.mxu1 %v25526_v39 }
0x21af   :  { %18398 = vmatpush3.bf16.msra.mxu1 %v25527_v40 }
0x21b0   :  { %18400 = vmatprep.subr.bf16.mxu1 %v25528_v33 }
0x21b3   :  { %18402 = vmatpush3.bf16.msra.mxu1 %v25529_v12 }
0x21b4   :  { %18404 = vmatprep.subr.bf16.mxu1 %v25530_v55 }
0x21b7   :  { %18406 = vmatpush3.bf16.msra.mxu1 %v25531_v9 }
0x21b8   :  { %18408 = vmatprep.subr.bf16.mxu1 %v25532_v24  ;;  %v25538_v24 = vld [vmem:[#allocation221_spill] sm:$0xff] }
0x21bb   :  { %18410 = vmatpush3.bf16.msra.mxu1 %v25533_v4 }
0x21bc   :  { %18412 = vmatprep.subr.bf16.mxu1 %v25534_v63 }
0x21bf   :  { %18414 = vmatpush3.bf16.msra.mxu1 %v25535_v34 }
0x21c0   :  { %18438 = vmatprep.subr.bf16.mxu1 %v25536_v51 }
0x21f5   :  { %v10484_v39 = vpop.f32.mrb[70].mxu1  ;;  %v10555_v40 = vpop.f32.mrb[68].mxu0 }
0x21f6   :  { %v10564_v33 = vadd.f32 %v10484_v39, %v25537_v25  ;;  %v10486_v10 = vpop.f32.mrb[71].mxu1  ;;  %v10557_v12 = vpop.f32.mrb[69].mxu0  ;;  %v10566_v63 = vadd.f32 %v10555_v40, %v24842_v38 }
0x21f7   :  { %v10565_v55 = vadd.f32 %v10486_v10, %v24840_v60  ;;  %v10567_v4 = vadd.f32 %v10557_v12, %v25538_v24 }
0x21f8   :  { %v14284_v43 = vmul.f32 -1.442695, %v10564_v33 }
0x21f9   :  { %v14285_v9 = vmul.f32 -1.442695, %v10565_v55  ;;  %v14286_v35 = vmul.f32 -1.442695, %v10567_v4  ;;  %v25539_v4 = vld [vmem:[#allocation189_spill] sm:$0xff] }
0x21fa   :  { %19394 = vpow2.f32 %v14284_v43 }
0x21fb   :  { %19396 = vpow2.f32 %v14285_v9 }
0x21fc   :  { %19398 = vpow2.f32 %v14286_v35 }
0x21fd   :  { %19400 = vtanh.f32 %v10566_v63  ;;  %v25541_v63 = vld [vmem:[#allocation67_spill] sm:$0xff] }
0x2204   :  { %v19395_v34 = vpop.eup %19394 }
0x2205   :  { %v19397_v32 = vpop.eup %19396  ;;  %v10571_v51 = vadd.f32 1.0, %v19395_v34  ;;  %v23351_v6 = vpop.f32.mrb[72].mxu1 }
0x2206   :  { %v10577_v39 = vadd.f32 1.0, %v19397_v32  ;;  %v15527_v25 = vpop.f32.mrb[73].mxu1  ;;  %v19399_v10 = vpop.eup %19398  ;;  %v14287_v32 = vld [vmem:[%s23940_s18 + $0xa] sm:$0x3] }
0x2207   :  { %19402 = vrcp.f32 %v10571_v51  ;;  %v19401_v55 = vpop.eup %19400  ;;  %v10584_v12 = vadd.f32 1.0, %v19399_v10  ;;  %v25543_v10 = vld [vmem:[#allocation71_spill] sm:$0xff] }
0x2208   :  { %19404 = vrcp.f32 %v10577_v39  ;;  %v11208_v39 = vpop.permute.xlu0 %11207 }
0x2209   :  { %19406 = vrcp.f32 %v10584_v12  ;;  %v25547_v12 = vld [vmem:[#allocation72_spill] sm:$0xff] }
0x2211   :  { %v19403_v43 = vpop.eup %19402 }
0x2212   :  { %v19405_v33 = vpop.eup %19404  ;;  %v10588_v9 = vmul.f32 %v19403_v43, %v19401_v55  ;;  %v25544_v55 = vld [vmem:[#allocation66_spill] sm:$0xff]  ;;  %v11210_v43 = vsel %vm978_vm4, %v23135_v30, %v11208_v39  ;;  %v25551_v30 = vld [vmem:[#allocation79_spill] sm:$0xff]  ;;  %v25554_v39 = vld [vmem:[#allocation85_spill] sm:$0xff] }
0x2213   :  { %v10587_v24 = vmul.f32 %v19405_v33, %v25539_v4  ;;  %v19407_v35 = vpop.eup %19406  ;;  %v25545_v33 = vld [vmem:[#allocation68_spill] sm:$0xff]  ;;  %v25548_v4 = vld [vmem:[#allocation73_spill] sm:$0xff] }
0x2215   :  { %v23354_v40 = vadd.f32 %v10588_v9, %v10587_v24  ;;  %v25542_v24 = vld [vmem:[#allocation69_spill] sm:$0xff]  ;;  %v25546_v9 = vld [vmem:[#allocation70_spill] sm:$0xff] }
0x2217   :  { %25540 = vst [vmem:[#allocation193_spill] sm:$0xff] %v23354_v40  ;;  %19408 = vtanh.f32 %v23354_v40 }
0x2221   :  { %v19409_v34 = vpop.eup %19408 }
0x2222   :  { %v10591_v51 = vmul.f32 %v19409_v34, %v19407_v35  ;;  %v25549_v35 = vld [vmem:[#allocation75_spill] sm:$0xff]  ;;  %v25550_v34 = vld [vmem:[#allocation77_spill] sm:$0xff] }
0x2224   :  { %v23360_v25 = vmul.f32 %v14287_v32, %v10591_v51  ;;  %v25552_v32 = vld [vmem:[#allocation81_spill] sm:$0xff]  ;;  %v25553_v51 = vld [vmem:[#allocation83_spill] sm:$0xff] }
0x2226   :  { %15561 = vmatmul.mubr.f32.vlgmr.msra.gmra.mrb[70].mxu0 %v23360_v25 }
0x2227   :  { %18274 = vmatpush1.bf16.msra.mxu0 %v25541_v63  ;;  %11278 = vmatprep.mubr.f32.mxu0 %v24486_v3 }
0x2228   :  { %18276 = vmatprep.subr.bf16.mxu0 %v25542_v24 }
0x222b   :  { %18278 = vmatpush1.bf16.msra.mxu0 %v25543_v10  ;;  %v25566_v10 = vld [vmem:[#allocation109_spill] sm:$0xff] }
0x222c   :  { %18280 = vmatprep.subr.bf16.mxu0 %v25544_v55  ;;  %v25565_v55 = vld [vmem:[#allocation108_spill] sm:$0xff] }
0x222e   :  { %14300 = vmatmul.mubr.msk.f32.vlgmr.msra.gmra.mrb[72].mxu0 %vm631_vm2, %v11210_v43 }
0x222f   :  { %18282 = vmatpush1.bf16.msra.mxu0 %v25545_v33  ;;  %11349 = vmatprep.mubr.f32.mxu0 %v24486_v3  ;;  %v25560_v33 = vld [vmem:[#allocation97_spill] sm:$0xff] }
0x2230   :  { %18284 = vmatprep.subr.bf16.mxu0 %v25546_v9  ;;  %v25555_v9 = vld [vmem:[#allocation87_spill] sm:$0xff] }
0x2233   :  { %18286 = vmatpush1.bf16.msra.mxu0 %v25547_v12  ;;  %v25556_v12 = vld [vmem:[#allocation89_spill] sm:$0xff] }
0x2234   :  { %18288 = vmatprep.subr.bf16.mxu0 %v25548_v4  ;;  %v25557_v4 = vld [vmem:[#allocation91_spill] sm:$0xff] }
0x2236   :  { %14301 = vmatmul.mubr.msk.f32.vlgmr.msra.gmra.mrb[74].mxu0 %vm631_vm2, %v11210_v43  ;;  %v25558_v43 = vld [vmem:[#allocation93_spill] sm:$0xff] }
0x2237   :  { %18290 = vmatpush1.bf16.msra.mxu0 %v25549_v35  ;;  %11420 = vmatprep.mubr.f32.mxu0 %v24486_v3  ;;  %v25559_v35 = vld [vmem:[#allocation95_spill] sm:$0xff] }
0x2238   :  { %18292 = vmatprep.subr.bf16.mxu0 %v25550_v34  ;;  %v25561_v34 = vld [vmem:[#allocation99_spill] sm:$0xff] }
0x223b   :  { %18294 = vmatpush1.bf16.msra.mxu0 %v25551_v30  ;;  %v25562_v30 = vld [vmem:[#allocation101_spill] sm:$0xff] }
0x223c   :  { %18296 = vmatprep.subr.bf16.mxu0 %v25552_v32  ;;  %v25563_v32 = vld [vmem:[#allocation103_spill] sm:$0xff] }
0x223f   :  { %18298 = vmatpush1.bf16.msra.mxu0 %v25553_v51  ;;  %v25564_v51 = vld [vmem:[#allocation74_spill] sm:$0xff] }
0x2240   :  { %18300 = vmatprep.subr.bf16.mxu0 %v25554_v39 }
0x2243   :  { %18302 = vmatpush1.bf16.msra.mxu0 %v25555_v9 }
0x2244   :  { %18304 = vmatprep.subr.bf16.mxu0 %v25556_v12 }
0x2247   :  { %18306 = vmatpush1.bf16.msra.mxu0 %v25557_v4 }
0x2248   :  { %18308 = vmatprep.subr.bf16.mxu0 %v25558_v43 }
0x224b   :  { %18310 = vmatpush1.bf16.msra.mxu0 %v25559_v35 }
0x224c   :  { %18312 = vmatprep.subr.bf16.mxu0 %v25560_v33 }
0x224f   :  { %18314 = vmatpush1.bf16.msra.mxu0 %v25561_v34 }
0x2250   :  { %18316 = vmatprep.subr.bf16.mxu0 %v25562_v30 }
0x2253   :  { %18318 = vmatpush1.bf16.msra.mxu0 %v25563_v32 }
0x2254   :  { %18320 = vmatprep.subr.bf16.mxu0 %v25564_v51 }
0x2255   :  { %v11095_v39 = vpop.f32.mrb[74].mxu1 }
0x2256   :  { %v11097_v9 = vpop.f32.mrb[75].mxu1  ;;  %v11175_v4 = vadd.f32 %v11095_v39, %v25566_v10 }
0x2257   :  { %v11176_v12 = vadd.f32 %v11097_v9, %v25565_v55 }
0x2258   :  { %v14296_v43 = vmul.f32 -1.442695, %v11175_v4 }
0x2259   :  { %v14297_v24 = vmul.f32 -1.442695, %v11176_v12 }
0x225b   :  { %19410 = vpow2.f32 %v14297_v24  ;;  %v25567_v24 = vld [vmem:[#allocation191_spill] sm:$0xff] }
0x225c   :  { %19412 = vpow2.f32 %v14296_v43 }
0x2265   :  { %v19411_v35 = vpop.eup %19410 }
0x2266   :  { %v19413_v33 = vpop.eup %19412  ;;  %v11188_v63 = vadd.f32 1.0, %v19411_v35 }
0x2267   :  { %v11182_v34 = vadd.f32 1.0, %v19413_v33 }
0x2268   :  { %19414 = vrcp.f32 %v11188_v63 }
0x2269   :  { %19416 = vrcp.f32 %v11182_v34  ;;  %v14299_v34 = vld [vmem:[%s23930_s17 + $0xc] sm:$0x3] }
0x2272   :  { %v19415_v39 = vpop.eup %19414 }
0x2273   :  { %v19417_v12 = vpop.eup %19416  ;;  %v11198_v43 = vmul.f32 %v19415_v39, %v25567_v24  ;;  %v25573_v39 = vld [vmem:[#allocation84_spill] sm:$0xff]  ;;  %v25576_v24 = vld [vmem:[#allocation90_spill] sm:$0xff] }
0x2275   :  { %v11166_v40 = vpop.f32.mrb[76].mxu1 }
0x2276   :  { %v11177_v32 = vadd.f32 %v11166_v40, %v24695_v2  ;;  %v11168_v30 = vpop.f32.mrb[77].mxu1 }
0x2277   :  { %v11178_v51 = vadd.f32 %v11168_v30, %v24696_v45 }
0x2278   :  { %19418 = vtanh.f32 %v11177_v32 }
0x2279   :  { %v14298_v9 = vmul.f32 -1.442695, %v11178_v51  ;;  %v25569_v51 = vld [vmem:[#allocation76_spill] sm:$0xff] }
0x227b   :  { %19420 = vpow2.f32 %v14298_v9  ;;  %v25572_v9 = vld [vmem:[#allocation82_spill] sm:$0xff] }
0x2282   :  { %v19419_v4 = vpop.eup %19418 }
0x2283   :  { %v11199_v10 = vmul.f32 %v19419_v4, %v19417_v12  ;;  %v25574_v12 = vld [vmem:[#allocation86_spill] sm:$0xff]  ;;  %v25575_v4 = vld [vmem:[#allocation88_spill] sm:$0xff] }
0x2285   :  { %v19421_v55 = vpop.eup %19420  ;;  %v23399_v35 = vadd.f32 %v11199_v10, %v11198_v43  ;;  %v25570_v10 = vld [vmem:[#allocation78_spill] sm:$0xff]  ;;  %v25577_v43 = vld [vmem:[#allocation92_spill] sm:$0xff] }
0x2286   :  { %v11195_v33 = vadd.f32 1.0, %v19421_v55  ;;  %v25571_v55 = vld [vmem:[#allocation80_spill] sm:$0xff] }
0x2287   :  { %25568 = vst [vmem:[#allocation194_spill] sm:$0xff] %v23399_v35  ;;  %19422 = vtanh.f32 %v23399_v35 }
0x2288   :  { %19424 = vrcp.f32 %v11195_v33  ;;  %v25578_v33 = vld [vmem:[#allocation94_spill] sm:$0xff] }
0x2291   :  { %v19423_v40 = vpop.eup %19422 }
0x2292   :  { %v19425_v63 = vpop.eup %19424 }
0x2293   :  { %v11202_v30 = vmul.f32 %v19425_v63, %v19423_v40  ;;  %v25579_v40 = vld [vmem:[#allocation96_spill] sm:$0xff]  ;;  %v25580_v63 = vld [vmem:[#allocation98_spill] sm:$0xff] }
0x2295   :  { %v23405_v32 = vmul.f32 %v14299_v34, %v11202_v30  ;;  %v25581_v34 = vld [vmem:[#allocation100_spill] sm:$0xff]  ;;  %v25582_v30 = vld [vmem:[#allocation102_spill] sm:$0xff] }
0x2297   :  { %11421 = vmatmul.mubr.f32.vlgmr.msra.gmra.mrb[72].mxu0 %v23405_v32 }
0x2298   :  { %18322 = vmatpush1.bf16.msra.mxu0 %v25569_v51  ;;  %11491 = vmatprep.mubr.f32.mxu0 %v24486_v3 }
0x2299   :  { %18324 = vmatprep.subr.bf16.mxu0 %v25570_v10 }
0x229c   :  { %18326 = vmatpush1.bf16.msra.mxu0 %v25571_v55 }
0x229d   :  { %18328 = vmatprep.subr.bf16.mxu0 %v25572_v9  ;;  %v25583_v9 = vld [vmem:[#allocation104_spill] sm:$0xff] }
0x22a0   :  { %18330 = vmatpush1.bf16.msra.mxu0 %v25573_v39  ;;  %v25584_v39 = vld [vmem:[#allocation105_spill] sm:$0xff] }
0x22a1   :  { %18332 = vmatprep.subr.bf16.mxu0 %v25574_v12  ;;  %v25595_v12 = vld [vmem:[#allocation133_spill] sm:$0xff] }
0x22a4   :  { %18334 = vmatpush1.bf16.msra.mxu0 %v25575_v4  ;;  %v25585_v4 = vld [vmem:[#allocation113_spill] sm:$0xff] }
0x22a5   :  { %18336 = vmatprep.subr.bf16.mxu0 %v25576_v24  ;;  %v25586_v24 = vld [vmem:[#allocation115_spill] sm:$0xff] }
0x22a8   :  { %18338 = vmatpush1.bf16.msra.mxu0 %v25577_v43  ;;  %v25587_v43 = vld [vmem:[#allocation117_spill] sm:$0xff] }
0x22a9   :  { %18340 = vmatprep.subr.bf16.mxu0 %v25578_v33  ;;  %v25588_v33 = vld [vmem:[#allocation119_spill] sm:$0xff] }
0x22ac   :  { %18342 = vmatpush1.bf16.msra.mxu0 %v25579_v40  ;;  %v25589_v40 = vld [vmem:[#allocation121_spill] sm:$0xff] }
0x22ad   :  { %18344 = vmatprep.subr.bf16.mxu0 %v25580_v63  ;;  %v25590_v63 = vld [vmem:[#allocation123_spill] sm:$0xff] }
0x22b0   :  { %18346 = vmatpush1.bf16.msra.mxu0 %v25581_v34  ;;  %v25591_v34 = vld [vmem:[#allocation125_spill] sm:$0xff] }
0x22b1   :  { %18348 = vmatprep.subr.bf16.mxu0 %v25582_v30  ;;  %v25592_v30 = vld [vmem:[#allocation127_spill] sm:$0xff] }
0x22b4   :  { %18350 = vmatpush1.bf16.msra.mxu0 %v25583_v9  ;;  %v25593_v9 = vld [vmem:[#allocation129_spill] sm:$0xff] }
0x22b5   :  { %18352 = vmatprep.subr.bf16.mxu0 %v25584_v39  ;;  %v25594_v39 = vld [vmem:[#allocation131_spill] sm:$0xff] }
0x22b7   :  { %11492 = vmatmul.mubr.f32.vlgmr.msra.gmra.mrb[74].mxu0 %v23405_v32 }
0x22b8   :  { %18354 = vmatpush3.bf16.msra.mxu0 %v25585_v4  ;;  %v25596_v4 = vld [vmem:[#allocation135_spill] sm:$0xff] }
0x22b9   :  { %18356 = vmatprep.subr.bf16.mxu0 %v25586_v24  ;;  %v25597_v24 = vld [vmem:[#allocation137_spill] sm:$0xff] }
0x22bc   :  { %18358 = vmatpush3.bf16.msra.mxu0 %v25587_v43  ;;  %v25598_v43 = vld [vmem:[#allocation139_spill] sm:$0xff] }
0x22bd   :  { %18360 = vmatprep.subr.bf16.mxu0 %v25588_v33  ;;  %v25599_v33 = vld [vmem:[#allocation141_spill] sm:$0xff] }
0x22c0   :  { %18362 = vmatpush3.bf16.msra.mxu0 %v25589_v40  ;;  %v25600_v40 = vld [vmem:[#allocation192_spill] sm:$0xff] }
0x22c1   :  { %18364 = vmatprep.subr.bf16.mxu0 %v25590_v63 }
0x22c4   :  { %18366 = vmatpush3.bf16.msra.mxu0 %v25591_v34 }
0x22c5   :  { %18368 = vmatprep.subr.bf16.mxu0 %v25592_v30 }
0x22c8   :  { %18370 = vmatpush3.bf16.msra.mxu0 %v25593_v9 }
0x22c9   :  { %18372 = vmatprep.subr.bf16.mxu0 %v25594_v39 }
0x22cc   :  { %18374 = vmatpush3.bf16.msra.mxu0 %v25595_v12  ;;  %v25601_v12 = vld [vmem:[#allocation143_spill] sm:$0xff] }
0x22cd   :  { %18376 = vmatprep.subr.bf16.mxu0 %v25596_v4 }
0x22d0   :  { %18378 = vmatpush3.bf16.msra.mxu0 %v25597_v24 }
0x22d1   :  { %18380 = vmatprep.subr.bf16.mxu0 %v25598_v43  ;;  %v25602_v43 = vld [vmem:[#allocation145_spill] sm:$0xff] }
0x22d4   :  { %18382 = vmatpush3.bf16.msra.mxu0 %v25599_v33 }
0x22d5   :  { %18415 = vmatprep.subr.bf16.mxu0 %v24616_v0 }
0x22f9   :  { %v10731_v63 = vpop.f32.mrb[70].mxu0 }
0x22fa   :  { %v10732_v34 = vadd.f32 %v10731_v63, %v23351_v6  ;;  %v15562_v30 = vpop.f32.mrb[71].mxu0  ;;  %v25603_v6 = vld [vmem:[#allocation147_spill] sm:$0xff] }
0x22fc   :  { %v10735_v9 = vadd.f32 %v25600_v40, %v10732_v34  ;;  %v25604_v40 = vld [vmem:[#allocation144_spill] sm:$0xff]  ;;  %v25605_v34 = vld [vmem:[#allocation146_spill] sm:$0xff] }
0x22fe   :  { %14289 = vst.msk [vmem:[%s23942_s19 + $0xa] sm:$0x3] %vm2252_vm7, %v10735_v9 }
0x236a   :  { %v11422_v4 = vpop.f32.mrb[72].mxu0 }
0x236b   :  { %v11498_v24 = vadd.f32 %v11422_v4, %v25601_v12  ;;  %v11424_v39 = vpop.f32.mrb[73].mxu0 }
0x236c   :  { %v11499_v55 = vadd.f32 %v11424_v39, %v25602_v43 }
0x236e   :  { %19426 = vtanh.f32 %v11499_v55 }
0x236f   :  { %19428 = vtanh.f32 %v11498_v24  ;;  %v25607_v24 = vld [vmem:[#allocation150_spill] sm:$0xff] }
0x2378   :  { %v19427_v33 = vpop.eup %19426 }
0x2379   :  { %v19429_v10 = vpop.eup %19428  ;;  %11570 = vmatprep.mubr.f32.mxu0 %v19427_v33  ;;  %v25608_v33 = vld [vmem:[#allocation152_spill] sm:$0xff] }
0x237a   :  { %11571 = vmatmul.mubr.f32.vlgmr.msra.gmra.mrb[76].mxu0 %v19429_v10  ;;  %v25606_v10 = vld [vmem:[#allocation149_spill] sm:$0xff] }
0x237b   :  { %18417 = vmatpush3.bf16.msra.mxu0 %v25603_v6  ;;  %15567 = vmatprep.mubr.msk.f32.mxu0 %vm19507_vm5, %v24486_v3  ;;  %v25609_v6 = vld [vmem:[#allocation153_spill] sm:$0xff] }
0x237c   :  { %18418 = vmatprep.subr.bf16.mxu0 %v24616_v0 }
0x238a   :  { %v11493_v9 = vpop.f32.mrb[74].mxu0 }
0x238b   :  { %v11500_v63 = vadd.f32 %v11493_v9, %v25604_v40  ;;  %v11495_v4 = vpop.f32.mrb[75].mxu0  ;;  %v25610_v9 = vld [vmem:[#allocation163_spill] sm:$0xff]  ;;  %v25611_v40 = vld [vmem:[#allocation165_spill] sm:$0xff] }
0x238c   :  { %v11501_v30 = vadd.f32 %v11495_v4, %v25605_v34  ;;  %v25612_v4 = vld [vmem:[#allocation167_spill] sm:$0xff] }
0x238e   :  { %19430 = vtanh.f32 %v11501_v30 }
0x238f   :  { %19432 = vtanh.f32 %v11500_v63  ;;  %v25613_v63 = vld [vmem:[#allocation169_spill] sm:$0xff] }
0x2398   :  { %v19431_v55 = vpop.eup %19430 }
0x2399   :  { %v19433_v39 = vpop.eup %19432  ;;  %11640 = vmatprep.mubr.f32.mxu1 %v19431_v55 }
0x239a   :  { %11641 = vmatmul.mubr.f32.vlgmr.msra.gmra.mrb[78].mxu1 %v19433_v39 }
0x239b   :  { %18440 = vmatpush1.bf16.msra.mxu1 %v25606_v10  ;;  %11966 = vmatprep.mubr.f32.mxu1 %v24486_v3 }
0x239c   :  { %18442 = vmatprep.subr.bf16.mxu1 %v25607_v24 }
0x239f   :  { %18444 = vmatpush1.bf16.msra.mxu1 %v25608_v33 }
0x23a0   :  { %18446 = vmatprep.subr.bf16.mxu1 %v25609_v6 }
0x23a3   :  { %18448 = vmatpush1.bf16.msra.mxu1 %v25610_v9 }
0x23a4   :  { %18450 = vmatprep.subr.bf16.mxu1 %v25611_v40 }
0x23a7   :  { %18452 = vmatpush1.bf16.msra.mxu1 %v25612_v4 }
0x23a8   :  { %18462 = vmatprep.subr.bf16.mxu1 %v25613_v63 }
0x244d   :  { %v14983_v30 = vpop.f32.mrb[76].mxu0 }
0x244e   :  { %v14984_v55 = vpop.f32.mrb[77].mxu0 }
0x244f   :  { %v14985_v39 = vadd.f32 %v14984_v55, %v14983_v30  ;;  %v25617_v30 = vld [vmem:[#allocation200_spill] sm:$0xff]  ;;  %v25618_v55 = vld [vmem:[#allocation201_spill] sm:$0xff] }
0x246d   :  { %v15018_v10 = vpop.f32.mrb[78].mxu1 }
0x246e   :  { %v15019_v34 = vpop.f32.mrb[79].mxu1 }
0x246f   :  { %v15020_v43 = vadd.f32 %v15019_v34, %v15018_v10 }
0x2471   :  { %v11643_v12 = vadd.f32 %v15020_v43, %v14985_v39  ;;  %v25619_v39 = vld [vmem:[#allocation202_spill] sm:$0xff] }
0x2473   :  { %v11646_v24 = vsel %vm72_vm1, %v11643_v12, -inf }
0x2474   :  { %11647 = vmax.xlane.f32.xlu1 %v11646_v24 }
0x2501   :  { %v11648_v33 = vpop.xlane.xlu1 %11647 }
0x2502   :  { %v11649_v6 = vsub.f32 %v11643_v12, %v11648_v33 }
0x2504   :  { %v11650_v51 = vmul.f32 1.442695, %v11649_v6 }
0x2506   :  { %19434 = vpow2.f32 %v11650_v51 }
0x2510   :  { %v19435_v9 = vpop.eup %19434 }
0x2511   :  { %v11652_v40 = vsel %vm72_vm1, %v19435_v9, 0.0 }
0x2512   :  { %11653 = vadd.xlane.f32.xlu0 %v11652_v40 }
0x259f   :  { %v11654_v4 = vpop.xlane.xlu0 %11653 }
0x25a0   :  { %19436 = vrcp.f32 %v11654_v4  ;;  %v25615_v4 = vld [vmem:[#allocation198_spill] sm:$0xff] }
0x25aa   :  { %v19437_v63 = vpop.eup %19436 }
0x25ab   :  { %v23467_v35 = vmul.f32 %v19437_v63, %v19435_v9  ;;  %v25616_v63 = vld [vmem:[#allocation199_spill] sm:$0xff] }
0x25ad   :  { %14314 = vst.msk [vmem:[%s23934_s20 + $0xc] sm:$0x3] %vm72_vm1, %v23467_v35  ;;  %v23476_v12 = vadd.f32 %v23467_v35, %v23144_v36  ;;  %v11664_v51 = vrot.slane %v23467_v35, %v24745_v46 }
0x25af   :  { %12904 = vrot.lane.b32.xlu1 %v23476_v12, %s19504_s4  ;;  %v11672_v43 = vrot.slane %v11664_v51, %v24745_v46  ;;  %v11665_v6 = vcombine.high %v11664_v51, %v11664_v51  ;;  %v25620_v51 = vld [vmem:[#allocation203_spill] sm:$0xff] }
0x25b1   :  { %15568 = vmatmul.mubr.msk.f32.vlgmr.msra.gmra.mrb[78].mxu0 %vm978_vm4, %v11672_v43  ;;  %v11679_v40 = vrot.slane %v11665_v6, %v24745_v46  ;;  %v25621_v43 = vld [vmem:[#allocation204_spill] sm:$0xff]  ;;  %v25622_v6 = vld [vmem:[#allocation205_spill] sm:$0xff] }
0x25b2   :  { %18420 = vmatpush3.bf16.msra.mxu0 %v24918_v23  ;;  %15574 = vmatprep.mubr.msk.f32.mxu0 %vm19507_vm5, %v24486_v3 }
0x25b3   :  { %18422 = vmatprep.subr.bf16.mxu0 %v24919_v59 }
0x25b5   :  { %15575 = vmatmul.mubr.msk.f32.vlgmr.msra.gmra.mrb[80].mxu0 %vm978_vm4, %v11679_v40  ;;  %v25623_v40 = vld [vmem:[#allocation206_spill] sm:$0xff] }
0x25b6   :  { %18424 = vmatpush1.bf16.msra.mxu0 %v24920_v1  ;;  %11895 = vmatprep.mubr.f32.mxu0 %v24486_v3 }
0x25b7   :  { %18426 = vmatprep.subr.bf16.mxu0 %v24749_v21 }
0x25ba   :  { %18428 = vmatpush1.bf16.msra.mxu0 %v24750_v19 }
0x25bb   :  { %18430 = vmatprep.subr.bf16.mxu0 %v24921_v56 }
0x25be   :  { %18432 = vmatpush1.bf16.msra.mxu0 %v24922_v61 }
0x25bf   :  { %18434 = vmatprep.subr.bf16.mxu0 %v25092_v26 }
0x25c2   :  { %18436 = vmatpush1.bf16.msra.mxu0 %v25093_v42 }
0x25c3   :  { %18454 = vmatprep.subr.bf16.mxu0 %v25094_v27 }
0x2684   :  { %v11748_v36 = vpop.f32.mrb[78].mxu0 }
0x2685   :  { %v15569_v34 = vpop.f32.mrb[79].mxu0 }
0x2686   :  { %v25625_v34 = vld [vmem:[#allocation208_spill] sm:$0xff] }
0x2688   :  { %v11820_v10 = vpop.f32.mrb[80].mxu0 }
0x2689   :  { %v11827_v24 = vrot.slane %v11820_v10, 7  ;;  %v15576_v33 = vpop.f32.mrb[81].mxu0  ;;  %v25626_v10 = vld [vmem:[#allocation212_spill] sm:$0xff] }
0x268a   :  { %v25628_v33 = vld [vmem:[#allocation213_spill] sm:$0xff] }
0x268b   :  { %v23500_v9 = vsel %vm1620_vm6, %v11827_v24, %v11748_v36  ;;  %v25624_v36 = vld [vmem:[#allocation207_spill] sm:$0xff]  ;;  %v25627_v24 = vld [vmem:[#allocation209_spill] sm:$0xff] }
0x268c   :  { %14304 = vmatmul.mubr.msk.f32.vlgmr.msra.gmra.mrb[82].mxu0 %vm485_vm3, %v23500_v9  ;;  %14305 = vmatmul.mubr.msk.f32.vlgmr.msra.gmra.mrb[80].mxu1 %vm485_vm3, %v23500_v9 }
0x268d   :  { %18456 = vmatpush1.bf16.msra.mxu0 %v24926_v54  ;;  %18464 = vmatpush1.bf16.msra.mxu1 %v25095_v22 }
0x268e   :  { %18458 = vmatprep.subr.bf16.mxu0 %v25096_v16  ;;  %18466 = vmatprep.subr.bf16.mxu1 %v25097_v57 }
0x268f   :  { %12037 = vmatprep.mubr.f32.mxu0 %v24486_v3  ;;  %12108 = vmatprep.mubr.f32.mxu1 %v24486_v3 }
0x2691   :  { %18460 = vmatpush1.bf16.msra.mxu0 %v25098_v13  ;;  %18468 = vmatpush1.bf16.msra.mxu1 %v25099_v7 }
0x2692   :  { %18470 = vmatprep.subr.bf16.mxu0 %v25100_v18  ;;  %18502 = vmatprep.subr.bf16.mxu1 %v25101_v14 }
0x2694   :  { %14306 = vmatmul.mubr.msk.f32.vlgmr.msra.gmra.mrb[82].mxu0 %vm631_vm2, %v23283_v29  ;;  %14307 = vmatmul.mubr.msk.f32.vlgmr.msra.gmra.mrb[80].mxu1 %vm631_vm2, %v23283_v29  ;;  %v25614_v29 = vld [vmem:[#allocation197_spill] sm:$0xff] }
0x2695   :  { %18472 = vmatpush1.bf16.msra.mxu0 %v24934_v20  ;;  %18504 = vmatpush1.bf16.msra.mxu1 %v25102_v28 }
0x2696   :  { %18474 = vmatprep.subr.bf16.mxu0 %v24936_v8  ;;  %18506 = vmatprep.subr.bf16.mxu1 %v24937_v15 }
0x2697   :  { %12179 = vmatprep.mubr.f32.mxu0 %v24486_v3  ;;  %12250 = vmatprep.mubr.f32.mxu1 %v24486_v3 }
0x2699   :  { %18476 = vmatpush1.bf16.msra.mxu0 %v24938_v31  ;;  %18508 = vmatpush1.bf16.msra.mxu1 %v24939_v50 }
0x269a   :  { %18478 = vmatprep.subr.bf16.mxu0 %v24940_v5  ;;  %18510 = vmatprep.subr.bf16.mxu1 %v24941_v48 }
0x269d   :  { %18480 = vmatpush1.bf16.msra.mxu0 %v24942_v58  ;;  %18512 = vmatpush1.bf16.msra.mxu1 %v24773_v44 }
0x269e   :  { %18482 = vmatprep.subr.bf16.mxu0 %v24943_v47  ;;  %18514 = vmatprep.subr.bf16.mxu1 %v24775_v41 }
0x26a1   :  { %18484 = vmatpush1.bf16.msra.mxu0 %v25103_v17  ;;  %18516 = vmatpush1.bf16.msra.mxu1 %v24777_v49 }
0x26a2   :  { %18486 = vmatprep.subr.bf16.mxu0 %v24778_v53  ;;  %18518 = vmatprep.subr.bf16.mxu1 %v24779_v52 }
0x26a5   :  { %18488 = vmatpush1.bf16.msra.mxu0 %v24780_v11  ;;  %18520 = vmatpush1.bf16.msra.mxu1 %v24781_v62 }
0x26a6   :  { %18490 = vmatprep.subr.bf16.mxu0 %v24782_v37  ;;  %18522 = vmatprep.subr.bf16.mxu1 %v25614_v29 }
0x26a9   :  { %18492 = vmatpush1.bf16.msra.mxu0 %v25615_v4  ;;  %18524 = vmatpush1.bf16.msra.mxu1 %v25616_v63 }
0x26aa   :  { %18494 = vmatprep.subr.bf16.mxu0 %v25617_v30  ;;  %18526 = vmatprep.subr.bf16.mxu1 %v25618_v55 }
0x26ad   :  { %18496 = vmatpush1.bf16.msra.mxu0 %v25619_v39  ;;  %18528 = vmatpush1.bf16.msra.mxu1 %v25620_v51  ;;  %v25672_v51 = vld [vmem:[#allocation38_spill] sm:$0xff] }
0x26ae   :  { %18498 = vmatprep.subr.bf16.mxu0 %v25621_v43  ;;  %18530 = vmatprep.subr.bf16.mxu1 %v25622_v6  ;;  %v25641_v6 = vld [vmem:[#allocation21_spill] sm:$0xff]  ;;  %v25645_v43 = vld [vmem:[#allocation219_spill] sm:$0xff]  ;;  %v25674_v39 = vld [vmem:[#allocation42_spill] sm:$0xff] }
0x26b1   :  { %18500 = vmatpush1.bf16.msra.mxu0 %v25623_v40  ;;  %18532 = vmatpush1.bf16.msra.mxu1 %v25624_v36  ;;  %v25632_v36 = vld [vmem:[#allocation9_spill] sm:$0xff]  ;;  %v25633_v40 = vld [vmem:[#allocation215_spill] sm:$0xff] }
0x26b2   :  { %18533 = vmatprep.subr.bf16.mxu0 %v24616_v0  ;;  %18545 = vmatprep.subr.bf16.mxu1 %v24616_v0 }
0x26b4   :  { %12180 = vmatmul.mubr.f32.vlgmr.msra.gmra.mrb[82].mxu0 %v23360_v25  ;;  %12251 = vmatmul.mubr.f32.vlgmr.msra.gmra.mrb[80].mxu1 %v23360_v25  ;;  %v25629_v25 = vld [vmem:[#allocation210_spill] sm:$0xff] }
0x26b5   :  { %18535 = vmatpush3.bf16.msra.mxu0 %v25625_v34  ;;  %15593 = vmatprep.mubr.msk.f32.mxu0 %vm19507_vm5, %v24486_v3  ;;  %v25630_v34 = vld [vmem:[#allocation214_spill] sm:$0xff] }
0x26b6   :  { %18536 = vmatprep.subr.bf16.mxu0 %v24616_v0  ;;  %18547 = vmatpush3.bf16.msra.mxu1 %v25626_v10  ;;  %v25631_v10 = vld [vmem:[#allocation211_spill] sm:$0xff] }
0x26b7   :  { %18548 = vmatprep.subr.bf16.mxu1 %v24616_v0  ;;  %15628 = vmatprep.mubr.msk.f32.mxu1 %vm19507_vm5, %v24486_v3 }
0x26b9   :  { %18538 = vmatpush3.bf16.msra.mxu0 %v25627_v24  ;;  %v25640_v24 = vld [vmem:[#allocation19_spill] sm:$0xff] }
0x26ba   :  { %18539 = vmatprep.subr.bf16.mxu0 %v24616_v0  ;;  %18550 = vmatpush3.bf16.msra.mxu1 %v25628_v33  ;;  %v25634_v33 = vld [vmem:[#allocation11_spill] sm:$0xff] }
0x26bb   :  { %18551 = vmatprep.subr.bf16.mxu1 %v24616_v0 }
0x26bd   :  { %18541 = vmatpush3.bf16.msra.mxu0 %v25629_v25  ;;  %v25635_v25 = vld [vmem:[#allocation13_spill] sm:$0xff] }
0x26be   :  { %18542 = vmatprep.subr.bf16.mxu0 %v24616_v0  ;;  %18553 = vmatpush3.bf16.msra.mxu1 %v25630_v34  ;;  %v25636_v34 = vld [vmem:[#allocation216_spill] sm:$0xff] }
0x26bf   :  { %18554 = vmatprep.subr.bf16.mxu1 %v24616_v0 }
0x26c1   :  { %18544 = vmatpush3.bf16.msra.mxu0 %v25631_v10  ;;  %v25637_v10 = vld [vmem:[#allocation15_spill] sm:$0xff] }
0x26c2   :  { %18570 = vmatprep.subr.bf16.mxu0 %v25632_v36  ;;  %18556 = vmatpush3.bf16.msra.mxu1 %v25633_v40  ;;  %v25638_v36 = vld [vmem:[#allocation17_spill] sm:$0xff] }
0x26c3   :  { %18557 = vmatprep.subr.bf16.mxu1 %v24616_v0  ;;  %v25639_v40 = vld [vmem:[#allocation217_spill] sm:$0xff] }
0x26c4   :  { %15594 = vmatmul.mubr.msk.f32.vlgmr.msra.gmra.mrb[84].mxu0 %vm485_vm3, %v23500_v9 }
0x26c5   :  { %18572 = vmatpush1.bf16.msra.mxu0 %v25634_v33  ;;  %12503 = vmatprep.mubr.f32.mxu0 %v24486_v3  ;;  %v25642_v33 = vld [vmem:[#allocation218_spill] sm:$0xff] }
0x26c6   :  { %18574 = vmatprep.subr.bf16.mxu0 %v25635_v25  ;;  %18559 = vmatpush3.bf16.msra.mxu1 %v25636_v34  ;;  %v25643_v25 = vld [vmem:[#allocation23_spill] sm:$0xff]  ;;  %v25644_v34 = vld [vmem:[#allocation25_spill] sm:$0xff] }
0x26c7   :  { %18560 = vmatprep.subr.bf16.mxu1 %v24616_v0 }
0x26c9   :  { %18576 = vmatpush1.bf16.msra.mxu0 %v25637_v10  ;;  %v25646_v10 = vld [vmem:[#allocation65_spill] sm:$0xff] }
0x26ca   :  { %18578 = vmatprep.subr.bf16.mxu0 %v25638_v36  ;;  %18562 = vmatpush3.bf16.msra.mxu1 %v25639_v40  ;;  %v25647_v36 = vld [vmem:[#allocation27_spill] sm:$0xff]  ;;  %v25671_v40 = vld [vmem:[#allocation36_spill] sm:$0xff] }
0x26cb   :  { %18563 = vmatprep.subr.bf16.mxu1 %v24616_v0 }
0x26cd   :  { %18580 = vmatpush1.bf16.msra.mxu0 %v25640_v24  ;;  %v25649_v24 = vld [vmem:[#allocation31_spill] sm:$0xff] }
0x26ce   :  { %18582 = vmatprep.subr.bf16.mxu0 %v25641_v6  ;;  %18565 = vmatpush3.bf16.msra.mxu1 %v25642_v33  ;;  %v25648_v6 = vld [vmem:[#allocation29_spill] sm:$0xff] }
0x26cf   :  { %18566 = vmatprep.subr.bf16.mxu1 %v24616_v0  ;;  %v25650_v33 = vld [vmem:[#allocation33_spill] sm:$0xff] }
0x26d1   :  { %18584 = vmatpush1.bf16.msra.mxu0 %v25643_v25  ;;  %v25651_v25 = vld [vmem:[#allocation35_spill] sm:$0xff] }
0x26d2   :  { %18586 = vmatprep.subr.bf16.mxu0 %v25644_v34  ;;  %18568 = vmatpush3.bf16.msra.mxu1 %v25645_v43  ;;  %v25652_v34 = vld [vmem:[#allocation37_spill] sm:$0xff]  ;;  %v25653_v43 = vld [vmem:[#allocation39_spill] sm:$0xff] }
0x26d3   :  { %18682 = vmatprep.subr.bf16.mxu1 %v25646_v10  ;;  %v25654_v10 = vld [vmem:[#allocation10_spill] sm:$0xff] }
0x26d4   :  { %14316 = vmatmul.mubr.msk.f32.vlgmr.msra.gmra.mrb[86].mxu0 %vm485_vm3, %v23500_v9 }
0x26d5   :  { %18588 = vmatpush1.bf16.msra.mxu0 %v25647_v36  ;;  %12574 = vmatprep.mubr.f32.mxu0 %v24486_v3  ;;  %v25655_v36 = vld [vmem:[#allocation12_spill] sm:$0xff] }
0x26d6   :  { %18590 = vmatprep.subr.bf16.mxu0 %v25648_v6  ;;  %v25656_v6 = vld [vmem:[#allocation14_spill] sm:$0xff] }
0x26d9   :  { %18592 = vmatpush1.bf16.msra.mxu0 %v25649_v24  ;;  %v25657_v24 = vld [vmem:[#allocation16_spill] sm:$0xff] }
0x26da   :  { %18594 = vmatprep.subr.bf16.mxu0 %v25650_v33  ;;  %v23615_v33 = vld [vmem:[%s24423_s12 + $0xe] sm:$0x3] }
0x26dd   :  { %18596 = vmatpush1.bf16.msra.mxu0 %v25651_v25  ;;  %v25658_v25 = vld [vmem:[#allocation41_spill] sm:$0xff] }
0x26de   :  { %18598 = vmatprep.subr.bf16.mxu0 %v25652_v34  ;;  %v25661_v34 = vld [vmem:[#allocation47_spill] sm:$0xff] }
0x26e1   :  { %18600 = vmatpush1.bf16.msra.mxu0 %v25653_v43  ;;  %v25659_v43 = vld [vmem:[#allocation43_spill] sm:$0xff] }
0x26e2   :  { %18602 = vmatprep.subr.bf16.mxu0 %v25654_v10  ;;  %v25662_v10 = vld [vmem:[#allocation18_spill] sm:$0xff] }
0x26e4   :  { %14317 = vmatmul.mubr.msk.f32.vlgmr.msra.gmra.mrb[88].mxu0 %vm485_vm3, %v23500_v9  ;;  %v25660_v9 = vld [vmem:[#allocation45_spill] sm:$0xff] }
0x26e5   :  { %18604 = vmatpush1.bf16.msra.mxu0 %v25655_v36  ;;  %12648 = vmatprep.mubr.f32.mxu0 %v24486_v3  ;;  %v25663_v36 = vld [vmem:[#allocation20_spill] sm:$0xff] }
0x26e6   :  { %18606 = vmatprep.subr.bf16.mxu0 %v25656_v6  ;;  %v25664_v6 = vld [vmem:[#allocation22_spill] sm:$0xff] }
0x26e9   :  { %18608 = vmatpush1.bf16.msra.mxu0 %v25657_v24  ;;  %v25665_v24 = vld [vmem:[#allocation24_spill] sm:$0xff] }
0x26ea   :  { %18610 = vmatprep.subr.bf16.mxu0 %v25658_v25  ;;  %v25666_v25 = vld [vmem:[#allocation26_spill] sm:$0xff] }
0x26ec   :  { %14318 = vmatmul.mubr.msk.f32.vlgmr.msra.gmra.mrb[86].mxu0 %vm631_vm2, %v23615_v33 }
0x26ed   :  { %18612 = vmatpush1.bf16.msra.mxu0 %v25659_v43  ;;  %12719 = vmatprep.mubr.f32.mxu0 %v24486_v3  ;;  %v25667_v43 = vld [vmem:[#allocation28_spill] sm:$0xff] }
0x26ee   :  { %18614 = vmatprep.subr.bf16.mxu0 %v25660_v9  ;;  %v25668_v9 = vld [vmem:[#allocation30_spill] sm:$0xff] }
0x26f1   :  { %18616 = vmatpush1.bf16.msra.mxu0 %v25661_v34  ;;  %v25669_v34 = vld [vmem:[#allocation32_spill] sm:$0xff] }
0x26f2   :  { %18618 = vmatprep.subr.bf16.mxu0 %v25662_v10  ;;  %v25670_v10 = vld [vmem:[#allocation34_spill] sm:$0xff] }
0x26f4   :  { %14319 = vmatmul.mubr.msk.f32.vlgmr.msra.gmra.mrb[88].mxu0 %vm631_vm2, %v23615_v33 }
0x26f5   :  { %18620 = vmatpush1.bf16.msra.mxu0 %v25663_v36  ;;  %12790 = vmatprep.mubr.f32.mxu0 %v24486_v3  ;;  %v25673_v36 = vld [vmem:[#allocation40_spill] sm:$0xff] }
0x26f6   :  { %18622 = vmatprep.subr.bf16.mxu0 %v25664_v6  ;;  %v25675_v6 = vld [vmem:[#allocation44_spill] sm:$0xff] }
0x26f9   :  { %18624 = vmatpush1.bf16.msra.mxu0 %v25665_v24  ;;  %v25676_v24 = vld [vmem:[#allocation46_spill] sm:$0xff] }
0x26fa   :  { %18626 = vmatprep.subr.bf16.mxu0 %v25666_v25  ;;  %v25677_v25 = vld [vmem:[#allocation48_spill] sm:$0xff] }
0x26fd   :  { %18628 = vmatpush1.bf16.msra.mxu0 %v25667_v43  ;;  %v25678_v43 = vld [vmem:[#allocation49_spill] sm:$0xff] }
0x26fe   :  { %18630 = vmatprep.subr.bf16.mxu0 %v25668_v9  ;;  %v25679_v9 = vld [vmem:[#allocation50_spill] sm:$0xff] }
0x2701   :  { %18632 = vmatpush1.bf16.msra.mxu0 %v25669_v34  ;;  %v25682_v34 = vld [vmem:[#allocation53_spill] sm:$0xff] }
0x2702   :  { %18634 = vmatprep.subr.bf16.mxu0 %v25670_v10  ;;  %v25684_v10 = vld [vmem:[#allocation55_spill] sm:$0xff] }
0x2705   :  { %18636 = vmatpush1.bf16.msra.mxu0 %v25671_v40  ;;  %v25680_v40 = vld [vmem:[#allocation51_spill] sm:$0xff] }
0x2706   :  { %18638 = vmatprep.subr.bf16.mxu0 %v25672_v51  ;;  %v25681_v51 = vld [vmem:[#allocation52_spill] sm:$0xff] }
0x2709   :  { %18640 = vmatpush1.bf16.msra.mxu0 %v25673_v36  ;;  %v25685_v36 = vld [vmem:[#allocation56_spill] sm:$0xff] }
0x270a   :  { %18642 = vmatprep.subr.bf16.mxu0 %v25674_v39  ;;  %v25683_v39 = vld [vmem:[#allocation54_spill] sm:$0xff] }
0x270d   :  { %18644 = vmatpush1.bf16.msra.mxu0 %v25675_v6  ;;  %v25686_v6 = vld [vmem:[#allocation57_spill] sm:$0xff] }
0x270e   :  { %18646 = vmatprep.subr.bf16.mxu0 %v25676_v24  ;;  %v25687_v24 = vld [vmem:[#allocation58_spill] sm:$0xff] }
0x2711   :  { %18648 = vmatpush1.bf16.msra.mxu0 %v25677_v25  ;;  %v25688_v25 = vld [vmem:[#allocation59_spill] sm:$0xff] }
0x2712   :  { %18650 = vmatprep.subr.bf16.mxu0 %v25678_v43  ;;  %v25689_v43 = vld [vmem:[#allocation60_spill] sm:$0xff] }
0x2714   :  { %12791 = vmatmul.mubr.f32.vlgmr.msra.gmra.mrb[86].mxu0 %v23405_v32 }
0x2715   :  { %18652 = vmatpush1.bf16.msra.mxu0 %v25679_v9  ;;  %12861 = vmatprep.mubr.f32.mxu0 %v24486_v3  ;;  %v25690_v9 = vld [vmem:[#allocation61_spill] sm:$0xff] }
0x2716   :  { %18654 = vmatprep.subr.bf16.mxu0 %v25680_v40  ;;  %v25691_v40 = vld [vmem:[#allocation62_spill] sm:$0xff] }
0x2719   :  { %18656 = vmatpush1.bf16.msra.mxu0 %v25681_v51  ;;  %v25692_v51 = vld [vmem:[#allocation63_spill] sm:$0xff] }
0x271a   :  { %18658 = vmatprep.subr.bf16.mxu0 %v25682_v34  ;;  %v25693_v34 = vld [vmem:[#allocation64_spill] sm:$0xff] }
0x271d   :  { %18660 = vmatpush1.bf16.msra.mxu0 %v25683_v39  ;;  %v25694_v39 = vld [vmem:[#allocation106_spill] sm:$0xff] }
0x271e   :  { %18662 = vmatprep.subr.bf16.mxu0 %v25684_v10  ;;  %v25695_v10 = vld [vmem:[#allocation114_spill] sm:$0xff] }
0x2721   :  { %18664 = vmatpush1.bf16.msra.mxu0 %v25685_v36  ;;  %v25696_v36 = vld [vmem:[#allocation116_spill] sm:$0xff] }
0x2722   :  { %18666 = vmatprep.subr.bf16.mxu0 %v25686_v6  ;;  %v25697_v6 = vld [vmem:[#allocation118_spill] sm:$0xff] }
0x2725   :  { %18668 = vmatpush1.bf16.msra.mxu0 %v25687_v24  ;;  %v25698_v24 = vld [vmem:[#allocation120_spill] sm:$0xff] }
0x2726   :  { %18670 = vmatprep.subr.bf16.mxu0 %v25688_v25  ;;  %v25699_v25 = vld [vmem:[#allocation122_spill] sm:$0xff] }
0x2729   :  { %18672 = vmatpush1.bf16.msra.mxu0 %v25689_v43  ;;  %v25700_v43 = vld [vmem:[#allocation124_spill] sm:$0xff] }
0x272a   :  { %18674 = vmatprep.subr.bf16.mxu0 %v25690_v9  ;;  %v25701_v9 = vld [vmem:[#allocation126_spill] sm:$0xff] }
0x272d   :  { %18676 = vmatpush1.bf16.msra.mxu0 %v25691_v40  ;;  %v25702_v40 = vld [vmem:[#allocation128_spill] sm:$0xff] }
0x272e   :  { %18678 = vmatprep.subr.bf16.mxu0 %v25692_v51  ;;  %v25703_v51 = vld [vmem:[#allocation130_spill] sm:$0xff] }
0x2731   :  { %18680 = vmatpush1.bf16.msra.mxu0 %v25693_v34  ;;  %v25704_v34 = vld [vmem:[#allocation132_spill] sm:$0xff] }
0x2732   :  { %18794 = vmatprep.subr.bf16.mxu0 %v25694_v39  ;;  %v25706_v39 = vld [vmem:[#allocation136_spill] sm:$0xff] }
0x2734   :  { %12862 = vmatmul.mubr.f32.vlgmr.msra.gmra.mrb[88].mxu0 %v23405_v32  ;;  %v25705_v32 = vld [vmem:[#allocation134_spill] sm:$0xff] }
0x2735   :  { %18796 = vmatpush3.bf16.msra.mxu0 %v25695_v10  ;;  %v25707_v10 = vld [vmem:[#allocation138_spill] sm:$0xff] }
0x2736   :  { %18798 = vmatprep.subr.bf16.mxu0 %v25696_v36  ;;  %v25708_v36 = vld [vmem:[#allocation140_spill] sm:$0xff] }
0x2739   :  { %18800 = vmatpush3.bf16.msra.mxu0 %v25697_v6  ;;  %v25709_v6 = vld [vmem:[#allocation142_spill] sm:$0xff] }
0x273a   :  { %18802 = vmatprep.subr.bf16.mxu0 %v25698_v24  ;;  %v25710_v24 = vld [vmem:[#allocation148_spill] sm:$0xff] }
0x273d   :  { %18804 = vmatpush3.bf16.msra.mxu0 %v25699_v25 }
0x273e   :  { %18806 = vmatprep.subr.bf16.mxu0 %v25700_v43 }
0x2741   :  { %18808 = vmatpush3.bf16.msra.mxu0 %v25701_v9  ;;  %v25711_v9 = vld [vmem:[#allocation107_spill] sm:$0xff] }
0x2742   :  { %18810 = vmatprep.subr.bf16.mxu0 %v25702_v40 }
0x2745   :  { %18812 = vmatpush3.bf16.msra.mxu0 %v25703_v51 }
0x2746   :  { %18814 = vmatprep.subr.bf16.mxu0 %v25704_v34 }
0x2749   :  { %18816 = vmatpush3.bf16.msra.mxu0 %v25705_v32 }
0x274a   :  { %18818 = vmatprep.subr.bf16.mxu0 %v25706_v39  ;;  %v25712_v39 = vld [vmem:[#allocation221_spill] sm:$0xff] }
0x274d   :  { %18820 = vmatpush3.bf16.msra.mxu0 %v25707_v10 }
0x274e   :  { %18822 = vmatprep.subr.bf16.mxu0 %v25708_v36 }
0x2751   :  { %18824 = vmatpush3.bf16.msra.mxu0 %v25709_v6 }
0x2752   :  { %18848 = vmatprep.subr.bf16.mxu0 %v25710_v24 }
0x2787   :  { %v12181_v25 = vpop.f32.mrb[82].mxu0  ;;  %v12252_v43 = vpop.f32.mrb[80].mxu1 }
0x2788   :  { %v12261_v40 = vadd.f32 %v12181_v25, %v25711_v9  ;;  %v12183_v55 = vpop.f32.mrb[83].mxu0  ;;  %v12254_v51 = vpop.f32.mrb[81].mxu1  ;;  %v12263_v36 = vadd.f32 %v12252_v43, %v24842_v38 }
0x2789   :  { %v12262_v34 = vadd.f32 %v12183_v55, %v24840_v60  ;;  %v12264_v10 = vadd.f32 %v12254_v51, %v25712_v39 }
0x278a   :  { %v14308_v30 = vmul.f32 -1.442695, %v12261_v40 }
0x278b   :  { %v14309_v32 = vmul.f32 -1.442695, %v12262_v34  ;;  %v14310_v63 = vmul.f32 -1.442695, %v12264_v10  ;;  %v25713_v10 = vld [vmem:[#allocation193_spill] sm:$0xff] }
0x278c   :  { %19438 = vpow2.f32 %v14308_v30 }
0x278d   :  { %19440 = vpow2.f32 %v14309_v32 }
0x278e   :  { %19442 = vpow2.f32 %v14310_v63 }
0x278f   :  { %19444 = vtanh.f32 %v12263_v36 }
0x2796   :  { %v19439_v6 = vpop.eup %19438 }
0x2797   :  { %v19441_v4 = vpop.eup %19440  ;;  %v12268_v24 = vadd.f32 1.0, %v19439_v6  ;;  %v23683_v29 = vpop.f32.mrb[84].mxu0 }
0x2798   :  { %v12274_v25 = vadd.f32 1.0, %v19441_v4  ;;  %v15595_v9 = vpop.f32.mrb[85].mxu0  ;;  %v19443_v55 = vpop.eup %19442  ;;  %v14311_v4 = vld [vmem:[%s23940_s18 + $0xc] sm:$0x3] }
0x2799   :  { %19446 = vrcp.f32 %v12268_v24  ;;  %v19445_v40 = vpop.eup %19444  ;;  %v12281_v51 = vadd.f32 1.0, %v19443_v55  ;;  %v25715_v24 = vld [vmem:[#allocation67_spill] sm:$0xff] }
0x279a   :  { %19448 = vrcp.f32 %v12274_v25  ;;  %v12905_v25 = vpop.permute.xlu1 %12904  ;;  %v25717_v55 = vld [vmem:[#allocation71_spill] sm:$0xff] }
0x279b   :  { %19450 = vrcp.f32 %v12281_v51  ;;  %v25721_v51 = vld [vmem:[#allocation72_spill] sm:$0xff] }
0x27a3   :  { %v19447_v30 = vpop.eup %19446 }
0x27a4   :  { %v19449_v34 = vpop.eup %19448  ;;  %v12285_v32 = vmul.f32 %v19447_v30, %v19445_v40  ;;  %v25718_v40 = vld [vmem:[#allocation66_spill] sm:$0xff]  ;;  %v12907_v30 = vsel %vm978_vm4, %v23467_v35, %v12905_v25  ;;  %v25725_v35 = vld [vmem:[#allocation79_spill] sm:$0xff]  ;;  %v25730_v25 = vld [vmem:[#allocation89_spill] sm:$0xff] }
0x27a5   :  { %v12284_v39 = vmul.f32 %v19449_v34, %v25713_v10  ;;  %v19451_v63 = vpop.eup %19450  ;;  %v25719_v34 = vld [vmem:[#allocation68_spill] sm:$0xff]  ;;  %v25722_v10 = vld [vmem:[#allocation73_spill] sm:$0xff] }
0x27a7   :  { %v23686_v43 = vadd.f32 %v12285_v32, %v12284_v39  ;;  %v25716_v39 = vld [vmem:[#allocation69_spill] sm:$0xff]  ;;  %v25720_v32 = vld [vmem:[#allocation70_spill] sm:$0xff] }
0x27a9   :  { %25714 = vst [vmem:[#allocation195_spill] sm:$0xff] %v23686_v43  ;;  %19452 = vtanh.f32 %v23686_v43 }
0x27b3   :  { %v19453_v6 = vpop.eup %19452 }
0x27b4   :  { %v12288_v9 = vmul.f32 %v19453_v6, %v19451_v63  ;;  %v25723_v63 = vld [vmem:[#allocation75_spill] sm:$0xff]  ;;  %v25724_v6 = vld [vmem:[#allocation77_spill] sm:$0xff] }
0x27b6   :  { %v23692_v36 = vmul.f32 %v14311_v4, %v12288_v9  ;;  %v25726_v4 = vld [vmem:[#allocation81_spill] sm:$0xff]  ;;  %v25727_v9 = vld [vmem:[#allocation83_spill] sm:$0xff] }
0x27b8   :  { %15629 = vmatmul.mubr.f32.vlgmr.msra.gmra.mrb[82].mxu1 %v23692_v36 }
0x27b9   :  { %18684 = vmatpush1.bf16.msra.mxu1 %v25715_v24  ;;  %12975 = vmatprep.mubr.f32.mxu1 %v24486_v3  ;;  %v25728_v24 = vld [vmem:[#allocation85_spill] sm:$0xff] }
0x27ba   :  { %18686 = vmatprep.subr.bf16.mxu1 %v25716_v39  ;;  %v25729_v39 = vld [vmem:[#allocation87_spill] sm:$0xff] }
0x27bd   :  { %18688 = vmatpush1.bf16.msra.mxu1 %v25717_v55  ;;  %v25731_v55 = vld [vmem:[#allocation91_spill] sm:$0xff] }
0x27be   :  { %18690 = vmatprep.subr.bf16.mxu1 %v25718_v40  ;;  %v25732_v40 = vld [vmem:[#allocation93_spill] sm:$0xff] }
0x27c0   :  { %14324 = vmatmul.mubr.msk.f32.vlgmr.msra.gmra.mrb[84].mxu1 %vm631_vm2, %v12907_v30 }
0x27c1   :  { %18692 = vmatpush1.bf16.msra.mxu1 %v25719_v34  ;;  %13046 = vmatprep.mubr.f32.mxu1 %v24486_v3  ;;  %v25734_v34 = vld [vmem:[#allocation97_spill] sm:$0xff] }
0x27c2   :  { %18694 = vmatprep.subr.bf16.mxu1 %v25720_v32  ;;  %v25735_v32 = vld [vmem:[#allocation99_spill] sm:$0xff] }
0x27c5   :  { %18696 = vmatpush1.bf16.msra.mxu1 %v25721_v51  ;;  %v25736_v51 = vld [vmem:[#allocation101_spill] sm:$0xff] }
0x27c6   :  { %18698 = vmatprep.subr.bf16.mxu1 %v25722_v10  ;;  %v25737_v10 = vld [vmem:[#allocation103_spill] sm:$0xff] }
0x27c8   :  { %14325 = vmatmul.mubr.msk.f32.vlgmr.msra.gmra.mrb[86].mxu1 %vm631_vm2, %v12907_v30  ;;  %v25733_v30 = vld [vmem:[#allocation95_spill] sm:$0xff] }
0x27c9   :  { %18700 = vmatpush1.bf16.msra.mxu1 %v25723_v63  ;;  %13117 = vmatprep.mubr.f32.mxu1 %v24486_v3  ;;  %v25738_v63 = vld [vmem:[#allocation74_spill] sm:$0xff] }
0x27ca   :  { %18702 = vmatprep.subr.bf16.mxu1 %v25724_v6 }
0x27cd   :  { %18704 = vmatpush1.bf16.msra.mxu1 %v25725_v35 }
0x27ce   :  { %18706 = vmatprep.subr.bf16.mxu1 %v25726_v4  ;;  %v25739_v4 = vld [vmem:[#allocation108_spill] sm:$0xff] }
0x27d1   :  { %18708 = vmatpush1.bf16.msra.mxu1 %v25727_v9 }
0x27d2   :  { %18710 = vmatprep.subr.bf16.mxu1 %v25728_v24  ;;  %v25740_v24 = vld [vmem:[#allocation109_spill] sm:$0xff] }
0x27d5   :  { %18712 = vmatpush1.bf16.msra.mxu1 %v25729_v39 }
0x27d6   :  { %18714 = vmatprep.subr.bf16.mxu1 %v25730_v25 }
0x27d9   :  { %18716 = vmatpush1.bf16.msra.mxu1 %v25731_v55 }
0x27da   :  { %18718 = vmatprep.subr.bf16.mxu1 %v25732_v40 }
0x27dd   :  { %18720 = vmatpush1.bf16.msra.mxu1 %v25733_v30 }
0x27de   :  { %18722 = vmatprep.subr.bf16.mxu1 %v25734_v34 }
0x27e1   :  { %18724 = vmatpush1.bf16.msra.mxu1 %v25735_v32 }
0x27e2   :  { %18726 = vmatprep.subr.bf16.mxu1 %v25736_v51 }
0x27e5   :  { %18728 = vmatpush1.bf16.msra.mxu1 %v25737_v10 }
0x27e6   :  { %18730 = vmatprep.subr.bf16.mxu1 %v25738_v63 }
0x27e7   :  { %v12792_v6 = vpop.f32.mrb[86].mxu0 }
0x27e8   :  { %v12794_v35 = vpop.f32.mrb[87].mxu0  ;;  %v12872_v39 = vadd.f32 %v12792_v6, %v25740_v24  ;;  %v25741_v24 = vld [vmem:[#allocation194_spill] sm:$0xff] }
0x27e9   :  { %v12873_v9 = vadd.f32 %v12794_v35, %v25739_v4 }
0x27ea   :  { %v14320_v55 = vmul.f32 -1.442695, %v12872_v39 }
0x27eb   :  { %v14321_v25 = vmul.f32 -1.442695, %v12873_v9 }
0x27ed   :  { %19454 = vpow2.f32 %v14321_v25 }
0x27ee   :  { %19456 = vpow2.f32 %v14320_v55 }
0x27f7   :  { %v19455_v40 = vpop.eup %19454 }
0x27f8   :  { %v19457_v30 = vpop.eup %19456  ;;  %v12885_v34 = vadd.f32 1.0, %v19455_v40 }
0x27f9   :  { %v12879_v32 = vadd.f32 1.0, %v19457_v30 }
0x27fa   :  { %19458 = vrcp.f32 %v12885_v34 }
0x27fb   :  { %19460 = vrcp.f32 %v12879_v32 }
0x2804   :  { %v19459_v6 = vpop.eup %19458 }
0x2805   :  { %v19461_v4 = vpop.eup %19460  ;;  %v12895_v39 = vmul.f32 %v19459_v6, %v25741_v24  ;;  %v25746_v6 = vld [vmem:[#allocation84_spill] sm:$0xff]  ;;  %v25749_v24 = vld [vmem:[#allocation90_spill] sm:$0xff] }
0x2807   :  { %v12863_v43 = vpop.f32.mrb[88].mxu0 }
0x2808   :  { %v12874_v51 = vadd.f32 %v12863_v43, %v24695_v2  ;;  %v12865_v10 = vpop.f32.mrb[89].mxu0 }
0x2809   :  { %v12875_v63 = vadd.f32 %v12865_v10, %v24696_v45  ;;  %v14323_v45 = vld [vmem:[%s23930_s17 + $0xe] sm:$0x3]  ;;  %v25743_v10 = vld [vmem:[#allocation78_spill] sm:$0xff] }
0x280a   :  { %19462 = vtanh.f32 %v12874_v51  ;;  %v25742_v51 = vld [vmem:[#allocation76_spill] sm:$0xff] }
0x280b   :  { %v14322_v35 = vmul.f32 -1.442695, %v12875_v63  ;;  %v25744_v63 = vld [vmem:[#allocation80_spill] sm:$0xff] }
0x280d   :  { %19464 = vpow2.f32 %v14322_v35  ;;  %v25745_v35 = vld [vmem:[#allocation82_spill] sm:$0xff] }
0x2814   :  { %v19463_v9 = vpop.eup %19462 }
0x2815   :  { %v12896_v25 = vmul.f32 %v19463_v9, %v19461_v4  ;;  %v25747_v4 = vld [vmem:[#allocation86_spill] sm:$0xff]  ;;  %v25748_v9 = vld [vmem:[#allocation88_spill] sm:$0xff] }
0x2817   :  { %v19465_v55 = vpop.eup %19464  ;;  %v12897_v40 = vadd.f32 %v12896_v25, %v12895_v39  ;;  %v25750_v39 = vld [vmem:[#allocation92_spill] sm:$0xff]  ;;  %v25751_v25 = vld [vmem:[#allocation94_spill] sm:$0xff] }
0x2818   :  { %v12892_v30 = vadd.f32 1.0, %v19465_v55  ;;  %v25752_v55 = vld [vmem:[#allocation96_spill] sm:$0xff] }
0x2819   :  { %19466 = vtanh.f32 %v12897_v40  ;;  %14135 = vst [vmem:[#allocation3] sm:$0x3] %v12897_v40  ;;  %v25753_v40 = vld [vmem:[#allocation98_spill] sm:$0xff] }
0x281a   :  { %19468 = vrcp.f32 %v12892_v30  ;;  %v25754_v30 = vld [vmem:[#allocation100_spill] sm:$0xff] }
0x2823   :  { %v19467_v2 = vpop.eup %19466 }
0x2824   :  { %v19469_v43 = vpop.eup %19468 }
0x2825   :  { %v12899_v34 = vmul.f32 %v19469_v43, %v19467_v2  ;;  %v25755_v2 = vld [vmem:[#allocation102_spill] sm:$0xff]  ;;  %v25756_v43 = vld [vmem:[#allocation104_spill] sm:$0xff] }
0x2827   :  { %v12902_v32 = vmul.f32 %v14323_v45, %v12899_v34  ;;  %v25757_v45 = vld [vmem:[#allocation105_spill] sm:$0xff] }
0x2828   :  { %v25758_v34 = vld [vmem:[#allocation113_spill] sm:$0xff] }
0x2829   :  { %13118 = vmatmul.mubr.f32.vlgmr.msra.gmra.mrb[84].mxu1 %v12902_v32  ;;  %14134 = vst [vmem:[#allocation2] sm:$0x3] %v12902_v32 }
0x282a   :  { %18732 = vmatpush1.bf16.msra.mxu1 %v25742_v51  ;;  %13188 = vmatprep.mubr.f32.mxu1 %v24486_v3  ;;  %v25759_v51 = vld [vmem:[#allocation115_spill] sm:$0xff] }
0x282b   :  { %18734 = vmatprep.subr.bf16.mxu1 %v25743_v10  ;;  %v25760_v10 = vld [vmem:[#allocation117_spill] sm:$0xff] }
0x282e   :  { %18736 = vmatpush1.bf16.msra.mxu1 %v25744_v63  ;;  %v25761_v63 = vld [vmem:[#allocation119_spill] sm:$0xff] }
0x282f   :  { %18738 = vmatprep.subr.bf16.mxu1 %v25745_v35  ;;  %v25762_v35 = vld [vmem:[#allocation121_spill] sm:$0xff] }
0x2832   :  { %18740 = vmatpush1.bf16.msra.mxu1 %v25746_v6  ;;  %v25763_v6 = vld [vmem:[#allocation123_spill] sm:$0xff] }
0x2833   :  { %18742 = vmatprep.subr.bf16.mxu1 %v25747_v4  ;;  %v25764_v4 = vld [vmem:[#allocation125_spill] sm:$0xff] }
0x2836   :  { %18744 = vmatpush1.bf16.msra.mxu1 %v25748_v9  ;;  %v25765_v9 = vld [vmem:[#allocation127_spill] sm:$0xff] }
0x2837   :  { %18746 = vmatprep.subr.bf16.mxu1 %v25749_v24  ;;  %v25766_v24 = vld [vmem:[#allocation129_spill] sm:$0xff] }
0x283a   :  { %18748 = vmatpush1.bf16.msra.mxu1 %v25750_v39  ;;  %v25767_v39 = vld [vmem:[#allocation131_spill] sm:$0xff] }
0x283b   :  { %18750 = vmatprep.subr.bf16.mxu1 %v25751_v25  ;;  %v25769_v25 = vld [vmem:[#allocation135_spill] sm:$0xff] }
0x283e   :  { %18752 = vmatpush1.bf16.msra.mxu1 %v25752_v55  ;;  %v25770_v55 = vld [vmem:[#allocation137_spill] sm:$0xff] }
0x283f   :  { %18754 = vmatprep.subr.bf16.mxu1 %v25753_v40  ;;  %v25771_v40 = vld [vmem:[#allocation139_spill] sm:$0xff] }
0x2842   :  { %18756 = vmatpush1.bf16.msra.mxu1 %v25754_v30  ;;  %v25772_v30 = vld [vmem:[#allocation141_spill] sm:$0xff] }
0x2843   :  { %18758 = vmatprep.subr.bf16.mxu1 %v25755_v2 }
0x2846   :  { %18760 = vmatpush1.bf16.msra.mxu1 %v25756_v43 }
0x2847   :  { %18762 = vmatprep.subr.bf16.mxu1 %v25757_v45 }
0x2849   :  { %13189 = vmatmul.mubr.f32.vlgmr.msra.gmra.mrb[86].mxu1 %v12902_v32  ;;  %v25768_v32 = vld [vmem:[#allocation133_spill] sm:$0xff] }
0x284a   :  { %18764 = vmatpush3.bf16.msra.mxu1 %v25758_v34  ;;  %v23771_v34 = vld [vmem:[%s23941_s16] ss:$0 sm:$0xff] }
0x284b   :  { %18766 = vmatprep.subr.bf16.mxu1 %v25759_v51 }
0x284e   :  { %18768 = vmatpush3.bf16.msra.mxu1 %v25760_v10 }
0x284f   :  { %18770 = vmatprep.subr.bf16.mxu1 %v25761_v63  ;;  %v25773_v63 = vld [vmem:[#allocation143_spill] sm:$0xff] }
0x2852   :  { %18772 = vmatpush3.bf16.msra.mxu1 %v25762_v35 }
0x2853   :  { %18774 = vmatprep.subr.bf16.mxu1 %v25763_v6 }
0x2856   :  { %18776 = vmatpush3.bf16.msra.mxu1 %v25764_v4  ;;  %v25774_v4 = vld [vmem:[#allocation145_spill] sm:$0xff] }
0x2857   :  { %18778 = vmatprep.subr.bf16.mxu1 %v25765_v9 }
0x285a   :  { %18780 = vmatpush3.bf16.msra.mxu1 %v25766_v24 }
0x285b   :  { %18782 = vmatprep.subr.bf16.mxu1 %v25767_v39  ;;  %v25775_v39 = vld [vmem:[#allocation147_spill] sm:$0xff] }
0x285e   :  { %18784 = vmatpush3.bf16.msra.mxu1 %v25768_v32 }
0x285f   :  { %18786 = vmatprep.subr.bf16.mxu1 %v25769_v25  ;;  %v25776_v25 = vld [vmem:[#allocation144_spill] sm:$0xff] }
0x2862   :  { %18788 = vmatpush3.bf16.msra.mxu1 %v25770_v55 }
0x2863   :  { %18790 = vmatprep.subr.bf16.mxu1 %v25771_v40 }
0x2866   :  { %18792 = vmatpush3.bf16.msra.mxu1 %v25772_v30  ;;  %v25777_v30 = vld [vmem:[#allocation146_spill] sm:$0xff] }
0x2867   :  { %18825 = vmatprep.subr.bf16.mxu1 %v24616_v0 }
0x288b   :  { %v12428_v2 = vpop.f32.mrb[82].mxu1 }
0x288c   :  { %v12429_v43 = vadd.f32 %v12428_v2, %v23683_v29  ;;  %v15630_v45 = vpop.f32.mrb[83].mxu1 }
0x288e   :  { %v12432_v51 = vadd.f32 %v23771_v34, %v12429_v43 }
0x2890   :  { %14313 = vst.msk [vmem:[%s23942_s19 + $0xc] sm:$0x3] %vm2252_vm7, %v12432_v51  ;;  %v25778_v51 = vld [vmem:[#allocation149_spill] sm:$0xff] }
0x28fc   :  { %v13119_v10 = vpop.f32.mrb[84].mxu1 }
0x28fd   :  { %v13195_v35 = vadd.f32 %v13119_v10, %v25773_v63  ;;  %v13121_v6 = vpop.f32.mrb[85].mxu1  ;;  %v25779_v10 = vld [vmem:[#allocation150_spill] sm:$0xff]  ;;  %v25780_v63 = vld [vmem:[#allocation152_spill] sm:$0xff] }
0x28fe   :  { %v13196_v9 = vadd.f32 %v13121_v6, %v25774_v4  ;;  %v25782_v6 = vld [vmem:[#allocation163_spill] sm:$0xff]  ;;  %v25783_v4 = vld [vmem:[#allocation165_spill] sm:$0xff] }
0x2900   :  { %19470 = vtanh.f32 %v13196_v9  ;;  %v25784_v9 = vld [vmem:[#allocation167_spill] sm:$0xff] }
0x2901   :  { %19472 = vtanh.f32 %v13195_v35  ;;  %v25781_v35 = vld [vmem:[#allocation153_spill] sm:$0xff] }
0x290a   :  { %v19471_v29 = vpop.eup %19470 }
0x290b   :  { %v19473_v24 = vpop.eup %19472  ;;  %13267 = vmatprep.mubr.f32.mxu1 %v19471_v29  ;;  %v25785_v29 = vld [vmem:[#allocation169_spill] sm:$0xff] }
0x290c   :  { %13268 = vmatmul.mubr.f32.vlgmr.msra.gmra.mrb[88].mxu1 %v19473_v24 }
0x290d   :  { %18827 = vmatpush3.bf16.msra.mxu1 %v25775_v39  ;;  %15635 = vmatprep.mubr.msk.f32.mxu1 %vm19507_vm5, %v24486_v3 }
0x290e   :  { %18828 = vmatprep.subr.bf16.mxu1 %v24616_v0 }
0x291c   :  { %v13190_v32 = vpop.f32.mrb[86].mxu1 }
0x291d   :  { %v13197_v55 = vadd.f32 %v13190_v32, %v25776_v25  ;;  %v13192_v40 = vpop.f32.mrb[87].mxu1 }
0x291e   :  { %v13198_v2 = vadd.f32 %v13192_v40, %v25777_v30 }
0x2920   :  { %19474 = vtanh.f32 %v13198_v2 }
0x2921   :  { %19476 = vtanh.f32 %v13197_v55 }
0x292a   :  { %v19475_v43 = vpop.eup %19474 }
0x292b   :  { %v19477_v45 = vpop.eup %19476  ;;  %13337 = vmatprep.mubr.f32.mxu0 %v19475_v43 }
0x292c   :  { %13338 = vmatmul.mubr.f32.vlgmr.msra.gmra.mrb[90].mxu0 %v19477_v45 }
0x292d   :  { %18850 = vmatpush1.bf16.msra.mxu0 %v25778_v51  ;;  %13663 = vmatprep.mubr.f32.mxu0 %v24486_v3 }
0x292e   :  { %18852 = vmatprep.subr.bf16.mxu0 %v25779_v10 }
0x2931   :  { %18854 = vmatpush1.bf16.msra.mxu0 %v25780_v63 }
0x2932   :  { %18856 = vmatprep.subr.bf16.mxu0 %v25781_v35 }
0x2935   :  { %18858 = vmatpush1.bf16.msra.mxu0 %v25782_v6 }
0x2936   :  { %18860 = vmatprep.subr.bf16.mxu0 %v25783_v4 }
0x2939   :  { %18862 = vmatpush1.bf16.msra.mxu0 %v25784_v9 }
0x293a   :  { %18872 = vmatprep.subr.bf16.mxu0 %v25785_v29 }
0x29df   :  { %v15085_v24 = vpop.f32.mrb[88].mxu1 }
0x29e0   :  { %v15086_v39 = vpop.f32.mrb[89].mxu1 }
0x29e1   :  { %v15087_v32 = vadd.f32 %v15086_v39, %v15085_v24 }
0x29ff   :  { %v15120_v25 = vpop.f32.mrb[90].mxu0 }
0x2a00   :  { %v15121_v55 = vpop.f32.mrb[91].mxu0 }
0x2a01   :  { %v15122_v40 = vadd.f32 %v15121_v55, %v15120_v25 }
0x2a03   :  { %v13340_v30 = vadd.f32 %v15122_v40, %v15087_v32 }
0x2a05   :  { %v13343_v2 = vsel %vm72_vm1, %v13340_v30, -inf }
0x2a06   :  { %13344 = vmax.xlane.f32.xlu1 %v13343_v2 }
0x2a93   :  { %v13345_v43 = vpop.xlane.xlu1 %13344 }
0x2a94   :  { %v13346_v45 = vsub.f32 %v13340_v30, %v13345_v43 }
0x2a96   :  { %v13347_v51 = vmul.f32 1.442695, %v13346_v45 }
0x2a98   :  { %19478 = vpow2.f32 %v13347_v51 }
0x2aa2   :  { %v19479_v10 = vpop.eup %19478 }
0x2aa3   :  { %v13349_v63 = vsel %vm72_vm1, %v19479_v10, 0.0 }
0x2aa4   :  { %13350 = vadd.xlane.f32.xlu0 %v13349_v63 }
0x2b31   :  { %v13351_v35 = vpop.xlane.xlu0 %13350 }
0x2b32   :  { %19480 = vrcp.f32 %v13351_v35  ;;  %v25811_v35 = vld [vmem:[#allocation195_spill] sm:$0xff] }
0x2b3c   :  { %v19481_v6 = vpop.eup %19480 }
0x2b3d   :  { %v13353_v4 = vmul.f32 %v19481_v6, %v19479_v10 }
0x2b3f   :  { %v13521_v9 = vadd.f32 %v13353_v4, %v23476_v12  ;;  %14338 = vst.msk [vmem:[%s23934_s20 + $0xe] sm:$0x3] %vm72_vm1, %v13353_v4  ;;  %14138 = vst.msk [vmem:[#allocation6] sm:$0x3] %vm72_vm1, %v13353_v4  ;;  %v13361_v29 = vrot.slane %v13353_v4, %v24745_v46 }
0x2b41   :  { %14139 = vst.msk [vmem:[#allocation7] sm:$0x3] %vm72_vm1, %v13521_v9  ;;  %v13369_v24 = vrot.slane %v13361_v29, %v24745_v46  ;;  %v13362_v39 = vcombine.high %v13361_v29, %v13361_v29  ;;  %v14335_v29 = vld [vmem:[%s23940_s18 + $0xe] sm:$0x3] }
0x2b43   :  { %15636 = vmatmul.mubr.msk.f32.vlgmr.msra.gmra.mrb[90].mxu1 %vm978_vm4, %v13369_v24  ;;  %v13376_v12 = vrot.slane %v13362_v39, %v24745_v46 }
0x2b44   :  { %18830 = vmatpush3.bf16.msra.mxu1 %v24918_v23  ;;  %15642 = vmatprep.mubr.msk.f32.mxu1 %vm19507_vm5, %v24486_v3 }
0x2b45   :  { %18832 = vmatprep.subr.bf16.mxu1 %v24919_v59 }
0x2b47   :  { %15643 = vmatmul.mubr.msk.f32.vlgmr.msra.gmra.mrb[92].mxu1 %vm978_vm4, %v13376_v12 }
0x2b48   :  { %18834 = vmatpush1.bf16.msra.mxu1 %v24920_v1  ;;  %13592 = vmatprep.mubr.f32.mxu1 %v24486_v3 }
0x2b49   :  { %18836 = vmatprep.subr.bf16.mxu1 %v24749_v21  ;;  %v25786_v21 = vld [vmem:[#allocation197_spill] sm:$0xff] }
0x2b4c   :  { %18838 = vmatpush1.bf16.msra.mxu1 %v24750_v19  ;;  %v25787_v19 = vld [vmem:[#allocation198_spill] sm:$0xff] }
0x2b4d   :  { %18840 = vmatprep.subr.bf16.mxu1 %v24921_v56  ;;  %v25790_v56 = vld [vmem:[#allocation201_spill] sm:$0xff] }
0x2b50   :  { %18842 = vmatpush1.bf16.msra.mxu1 %v24922_v61  ;;  %v25797_v61 = vld [vmem:[#allocation208_spill] sm:$0xff] }
0x2b51   :  { %18844 = vmatprep.subr.bf16.mxu1 %v25092_v26 }
0x2b54   :  { %18846 = vmatpush1.bf16.msra.mxu1 %v25093_v42 }
0x2b55   :  { %18864 = vmatprep.subr.bf16.mxu1 %v25094_v27  ;;  %v25809_v27 = vld [vmem:[#allocation107_spill] sm:$0xff] }
0x2c16   :  { %v13445_v46 = vpop.f32.mrb[90].mxu1 }
0x2c17   :  { %v15637_v23 = vpop.f32.mrb[91].mxu1 }
0x2c1a   :  { %v13517_v59 = vpop.f32.mrb[92].mxu1 }
0x2c1b   :  { %v13524_v1 = vrot.slane %v13517_v59, 7  ;;  %v15644_v32 = vpop.f32.mrb[93].mxu1 }
0x2c1d   :  { %v23823_v25 = vsel %vm1620_vm6, %v13524_v1, %v13445_v46 }
0x2c1e   :  { %14142 = vst.msk [vmem:[#allocation8] sm:$0x3] %vm75_vm0, %v23823_v25  ;;  %14328 = vmatmul.mubr.msk.f32.vlgmr.msra.gmra.mrb[94].mxu1 %vm485_vm3, %v23823_v25  ;;  %14329 = vmatmul.mubr.msk.f32.vlgmr.msra.gmra.mrb[92].mxu0 %vm485_vm3, %v23823_v25 }
0x2c1f   :  { %18866 = vmatpush1.bf16.msra.mxu1 %v24926_v54  ;;  %18874 = vmatpush1.bf16.msra.mxu0 %v25095_v22  ;;  %v25801_v54 = vld [vmem:[#allocation210_spill] sm:$0xff] }
0x2c20   :  { %18868 = vmatprep.subr.bf16.mxu1 %v25096_v16  ;;  %18876 = vmatprep.subr.bf16.mxu0 %v25097_v57 }
0x2c21   :  { %13734 = vmatprep.mubr.f32.mxu1 %v24486_v3  ;;  %13805 = vmatprep.mubr.f32.mxu0 %v24486_v3 }
0x2c23   :  { %18870 = vmatpush1.bf16.msra.mxu1 %v25098_v13  ;;  %18878 = vmatpush1.bf16.msra.mxu0 %v25099_v7 }
0x2c24   :  { %18880 = vmatprep.subr.bf16.mxu1 %v25100_v18  ;;  %18912 = vmatprep.subr.bf16.mxu0 %v25101_v14  ;;  %v25810_v14 = vld [vmem:[#allocation221_spill] sm:$0xff] }
0x2c26   :  { %14330 = vmatmul.mubr.msk.f32.vlgmr.msra.gmra.mrb[94].mxu1 %vm631_vm2, %v23615_v33  ;;  %14331 = vmatmul.mubr.msk.f32.vlgmr.msra.gmra.mrb[92].mxu0 %vm631_vm2, %v23615_v33 }
0x2c27   :  { %18882 = vmatpush1.bf16.msra.mxu1 %v24934_v20  ;;  %18914 = vmatpush1.bf16.msra.mxu0 %v25102_v28  ;;  %v25807_v20 = vld [vmem:[#allocation218_spill] sm:$0xff] }
0x2c28   :  { %18884 = vmatprep.subr.bf16.mxu1 %v24936_v8  ;;  %18916 = vmatprep.subr.bf16.mxu0 %v24937_v15  ;;  %v25798_v15 = vld [vmem:[#allocation212_spill] sm:$0xff]  ;;  %v25799_v8 = vld [vmem:[#allocation209_spill] sm:$0xff] }
0x2c29   :  { %13876 = vmatprep.mubr.f32.mxu1 %v24486_v3  ;;  %13947 = vmatprep.mubr.f32.mxu0 %v24486_v3 }
0x2c2b   :  { %18886 = vmatpush1.bf16.msra.mxu1 %v24938_v31  ;;  %18918 = vmatpush1.bf16.msra.mxu0 %v24939_v50  ;;  %v25804_v31 = vld [vmem:[#allocation215_spill] sm:$0xff]  ;;  %v25806_v50 = vld [vmem:[#allocation217_spill] sm:$0xff] }
0x2c2c   :  { %18888 = vmatprep.subr.bf16.mxu1 %v24940_v5  ;;  %18920 = vmatprep.subr.bf16.mxu0 %v24941_v48  ;;  %v25802_v48 = vld [vmem:[#allocation214_spill] sm:$0xff]  ;;  %v25803_v5 = vld [vmem:[#allocation211_spill] sm:$0xff] }
0x2c2f   :  { %18890 = vmatpush1.bf16.msra.mxu1 %v24942_v58  ;;  %18922 = vmatpush1.bf16.msra.mxu0 %v24773_v44  ;;  %v25788_v44 = vld [vmem:[#allocation199_spill] sm:$0xff] }
0x2c30   :  { %18892 = vmatprep.subr.bf16.mxu1 %v24943_v47  ;;  %18924 = vmatprep.subr.bf16.mxu0 %v24775_v41  ;;  %v25789_v41 = vld [vmem:[#allocation200_spill] sm:$0xff]  ;;  %v25800_v47 = vld [vmem:[#allocation213_spill] sm:$0xff]  ;;  %v25808_v58 = vld [vmem:[#allocation219_spill] sm:$0xff] }
0x2c33   :  { %18894 = vmatpush1.bf16.msra.mxu1 %v25103_v17  ;;  %18926 = vmatpush1.bf16.msra.mxu0 %v24777_v49  ;;  %v25791_v49 = vld [vmem:[#allocation202_spill] sm:$0xff] }
0x2c34   :  { %18896 = vmatprep.subr.bf16.mxu1 %v24778_v53  ;;  %18928 = vmatprep.subr.bf16.mxu0 %v24779_v52  ;;  %v25792_v53 = vld [vmem:[#allocation203_spill] sm:$0xff]  ;;  %v25793_v52 = vld [vmem:[#allocation204_spill] sm:$0xff] }
0x2c37   :  { %18898 = vmatpush1.bf16.msra.mxu1 %v24780_v11  ;;  %18930 = vmatpush1.bf16.msra.mxu0 %v24781_v62  ;;  %v25794_v11 = vld [vmem:[#allocation205_spill] sm:$0xff]  ;;  %v25795_v62 = vld [vmem:[#allocation206_spill] sm:$0xff] }
0x2c38   :  { %18900 = vmatprep.subr.bf16.mxu1 %v24782_v37  ;;  %18932 = vmatprep.subr.bf16.mxu0 %v25786_v21  ;;  %v25796_v37 = vld [vmem:[#allocation207_spill] sm:$0xff] }
0x2c3b   :  { %18902 = vmatpush1.bf16.msra.mxu1 %v25787_v19  ;;  %18934 = vmatpush1.bf16.msra.mxu0 %v25788_v44 }
0x2c3c   :  { %18904 = vmatprep.subr.bf16.mxu1 %v25789_v41  ;;  %18936 = vmatprep.subr.bf16.mxu0 %v25790_v56 }
0x2c3f   :  { %18906 = vmatpush1.bf16.msra.mxu1 %v25791_v49  ;;  %18938 = vmatpush1.bf16.msra.mxu0 %v25792_v53 }
0x2c40   :  { %18908 = vmatprep.subr.bf16.mxu1 %v25793_v52  ;;  %18940 = vmatprep.subr.bf16.mxu0 %v25794_v11 }
0x2c43   :  { %18910 = vmatpush1.bf16.msra.mxu1 %v25795_v62  ;;  %18942 = vmatpush1.bf16.msra.mxu0 %v25796_v37 }
0x2c44   :  { %18943 = vmatprep.subr.bf16.mxu1 %v24616_v0  ;;  %18955 = vmatprep.subr.bf16.mxu0 %v24616_v0 }
0x2c46   :  { %13877 = vmatmul.mubr.f32.vlgmr.msra.gmra.mrb[94].mxu1 %v23692_v36  ;;  %13948 = vmatmul.mubr.f32.vlgmr.msra.gmra.mrb[92].mxu0 %v23692_v36 }
0x2c47   :  { %18945 = vmatpush3.bf16.msra.mxu1 %v25797_v61  ;;  %15661 = vmatprep.mubr.msk.f32.mxu1 %vm19507_vm5, %v24486_v3 }
0x2c48   :  { %18946 = vmatprep.subr.bf16.mxu1 %v24616_v0  ;;  %18957 = vmatpush3.bf16.msra.mxu0 %v25798_v15 }
0x2c49   :  { %18958 = vmatprep.subr.bf16.mxu0 %v24616_v0  ;;  %15696 = vmatprep.mubr.msk.f32.mxu0 %vm19507_vm5, %v24486_v3  ;;  %v25805_v3 = vld [vmem:[#allocation216_spill] sm:$0xff] }
0x2c4b   :  { %18948 = vmatpush3.bf16.msra.mxu1 %v25799_v8 }
0x2c4c   :  { %18949 = vmatprep.subr.bf16.mxu1 %v24616_v0  ;;  %18960 = vmatpush3.bf16.msra.mxu0 %v25800_v47 }
0x2c4d   :  { %18961 = vmatprep.subr.bf16.mxu0 %v24616_v0 }
0x2c4f   :  { %18951 = vmatpush3.bf16.msra.mxu1 %v25801_v54 }
0x2c50   :  { %18952 = vmatprep.subr.bf16.mxu1 %v24616_v0  ;;  %18963 = vmatpush3.bf16.msra.mxu0 %v25802_v48 }
0x2c51   :  { %18964 = vmatprep.subr.bf16.mxu0 %v24616_v0 }
0x2c53   :  { %18954 = vmatpush3.bf16.msra.mxu1 %v25803_v5 }
0x2c54   :  { %18966 = vmatpush3.bf16.msra.mxu0 %v25804_v31 }
0x2c55   :  { %18967 = vmatprep.subr.bf16.mxu0 %v24616_v0 }
0x2c56   :  { %15662 = vmatmul.mubr.msk.f32.vlgmr.msra.gmra.mrb[96].mxu1 %vm485_vm3, %v23823_v25 }
0x2c58   :  { %18969 = vmatpush3.bf16.msra.mxu0 %v25805_v3 }
0x2c59   :  { %18970 = vmatprep.subr.bf16.mxu0 %v24616_v0 }
0x2c5c   :  { %18972 = vmatpush3.bf16.msra.mxu0 %v25806_v50 }
0x2c5d   :  { %18973 = vmatprep.subr.bf16.mxu0 %v24616_v0 }
0x2c60   :  { %18975 = vmatpush3.bf16.msra.mxu0 %v25807_v20 }
0x2c61   :  { %18976 = vmatprep.subr.bf16.mxu0 %v24616_v0 }
0x2c64   :  { %18978 = vmatpush3.bf16.msra.mxu0 %v25808_v58 }
0x2d19   :  { %v13878_v26 = vpop.f32.mrb[94].mxu1  ;;  %v13949_v42 = vpop.f32.mrb[92].mxu0 }
0x2d1a   :  { %v13958_v22 = vadd.f32 %v13878_v26, %v25809_v27  ;;  %v13880_v16 = vpop.f32.mrb[95].mxu1  ;;  %v13951_v57 = vpop.f32.mrb[93].mxu0  ;;  %v13960_v33 = vadd.f32 %v13949_v42, %v24842_v38 }
0x2d1b   :  { %v13959_v13 = vadd.f32 %v13880_v16, %v24840_v60  ;;  %v13961_v28 = vadd.f32 %v13951_v57, %v25810_v14 }
0x2d1c   :  { %v14332_v7 = vmul.f32 -1.442695, %v13958_v22 }
0x2d1d   :  { %v14333_v18 = vmul.f32 -1.442695, %v13959_v13  ;;  %v14334_v17 = vmul.f32 -1.442695, %v13961_v28 }
0x2d1e   :  { %19482 = vpow2.f32 %v14332_v7 }
0x2d1f   :  { %19484 = vpow2.f32 %v14333_v18 }
0x2d20   :  { %19486 = vpow2.f32 %v14334_v17 }
0x2d21   :  { %19488 = vtanh.f32 %v13960_v33 }
0x2d28   :  { %v19483_v0 = vpop.eup %19482 }
0x2d29   :  { %v19485_v36 = vpop.eup %19484  ;;  %v13965_v55 = vadd.f32 1.0, %v19483_v0  ;;  %v14055_v40 = vpop.f32.mrb[96].mxu1 }
0x2d2a   :  { %v13971_v30 = vadd.f32 1.0, %v19485_v36  ;;  %v15663_v2 = vpop.f32.mrb[97].mxu1  ;;  %v19487_v60 = vpop.eup %19486 }
0x2d2b   :  { %19490 = vrcp.f32 %v13965_v55  ;;  %v19489_v43 = vpop.eup %19488  ;;  %v13978_v63 = vadd.f32 1.0, %v19487_v60 }
0x2d2c   :  { %19492 = vrcp.f32 %v13971_v30 }
0x2d2d   :  { %19494 = vrcp.f32 %v13978_v63 }
0x2d35   :  { %v19491_v45 = vpop.eup %19490 }
0x2d36   :  { %v19493_v51 = vpop.eup %19492  ;;  %v13982_v10 = vmul.f32 %v19491_v45, %v19489_v43 }
0x2d37   :  { %v13981_v6 = vmul.f32 %v19493_v51, %v25811_v35  ;;  %v19495_v38 = vpop.eup %19494 }
0x2d39   :  { %v13983_v4 = vadd.f32 %v13982_v10, %v13981_v6 }
0x2d3b   :  { %19496 = vtanh.f32 %v13983_v4  ;;  %14137 = vst [vmem:[#allocation5] sm:$0x3] %v13983_v4 }
0x2d45   :  { %v19497_v9 = vpop.eup %19496 }
0x2d46   :  { %v13985_v24 = vmul.f32 %v19497_v9, %v19495_v38 }
0x2d48   :  { %v13988_v39 = vmul.f32 %v14335_v29, %v13985_v24 }
0x2d4a   :  { %15697 = vmatmul.mubr.f32.vlgmr.msra.gmra.mrb[94].mxu0 %v13988_v39  ;;  %14136 = vst [vmem:[#allocation4] sm:$0x3] %v13988_v39 }
0x2e1d   :  { %v14125_v12 = vpop.f32.mrb[94].mxu0 }
0x2e1e   :  { %v14126_v46 = vadd.f32 %v14125_v12, %v14055_v40  ;;  %v15698_v23 = vpop.f32.mrb[95].mxu0 }
0x2e20   :  { %v14129_v59 = vadd.f32 %v23771_v34, %v14126_v46 }
0x2e22   :  { %14337 = vst.msk [vmem:[%s23942_s19 + $0xe] sm:$0x3] %vm2252_vm7, %v14129_v59 }

</bundles_post_ra>
